<compile_context>
chip_gen: v7x
topology: tpu7x:2x2x1
jax: 0.10.0
libtpu: 0.0.40
codegen_flags: <defaults>
</compile_context>

<pallas_src>
import jax
import jax.numpy as jnp
from jax.experimental import pallas as pl
from jax.experimental.pallas import tpu as pltpu


# ----------------------------- in-kernel helpers -----------------------------

def _silu(v):
    return v * jax.nn.sigmoid(v)


def _layernorm(v, g, b, eps=1e-5):
    mu = jnp.mean(v, axis=-1, keepdims=True)
    var = jnp.mean((v - mu) ** 2, axis=-1, keepdims=True)
    return (v - mu) * jax.lax.rsqrt(var + eps) * g + b


def _res_block(h, w1, w2, p2, pd):
    # p2 rows: [b1, ln1_gamma, ln1_beta]                 (3, 2d)
    # pd rows: [b2, ln2_gamma, ln2_beta, ln3_g, ln3_b]   (5, d)
    a = jnp.dot(h.astype(jnp.bfloat16), w1,
                preferred_element_type=jnp.float32) + p2[0:1]
    a = _silu(_layernorm(a, p2[1:2], p2[2:3]))
    b = jnp.dot(a.astype(jnp.bfloat16), w2,
                preferred_element_type=jnp.float32) + pd[0:1]
    b = _layernorm(b, pd[1:2], pd[2:3])
    return _silu(_layernorm(b + h, pd[3:4], pd[4:5]))


# ---------------------------------- kernel -----------------------------------

def trans_fc_kernel(x_ref, wconv_ref, bshift_ref, w1a_ref, w2a_ref,
                    w1b_ref, w2b_ref, wout_ref, vp_ref, o_ref):
    D = x_ref.shape[1]              # d_model

    # --- CBS_1D: Conv1d(seq->pred, k=3, p=1, no bias) + folded BN, ONE matmul.
    # x_ref already carries the three +-1 shifted copies stacked along K
    # (wrapper-side, bf16); wconv_ref is the block-diagonal BN-scaled weight;
    # bshift_ref is the folded BN shift broadcast to the output rows.
    y = jnp.dot(wconv_ref[...], x_ref[...],
                preferred_element_type=jnp.float32) + bshift_ref[...]
    h = _silu(y)                                                # (BB*P, D) f32

    # --- LinearResBlock x 2 (per-feature params packed in one f32 slab) -----
    vp = vp_ref[...]                                            # (17, 128) f32
    h = _res_block(h, w1a_ref[...], w2a_ref[...],
                   vp[0:3, :2 * D], vp[3:8, :D])
    h = _res_block(h, w1b_ref[...], w2b_ref[...],
                   vp[8:11, :2 * D], vp[11:16, :D])

    # --- final nn.Linear(d_model, 3), zero-padded to 128 lanes (lane-dense) --
    out = jnp.dot(h.astype(jnp.bfloat16), wout_ref[...],
                  preferred_element_type=jnp.float32) + vp[16:17, :]
    o_ref[...] = out.astype(o_ref.dtype)


# --------------------------------- wrapper ------------------------------------

def trans_fc_forward(x, packed, *, block_b=32):
    B, S, D = x.shape
    BB = block_b
    P = packed["wbig"].shape[0] // BB
    nb = pl.cdiv(B, BB)
    Bp = nb * BB
    if Bp != B:
        x = jnp.pad(x, ((0, Bp - B), (0, 0), (0, 0)))

    # Pre-shift x by +/-1 along d_model (zero edges) and stack the three
    # copies along the conv reduction axis; cast once to bf16 (MXU operand).
    x_m1 = jnp.pad(x, ((0, 0), (0, 0), (1, 0)))[:, :, :D]   # x[..., l-1]
    x_p1 = jnp.pad(x, ((0, 0), (0, 0), (0, 1)))[:, :, 1:]   # x[..., l+1]
    x2 = jnp.concatenate([x_m1, x, x_p1], axis=1)           # (Bp, 3S, D)
    x2 = x2.reshape(Bp * 3 * S, D).astype(jnp.bfloat16)

    wbig, bshift = packed["wbig"], packed["bshift"]
    w1a, w2a = packed["w1a"], packed["w2a"]
    w1b, w2b = packed["w1b"], packed["w2b"]
    wout, vparams = packed["wout"], packed["vparams"]

    in_specs = [
        pl.BlockSpec((BB * 3 * S, D), lambda i: (i, 0)),     # x batch block
        pl.BlockSpec(wbig.shape, lambda i: (0, 0)),          # conv (+BN) weight
        pl.BlockSpec(bshift.shape, lambda i: (0, 0)),        # folded BN shift
        pl.BlockSpec(w1a.shape, lambda i: (0, 0)),
        pl.BlockSpec(w2a.shape, lambda i: (0, 0)),
        pl.BlockSpec(w1b.shape, lambda i: (0, 0)),
        pl.BlockSpec(w2b.shape, lambda i: (0, 0)),
        pl.BlockSpec(wout.shape, lambda i: (0, 0)),
        pl.BlockSpec(vparams.shape, lambda i: (0, 0)),
    ]
    out_specs = pl.BlockSpec((BB * P, 128), lambda i: (i, 0))

    # Advisory cost hint for XLA scheduling around the custom call.
    m = BB * P
    macs = (m * (BB * 3 * S) * D + 8 * m * D * D + m * D * 128)
    w_bf16_elems = (wbig.size + w1a.size + w2a.size + w1b.size + w2b.size
                    + wout.size)
    cost = pl.CostEstimate(
        flops=int(2 * macs * nb),
        transcendentals=int(nb * m * (7 * D + 6)),
        bytes_accessed=int(2 * Bp * 3 * S * D + 4 * Bp * P * 128
                           + 2 * w_bf16_elems
                           + 4 * (vparams.size + bshift.size)),
    )

    out_flat = pl.pallas_call(
        trans_fc_kernel,
        out_shape=jax.ShapeDtypeStruct((Bp * P, 128), jnp.float32),
        grid_spec=pltpu.PrefetchScalarGridSpec(
            num_scalar_prefetch=0,
            grid=(nb,),
            in_specs=in_specs,
            out_specs=out_specs,
        ),
        compiler_params=pltpu.CompilerParams(
            dimension_semantics=("parallel",)),
        cost_estimate=cost,
    )(x2, wbig, bshift, w1a, w2a, w1b, w2b, wout, vparams)

    return out_flat.reshape(Bp, P, 128)[:B, :, :3]


# --------------------------- deterministic params -----------------------------

def init_params(key, seq_len, pred_len, d_model):
    ks = iter(jax.random.split(key, 32))

    def rnd(shape, scale=0.1):
        return scale * jax.random.normal(next(ks), shape, jnp.float32)

    p = {}
    p["wconv"] = rnd((pred_len, seq_len, 3))        # PyTorch Conv1d (out, in, k)
    p["bn_gamma"] = 1.0 + rnd((pred_len,))
    p["bn_beta"] = rnd((pred_len,))
    p["bn_mean"] = rnd((pred_len,), 0.05)
    p["bn_var"] = jnp.abs(1.0 + rnd((pred_len,)))
    for t in ("a", "b"):
        p[f"w1{t}"] = rnd((2 * d_model, d_model))   # PyTorch Linear (out, in)
        p[f"b1{t}"] = rnd((2 * d_model,))
        p[f"g1{t}"] = 1.0 + rnd((2 * d_model,))
        p[f"be1{t}"] = rnd((2 * d_model,))
        p[f"w2{t}"] = rnd((d_model, 2 * d_model))
        p[f"b2{t}"] = rnd((d_model,))
        p[f"g2{t}"] = 1.0 + rnd((d_model,))
        p[f"be2{t}"] = rnd((d_model,))
        p[f"g3{t}"] = 1.0 + rnd((d_model,))
        p[f"be3{t}"] = rnd((d_model,))
    p["wout"] = rnd((3, d_model))
    p["bout"] = rnd((3,))
    return p


def pack_params(p, block_b):
    """Pre-pack parameters for the kernel (one-time weight prep)."""
    P, S, _ = p["wconv"].shape
    D = p["w1a"].shape[1]
    eps = 1e-5

    # Fold inference BatchNorm1d into the conv: scale into the weights; the
    # shift becomes a small per-row f32 slab added in-kernel after the matmul.
    scale = p["bn_gamma"] * jax.lax.rsqrt(p["bn_var"] + eps)
    shift = p["bn_beta"] - p["bn_mean"] * scale

    # Weight columns ordered (tap, s) to match the wrapper's [x_m1; x; x_p1]
    # stacking: column tap*S + s holds wconv[o, s, tap] * scale[o].
    wflat = jnp.transpose(p["wconv"], (0, 2, 1)).reshape(P, 3 * S)
    wflat = wflat * scale[:, None]                                # (P, 3S)

    # Block-diagonal expansion over the batch block.
    eye = jnp.eye(block_b, dtype=jnp.float32)
    wbig = jnp.einsum("ij,oc->iojc", eye, wflat).reshape(
        block_b * P, block_b * 3 * S).astype(jnp.bfloat16)

    # Folded BN shift broadcast to the (BB*P, D) conv-output rows (f32).
    bshift = jnp.tile(shift[None, :, None], (block_b, 1, D)).reshape(
        block_b * P, D).astype(jnp.float32)

    def row(v):                       # one lane-dense (1, 128) slab row
        return jnp.pad(v, (0, 128 - v.shape[0]))[None, :]

    vrows = []
    for t in ("a", "b"):
        vrows += [row(p[f"b1{t}"]), row(p[f"g1{t}"]), row(p[f"be1{t}"]),
                  row(p[f"b2{t}"]), row(p[f"g2{t}"]), row(p[f"be2{t}"]),
                  row(p[f"g3{t}"]), row(p[f"be3{t}"])]
    vrows.append(row(p["bout"]))
    vparams = jnp.concatenate(vrows, axis=0)                 # (17, 128) f32

    wout = jnp.zeros((D, 128), jnp.float32).at[:, :3].set(
        p["wout"].T).astype(jnp.bfloat16)                    # lane-dense output

    return dict(
        wbig=wbig, bshift=bshift,
        w1a=p["w1a"].T.astype(jnp.bfloat16),
        w2a=p["w2a"].T.astype(jnp.bfloat16),
        w1b=p["w1b"].T.astype(jnp.bfloat16),
        w2b=p["w2b"].T.astype(jnp.bfloat16),
        wout=wout, vparams=vparams)


# ------------------------------ pure-JAX reference ----------------------------

def reference(x, p, cast=lambda v: v):
    """Reference forward.  cast=identity -> exact f32 module semantics;
    cast=bf16 -> precision-matched to the kernel's bf16 matmul operands."""
    eps = 1e-5
    B, S, D = x.shape
    xpad = jnp.pad(x, ((0, 0), (0, 0), (1, 1)))
    scale = p["bn_gamma"] * jax.lax.rsqrt(p["bn_var"] + eps)
    shift = p["bn_beta"] - p["bn_mean"] * scale
    wk = jnp.transpose(p["wconv"], (2, 0, 1)) * scale[None, :, None]
    y = sum(jnp.einsum("os,bsl->bol", cast(wk[k]), cast(xpad[:, :, k:k + D]),
                       preferred_element_type=jnp.float32)
            for k in range(3))
    y = y + shift[None, :, None]
    h = y * jax.nn.sigmoid(y)

    def ln(v, g, b):
        mu = v.mean(-1, keepdims=True)
        var = ((v - mu) ** 2).mean(-1, keepdims=True)
        return (v - mu) * jax.lax.rsqrt(var + eps) * g + b

    def rb(h, t):
        a = jnp.einsum("bld,df->blf", cast(h), cast(p[f"w1{t}"].T),
                       preferred_element_type=jnp.float32) + p[f"b1{t}"]
        a = ln(a, p[f"g1{t}"], p[f"be1{t}"])
        a = a * jax.nn.sigmoid(a)
        b = jnp.einsum("blf,fd->bld", cast(a), cast(p[f"w2{t}"].T),
                       preferred_element_type=jnp.float32) + p[f"b2{t}"]
        b = ln(b, p[f"g2{t}"], p[f"be2{t}"])
        c = ln(b + h, p[f"g3{t}"], p[f"be3{t}"])
        return c * jax.nn.sigmoid(c)

    h = rb(h, "a")
    h = rb(h, "b")
    return jnp.einsum("bld,do->blo", cast(h), cast(p["wout"].T),
                      preferred_element_type=jnp.float32) + p["bout"]


# ------------------------------------ main ------------------------------------

if __name__ == "__main__":
    seq_len, pred_len, d_model = 8, 8, 32
    batch, block_b = 64, 32             # 2 batch blocks -> grid=(2,), parallel

    key = jax.random.PRNGKey(0)
    kx, kp = jax.random.split(key)
    x = jax.random.normal(kx, (batch, seq_len, d_model), jnp.float32)

    raw = init_params(kp, seq_len, pred_len, d_model)
    packed = pack_params(raw, block_b)

    out = jax.block_until_ready(trans_fc_forward(x, packed, block_b=block_b))
    assert out.shape == (batch, pred_len, 3), out.shape

    # precision-matched reference (bf16 matmul operands, f32 accumulation)
    ref_bf = jax.block_until_ready(
        reference(x, raw, cast=lambda v: v.astype(jnp.bfloat16)))
    # pure-f32 reference (module semantics); gap is bf16 matmul rounding only
    ref_f32 = jax.block_until_ready(reference(x, raw))

    assert jnp.allclose(out, ref_bf, atol=1e-2, rtol=1e-2), \
        float(jnp.max(jnp.abs(out - ref_bf)))
    assert jnp.allclose(out, ref_f32, atol=5e-2, rtol=5e-2), \
        float(jnp.max(jnp.abs(out - ref_f32)))

    print("KERNEL_OK")
</pallas_src>

<mosaic_0001>
module attributes {stable_mosaic.version = 11 : i64} {
  func.func @trans_fc_kernel(%arg0: i32, %arg1: memref<768x32xbf16, #tpu.memory_space<vmem>>, %arg2: memref<256x768xbf16, #tpu.memory_space<vmem>>, %arg3: memref<256x32xf32, #tpu.memory_space<vmem>>, %arg4: memref<32x64xbf16, #tpu.memory_space<vmem>>, %arg5: memref<64x32xbf16, #tpu.memory_space<vmem>>, %arg6: memref<32x64xbf16, #tpu.memory_space<vmem>>, %arg7: memref<64x32xbf16, #tpu.memory_space<vmem>>, %arg8: memref<32x128xbf16, #tpu.memory_space<vmem>>, %arg9: memref<17x128xf32, #tpu.memory_space<vmem>>, %arg10: memref<256x128xf32, #tpu.memory_space<vmem>>) attributes {dimension_semantics = [#tpu.dimension_semantics<parallel>], iteration_bounds = array<i64: 2>, scalar_prefetch = 0 : i64, scratch_operands = 0 : i64, tpu.core_type = #tpu.core_type<tc>, window_params = [{transform_indices = @transform_0, window_bounds = array<i64: 768, 32>}, {pipeline_mode = #tpu.pipeline_mode<synchronous>, transform_indices = @transform_1, window_bounds = array<i64: 256, 768>}, {pipeline_mode = #tpu.pipeline_mode<synchronous>, transform_indices = @transform_2, window_bounds = array<i64: 256, 32>}, {pipeline_mode = #tpu.pipeline_mode<synchronous>, transform_indices = @transform_3, window_bounds = array<i64: 32, 64>}, {pipeline_mode = #tpu.pipeline_mode<synchronous>, transform_indices = @transform_4, window_bounds = array<i64: 64, 32>}, {pipeline_mode = #tpu.pipeline_mode<synchronous>, transform_indices = @transform_5, window_bounds = array<i64: 32, 64>}, {pipeline_mode = #tpu.pipeline_mode<synchronous>, transform_indices = @transform_6, window_bounds = array<i64: 64, 32>}, {pipeline_mode = #tpu.pipeline_mode<synchronous>, transform_indices = @transform_7, window_bounds = array<i64: 32, 128>}, {pipeline_mode = #tpu.pipeline_mode<synchronous>, transform_indices = @transform_8, window_bounds = array<i64: 17, 128>}, {transform_indices = @transform_9, window_bounds = array<i64: 256, 128>}]} {
    %c0 = arith.constant 0 : index
    %c0_0 = arith.constant 0 : index
    %0 = vector.load %arg2[%c0, %c0_0] : memref<256x768xbf16, #tpu.memory_space<vmem>>, vector<256x768xbf16>
    %c0_1 = arith.constant 0 : index
    %c0_2 = arith.constant 0 : index
    %1 = vector.load %arg1[%c0_1, %c0_2] : memref<768x32xbf16, #tpu.memory_space<vmem>>, vector<768x32xbf16>
    %cst = arith.constant dense<0.000000e+00> : vector<256x32xf32>
    %2 = tpu.matmul %0, %1, %cst {dimension_numbers = #tpu.dot_dimension_numbers<[1], [0], [0], [1], [0, 0, 1, 1], [], []>} : vector<256x768xbf16>, vector<768x32xbf16>, vector<256x32xf32> -> vector<256x32xf32>
    %c0_3 = arith.constant 0 : index
    %c0_4 = arith.constant 0 : index
    %3 = vector.load %arg3[%c0_3, %c0_4] : memref<256x32xf32, #tpu.memory_space<vmem>>, vector<256x32xf32>
    %4 = arith.addf %2, %3 : vector<256x32xf32>
    %5 = arith.negf %4 : vector<256x32xf32>
    %6 = math.exp %5 : vector<256x32xf32>
    %cst_5 = arith.constant 1.000000e+00 : f32
    %7 = vector.broadcast %cst_5 : f32 to vector<256x32xf32>
    %8 = arith.addf %7, %6 : vector<256x32xf32>
    %9 = arith.divf %7, %8 : vector<256x32xf32>
    %10 = arith.mulf %4, %9 : vector<256x32xf32>
    %c0_6 = arith.constant 0 : index
    %c0_7 = arith.constant 0 : index
    %11 = vector.load %arg9[%c0_6, %c0_7] : memref<17x128xf32, #tpu.memory_space<vmem>>, vector<17x128xf32>
    %c0_8 = arith.constant 0 : index
    %c0_9 = arith.constant 0 : index
    %12 = vector.load %arg4[%c0_8, %c0_9] : memref<32x64xbf16, #tpu.memory_space<vmem>>, vector<32x64xbf16>
    %c0_10 = arith.constant 0 : index
    %c0_11 = arith.constant 0 : index
    %13 = vector.load %arg5[%c0_10, %c0_11] : memref<64x32xbf16, #tpu.memory_space<vmem>>, vector<64x32xbf16>
    %14 = vector.extract_strided_slice %11 {offsets = [0, 0], sizes = [3, 64], strides = [1, 1]} : vector<17x128xf32> to vector<3x64xf32>
    %15 = vector.extract_strided_slice %11 {offsets = [3, 0], sizes = [5, 32], strides = [1, 1]} : vector<17x128xf32> to vector<5x32xf32>
    %16 = arith.truncf %10 : vector<256x32xf32> to vector<256x32xbf16>
    %cst_12 = arith.constant dense<0.000000e+00> : vector<256x64xf32>
    %17 = tpu.matmul %16, %12, %cst_12 {dimension_numbers = #tpu.dot_dimension_numbers<[1], [0], [0], [1], [0, 0, 1, 1], [], []>} : vector<256x32xbf16>, vector<32x64xbf16>, vector<256x64xf32> -> vector<256x64xf32>
    %18 = vector.extract_strided_slice %14 {offsets = [0, 0], sizes = [1, 64], strides = [1, 1]} : vector<3x64xf32> to vector<1x64xf32>
    %19 = vector.broadcast %18 : vector<1x64xf32> to vector<256x64xf32>
    %20 = arith.addf %17, %19 : vector<256x64xf32>
    %21 = vector.extract_strided_slice %14 {offsets = [1, 0], sizes = [1, 64], strides = [1, 1]} : vector<3x64xf32> to vector<1x64xf32>
    %22 = vector.extract_strided_slice %14 {offsets = [2, 0], sizes = [1, 64], strides = [1, 1]} : vector<3x64xf32> to vector<1x64xf32>
    %cst_13 = arith.constant dense<0.000000e+00> : vector<256xf32>
    %23 = vector.multi_reduction <add>, %20, %cst_13 [1] : vector<256x64xf32> to vector<256xf32>
    %24 = vector.shape_cast %23 : vector<256xf32> to vector<256x1xf32>
    %cst_14 = arith.constant 6.400000e+01 : f32
    %25 = vector.broadcast %cst_14 : f32 to vector<256x1xf32>
    %26 = arith.divf %24, %25 : vector<256x1xf32>
    %27 = vector.broadcast %26 : vector<256x1xf32> to vector<256x64xf32>
    %28 = arith.subf %20, %27 : vector<256x64xf32>
    %29 = arith.mulf %28, %28 : vector<256x64xf32>
    %cst_15 = arith.constant dense<0.000000e+00> : vector<256xf32>
    %30 = vector.multi_reduction <add>, %29, %cst_15 [1] : vector<256x64xf32> to vector<256xf32>
    %31 = vector.shape_cast %30 : vector<256xf32> to vector<256x1xf32>
    %cst_16 = arith.constant 6.400000e+01 : f32
    %32 = vector.broadcast %cst_16 : f32 to vector<256x1xf32>
    %33 = arith.divf %31, %32 : vector<256x1xf32>
    %34 = vector.broadcast %26 : vector<256x1xf32> to vector<256x64xf32>
    %35 = arith.subf %20, %34 : vector<256x64xf32>
    %cst_17 = arith.constant 9.99999974E-6 : f32
    %36 = vector.broadcast %cst_17 : f32 to vector<256x1xf32>
    %37 = arith.addf %33, %36 : vector<256x1xf32>
    %38 = math.rsqrt %37 : vector<256x1xf32>
    %39 = vector.broadcast %38 : vector<256x1xf32> to vector<256x64xf32>
    %40 = arith.mulf %35, %39 : vector<256x64xf32>
    %41 = vector.broadcast %21 : vector<1x64xf32> to vector<256x64xf32>
    %42 = arith.mulf %40, %41 : vector<256x64xf32>
    %43 = vector.broadcast %22 : vector<1x64xf32> to vector<256x64xf32>
    %44 = arith.addf %42, %43 : vector<256x64xf32>
    %45 = arith.negf %44 : vector<256x64xf32>
    %46 = math.exp %45 : vector<256x64xf32>
    %cst_18 = arith.constant 1.000000e+00 : f32
    %47 = vector.broadcast %cst_18 : f32 to vector<256x64xf32>
    %48 = arith.addf %47, %46 : vector<256x64xf32>
    %49 = arith.divf %47, %48 : vector<256x64xf32>
    %50 = arith.mulf %44, %49 : vector<256x64xf32>
    %51 = arith.truncf %50 : vector<256x64xf32> to vector<256x64xbf16>
    %cst_19 = arith.constant dense<0.000000e+00> : vector<256x32xf32>
    %52 = tpu.matmul %51, %13, %cst_19 {dimension_numbers = #tpu.dot_dimension_numbers<[1], [0], [0], [1], [0, 0, 1, 1], [], []>} : vector<256x64xbf16>, vector<64x32xbf16>, vector<256x32xf32> -> vector<256x32xf32>
    %53 = vector.extract_strided_slice %15 {offsets = [0, 0], sizes = [1, 32], strides = [1, 1]} : vector<5x32xf32> to vector<1x32xf32>
    %54 = vector.broadcast %53 : vector<1x32xf32> to vector<256x32xf32>
    %55 = arith.addf %52, %54 : vector<256x32xf32>
    %56 = vector.extract_strided_slice %15 {offsets = [1, 0], sizes = [1, 32], strides = [1, 1]} : vector<5x32xf32> to vector<1x32xf32>
    %57 = vector.extract_strided_slice %15 {offsets = [2, 0], sizes = [1, 32], strides = [1, 1]} : vector<5x32xf32> to vector<1x32xf32>
    %cst_20 = arith.constant dense<0.000000e+00> : vector<256xf32>
    %58 = vector.multi_reduction <add>, %55, %cst_20 [1] : vector<256x32xf32> to vector<256xf32>
    %59 = vector.shape_cast %58 : vector<256xf32> to vector<256x1xf32>
    %cst_21 = arith.constant 3.200000e+01 : f32
    %60 = vector.broadcast %cst_21 : f32 to vector<256x1xf32>
    %61 = arith.divf %59, %60 : vector<256x1xf32>
    %62 = vector.broadcast %61 : vector<256x1xf32> to vector<256x32xf32>
    %63 = arith.subf %55, %62 : vector<256x32xf32>
    %64 = arith.mulf %63, %63 : vector<256x32xf32>
    %cst_22 = arith.constant dense<0.000000e+00> : vector<256xf32>
    %65 = vector.multi_reduction <add>, %64, %cst_22 [1] : vector<256x32xf32> to vector<256xf32>
    %66 = vector.shape_cast %65 : vector<256xf32> to vector<256x1xf32>
    %cst_23 = arith.constant 3.200000e+01 : f32
    %67 = vector.broadcast %cst_23 : f32 to vector<256x1xf32>
    %68 = arith.divf %66, %67 : vector<256x1xf32>
    %69 = vector.broadcast %61 : vector<256x1xf32> to vector<256x32xf32>
    %70 = arith.subf %55, %69 : vector<256x32xf32>
    %cst_24 = arith.constant 9.99999974E-6 : f32
    %71 = vector.broadcast %cst_24 : f32 to vector<256x1xf32>
    %72 = arith.addf %68, %71 : vector<256x1xf32>
    %73 = math.rsqrt %72 : vector<256x1xf32>
    %74 = vector.broadcast %73 : vector<256x1xf32> to vector<256x32xf32>
    %75 = arith.mulf %70, %74 : vector<256x32xf32>
    %76 = vector.broadcast %56 : vector<1x32xf32> to vector<256x32xf32>
    %77 = arith.mulf %75, %76 : vector<256x32xf32>
    %78 = vector.broadcast %57 : vector<1x32xf32> to vector<256x32xf32>
    %79 = arith.addf %77, %78 : vector<256x32xf32>
    %80 = arith.addf %79, %10 : vector<256x32xf32>
    %81 = vector.extract_strided_slice %15 {offsets = [3, 0], sizes = [1, 32], strides = [1, 1]} : vector<5x32xf32> to vector<1x32xf32>
    %82 = vector.extract_strided_slice %15 {offsets = [4, 0], sizes = [1, 32], strides = [1, 1]} : vector<5x32xf32> to vector<1x32xf32>
    %cst_25 = arith.constant dense<0.000000e+00> : vector<256xf32>
    %83 = vector.multi_reduction <add>, %80, %cst_25 [1] : vector<256x32xf32> to vector<256xf32>
    %84 = vector.shape_cast %83 : vector<256xf32> to vector<256x1xf32>
    %cst_26 = arith.constant 3.200000e+01 : f32
    %85 = vector.broadcast %cst_26 : f32 to vector<256x1xf32>
    %86 = arith.divf %84, %85 : vector<256x1xf32>
    %87 = vector.broadcast %86 : vector<256x1xf32> to vector<256x32xf32>
    %88 = arith.subf %80, %87 : vector<256x32xf32>
    %89 = arith.mulf %88, %88 : vector<256x32xf32>
    %cst_27 = arith.constant dense<0.000000e+00> : vector<256xf32>
    %90 = vector.multi_reduction <add>, %89, %cst_27 [1] : vector<256x32xf32> to vector<256xf32>
    %91 = vector.shape_cast %90 : vector<256xf32> to vector<256x1xf32>
    %cst_28 = arith.constant 3.200000e+01 : f32
    %92 = vector.broadcast %cst_28 : f32 to vector<256x1xf32>
    %93 = arith.divf %91, %92 : vector<256x1xf32>
    %94 = vector.broadcast %86 : vector<256x1xf32> to vector<256x32xf32>
    %95 = arith.subf %80, %94 : vector<256x32xf32>
    %cst_29 = arith.constant 9.99999974E-6 : f32
    %96 = vector.broadcast %cst_29 : f32 to vector<256x1xf32>
    %97 = arith.addf %93, %96 : vector<256x1xf32>
    %98 = math.rsqrt %97 : vector<256x1xf32>
    %99 = vector.broadcast %98 : vector<256x1xf32> to vector<256x32xf32>
    %100 = arith.mulf %95, %99 : vector<256x32xf32>
    %101 = vector.broadcast %81 : vector<1x32xf32> to vector<256x32xf32>
    %102 = arith.mulf %100, %101 : vector<256x32xf32>
    %103 = vector.broadcast %82 : vector<1x32xf32> to vector<256x32xf32>
    %104 = arith.addf %102, %103 : vector<256x32xf32>
    %105 = arith.negf %104 : vector<256x32xf32>
    %106 = math.exp %105 : vector<256x32xf32>
    %cst_30 = arith.constant 1.000000e+00 : f32
    %107 = vector.broadcast %cst_30 : f32 to vector<256x32xf32>
    %108 = arith.addf %107, %106 : vector<256x32xf32>
    %109 = arith.divf %107, %108 : vector<256x32xf32>
    %110 = arith.mulf %104, %109 : vector<256x32xf32>
    %c0_31 = arith.constant 0 : index
    %c0_32 = arith.constant 0 : index
    %111 = vector.load %arg6[%c0_31, %c0_32] : memref<32x64xbf16, #tpu.memory_space<vmem>>, vector<32x64xbf16>
    %c0_33 = arith.constant 0 : index
    %c0_34 = arith.constant 0 : index
    %112 = vector.load %arg7[%c0_33, %c0_34] : memref<64x32xbf16, #tpu.memory_space<vmem>>, vector<64x32xbf16>
    %113 = vector.extract_strided_slice %11 {offsets = [8, 0], sizes = [3, 64], strides = [1, 1]} : vector<17x128xf32> to vector<3x64xf32>
    %114 = vector.extract_strided_slice %11 {offsets = [11, 0], sizes = [5, 32], strides = [1, 1]} : vector<17x128xf32> to vector<5x32xf32>
    %115 = arith.truncf %110 : vector<256x32xf32> to vector<256x32xbf16>
    %cst_35 = arith.constant dense<0.000000e+00> : vector<256x64xf32>
    %116 = tpu.matmul %115, %111, %cst_35 {dimension_numbers = #tpu.dot_dimension_numbers<[1], [0], [0], [1], [0, 0, 1, 1], [], []>} : vector<256x32xbf16>, vector<32x64xbf16>, vector<256x64xf32> -> vector<256x64xf32>
    %117 = vector.extract_strided_slice %113 {offsets = [0, 0], sizes = [1, 64], strides = [1, 1]} : vector<3x64xf32> to vector<1x64xf32>
    %118 = vector.broadcast %117 : vector<1x64xf32> to vector<256x64xf32>
    %119 = arith.addf %116, %118 : vector<256x64xf32>
    %120 = vector.extract_strided_slice %113 {offsets = [1, 0], sizes = [1, 64], strides = [1, 1]} : vector<3x64xf32> to vector<1x64xf32>
    %121 = vector.extract_strided_slice %113 {offsets = [2, 0], sizes = [1, 64], strides = [1, 1]} : vector<3x64xf32> to vector<1x64xf32>
    %cst_36 = arith.constant dense<0.000000e+00> : vector<256xf32>
    %122 = vector.multi_reduction <add>, %119, %cst_36 [1] : vector<256x64xf32> to vector<256xf32>
    %123 = vector.shape_cast %122 : vector<256xf32> to vector<256x1xf32>
    %cst_37 = arith.constant 6.400000e+01 : f32
    %124 = vector.broadcast %cst_37 : f32 to vector<256x1xf32>
    %125 = arith.divf %123, %124 : vector<256x1xf32>
    %126 = vector.broadcast %125 : vector<256x1xf32> to vector<256x64xf32>
    %127 = arith.subf %119, %126 : vector<256x64xf32>
    %128 = arith.mulf %127, %127 : vector<256x64xf32>
    %cst_38 = arith.constant dense<0.000000e+00> : vector<256xf32>
    %129 = vector.multi_reduction <add>, %128, %cst_38 [1] : vector<256x64xf32> to vector<256xf32>
    %130 = vector.shape_cast %129 : vector<256xf32> to vector<256x1xf32>
    %cst_39 = arith.constant 6.400000e+01 : f32
    %131 = vector.broadcast %cst_39 : f32 to vector<256x1xf32>
    %132 = arith.divf %130, %131 : vector<256x1xf32>
    %133 = vector.broadcast %125 : vector<256x1xf32> to vector<256x64xf32>
    %134 = arith.subf %119, %133 : vector<256x64xf32>
    %cst_40 = arith.constant 9.99999974E-6 : f32
    %135 = vector.broadcast %cst_40 : f32 to vector<256x1xf32>
    %136 = arith.addf %132, %135 : vector<256x1xf32>
    %137 = math.rsqrt %136 : vector<256x1xf32>
    %138 = vector.broadcast %137 : vector<256x1xf32> to vector<256x64xf32>
    %139 = arith.mulf %134, %138 : vector<256x64xf32>
    %140 = vector.broadcast %120 : vector<1x64xf32> to vector<256x64xf32>
    %141 = arith.mulf %139, %140 : vector<256x64xf32>
    %142 = vector.broadcast %121 : vector<1x64xf32> to vector<256x64xf32>
    %143 = arith.addf %141, %142 : vector<256x64xf32>
    %144 = arith.negf %143 : vector<256x64xf32>
    %145 = math.exp %144 : vector<256x64xf32>
    %cst_41 = arith.constant 1.000000e+00 : f32
    %146 = vector.broadcast %cst_41 : f32 to vector<256x64xf32>
    %147 = arith.addf %146, %145 : vector<256x64xf32>
    %148 = arith.divf %146, %147 : vector<256x64xf32>
    %149 = arith.mulf %143, %148 : vector<256x64xf32>
    %150 = arith.truncf %149 : vector<256x64xf32> to vector<256x64xbf16>
    %cst_42 = arith.constant dense<0.000000e+00> : vector<256x32xf32>
    %151 = tpu.matmul %150, %112, %cst_42 {dimension_numbers = #tpu.dot_dimension_numbers<[1], [0], [0], [1], [0, 0, 1, 1], [], []>} : vector<256x64xbf16>, vector<64x32xbf16>, vector<256x32xf32> -> vector<256x32xf32>
    %152 = vector.extract_strided_slice %114 {offsets = [0, 0], sizes = [1, 32], strides = [1, 1]} : vector<5x32xf32> to vector<1x32xf32>
    %153 = vector.broadcast %152 : vector<1x32xf32> to vector<256x32xf32>
    %154 = arith.addf %151, %153 : vector<256x32xf32>
    %155 = vector.extract_strided_slice %114 {offsets = [1, 0], sizes = [1, 32], strides = [1, 1]} : vector<5x32xf32> to vector<1x32xf32>
    %156 = vector.extract_strided_slice %114 {offsets = [2, 0], sizes = [1, 32], strides = [1, 1]} : vector<5x32xf32> to vector<1x32xf32>
    %cst_43 = arith.constant dense<0.000000e+00> : vector<256xf32>
    %157 = vector.multi_reduction <add>, %154, %cst_43 [1] : vector<256x32xf32> to vector<256xf32>
    %158 = vector.shape_cast %157 : vector<256xf32> to vector<256x1xf32>
    %cst_44 = arith.constant 3.200000e+01 : f32
    %159 = vector.broadcast %cst_44 : f32 to vector<256x1xf32>
    %160 = arith.divf %158, %159 : vector<256x1xf32>
    %161 = vector.broadcast %160 : vector<256x1xf32> to vector<256x32xf32>
    %162 = arith.subf %154, %161 : vector<256x32xf32>
    %163 = arith.mulf %162, %162 : vector<256x32xf32>
    %cst_45 = arith.constant dense<0.000000e+00> : vector<256xf32>
    %164 = vector.multi_reduction <add>, %163, %cst_45 [1] : vector<256x32xf32> to vector<256xf32>
    %165 = vector.shape_cast %164 : vector<256xf32> to vector<256x1xf32>
    %cst_46 = arith.constant 3.200000e+01 : f32
    %166 = vector.broadcast %cst_46 : f32 to vector<256x1xf32>
    %167 = arith.divf %165, %166 : vector<256x1xf32>
    %168 = vector.broadcast %160 : vector<256x1xf32> to vector<256x32xf32>
    %169 = arith.subf %154, %168 : vector<256x32xf32>
    %cst_47 = arith.constant 9.99999974E-6 : f32
    %170 = vector.broadcast %cst_47 : f32 to vector<256x1xf32>
    %171 = arith.addf %167, %170 : vector<256x1xf32>
    %172 = math.rsqrt %171 : vector<256x1xf32>
    %173 = vector.broadcast %172 : vector<256x1xf32> to vector<256x32xf32>
    %174 = arith.mulf %169, %173 : vector<256x32xf32>
    %175 = vector.broadcast %155 : vector<1x32xf32> to vector<256x32xf32>
    %176 = arith.mulf %174, %175 : vector<256x32xf32>
    %177 = vector.broadcast %156 : vector<1x32xf32> to vector<256x32xf32>
    %178 = arith.addf %176, %177 : vector<256x32xf32>
    %179 = arith.addf %178, %110 : vector<256x32xf32>
    %180 = vector.extract_strided_slice %114 {offsets = [3, 0], sizes = [1, 32], strides = [1, 1]} : vector<5x32xf32> to vector<1x32xf32>
    %181 = vector.extract_strided_slice %114 {offsets = [4, 0], sizes = [1, 32], strides = [1, 1]} : vector<5x32xf32> to vector<1x32xf32>
    %cst_48 = arith.constant dense<0.000000e+00> : vector<256xf32>
    %182 = vector.multi_reduction <add>, %179, %cst_48 [1] : vector<256x32xf32> to vector<256xf32>
    %183 = vector.shape_cast %182 : vector<256xf32> to vector<256x1xf32>
    %cst_49 = arith.constant 3.200000e+01 : f32
    %184 = vector.broadcast %cst_49 : f32 to vector<256x1xf32>
    %185 = arith.divf %183, %184 : vector<256x1xf32>
    %186 = vector.broadcast %185 : vector<256x1xf32> to vector<256x32xf32>
    %187 = arith.subf %179, %186 : vector<256x32xf32>
    %188 = arith.mulf %187, %187 : vector<256x32xf32>
    %cst_50 = arith.constant dense<0.000000e+00> : vector<256xf32>
    %189 = vector.multi_reduction <add>, %188, %cst_50 [1] : vector<256x32xf32> to vector<256xf32>
    %190 = vector.shape_cast %189 : vector<256xf32> to vector<256x1xf32>
    %cst_51 = arith.constant 3.200000e+01 : f32
    %191 = vector.broadcast %cst_51 : f32 to vector<256x1xf32>
    %192 = arith.divf %190, %191 : vector<256x1xf32>
    %193 = vector.broadcast %185 : vector<256x1xf32> to vector<256x32xf32>
    %194 = arith.subf %179, %193 : vector<256x32xf32>
    %cst_52 = arith.constant 9.99999974E-6 : f32
    %195 = vector.broadcast %cst_52 : f32 to vector<256x1xf32>
    %196 = arith.addf %192, %195 : vector<256x1xf32>
    %197 = math.rsqrt %196 : vector<256x1xf32>
    %198 = vector.broadcast %197 : vector<256x1xf32> to vector<256x32xf32>
    %199 = arith.mulf %194, %198 : vector<256x32xf32>
    %200 = vector.broadcast %180 : vector<1x32xf32> to vector<256x32xf32>
    %201 = arith.mulf %199, %200 : vector<256x32xf32>
    %202 = vector.broadcast %181 : vector<1x32xf32> to vector<256x32xf32>
    %203 = arith.addf %201, %202 : vector<256x32xf32>
    %204 = arith.negf %203 : vector<256x32xf32>
    %205 = math.exp %204 : vector<256x32xf32>
    %cst_53 = arith.constant 1.000000e+00 : f32
    %206 = vector.broadcast %cst_53 : f32 to vector<256x32xf32>
    %207 = arith.addf %206, %205 : vector<256x32xf32>
    %208 = arith.divf %206, %207 : vector<256x32xf32>
    %209 = arith.mulf %203, %208 : vector<256x32xf32>
    %210 = arith.truncf %209 : vector<256x32xf32> to vector<256x32xbf16>
    %c0_54 = arith.constant 0 : index
    %c0_55 = arith.constant 0 : index
    %211 = vector.load %arg8[%c0_54, %c0_55] : memref<32x128xbf16, #tpu.memory_space<vmem>>, vector<32x128xbf16>
    %cst_56 = arith.constant dense<0.000000e+00> : vector<256x128xf32>
    %212 = tpu.matmul %210, %211, %cst_56 {dimension_numbers = #tpu.dot_dimension_numbers<[1], [0], [0], [1], [0, 0, 1, 1], [], []>} : vector<256x32xbf16>, vector<32x128xbf16>, vector<256x128xf32> -> vector<256x128xf32>
    %213 = vector.extract_strided_slice %11 {offsets = [16, 0], sizes = [1, 128], strides = [1, 1]} : vector<17x128xf32> to vector<1x128xf32>
    %214 = vector.broadcast %213 : vector<1x128xf32> to vector<256x128xf32>
    %215 = arith.addf %212, %214 : vector<256x128xf32>
    %c0_57 = arith.constant 0 : index
    %c0_58 = arith.constant 0 : index
    %216 = vector.load %arg10[%c0_57, %c0_58] : memref<256x128xf32, #tpu.memory_space<vmem>>, vector<256x128xf32>
    tpu.vector_store %arg10[%c0_57, %c0_58], %215 {strides = array<i32>} : memref<256x128xf32, #tpu.memory_space<vmem>>, vector<256x128xf32>,
    return
  }
  func.func @transform_0(%arg0: i32) -> (i32, i32) {
    %c0_i32 = arith.constant 0 : i32
    %c0_i32_0 = arith.constant 0 : i32
    return %arg0, %c0_i32 : i32, i32
  }
  func.func @transform_1(%arg0: i32) -> (i32, i32) {
    %c0_i32 = arith.constant 0 : i32
    %c0_i32_0 = arith.constant 0 : i32
    %c0_i32_1 = arith.constant 0 : i32
    return %c0_i32, %c0_i32_0 : i32, i32
  }
  func.func @transform_2(%arg0: i32) -> (i32, i32) {
    %c0_i32 = arith.constant 0 : i32
    %c0_i32_0 = arith.constant 0 : i32
    %c0_i32_1 = arith.constant 0 : i32
    return %c0_i32, %c0_i32_0 : i32, i32
  }
  func.func @transform_3(%arg0: i32) -> (i32, i32) {
    %c0_i32 = arith.constant 0 : i32
    %c0_i32_0 = arith.constant 0 : i32
    %c0_i32_1 = arith.constant 0 : i32
    return %c0_i32, %c0_i32_0 : i32, i32
  }
  func.func @transform_4(%arg0: i32) -> (i32, i32) {
    %c0_i32 = arith.constant 0 : i32
    %c0_i32_0 = arith.constant 0 : i32
    %c0_i32_1 = arith.constant 0 : i32
    return %c0_i32, %c0_i32_0 : i32, i32
  }
  func.func @transform_5(%arg0: i32) -> (i32, i32) {
    %c0_i32 = arith.constant 0 : i32
    %c0_i32_0 = arith.constant 0 : i32
    %c0_i32_1 = arith.constant 0 : i32
    return %c0_i32, %c0_i32_0 : i32, i32
  }
  func.func @transform_6(%arg0: i32) -> (i32, i32) {
    %c0_i32 = arith.constant 0 : i32
    %c0_i32_0 = arith.constant 0 : i32
    %c0_i32_1 = arith.constant 0 : i32
    return %c0_i32, %c0_i32_0 : i32, i32
  }
  func.func @transform_7(%arg0: i32) -> (i32, i32) {
    %c0_i32 = arith.constant 0 : i32
    %c0_i32_0 = arith.constant 0 : i32
    %c0_i32_1 = arith.constant 0 : i32
    return %c0_i32, %c0_i32_0 : i32, i32
  }
  func.func @transform_8(%arg0: i32) -> (i32, i32) {
    %c0_i32 = arith.constant 0 : i32
    %c0_i32_0 = arith.constant 0 : i32
    %c0_i32_1 = arith.constant 0 : i32
    return %c0_i32, %c0_i32_0 : i32, i32
  }
  func.func @transform_9(%arg0: i32) -> (i32, i32) {
    %c0_i32 = arith.constant 0 : i32
    %c0_i32_0 = arith.constant 0 : i32
    return %arg0, %c0_i32 : i32, i32
  }
}

</mosaic_0001>

<bundles_post_ra>
// kernel: tpu_custom_call.1
= control target key start
LH: loop header
LB: loop body
LE: loop exit
PB: predicated region body
PF: predicated region fallthrough
CT: control target
= control target key end

     0   :  { %14 = vsyncpa [#allocation3], 0  ;;  %s14206_s0 = inlined_call_operand.vmem [shape: bf16[1536,32], index: 0, kind: input, shape index: {}]   ;;  %s14207_s1 = inlined_call_operand.vmem [shape: bf16[256,768], index: 1, kind: input, shape index: {}]   ;;  %s14208_s2 = inlined_call_operand.vmem [shape: f32[256,32], index: 2, kind: input, shape index: {}]   ;;  %s14209_s3 = inlined_call_operand.vmem [shape: bf16[32,64], index: 3, kind: input, shape index: {}]   ;;  %s14210_s4 = inlined_call_operand.vmem [shape: bf16[64,32], index: 4, kind: input, shape index: {}]   ;;  %s14211_s5 = inlined_call_operand.vmem [shape: bf16[32,64], index: 5, kind: input, shape index: {}]   ;;  %s14212_s6 = inlined_call_operand.vmem [shape: bf16[64,32], index: 6, kind: input, shape index: {}]   ;;  %s14213_s7 = inlined_call_operand.vmem [shape: bf16[32,128], index: 7, kind: input, shape index: {}]   ;;  %s14214_s8 = inlined_call_operand.vmem [shape: f32[17,128], index: 8, kind: input, shape index: {}]   ;;  %s14215_s9 = inlined_call_operand.hbm [shape: f32[512,128], index: 9, kind: output, shape index: {}]  }
   0x1   :  { %16 = vsyncpa [#allocation3 + $0x1], 0  ;;  %s9731_s30 = smov 0   ;;  %s9733_s10 = smov 0  }
   0x2   :  { %s9735_s11 = smov 0   ;;  %s9737_s12 = smov 0  }
   0x3 LB: > { %s9752_s13 = sadd.s32 4294967295, %s9676_s12   ;;  %s7294_s14 = sadd.s32 4294967294, %s9676_s12   ;;  %s9676_s12 = sphi %s9737_s12, %s14363_s12   ;;  %s9672_s11 = sphi %s9735_s11, %s14362_s11   ;;  %s9668_s10 = sphi %s9733_s10, %s14361_s10   ;;  %s9664_s30 = sphi %s9731_s30, %s14360_s30  }
   0x4   : > { %s9756_s15 = sadd.s32 1, %s9676_s12   ;;  %s223_s16 = sadd.s32 1, %s9672_s11 }
   0x5   : > { %s220_s17 = ssub.s32 %s9676_s12, %s9756_s15  ;;  %p233_p0 = scmp.ne.s32.totalorder %s9672_s11, %s9668_s10 }
   0x6   : > { %p221_p1 = scmp.eq.s32.totalorder %s220_s17, 0  ;;  %p234_p2 = scmp.eq.s32.totalorder %s9752_s13, 1 }
   0x7   : > { %p239_p3 = scmp.ne.s32.totalorder %s9668_s10, %s9664_s30  ;;  %p240_p4 = scmp.eq.s32.totalorder %s7294_s14, 1 }
   0x8   : > { %s9767_s18 = scalar_select %p221_p1, %s9672_s11, %s223_s16  }
   0x9   : > { %p9769_p5 = por %p234_p2, %p233_p0  ;;  %p9773_p6 = por %p240_p4, %p239_p3 }
   0xa   : > { %p7297_p7 = scmp.ge.s32.totalorder %s9676_s12, 1  ;;  %p291_p8 = scmp.lt.s32.totalorder %s9676_s12, 3 }
   0xc   : > { %p292_p9 = pnand %p7297_p7, %p291_p8 }
   0xe   : > { %295 = sbr.rel (%p292_p9) target bundleno = 3655 (0xe47), region = 56 }
  0x15   : > { %s327_s21 = smul.u32 96, %s9752_s13  ;;  %v8398_v0 = vld [vmem:[%s14207_s1 + $0x4] ss:$24 sps:$4 sm:$0xff]   ;;  %v8396_v19 = vld [vmem:[%s14207_s1] ss:$24 sps:$4 sm:$0xff]   ;;  %vm2081_vm0 = vcmask 261120  }
  0x16   : > { %v8401_v1 = vld [vmem:[%s14207_s1 + $0x244] ss:$24 sps:$4 sm:$0xff]   ;;  %1359 = vmatprep.mubr.bf16.mxu0 %v8398_v0  ;;  %v8399_v21 = vld [vmem:[%s14207_s1 + $0x240] ss:$24 sps:$4 sm:$0xff]   ;;  %v8408_v23 = vld [vmem:[%s14207_s1 + $0x34] ss:$24 sps:$4 sm:$0xff]  }
  0x17   : > { %p328_p10 = scmp.lt.s32.totalorder %s327_s21, 191  ;;  %1455 = vmatprep.mubr.bf16.mxu1 %v8401_v1  ;;  %v8410_v25 = vld [vmem:[%s14207_s1 + $0x274] ss:$24 sps:$4 sm:$0xff]   ;;  %v8412_v31 = vld [vmem:[%s14207_s1 + $0x30] ss:$24 sps:$4 sm:$0xff]   ;;  %vm2291_vm1 = vcmask 523264  }
  0x18   : > { %v8413_v32 = vld [vmem:[%s14207_s1 + $0x270] ss:$24 sps:$4 sm:$0xff]   ;;  %v8420_v34 = vld [vmem:[%s14207_s1 + $0x64] ss:$24 sps:$4 sm:$0xff]   ;;  %v8424_v41 = vld [vmem:[%s14207_s1 + $0x60] ss:$24 sps:$4 sm:$0xff]  }
  0x19   : > { %s14365_s21 = smov (!%p328_p10, %s327_s21), 191  ;;  %v8422_v35 = vld [vmem:[%s14207_s1 + $0x2a4] ss:$24 sps:$4 sm:$0xff]   ;;  %v8425_v44 = vld [vmem:[%s14207_s1 + $0x2a0] ss:$24 sps:$4 sm:$0xff]   ;;  %s324_s25 = sand.u32 1, %s9668_s10  }
  0x1a   : > { %s7299_s26 = sshll.u32 %s14365_s21, 2  ;;  %v8430_v47 = vld [vmem:[%s14207_s1 + $0x94] ss:$24 sps:$4 sm:$0xff]   ;;  %v8434_v52 = vld [vmem:[%s14207_s1 + $0x90] ss:$24 sps:$4 sm:$0xff]   ;;  %s7704_s16 = sshll.u32 %s9752_s13, 12 }
  0x1b   : > { %s9789_s29 = scalar_lea.vmem %s14206_s0, %s7299_s26  ;;  %v8432_v48 = vld [vmem:[%s14207_s1 + $0x2d4] ss:$24 sps:$4 sm:$0xff]   ;;  %v8435_v54 = vld [vmem:[%s14207_s1 + $0x2d0] ss:$24 sps:$4 sm:$0xff]   ;;  %v8442_v57 = vld [vmem:[%s14207_s1 + $0xc4] ss:$24 sps:$4 sm:$0xff]  }
  0x1c   : > { %v8380_v2 = vld [vmem:[%s9789_s29 + $0x40] sm:$0xff]   ;;  %v8382_v4 = vld [vmem:[%s9789_s29 + $0x48] sm:$0xff]   ;;  %v8384_v6 = vld [vmem:[%s9789_s29 + $0x50] sm:$0xff]   ;;  %s7298_s26 = sshll.u32 %s324_s25, 8  ;;  %s14165_s13 = scalar_lea.sflag [#allocation3], %s324_s25 }
  0x1d   : > { %v8381_v3 = vld [vmem:[%s9789_s29] sm:$0xff]   ;;  %7705 = vmatprep.subr.bf16.mxu0 %v8380_v2  ;;  %8323 = vmatprep.subr.bf16.mxu1 %v8380_v2  ;;  %v8383_v5 = vld [vmem:[%s9789_s29 + $0x8] sm:$0xff]   ;;  %v8385_v7 = vld [vmem:[%s9789_s29 + $0x10] sm:$0xff]   ;;  %s14090_s14 = scalar_lea.vmem [#allocation2], %s7298_s26  ;;  %s9678_s24 = smov [#allocation2]  }
  0x1e   : > { %7706 = vmatpush3.bf16.msra.mxu0 %v8381_v3  ;;  %8331 = vmatpush3.bf16.msra.mxu1 %v8381_v3  ;;  %v8386_v8 = vld [vmem:[%s9789_s29 + $0x58] sm:$0xff]   ;;  %v8388_v10 = vld [vmem:[%s9789_s29 + $0x60] sm:$0xff]   ;;  %v8390_v12 = vld [vmem:[%s9789_s29 + $0x68] sm:$0xff]   ;;  %s7232_s17 = sshll.u32 %s14090_s14, 4  ;;  %s9618_s26 = sshll.u32 %s9678_s24, 4  ;;  %s14157_s17 = int_to_ptr.vmem [resolvable:$true] %s7232_s17  ;;  %s9619_s26 = int_to_ptr.vmem [resolvable:$false] %s9618_s26 }
  0x1f   : > { %7707 = vmatprep.subr.bf16.mxu0 %v8382_v4  ;;  %8324 = vmatprep.subr.bf16.mxu1 %v8382_v4  ;;  %v8387_v9 = vld [vmem:[%s9789_s29 + $0x18] sm:$0xff]   ;;  %v8389_v11 = vld [vmem:[%s9789_s29 + $0x20] sm:$0xff]   ;;  %v8391_v13 = vld [vmem:[%s9789_s29 + $0x28] sm:$0xff]   ;;  %s9614_s23 = scalar_lea.vmem %s14157_s17, 4096  ;;  %s9620_s27 = scalar_lea.vmem %s9619_s26, 8192 }
  0x20   : > { %v8392_v14 = vld [vmem:[%s9789_s29 + $0x70] sm:$0xff]   ;;  %v8394_v16 = vld [vmem:[%s9789_s29 + $0x78] sm:$0xff]   ;;  %v8402_v18 = vld [vmem:[%s9789_s29 + $0xc0] sm:$0xff]   ;;  %p9615_p11 = scmp.ne.s32.totalorder %s14157_s17, %s9614_s23  ;;  %p9621_p0 = scmp.lt.s32.totalorder %s14157_s17, %s9619_s26 }
  0x21   : > { %v8393_v15 = vld [vmem:[%s9789_s29 + $0x30] sm:$0xff]   ;;  %v8395_v17 = vld [vmem:[%s9789_s29 + $0x38] sm:$0xff]   ;;  %v8403_v20 = vld [vmem:[%s9789_s29 + $0x140] sm:$0xff]   ;;  %p9622_p1 = scmp.lt.s32.totalorder %s9620_s27, %s9614_s23 }
  0x22   : > { %7708 = vmatpush3.bf16.msra.mxu0 %v8383_v5  ;;  %8332 = vmatpush3.bf16.msra.mxu1 %v8383_v5  ;;  %v8404_v22 = vld [vmem:[%s9789_s29 + $0x80] sm:$0xff]   ;;  %v8406_v26 = vld [vmem:[%s9789_s29 + $0xc8] sm:$0xff]   ;;  %v8414_v29 = vld [vmem:[%s9789_s29 + $0xd0] sm:$0xff]   ;;  %p9616_p12 = pnand %p9615_p11, %p9769_p5 }
  0x23   : > { %7709 = vmatprep.subr.bf16.mxu0 %v8384_v6  ;;  %8325 = vmatprep.subr.bf16.mxu1 %v8384_v6  ;;  %v8405_v24 = vld [vmem:[%s9789_s29 + $0x100] sm:$0xff]   ;;  %v8417_v27 = vld [vmem:[%s9789_s29 + $0x148] sm:$0xff]   ;;  %v8437_v33 = vld [vmem:[%s9789_s29 + $0x150] sm:$0xff]   ;;  %p9623_p2 = por %p9622_p1, %p9621_p0 }
  0x24   : > { %v8407_v28 = vld [vmem:[%s9789_s29 + $0x88] sm:$0xff]   ;;  %v8415_v36 = vld [vmem:[%s9789_s29 + $0x90] sm:$0xff]   ;;  %v8416_v37 = vld [vmem:[%s9789_s29 + $0xd8] sm:$0xff]   ;;  %p9617_p13 = pneg %p9616_p12 }
  0x25   : > { %v8419_v30 = vld [vmem:[%s9789_s29 + $0x108] sm:$0xff]   ;;  %v8439_v38 = vld [vmem:[%s9789_s29 + $0x110] sm:$0xff]   ;;  %v8418_v39 = vld [vmem:[%s9789_s29 + $0x98] sm:$0xff]  }
  0x26   : > { %7710 = vmatpush3.bf16.msra.mxu0 %v8385_v7  ;;  %8333 = vmatpush3.bf16.msra.mxu1 %v8385_v7  ;;  %v8426_v40 = vld [vmem:[%s9789_s29 + $0xe0] sm:$0xff]   ;;  %v8448_v42 = vld [vmem:[%s9789_s29 + $0x158] sm:$0xff]   ;;  %v8428_v46 = vld [vmem:[%s9789_s29 + $0xe8] sm:$0xff]   ;;  %p9624_p3 = pnand %p9623_p2, %p9617_p13 }
  0x27   : > { %7711 = vmatprep.subr.bf16.mxu0 %v8386_v8  ;;  %8326 = vmatprep.subr.bf16.mxu1 %v8386_v8  ;;  %v8449_v43 = vld [vmem:[%s9789_s29 + $0x118] sm:$0xff]   ;;  %v8427_v45 = vld [vmem:[%s9789_s29 + $0xa0] sm:$0xff]   ;;  %v8429_v49 = vld [vmem:[%s9789_s29 + $0xa8] sm:$0xff]  }
  0x28   : > { %v8436_v50 = vld [vmem:[%s9789_s29 + $0xf0] sm:$0xff]   ;;  %v8462_v51 = vld [vmem:[%s9789_s29 + $0x160] sm:$0xff]   ;;  %v8440_v56 = vld [vmem:[%s9789_s29 + $0xf8] sm:$0xff]  }
  0x29   : > { %v8463_v53 = vld [vmem:[%s9789_s29 + $0x120] sm:$0xff]   ;;  %v8438_v55 = vld [vmem:[%s9789_s29 + $0xb0] sm:$0xff]   ;;  %v8470_v59 = vld [vmem:[%s9789_s29 + $0x168] sm:$0xff]  }
  0x2a   : > { %7712 = vmatpush3.bf16.msra.mxu0 %v8387_v9  ;;  %8334 = vmatpush3.bf16.msra.mxu1 %v8387_v9  ;;  %v8446_v58 = vld [vmem:[%s14207_s1 + $0xc] ss:$24 sps:$4 sm:$0xff]   ;;  %v8441_v61 = vld [vmem:[%s9789_s29 + $0xb8] sm:$0xff]   ;;  %v8444_v62 = vld [vmem:[%s14207_s1 + $0x8] ss:$24 sps:$4 sm:$0xff]  }
  0x2b   : > { %7713 = vmatprep.subr.bf16.mxu0 %v8388_v10  ;;  %8327 = vmatprep.subr.bf16.mxu1 %v8388_v10  ;;  %v8471_v60 = vld [vmem:[%s9789_s29 + $0x128] sm:$0xff]   ;;  %v8447_v63 = vld [vmem:[%s14207_s1 + $0xc0] ss:$24 sps:$4 sm:$0xff]   ;;  %v8452_v1 = vld [vmem:[%s14207_s1 + $0x3c] ss:$24 sps:$4 sm:$0xff]  }
  0x2c   : > { %v8450_v0 = vld [vmem:[%s14207_s1 + $0xf4] ss:$24 sps:$4 sm:$0xff]   ;;  %v8454_v4 = vld [vmem:[%s14207_s1 + $0xf0] ss:$24 sps:$4 sm:$0xff]   ;;  %v8492_v5 = vld [vmem:[%s9789_s29 + $0x178] sm:$0xff]  }
  0x2d   : > { %v8484_v2 = vld [vmem:[%s9789_s29 + $0x170] sm:$0xff]   ;;  %v8493_v6 = vld [vmem:[%s9789_s29 + $0x138] sm:$0xff]   ;;  %v8458_v9 = vld [vmem:[%s14207_s1 + $0x6c] ss:$24 sps:$4 sm:$0xff]  }
  0x2e   : > { %7714 = vmatpush3.bf16.msra.mxu0 %v8389_v11  ;;  %8335 = vmatpush3.bf16.msra.mxu1 %v8389_v11  ;;  %v8485_v3 = vld [vmem:[%s9789_s29 + $0x130] sm:$0xff]   ;;  %v8456_v8 = vld [vmem:[%s14207_s1 + $0x124] ss:$24 sps:$4 sm:$0xff]   ;;  %v8460_v10 = vld [vmem:[%s14207_s1 + $0x120] ss:$24 sps:$4 sm:$0xff]   ;;  %s14155_s29 = scalar_lea.hbm %s14215_s9, %s7704_s16 }
  0x2f   : > { %7715 = vmatprep.subr.bf16.mxu0 %v8390_v12  ;;  %8328 = vmatprep.subr.bf16.mxu1 %v8390_v12  ;;  %v8455_v7 = vld [vmem:[%s14207_s1 + $0x38] ss:$24 sps:$4 sm:$0xff]   ;;  %v8461_v11 = vld [vmem:[%s14207_s1 + $0x68] ss:$24 sps:$4 sm:$0xff]   ;;  %v8464_v12 = vld [vmem:[%s14207_s1 + $0x154] ss:$24 sps:$4 sm:$0xff]  }
  0x32   : > { %7716 = vmatpush3.bf16.msra.mxu0 %v8391_v13  ;;  %8336 = vmatpush3.bf16.msra.mxu1 %v8391_v13  ;;  %v8466_v13 = vld [vmem:[%s14207_s1 + $0x9c] ss:$24 sps:$4 sm:$0xff]  }
  0x33   : > { %7717 = vmatprep.subr.bf16.mxu0 %v8392_v14  ;;  %8329 = vmatprep.subr.bf16.mxu1 %v8392_v14  ;;  %v8468_v14 = vld [vmem:[%s14207_s1 + $0x150] ss:$24 sps:$4 sm:$0xff]  }
  0x36   : > { %7718 = vmatpush3.bf16.msra.mxu0 %v8393_v15  ;;  %8337 = vmatpush3.bf16.msra.mxu1 %v8393_v15  ;;  %v8469_v15 = vld [vmem:[%s14207_s1 + $0x98] ss:$24 sps:$4 sm:$0xff]  }
  0x37   : > { %7719 = vmatprep.subr.bf16.mxu0 %v8394_v16  ;;  %8330 = vmatprep.subr.bf16.mxu1 %v8394_v16  ;;  %v8472_v16 = vld [vmem:[%s14207_s1 + $0x184] ss:$24 sps:$4 sm:$0xff]  }
  0x3a   : > { %7720 = vmatpush3.bf16.msra.mxu0 %v8395_v17  ;;  %8338 = vmatpush3.bf16.msra.mxu1 %v8395_v17  ;;  %v8474_v17 = vld [vmem:[%s14207_s1 + $0xcc] ss:$24 sps:$4 sm:$0xff]  }
  0x3b   : > { %7817 = vmatprep.subr.bf16.mxu1 %v8402_v18  ;;  %7929 = vmatprep.subr.bf16.mxu0 %v8403_v20  ;;  %v8476_v18 = vld [vmem:[%s14207_s1 + $0x180] ss:$24 sps:$4 sm:$0xff]   ;;  %v8478_v20 = vld [vmem:[%s14207_s1 + $0x1b4] ss:$24 sps:$4 sm:$0xff]  }
  0x3d   : > { %1360 = vmatmul.mubr.bf16.vlgmr.msra.gmra.mrb[0].mxu0 %v8396_v19  ;;  %1456 = vmatmul.mubr.bf16.vlgmr.msra.gmra.mrb[0].mxu1 %v8399_v21  ;;  %v8477_v19 = vld [vmem:[%s14207_s1 + $0xc8] ss:$24 sps:$4 sm:$0xff]   ;;  %v8480_v21 = vld [vmem:[%s14207_s1 + $0xfc] ss:$24 sps:$4 sm:$0xff]  }
  0x3e   : > { %7818 = vmatpush3.bf16.msra.mxu1 %v8404_v22  ;;  %7930 = vmatpush3.bf16.msra.mxu0 %v8405_v24  ;;  %v8482_v22 = vld [vmem:[%s14207_s1 + $0x1b0] ss:$24 sps:$4 sm:$0xff]   ;;  %v8486_v24 = vld [vmem:[%s14207_s1 + $0x1e4] ss:$24 sps:$4 sm:$0xff]  }
  0x3f   : > { %7819 = vmatprep.subr.bf16.mxu1 %v8406_v26  ;;  %1367 = vmatprep.mubr.bf16.mxu0 %v8408_v23  ;;  %v8483_v23 = vld [vmem:[%s14207_s1 + $0xf8] ss:$24 sps:$4 sm:$0xff]  }
  0x40   : > { %1463 = vmatprep.mubr.bf16.mxu1 %v8410_v25  ;;  %7931 = vmatprep.subr.bf16.mxu0 %v8417_v27  ;;  %v8488_v25 = vld [vmem:[%s14207_s1 + $0x12c] ss:$24 sps:$4 sm:$0xff]   ;;  %v8490_v26 = vld [vmem:[%s14207_s1 + $0x1e0] ss:$24 sps:$4 sm:$0xff]  }
  0x41   : > { %v8491_v27 = vld [vmem:[%s14207_s1 + $0x128] ss:$24 sps:$4 sm:$0xff]  }
  0x42   : > { %7820 = vmatpush3.bf16.msra.mxu1 %v8407_v28  ;;  %7932 = vmatpush3.bf16.msra.mxu0 %v8419_v30  ;;  %v8494_v28 = vld [vmem:[%s14207_s1 + $0x214] ss:$24 sps:$4 sm:$0xff]   ;;  %v8498_v30 = vld [vmem:[%s14207_s1 + $0x210] ss:$24 sps:$4 sm:$0xff]  }
  0x43   : > { %7821 = vmatprep.subr.bf16.mxu1 %v8414_v29  ;;  %7933 = vmatprep.subr.bf16.mxu0 %v8437_v33  ;;  %v8496_v29 = vld [vmem:[%s14207_s1 + $0x15c] ss:$24 sps:$4 sm:$0xff]  }
  0x44   : > { %v8504_v33 = vld [vmem:[%s14207_s1 + $0x14] ss:$24 sps:$4 sm:$0xff]  }
  0x45   : > { %1368 = vmatmul.mubr.bf16.gmra.mrb[4].mxu0 %v8412_v31  ;;  %1464 = vmatmul.mubr.bf16.gmra.mrb[4].mxu1 %v8413_v32  ;;  %v8499_v31 = vld [vmem:[%s14207_s1 + $0x158] ss:$24 sps:$4 sm:$0xff]   ;;  %v8500_v32 = vld [vmem:[%s14207_s1 + $0x18c] ss:$24 sps:$4 sm:$0xff]  }
  0x46   : > { %7822 = vmatpush3.bf16.msra.mxu1 %v8415_v36  ;;  %1375 = vmatprep.mubr.bf16.mxu0 %v8420_v34  ;;  %v8502_v34 = vld [vmem:[%s14207_s1 + $0x10] ss:$24 sps:$4 sm:$0xff]   ;;  %v8506_v36 = vld [vmem:[%s14207_s1 + $0x1bc] ss:$24 sps:$4 sm:$0xff]  }
  0x47   : > { %7823 = vmatprep.subr.bf16.mxu1 %v8416_v37  ;;  %1471 = vmatprep.mubr.bf16.mxu1 %v8422_v35  ;;  %v8505_v35 = vld [vmem:[%s14207_s1 + $0x188] ss:$24 sps:$4 sm:$0xff]   ;;  %v8508_v37 = vld [vmem:[%s14207_s1 + $0x44] ss:$24 sps:$4 sm:$0xff]  }
  0x48   : > { %7934 = vmatpush3.bf16.msra.mxu0 %v8439_v38  ;;  %v8510_v38 = vld [vmem:[%s14207_s1 + $0x1b8] ss:$24 sps:$4 sm:$0xff]  }
  0x49   : > { %7935 = vmatprep.subr.bf16.mxu0 %v8448_v42  ;;  %v8516_v42 = vld [vmem:[%s14207_s1 + $0x1e8] ss:$24 sps:$4 sm:$0xff]  }
  0x4a   : > { %7824 = vmatpush3.bf16.msra.mxu1 %v8418_v39  ;;  %v8511_v39 = vld [vmem:[%s14207_s1 + $0x40] ss:$24 sps:$4 sm:$0xff]  }
  0x4b   : > { %7825 = vmatprep.subr.bf16.mxu1 %v8426_v40  ;;  %v8512_v40 = vld [vmem:[%s14207_s1 + $0x1ec] ss:$24 sps:$4 sm:$0xff]  }
  0x4c   : > { %7936 = vmatpush3.bf16.msra.mxu0 %v8449_v43  ;;  %v8517_v43 = vld [vmem:[%s14207_s1 + $0x70] ss:$24 sps:$4 sm:$0xff]  }
  0x4d   : > { %1376 = vmatmul.mubr.bf16.gmra.mrb[8].mxu0 %v8424_v41  ;;  %1472 = vmatmul.mubr.bf16.gmra.mrb[8].mxu1 %v8425_v44  ;;  %v8514_v41 = vld [vmem:[%s14207_s1 + $0x74] ss:$24 sps:$4 sm:$0xff]  }
  0x4e   : > { %7826 = vmatpush3.bf16.msra.mxu1 %v8427_v45  ;;  %1383 = vmatprep.mubr.bf16.mxu0 %v8430_v47  ;;  %v8518_v44 = vld [vmem:[%s14207_s1 + $0x21c] ss:$24 sps:$4 sm:$0xff]   ;;  %v8523_v47 = vld [vmem:[%s14207_s1 + $0xa0] ss:$24 sps:$4 sm:$0xff]  }
  0x4f   : > { %7827 = vmatprep.subr.bf16.mxu1 %v8428_v46  ;;  %1479 = vmatprep.mubr.bf16.mxu1 %v8432_v48  ;;  %v8520_v45 = vld [vmem:[%s14207_s1 + $0xa4] ss:$24 sps:$4 sm:$0xff]   ;;  %v8522_v46 = vld [vmem:[%s14207_s1 + $0x218] ss:$24 sps:$4 sm:$0xff]  }
  0x50   : > { %7937 = vmatprep.subr.bf16.mxu0 %v8462_v51  ;;  %v8524_v48 = vld [vmem:[%s14207_s1 + $0x24c] ss:$24 sps:$4 sm:$0xff]   ;;  %v8529_v51 = vld [vmem:[%s14207_s1 + $0xd0] ss:$24 sps:$4 sm:$0xff]  }
  0x51   : > { %7938 = vmatpush3.bf16.msra.mxu0 %v8463_v53  ;;  %v8532_v53 = vld [vmem:[%s14207_s1 + $0x104] ss:$24 sps:$4 sm:$0xff]  }
  0x52   : > { %7828 = vmatpush3.bf16.msra.mxu1 %v8429_v49  ;;  %7939 = vmatprep.subr.bf16.mxu0 %v8470_v59  ;;  %v8526_v49 = vld [vmem:[%s14207_s1 + $0xd4] ss:$24 sps:$4 sm:$0xff]   ;;  %v8541_v59 = vld [vmem:[%s14207_s1 + $0x130] ss:$24 sps:$4 sm:$0xff]  }
  0x53   : > { %7829 = vmatprep.subr.bf16.mxu1 %v8436_v50  ;;  %v8528_v50 = vld [vmem:[%s14207_s1 + $0x248] ss:$24 sps:$4 sm:$0xff]  }
  0x55   : > { %1384 = vmatmul.mubr.bf16.gmra.mrb[12].mxu0 %v8434_v52  ;;  %1480 = vmatmul.mubr.bf16.gmra.mrb[12].mxu1 %v8435_v54  ;;  %v8530_v52 = vld [vmem:[%s14207_s1 + $0x27c] ss:$24 sps:$4 sm:$0xff]   ;;  %v8534_v54 = vld [vmem:[%s14207_s1 + $0x278] ss:$24 sps:$4 sm:$0xff]  }
  0x56   : > { %7830 = vmatpush3.bf16.msra.mxu1 %v8438_v55  ;;  %1391 = vmatprep.mubr.bf16.mxu0 %v8442_v57  ;;  %v8535_v55 = vld [vmem:[%s14207_s1 + $0x100] ss:$24 sps:$4 sm:$0xff]   ;;  %v8538_v57 = vld [vmem:[%s14207_s1 + $0x134] ss:$24 sps:$4 sm:$0xff]  }
  0x57   : > { %7831 = vmatprep.subr.bf16.mxu1 %v8440_v56  ;;  %1520 = vmatprep.mubr.bf16.mxu1 %v8446_v58  ;;  %v8536_v56 = vld [vmem:[%s14207_s1 + $0x2ac] ss:$24 sps:$4 sm:$0xff]   ;;  %v8540_v58 = vld [vmem:[%s14207_s1 + $0x2a8] ss:$24 sps:$4 sm:$0xff]  }
  0x58   : > { %7940 = vmatpush3.bf16.msra.mxu0 %v8471_v60  ;;  %v8542_v60 = vld [vmem:[%s14207_s1 + $0x2dc] ss:$24 sps:$4 sm:$0xff]  }
  0x59   : > { %7941 = vmatprep.subr.bf16.mxu0 %v8484_v2  ;;  %v8550_v2 = vld [vmem:[%s14207_s1 + $0x190] ss:$24 sps:$4 sm:$0xff]  }
  0x5a   : > { %7832 = vmatpush3.bf16.msra.mxu1 %v8441_v61  ;;  %v8544_v61 = vld [vmem:[%s14207_s1 + $0x164] ss:$24 sps:$4 sm:$0xff]  }
  0x5c   : > { %7942 = vmatpush3.bf16.msra.mxu0 %v8485_v3  ;;  %v8551_v3 = vld [vmem:[%s14207_s1 + $0x1c4] ss:$24 sps:$4 sm:$0xff]  }
  0x5d   : > { %1392 = vmatmul.mubr.bf16.gmra.mrb[16].mxu0 %v8447_v63  ;;  %1521 = vmatmul.mubr.bf16.vlgmr.msra.gmra.mrb[16].mxu1 %v8444_v62  ;;  %v8546_v62 = vld [vmem:[%s14207_s1 + $0x2d8] ss:$24 sps:$4 sm:$0xff]  }
  0x5e   : > { %1399 = vmatprep.mubr.bf16.mxu0 %v8450_v0  ;;  %1528 = vmatprep.mubr.bf16.mxu1 %v8452_v1  ;;  %v8547_v63 = vld [vmem:[%s14207_s1 + $0x160] ss:$24 sps:$4 sm:$0xff]   ;;  %v8548_v0 = vld [vmem:[%s14207_s1 + $0x194] ss:$24 sps:$4 sm:$0xff]  }
  0x5f   : > { %7943 = vmatprep.subr.bf16.mxu0 %v8492_v5  ;;  %v8572_v1 = vld [vmem:[%s14209_s3] sm:$0xff]   ;;  %v8554_v5 = vld [vmem:[%s14207_s1 + $0x1f4] ss:$24 sps:$4 sm:$0xff]  }
  0x60   : > { %7944 = vmatpush3.bf16.msra.mxu0 %v8493_v6  ;;  %8135 = vmatprep.subr.bf16.mxu1 %v8572_v1  ;;  %v8556_v6 = vld [vmem:[%s14207_s1 + $0x1f0] ss:$24 sps:$4 sm:$0xff]  }
  0x61   : > { %8136 = vmatpush3.bf16.msra.mxu1 %v8572_v1 }
  0x65   : > { %1400 = vmatmul.mubr.bf16.gmra.mrb[20].mxu0 %v8454_v4  ;;  %1529 = vmatmul.mubr.bf16.gmra.mrb[20].mxu1 %v8455_v7  ;;  %v8553_v4 = vld [vmem:[%s14207_s1 + $0x1c0] ss:$24 sps:$4 sm:$0xff]   ;;  %v8557_v7 = vld [vmem:[%s14207_s1 + $0x224] ss:$24 sps:$4 sm:$0xff]  }
  0x66   : > { %1407 = vmatprep.mubr.bf16.mxu0 %v8456_v8  ;;  %1536 = vmatprep.mubr.bf16.mxu1 %v8458_v9  ;;  %v8559_v8 = vld [vmem:[%s14207_s1 + $0x220] ss:$24 sps:$4 sm:$0xff]   ;;  %v8560_v9 = vld [vmem:[%s14207_s1 + $0x254] ss:$24 sps:$4 sm:$0xff]  }
  0x6d   : > { %1408 = vmatmul.mubr.bf16.gmra.mrb[24].mxu0 %v8460_v10  ;;  %1537 = vmatmul.mubr.bf16.gmra.mrb[24].mxu1 %v8461_v11  ;;  %v8562_v10 = vld [vmem:[%s14207_s1 + $0x250] ss:$24 sps:$4 sm:$0xff]   ;;  %v8563_v11 = vld [vmem:[%s14207_s1 + $0x284] ss:$24 sps:$4 sm:$0xff]  }
  0x6e   : > { %1415 = vmatprep.mubr.bf16.mxu0 %v8464_v12  ;;  %1544 = vmatprep.mubr.bf16.mxu1 %v8466_v13  ;;  %v8565_v12 = vld [vmem:[%s14207_s1 + $0x280] ss:$24 sps:$4 sm:$0xff]   ;;  %v8566_v13 = vld [vmem:[%s14207_s1 + $0x2b4] ss:$24 sps:$4 sm:$0xff]  }
  0x75   : > { %1416 = vmatmul.mubr.bf16.gmra.mrb[28].mxu0 %v8468_v14  ;;  %1545 = vmatmul.mubr.bf16.gmra.mrb[28].mxu1 %v8469_v15  ;;  %v8568_v14 = vld [vmem:[%s14207_s1 + $0x2b0] ss:$24 sps:$4 sm:$0xff]   ;;  %v8569_v15 = vld [vmem:[%s14207_s1 + $0x2e4] ss:$24 sps:$4 sm:$0xff]  }
  0x76   : > { %1423 = vmatprep.mubr.bf16.mxu0 %v8472_v16  ;;  %1552 = vmatprep.mubr.bf16.mxu1 %v8474_v17 }
  0x7d   : > { %1424 = vmatmul.mubr.bf16.gmra.mrb[32].mxu0 %v8476_v18  ;;  %1553 = vmatmul.mubr.bf16.gmra.mrb[32].mxu1 %v8477_v19  ;;  %v8571_v19 = vld [vmem:[%s14207_s1 + $0x2e0] ss:$24 sps:$4 sm:$0xff]  }
  0x7e   : > { %1431 = vmatprep.mubr.bf16.mxu0 %v8478_v20  ;;  %1560 = vmatprep.mubr.bf16.mxu1 %v8480_v21 }
  0x85   : > { %1432 = vmatmul.mubr.bf16.gmra.mrb[36].mxu0 %v8482_v22  ;;  %1561 = vmatmul.mubr.bf16.gmra.mrb[36].mxu1 %v8483_v23 }
  0x86   : > { %1439 = vmatprep.mubr.bf16.mxu0 %v8486_v24  ;;  %1568 = vmatprep.mubr.bf16.mxu1 %v8488_v25 }
  0x8d   : > { %1440 = vmatmul.mubr.bf16.gmra.mrb[40].mxu0 %v8490_v26  ;;  %1569 = vmatmul.mubr.bf16.gmra.mrb[40].mxu1 %v8491_v27 }
  0x8e   : > { %1447 = vmatprep.mubr.bf16.mxu0 %v8494_v28  ;;  %1576 = vmatprep.mubr.bf16.mxu1 %v8496_v29 }
  0x95   : > { %1448 = vmatmul.mubr.bf16.gmra.mrb[44].mxu0 %v8498_v30  ;;  %1577 = vmatmul.mubr.bf16.gmra.mrb[44].mxu1 %v8499_v31 }
  0x96   : > { %1584 = vmatprep.mubr.bf16.mxu1 %v8500_v32  ;;  %1681 = vmatprep.mubr.bf16.mxu0 %v8504_v33  ;;  %v8573_v33 = vld [vmem:[%s14209_s3 + $0x8] sm:$0xff]  }
  0x97   : > { %8137 = vmatprep.subr.bf16.mxu1 %v8573_v33 }
  0x98   : > { %8138 = vmatpush3.bf16.msra.mxu1 %v8573_v33 }
  0x9d   : > { %1585 = vmatmul.mubr.bf16.gmra.mrb[48].mxu1 %v8505_v35  ;;  %1682 = vmatmul.mubr.bf16.vlgmr.msra.gmra.mrb[48].mxu0 %v8502_v34 }
  0x9e   : > { %1592 = vmatprep.mubr.bf16.mxu1 %v8506_v36  ;;  %1689 = vmatprep.mubr.bf16.mxu0 %v8508_v37 }
  0xa5   : > { %1593 = vmatmul.mubr.bf16.gmra.mrb[52].mxu1 %v8510_v38  ;;  %1690 = vmatmul.mubr.bf16.gmra.mrb[52].mxu0 %v8511_v39 }
  0xa6   : > { %1600 = vmatprep.mubr.bf16.mxu1 %v8512_v40  ;;  %1697 = vmatprep.mubr.bf16.mxu0 %v8514_v41 }
  0xad   : > { %1601 = vmatmul.mubr.bf16.gmra.mrb[56].mxu1 %v8516_v42  ;;  %1698 = vmatmul.mubr.bf16.gmra.mrb[56].mxu0 %v8517_v43 }
  0xae   : > { %1608 = vmatprep.mubr.bf16.mxu1 %v8518_v44  ;;  %1705 = vmatprep.mubr.bf16.mxu0 %v8520_v45 }
  0xb5   : > { %1609 = vmatmul.mubr.bf16.gmra.mrb[60].mxu1 %v8522_v46  ;;  %1706 = vmatmul.mubr.bf16.gmra.mrb[60].mxu0 %v8523_v47 }
  0xb6   : > { %1616 = vmatprep.mubr.bf16.mxu1 %v8524_v48  ;;  %1713 = vmatprep.mubr.bf16.mxu0 %v8526_v49 }
  0xbd   : > { %1617 = vmatmul.mubr.bf16.gmra.mrb[64].mxu1 %v8528_v50  ;;  %1714 = vmatmul.mubr.bf16.gmra.mrb[64].mxu0 %v8529_v51 }
  0xbe   : > { %1624 = vmatprep.mubr.bf16.mxu1 %v8530_v52  ;;  %1721 = vmatprep.mubr.bf16.mxu0 %v8532_v53 }
  0xc5   : > { %1625 = vmatmul.mubr.bf16.gmra.mrb[68].mxu1 %v8534_v54  ;;  %1722 = vmatmul.mubr.bf16.gmra.mrb[68].mxu0 %v8535_v55 }
  0xc6   : > { %1632 = vmatprep.mubr.bf16.mxu1 %v8536_v56  ;;  %1729 = vmatprep.mubr.bf16.mxu0 %v8538_v57 }
  0xcd   : > { %1633 = vmatmul.mubr.bf16.gmra.mrb[72].mxu1 %v8540_v58  ;;  %1730 = vmatmul.mubr.bf16.gmra.mrb[72].mxu0 %v8541_v59 }
  0xce   : > { %1640 = vmatprep.mubr.bf16.mxu1 %v8542_v60  ;;  %1737 = vmatprep.mubr.bf16.mxu0 %v8544_v61 }
  0xd5   : > { %1641 = vmatmul.mubr.bf16.gmra.mrb[76].mxu1 %v8546_v62  ;;  %1738 = vmatmul.mubr.bf16.gmra.mrb[76].mxu0 %v8547_v63 }
  0xd6   : > { %1745 = vmatprep.mubr.bf16.mxu0 %v8548_v0 }
  0xdd   : > { %1746 = vmatmul.mubr.bf16.gmra.mrb[80].mxu0 %v8550_v2  ;;  %v527_v2 = vld [vmem:[%s14208_s2] sm:$0xff] }
  0xde   : > { %1753 = vmatprep.mubr.bf16.mxu0 %v8551_v3 }
  0xe5   : > { %1754 = vmatmul.mubr.bf16.gmra.mrb[84].mxu0 %v8553_v4 }
  0xe6   : > { %1761 = vmatprep.mubr.bf16.mxu0 %v8554_v5  ;;  %v528_v5 = vld [vmem:[%s14208_s2 + $0x8] sm:$0xff] }
  0xed   : > { %1762 = vmatmul.mubr.bf16.gmra.mrb[88].mxu0 %v8556_v6 }
  0xee   : > { %1769 = vmatprep.mubr.bf16.mxu0 %v8557_v7 }
  0xf5   : > { %1770 = vmatmul.mubr.bf16.gmra.mrb[92].mxu0 %v8559_v8 }
  0xf6   : > { %1777 = vmatprep.mubr.bf16.mxu0 %v8560_v9 }
  0xfd   : > { %1778 = vmatmul.mubr.bf16.gmra.mrb[96].mxu0 %v8562_v10 }
  0xfe   : > { %1785 = vmatprep.mubr.bf16.mxu0 %v8563_v11 }
 0x105   : > { %1786 = vmatmul.mubr.bf16.gmra.mrb[100].mxu0 %v8565_v12 }
 0x106   : > { %1793 = vmatprep.mubr.bf16.mxu0 %v8566_v13 }
 0x10d   : > { %1794 = vmatmul.mubr.bf16.gmra.mrb[104].mxu0 %v8568_v14 }
 0x10e   : > { %1801 = vmatprep.mubr.bf16.mxu0 %v8569_v15 }
 0x110   : > { %v7721_v16 = vpop.f32.mrb[0].mxu0  ;;  %v7793_v17 = vpop.f32.mrb[0].mxu1 }
 0x111   : > { %v7722_v18 = vpop.f32.mrb[1].mxu0  ;;  %v7794_v20 = vpop.f32.mrb[1].mxu1 }
 0x112   : > { %v7723_v21 = vadd.f32 %v7722_v18, %v7721_v16  ;;  %v7724_v22 = vpop.f32.mrb[2].mxu0  ;;  %v10124_v23 = vadd.f32 %v7794_v20, %v7793_v17  ;;  %v7796_v24 = vpop.f32.mrb[2].mxu1  ;;  %v529_v20 = vld [vmem:[%s14208_s2 + $0x10] sm:$0xff] }
 0x113   : > { %v7725_v25 = vpop.f32.mrb[3].mxu0  ;;  %v7797_v26 = vpop.f32.mrb[3].mxu1 }
 0x114   : > { %v7726_v27 = vadd.f32 %v7725_v25, %v7724_v22  ;;  %v10126_v28 = vadd.f32 %v7797_v26, %v7796_v24  ;;  %v1362_v8 = vadd.f32 %v7723_v21, %v527_v2  ;;  %v530_v24 = vld [vmem:[%s14208_s2 + $0x18] sm:$0xff] }
 0x115   : > { %1802 = vmatmul.mubr.bf16.gmra.mrb[108].mxu0 %v8571_v19 }
 0x116   : > { %v1365_v15 = vadd.f32 %v7726_v27, %v528_v5 }
 0x118   : > { %v7727_v29 = vpop.f32.mrb[4].mxu0  ;;  %v7799_v30 = vpop.f32.mrb[4].mxu1 }
 0x119   : > { %v7728_v31 = vpop.f32.mrb[5].mxu0  ;;  %v7800_v32 = vpop.f32.mrb[5].mxu1 }
 0x11a   : > { %v7729_v34 = vadd.f32 %v7728_v31, %v7727_v29  ;;  %v7730_v35 = vpop.f32.mrb[6].mxu0  ;;  %v10131_v36 = vadd.f32 %v7800_v32, %v7799_v30  ;;  %v7802_v37 = vpop.f32.mrb[6].mxu1 }
 0x11b   : > { %v7731_v38 = vpop.f32.mrb[7].mxu0  ;;  %v7803_v39 = vpop.f32.mrb[7].mxu1 }
 0x11c   : > { %v7732_v40 = vadd.f32 %v7731_v38, %v7730_v35  ;;  %v10133_v41 = vadd.f32 %v7803_v39, %v7802_v37  ;;  %v1370_v27 = vadd.f32 %v7729_v34, %v529_v20 }
 0x11e   : > { %v1373_v37 = vadd.f32 %v7732_v40, %v530_v24 }
 0x120   : > { %v7733_v42 = vpop.f32.mrb[8].mxu0  ;;  %v7805_v43 = vpop.f32.mrb[8].mxu1 }
 0x121   : > { %v7734_v44 = vpop.f32.mrb[9].mxu0  ;;  %v7806_v45 = vpop.f32.mrb[9].mxu1 }
 0x122   : > { %v7735_v46 = vadd.f32 %v7734_v44, %v7733_v42  ;;  %v7736_v47 = vpop.f32.mrb[10].mxu0  ;;  %v10135_v48 = vadd.f32 %v7806_v45, %v7805_v43  ;;  %v7808_v49 = vpop.f32.mrb[10].mxu1  ;;  %v531_v44 = vld [vmem:[%s14208_s2 + $0x20] sm:$0xff] }
 0x123   : > { %v7737_v50 = vpop.f32.mrb[11].mxu0  ;;  %v7809_v51 = vpop.f32.mrb[11].mxu1 }
 0x124   : > { %v10137_v52 = vadd.f32 %v7737_v50, %v7736_v47  ;;  %v10139_v53 = vadd.f32 %v7809_v51, %v7808_v49  ;;  %v532_v47 = vld [vmem:[%s14208_s2 + $0x28] sm:$0xff]  ;;  %v1378_v40 = vadd.f32 %v7735_v46, %v531_v44  ;;  %v533_v46 = vld [vmem:[%s14208_s2 + $0x30] sm:$0xff] }
 0x128   : > { %v7739_v54 = vpop.f32.mrb[12].mxu0  ;;  %v7811_v55 = vpop.f32.mrb[12].mxu1 }
 0x129   : > { %v7740_v56 = vpop.f32.mrb[13].mxu0  ;;  %v7812_v57 = vpop.f32.mrb[13].mxu1 }
 0x12a   : > { %v10141_v58 = vadd.f32 %v7740_v56, %v7739_v54  ;;  %v7742_v59 = vpop.f32.mrb[14].mxu0  ;;  %v10143_v60 = vadd.f32 %v7812_v57, %v7811_v55  ;;  %v7814_v61 = vpop.f32.mrb[14].mxu1 }
 0x12b   : > { %v7743_v62 = vpop.f32.mrb[15].mxu0  ;;  %v7815_v63 = vpop.f32.mrb[15].mxu1 }
 0x12c   : > { %v10145_v0 = vadd.f32 %v7743_v62, %v7742_v59  ;;  %v10147_v1 = vadd.f32 %v7815_v63, %v7814_v61  ;;  %v1381_v61 = vadd.f32 %v10137_v52, %v532_v47  ;;  %v1386_v52 = vadd.f32 %v10141_v58, %v533_v46  ;;  %v535_v58 = vld [vmem:[%s14208_s2 + $0x40] sm:$0xff] }
 0x130   : > { %v7745_v3 = vpop.f32.mrb[16].mxu0  ;;  %v7833_v4 = vpop.f32.mrb[16].mxu1 }
 0x131   : > { %v7746_v6 = vpop.f32.mrb[17].mxu0  ;;  %v7834_v7 = vpop.f32.mrb[17].mxu1 }
 0x132   : > { %v10155_v9 = vadd.f32 %v7746_v6, %v7745_v3  ;;  %v7835_v10 = vadd.f32 %v7834_v7, %v7833_v4  ;;  %v7748_v11 = vpop.f32.mrb[18].mxu0  ;;  %v7836_v12 = vpop.f32.mrb[18].mxu1  ;;  %v534_v6 = vld [vmem:[%s14208_s2 + $0x38] sm:$0xff] }
 0x133   : > { %v7749_v13 = vpop.f32.mrb[19].mxu0  ;;  %v7837_v14 = vpop.f32.mrb[19].mxu1 }
 0x134   : > { %v10157_v16 = vadd.f32 %v7835_v10, %v1362_v8  ;;  %v10159_v17 = vadd.f32 %v7749_v13, %v7748_v11  ;;  %v7838_v18 = vadd.f32 %v7837_v14, %v7836_v12 }
 0x136   : > { %v10161_v19 = vadd.f32 %v7838_v18, %v1365_v15  ;;  %v1389_v18 = vadd.f32 %v10145_v0, %v534_v6  ;;  %v1394_v0 = vadd.f32 %v10155_v9, %v535_v58  ;;  %v537_v9 = vld [vmem:[%s14208_s2 + $0x50] sm:$0xff] }
 0x138   : > { %v7751_v21 = vpop.f32.mrb[20].mxu0  ;;  %v7839_v22 = vpop.f32.mrb[20].mxu1 }
 0x139   : > { %v7752_v25 = vpop.f32.mrb[21].mxu0  ;;  %v7840_v26 = vpop.f32.mrb[21].mxu1 }
 0x13a   : > { %v10169_v29 = vadd.f32 %v7752_v25, %v7751_v21  ;;  %v7841_v30 = vadd.f32 %v7840_v26, %v7839_v22  ;;  %v7754_v31 = vpop.f32.mrb[22].mxu0  ;;  %v7842_v32 = vpop.f32.mrb[22].mxu1 }
 0x13b   : > { %v7755_v33 = vpop.f32.mrb[23].mxu0  ;;  %v7843_v35 = vpop.f32.mrb[23].mxu1 }
 0x13c   : > { %v10171_v38 = vadd.f32 %v7841_v30, %v1370_v27  ;;  %v10173_v39 = vadd.f32 %v7755_v33, %v7754_v31  ;;  %v7844_v42 = vadd.f32 %v7843_v35, %v7842_v32  ;;  %v536_v27 = vld [vmem:[%s14208_s2 + $0x48] sm:$0xff] }
 0x13e   : > { %v10175_v43 = vadd.f32 %v7844_v42, %v1373_v37 }
 0x140   : > { %v7757_v34 = vpop.f32.mrb[24].mxu0  ;;  %v7845_v45 = vpop.f32.mrb[24].mxu1 }
 0x141   : > { %v7758_v49 = vpop.f32.mrb[25].mxu0  ;;  %v7846_v50 = vpop.f32.mrb[25].mxu1 }
 0x142   : > { %v10183_v51 = vadd.f32 %v7758_v49, %v7757_v34  ;;  %v7847_v54 = vadd.f32 %v7846_v50, %v7845_v45  ;;  %v7760_v55 = vpop.f32.mrb[26].mxu0  ;;  %v7848_v56 = vpop.f32.mrb[26].mxu1  ;;  %v1397_v34 = vadd.f32 %v10159_v17, %v536_v27  ;;  %v1402_v17 = vadd.f32 %v10169_v29, %v537_v9  ;;  %v539_v29 = vld [vmem:[%s14208_s2 + $0x60] sm:$0xff] }
 0x143   : > { %v7761_v57 = vpop.f32.mrb[27].mxu0  ;;  %v7849_v59 = vpop.f32.mrb[27].mxu1 }
 0x144   : > { %v10186_v62 = vadd.f32 %v7847_v54, %v1378_v40  ;;  %v10188_v63 = vadd.f32 %v7761_v57, %v7760_v55  ;;  %v7850_v2 = vadd.f32 %v7849_v59, %v7848_v56  ;;  %v538_v55 = vld [vmem:[%s14208_s2 + $0x58] sm:$0xff] }
 0x145   : > { %v1405_v6 = vadd.f32 %v10173_v39, %v538_v55  ;;  %v1410_v39 = vadd.f32 %v10183_v51, %v539_v29  ;;  %v541_v51 = vld [vmem:[%s14208_s2 + $0x70] sm:$0xff] }
 0x146   : > { %v10190_v3 = vadd.f32 %v7850_v2, %v1381_v61 }
 0x148   : > { %v7763_v4 = vpop.f32.mrb[28].mxu0  ;;  %v7851_v5 = vpop.f32.mrb[28].mxu1 }
 0x149   : > { %v7764_v7 = vpop.f32.mrb[29].mxu0  ;;  %v7852_v8 = vpop.f32.mrb[29].mxu1 }
 0x14a   : > { %v10199_v10 = vadd.f32 %v7764_v7, %v7763_v4  ;;  %v7853_v11 = vadd.f32 %v7852_v8, %v7851_v5  ;;  %v7766_v12 = vpop.f32.mrb[30].mxu0  ;;  %v7854_v13 = vpop.f32.mrb[30].mxu1 }
 0x14b   : > { %v7767_v14 = vpop.f32.mrb[31].mxu0  ;;  %v7855_v15 = vpop.f32.mrb[31].mxu1 }
 0x14c   : > { %v10202_v20 = vadd.f32 %v7853_v11, %v1386_v52  ;;  %v10204_v21 = vadd.f32 %v7767_v14, %v7766_v12  ;;  %v7856_v22 = vadd.f32 %v7855_v15, %v7854_v13  ;;  %v540_v14 = vld [vmem:[%s14208_s2 + $0x68] sm:$0xff] }
 0x14e   : > { %v10206_v24 = vadd.f32 %v7856_v22, %v1389_v18 }
 0x150   : > { %v7769_v25 = vpop.f32.mrb[32].mxu0  ;;  %v7857_v26 = vpop.f32.mrb[32].mxu1 }
 0x151   : > { %v7770_v30 = vpop.f32.mrb[33].mxu0  ;;  %v7858_v31 = vpop.f32.mrb[33].mxu1 }
 0x152   : > { %v10215_v32 = vadd.f32 %v7770_v30, %v7769_v25  ;;  %v7859_v33 = vadd.f32 %v7858_v31, %v7857_v26  ;;  %v7772_v35 = vpop.f32.mrb[34].mxu0  ;;  %v7860_v37 = vpop.f32.mrb[34].mxu1  ;;  %v1413_v31 = vadd.f32 %v10188_v63, %v540_v14  ;;  %v1418_v63 = vadd.f32 %v10199_v10, %v541_v51  ;;  %v543_v10 = vld [vmem:[%s14208_s2 + $0x80] sm:$0xff] }
 0x153   : > { %v7773_v42 = vpop.f32.mrb[35].mxu0  ;;  %v7861_v44 = vpop.f32.mrb[35].mxu1 }
 0x154   : > { %v10218_v45 = vadd.f32 %v7859_v33, %v1394_v0  ;;  %v10220_v47 = vadd.f32 %v7773_v42, %v7772_v35  ;;  %v7862_v49 = vadd.f32 %v7861_v44, %v7860_v37 }
 0x156   : > { %v10222_v50 = vadd.f32 %v7862_v49, %v1397_v34  ;;  %v542_v34 = vld [vmem:[%s14208_s2 + $0x78] sm:$0xff] }
 0x158   : > { %v7775_v40 = vpop.f32.mrb[36].mxu0  ;;  %v7863_v54 = vpop.f32.mrb[36].mxu1 }
 0x159   : > { %v7776_v56 = vpop.f32.mrb[37].mxu0  ;;  %v7864_v57 = vpop.f32.mrb[37].mxu1 }
 0x15a   : > { %v10231_v59 = vadd.f32 %v7776_v56, %v7775_v40  ;;  %v7865_v61 = vadd.f32 %v7864_v57, %v7863_v54  ;;  %v7778_v2 = vpop.f32.mrb[38].mxu0  ;;  %v7866_v46 = vpop.f32.mrb[38].mxu1 }
 0x15b   : > { %v7779_v4 = vpop.f32.mrb[39].mxu0  ;;  %v7867_v5 = vpop.f32.mrb[39].mxu1 }
 0x15c   : > { %v10234_v7 = vadd.f32 %v7865_v61, %v1402_v17  ;;  %v10236_v8 = vadd.f32 %v7779_v4, %v7778_v2  ;;  %v7868_v52 = vadd.f32 %v7867_v5, %v7866_v46  ;;  %v1421_v61 = vadd.f32 %v10204_v21, %v542_v34 }
 0x15d   : > { %v1426_v21 = vadd.f32 %v10215_v32, %v543_v10 }
 0x15e   : > { %v10238_v11 = vadd.f32 %v7868_v52, %v1405_v6  ;;  %v544_v6 = vld [vmem:[%s14208_s2 + $0x88] sm:$0xff] }
 0x160   : > { %v7781_v12 = vpop.f32.mrb[40].mxu0  ;;  %v7869_v13 = vpop.f32.mrb[40].mxu1 }
 0x161   : > { %v7782_v15 = vpop.f32.mrb[41].mxu0  ;;  %v7870_v18 = vpop.f32.mrb[41].mxu1 }
 0x162   : > { %v10247_v22 = vadd.f32 %v7782_v15, %v7781_v12  ;;  %v7871_v58 = vadd.f32 %v7870_v18, %v7869_v13  ;;  %v7784_v25 = vpop.f32.mrb[42].mxu0  ;;  %v7872_v26 = vpop.f32.mrb[42].mxu1 }
 0x163   : > { %v7785_v27 = vpop.f32.mrb[43].mxu0  ;;  %v7873_v30 = vpop.f32.mrb[43].mxu1 }
 0x164   : > { %v10250_v0 = vadd.f32 %v7871_v58, %v1410_v39  ;;  %v10252_v33 = vadd.f32 %v7785_v27, %v7784_v25  ;;  %v7874_v35 = vadd.f32 %v7873_v30, %v7872_v26  ;;  %v1429_v58 = vadd.f32 %v10220_v47, %v544_v6  ;;  %v545_v47 = vld [vmem:[%s14208_s2 + $0x90] sm:$0xff] }
 0x166   : > { %v10254_v37 = vadd.f32 %v7874_v35, %v1413_v31 }
 0x168   : > { %v7787_v42 = vpop.f32.mrb[44].mxu0  ;;  %v7875_v44 = vpop.f32.mrb[44].mxu1 }
 0x169   : > { %v7788_v49 = vpop.f32.mrb[45].mxu0  ;;  %v7876_v9 = vpop.f32.mrb[45].mxu1 }
 0x16a   : > { %v10263_v40 = vadd.f32 %v7788_v49, %v7787_v42  ;;  %v7877_v54 = vadd.f32 %v7876_v9, %v7875_v44  ;;  %v7790_v55 = vpop.f32.mrb[46].mxu0  ;;  %v7878_v56 = vpop.f32.mrb[46].mxu1  ;;  %v546_v44 = vld [vmem:[%s14208_s2 + $0x98] sm:$0xff] }
 0x16b   : > { %v7791_v57 = vpop.f32.mrb[47].mxu0  ;;  %v7879_v17 = vpop.f32.mrb[47].mxu1 }
 0x16c   : > { %v10266_v2 = vadd.f32 %v7877_v54, %v1418_v63  ;;  %v10268_v46 = vadd.f32 %v7791_v57, %v7790_v55  ;;  %v7880_v4 = vadd.f32 %v7879_v17, %v7878_v56  ;;  %v1434_v54 = vadd.f32 %v10231_v59, %v545_v47 }
 0x16d   : > { %v1437_v17 = vadd.f32 %v10236_v8, %v546_v44  ;;  %v547_v8 = vld [vmem:[%s14208_s2 + $0xa0] sm:$0xff] }
 0x16e   : > { %v10270_v5 = vadd.f32 %v7880_v4, %v1421_v61 }
 0x170   : > { %v7881_v52 = vpop.f32.mrb[48].mxu1  ;;  %v7945_v29 = vpop.f32.mrb[48].mxu0 }
 0x171   : > { %v7882_v12 = vpop.f32.mrb[49].mxu1  ;;  %v7946_v13 = vpop.f32.mrb[49].mxu0 }
 0x172   : > { %v7883_v14 = vadd.f32 %v7882_v12, %v7881_v52  ;;  %v7947_v15 = vadd.f32 %v7946_v13, %v7945_v29  ;;  %v7884_v18 = vpop.f32.mrb[50].mxu1  ;;  %v7948_v39 = vpop.f32.mrb[50].mxu0 }
 0x173   : > { %v7885_v25 = vpop.f32.mrb[51].mxu1  ;;  %v7949_v26 = vpop.f32.mrb[51].mxu0 }
 0x174   : > { %v10280_v27 = vadd.f32 %v7883_v14, %v1426_v21  ;;  %v10283_v30 = vadd.f32 %v7947_v15, %v10157_v16  ;;  %v7886_v31 = vadd.f32 %v7885_v25, %v7884_v18  ;;  %v7950_v35 = vadd.f32 %v7949_v26, %v7948_v39  ;;  %v548_v21 = vld [vmem:[%s14208_s2 + $0xa8] sm:$0xff] }
 0x175   : > { %v1442_v25 = vadd.f32 %v10247_v22, %v547_v8 }
 0x176   : > { %v7444_v51 = vmul.f32 -1.442695, %v10283_v30  ;;  %v10286_v42 = vadd.f32 %v7886_v31, %v1429_v58  ;;  %v10289_v32 = vadd.f32 %v7950_v35, %v10161_v19 }
 0x178   : > { %8586 = vpow2.f32 %v7444_v51  ;;  %v7445_v16 = vmul.f32 -1.442695, %v10289_v32  ;;  %v7887_v34 = vpop.f32.mrb[52].mxu1  ;;  %v7951_v49 = vpop.f32.mrb[52].mxu0  ;;  %v1445_v51 = vadd.f32 %v10252_v33, %v548_v21  ;;  %v549_v33 = vld [vmem:[%s14208_s2 + $0xb0] sm:$0xff] }
 0x179   : > { %v7888_v9 = vpop.f32.mrb[53].mxu1  ;;  %v7952_v63 = vpop.f32.mrb[53].mxu0 }
 0x17a   : > { %8588 = vpow2.f32 %v7445_v16  ;;  %v7889_v19 = vadd.f32 %v7888_v9, %v7887_v34  ;;  %v7953_v55 = vadd.f32 %v7952_v63, %v7951_v49  ;;  %v7890_v56 = vpop.f32.mrb[54].mxu1  ;;  %v7954_v57 = vpop.f32.mrb[54].mxu0 }
 0x17b   : > { %v7891_v61 = vpop.f32.mrb[55].mxu1  ;;  %v7955_v4 = vpop.f32.mrb[55].mxu0 }
 0x17c   : > { %v10300_v10 = vadd.f32 %v7889_v19, %v1434_v54  ;;  %v10303_v6 = vadd.f32 %v7953_v55, %v10171_v38  ;;  %v7892_v52 = vadd.f32 %v7891_v61, %v7890_v56  ;;  %v7956_v29 = vadd.f32 %v7955_v4, %v7954_v57 }
 0x17e   : > { %v7446_v12 = vmul.f32 -1.442695, %v10303_v6  ;;  %v10306_v13 = vadd.f32 %v7892_v52, %v1437_v17  ;;  %v10309_v59 = vadd.f32 %v7956_v29, %v10175_v43 }
 0x180   : > { %8590 = vpow2.f32 %v7446_v12  ;;  %v7447_v38 = vmul.f32 -1.442695, %v10309_v59  ;;  %v7893_v14 = vpop.f32.mrb[56].mxu1  ;;  %v7957_v15 = vpop.f32.mrb[56].mxu0 }
 0x181   : > { %v7894_v18 = vpop.f32.mrb[57].mxu1  ;;  %v7958_v39 = vpop.f32.mrb[57].mxu0 }
 0x182   : > { %v8587_v58 = vpop.eup %8586  ;;  %8592 = vpow2.f32 %v7447_v38  ;;  %v7895_v43 = vadd.f32 %v7894_v18, %v7893_v14  ;;  %v7959_v26 = vadd.f32 %v7958_v39, %v7957_v15  ;;  %v7896_v31 = vpop.f32.mrb[58].mxu1 }
 0x183   : > { %v7960_v35 = vpop.f32.mrb[58].mxu0  ;;  %v1906_v47 = vadd.f32 1.0, %v8587_v58  ;;  %v7897_v44 = vpop.f32.mrb[59].mxu1 }
 0x184   : > { %v7961_v16 = vpop.f32.mrb[59].mxu0  ;;  %v8589_v34 = vpop.eup %8588  ;;  %v10320_v49 = vadd.f32 %v7895_v43, %v1442_v25  ;;  %v10323_v9 = vadd.f32 %v7959_v26, %v10186_v62  ;;  %v7898_v63 = vadd.f32 %v7897_v44, %v7896_v31  ;;  %v550_v62 = vld [vmem:[%s14208_s2 + $0xb8] sm:$0xff] }
 0x185   : > { %v7962_v54 = vadd.f32 %v7961_v16, %v7960_v35  ;;  %8594 = vrcp.f32 %v1906_v47  ;;  %v1907_v22 = vadd.f32 1.0, %v8589_v34  ;;  %v1453_v14 = vadd.f32 %v10268_v46, %v550_v62  ;;  %v551_v35 = vld [vmem:[%s14208_s2 + $0xc0] sm:$0xff] }
 0x186   : > { %v7448_v19 = vmul.f32 -1.442695, %v10323_v9  ;;  %v10326_v55 = vadd.f32 %v7898_v63, %v1445_v51 }
 0x187   : > { %v10329_v56 = vadd.f32 %v7962_v54, %v10190_v3  ;;  %8596 = vrcp.f32 %v1907_v22  ;;  %v1450_v3 = vadd.f32 %v10263_v40, %v549_v33  ;;  %v1458_v22 = vadd.f32 %v10124_v23, %v551_v35 }
 0x188   : > { %8598 = vpow2.f32 %v7448_v19  ;;  %v7899_v17 = vpop.f32.mrb[60].mxu1  ;;  %v7963_v61 = vpop.f32.mrb[60].mxu0 }
 0x189   : > { %v7449_v57 = vmul.f32 -1.442695, %v10329_v56  ;;  %v7900_v4 = vpop.f32.mrb[61].mxu1  ;;  %v7964_v52 = vpop.f32.mrb[61].mxu0 }
 0x18a   : > { %v8591_v29 = vpop.eup %8590  ;;  %v7901_v12 = vadd.f32 %v7900_v4, %v7899_v17  ;;  %v7965_v8 = vadd.f32 %v7964_v52, %v7963_v61  ;;  %v7902_v21 = vpop.f32.mrb[62].mxu1 }
 0x18b   : > { %8600 = vpow2.f32 %v7449_v57  ;;  %v7966_v38 = vpop.f32.mrb[62].mxu0  ;;  %v1908_v15 = vadd.f32 1.0, %v8591_v29  ;;  %v7903_v18 = vpop.f32.mrb[63].mxu1 }
 0x18c   : > { %v7967_v39 = vpop.f32.mrb[63].mxu0  ;;  %v8593_v58 = vpop.eup %8592  ;;  %v10340_v25 = vadd.f32 %v7901_v12, %v1450_v3  ;;  %v10343_v43 = vadd.f32 %v7965_v8, %v10202_v20  ;;  %v7904_v26 = vadd.f32 %v7903_v18, %v7902_v21  ;;  %v552_v20 = vld [vmem:[%s14208_s2 + $0xc8] sm:$0xff] }
 0x18d   : > { %v7968_v31 = vadd.f32 %v7967_v39, %v7966_v38  ;;  %8602 = vrcp.f32 %v1908_v15  ;;  %v1909_v40 = vadd.f32 1.0, %v8593_v58  ;;  %v1461_v29 = vadd.f32 %v10126_v28, %v552_v20  ;;  %v553_v28 = vld [vmem:[%s14208_s2 + $0xd0] sm:$0xff] }
 0x18e   : > { %v7450_v51 = vmul.f32 -1.442695, %v10343_v43  ;;  %v10349_v46 = vadd.f32 %v7904_v26, %v1453_v14 }
 0x18f   : > { %v10352_v47 = vadd.f32 %v7968_v31, %v10206_v24  ;;  %v8595_v44 = vpop.eup %8594  ;;  %8604 = vrcp.f32 %v1909_v40 }
 0x190   : > { %8606 = vpow2.f32 %v7450_v51  ;;  %v7905_v34 = vpop.f32.mrb[64].mxu1  ;;  %v7969_v63 = vpop.f32.mrb[64].mxu0  ;;  %v10360_v19 = vmul.f32 %v8595_v44, %v10283_v30  ;;  %v1466_v51 = vadd.f32 %v10131_v36, %v553_v28 }
 0x191   : > { %v7451_v16 = vmul.f32 -1.442695, %v10352_v47  ;;  %v8597_v54 = vpop.eup %8596  ;;  %v7906_v33 = vpop.f32.mrb[65].mxu1 }
 0x192   : > { %v7970_v24 = vpop.f32.mrb[65].mxu0  ;;  %v8599_v62 = vpop.eup %8598  ;;  %v10363_v57 = vmul.f32 %v8597_v54, %v10289_v32  ;;  %v7907_v17 = vadd.f32 %v7906_v33, %v7905_v34 }
 0x193   : > { %8608 = vpow2.f32 %v7451_v16  ;;  %v7971_v61 = vadd.f32 %v7970_v24, %v7969_v63  ;;  %v7908_v4 = vpop.f32.mrb[66].mxu1  ;;  %v7972_v52 = vpop.f32.mrb[66].mxu0  ;;  %v1910_v3 = vadd.f32 1.0, %v8599_v62 }
 0x194   : > { %v7909_v12 = vpop.f32.mrb[67].mxu1  ;;  %v7973_v8 = vpop.f32.mrb[67].mxu0  ;;  %v2049_v30 = vpack.c.bf16 %v10363_v57, %v10360_v19  ;;  %v10368_v21 = vadd.f32 %v7907_v17, %v1458_v22 }
 0x195   : > { %v8601_v23 = vpop.eup %8600  ;;  %v10371_v32 = vadd.f32 %v7971_v61, %v10218_v45  ;;  %v7910_v38 = vadd.f32 %v7909_v12, %v7908_v4  ;;  %8610 = vrcp.f32 %v1910_v3  ;;  %v7974_v15 = vadd.f32 %v7973_v8, %v7972_v52  ;;  %v554_v45 = vld [vmem:[%s14208_s2 + $0xd8] sm:$0xff] }
 0x196   : > { %v1911_v14 = vadd.f32 1.0, %v8601_v23  ;;  %8139 = vmatprep.mubr.msk.bf16.mxu1 %vm2081_vm0, %v2049_v30  ;;  %v1469_v62 = vadd.f32 %v10133_v41, %v554_v45  ;;  %v555_v41 = vld [vmem:[%s14208_s2 + $0xe0] sm:$0xff] }
 0x197   : > { %v7452_v18 = vmul.f32 -1.442695, %v10371_v32  ;;  %v10377_v39 = vadd.f32 %v7910_v38, %v1461_v29  ;;  %v8603_v58 = vpop.eup %8602  ;;  %v10381_v26 = vadd.f32 %v7974_v15, %v10222_v50 }
 0x198   : > { %8612 = vrcp.f32 %v1911_v14  ;;  %v7911_v31 = vpop.f32.mrb[68].mxu1  ;;  %v7975_v40 = vpop.f32.mrb[68].mxu0  ;;  %v10389_v63 = vmul.f32 %v8603_v58, %v10303_v6 }
 0x199   : > { %8614 = vpow2.f32 %v7452_v18  ;;  %v8605_v35 = vpop.eup %8604  ;;  %v7453_v44 = vmul.f32 -1.442695, %v10381_v26  ;;  %v7912_v20 = vpop.f32.mrb[69].mxu1  ;;  %v1474_v18 = vadd.f32 %v10135_v48, %v555_v41 }
 0x19a   : > { %v7976_v16 = vpop.f32.mrb[69].mxu0  ;;  %v8607_v34 = vpop.eup %8606  ;;  %v10392_v50 = vmul.f32 %v8605_v35, %v10309_v59  ;;  %v7913_v54 = vadd.f32 %v7912_v20, %v7911_v31 }
 0x19b   : > { %v7977_v22 = vadd.f32 %v7976_v16, %v7975_v40  ;;  %v7914_v33 = vpop.f32.mrb[70].mxu1  ;;  %v7978_v24 = vpop.f32.mrb[70].mxu0  ;;  %v1912_v17 = vadd.f32 1.0, %v8607_v34  ;;  %8616 = vpow2.f32 %v7453_v44 }
 0x19c   : > { %v7915_v36 = vpop.f32.mrb[71].mxu1  ;;  %v7979_v61 = vpop.f32.mrb[71].mxu0  ;;  %v2050_v52 = vpack.c.bf16 %v10392_v50, %v10389_v63  ;;  %v10397_v29 = vadd.f32 %v7913_v54, %v1466_v51 }
 0x19d   : > { %v8609_v4 = vpop.eup %8608  ;;  %v10400_v6 = vadd.f32 %v7977_v22, %v10234_v7  ;;  %v7916_v59 = vadd.f32 %v7915_v36, %v7914_v33  ;;  %8618 = vrcp.f32 %v1912_v17  ;;  %v7980_v12 = vadd.f32 %v7979_v61, %v7978_v24  ;;  %v556_v7 = vld [vmem:[%s14208_s2 + $0xe8] sm:$0xff]  ;;  %v557_v36 = vld [vmem:[%s14208_s2 + $0xf0] sm:$0xff] }
 0x19e   : > { %v1913_v3 = vadd.f32 1.0, %v8609_v4  ;;  %8140 = vmatmul.mubr.msk.bf16.vlgmr.msra.gmra.mrb[80].mxu1 %vm2081_vm0, %v2050_v52  ;;  %v1477_v34 = vadd.f32 %v10139_v53, %v556_v7 }
 0x19f   : > { %v7454_v8 = vmul.f32 -1.442695, %v10400_v6  ;;  %v10406_v23 = vadd.f32 %v7916_v59, %v1469_v62  ;;  %v8611_v30 = vpop.eup %8610  ;;  %v10410_v38 = vadd.f32 %v7980_v12, %v10238_v11 }
 0x1a0   : > { %8620 = vrcp.f32 %v1913_v3  ;;  %v7917_v14 = vpop.f32.mrb[72].mxu1  ;;  %v7981_v15 = vpop.f32.mrb[72].mxu0  ;;  %v10418_v35 = vmul.f32 %v8611_v30, %v10323_v9 }
 0x1a1   : > { %8622 = vpow2.f32 %v7454_v8  ;;  %v7455_v58 = vmul.f32 -1.442695, %v10410_v38  ;;  %v7918_v45 = vpop.f32.mrb[73].mxu1  ;;  %v7982_v31 = vpop.f32.mrb[73].mxu0  ;;  %v1482_v8 = vadd.f32 %v10143_v60, %v557_v36 }
 0x1a2   : > { %v8613_v28 = vpop.eup %8612  ;;  %v7919_v51 = vadd.f32 %v7918_v45, %v7917_v14  ;;  %v7983_v44 = vadd.f32 %v7982_v31, %v7981_v15  ;;  %v7920_v20 = vpop.f32.mrb[74].mxu1 }
 0x1a3   : > { %v8615_v40 = vpop.eup %8614  ;;  %v10421_v11 = vmul.f32 %v8613_v28, %v10329_v56  ;;  %v7984_v16 = vpop.f32.mrb[74].mxu0  ;;  %8624 = vpow2.f32 %v7455_v58 }
 0x1a4   : > { %v1914_v54 = vadd.f32 1.0, %v8615_v40  ;;  %v7921_v48 = vpop.f32.mrb[75].mxu1  ;;  %v7985_v22 = vpop.f32.mrb[75].mxu0  ;;  %v10426_v24 = vadd.f32 %v7919_v51, %v1474_v18  ;;  %v10429_v9 = vadd.f32 %v7983_v44, %v10250_v0  ;;  %v558_v0 = vld [vmem:[%s14208_s2 + $0xf8] sm:$0xff] }
 0x1a5   : > { %v2051_v33 = vpack.c.bf16 %v10421_v11, %v10418_v35  ;;  %v7922_v56 = vadd.f32 %v7921_v48, %v7920_v20  ;;  %v8617_v62 = vpop.eup %8616  ;;  %v7986_v17 = vadd.f32 %v7985_v22, %v7984_v16  ;;  %v1485_v40 = vadd.f32 %v10147_v1, %v558_v0 }
 0x1a6   : > { %8626 = vrcp.f32 %v1914_v54  ;;  %v1915_v53 = vadd.f32 1.0, %v8617_v62  ;;  %v7456_v61 = vmul.f32 -1.442695, %v10429_v9 }
 0x1a7   : > { %v10435_v4 = vadd.f32 %v7922_v56, %v1477_v34  ;;  %8143 = vmatprep.mubr.msk.bf16.mxu1 %vm2081_vm0, %v2051_v33  ;;  %v8619_v52 = vpop.eup %8618  ;;  %v10439_v59 = vadd.f32 %v7986_v17, %v10254_v37 }
 0x1a8   : > { %8628 = vrcp.f32 %v1915_v53  ;;  %v7923_v3 = vpop.f32.mrb[76].mxu1  ;;  %v7987_v12 = vpop.f32.mrb[76].mxu0  ;;  %v10447_v28 = vmul.f32 %v8619_v52, %v10343_v43 }
 0x1a9   : > { %8630 = vpow2.f32 %v7456_v61  ;;  %v7457_v30 = vmul.f32 -1.442695, %v10439_v59  ;;  %v7924_v7 = vpop.f32.mrb[77].mxu1  ;;  %v7988_v14 = vpop.f32.mrb[77].mxu0 }
 0x1aa   : > { %v8621_v41 = vpop.eup %8620  ;;  %v7925_v18 = vadd.f32 %v7924_v7, %v7923_v3  ;;  %v7989_v58 = vadd.f32 %v7988_v14, %v7987_v12  ;;  %v7926_v45 = vpop.f32.mrb[78].mxu1 }
 0x1ab   : > { %v8623_v15 = vpop.eup %8622  ;;  %v10450_v37 = vmul.f32 %v8621_v41, %v10352_v47  ;;  %v7990_v31 = vpop.f32.mrb[78].mxu0  ;;  %8632 = vpow2.f32 %v7457_v30 }
 0x1ac   : > { %v1916_v51 = vadd.f32 1.0, %v8623_v15  ;;  %v7927_v60 = vpop.f32.mrb[79].mxu1  ;;  %v7991_v44 = vpop.f32.mrb[79].mxu0  ;;  %v10455_v16 = vadd.f32 %v7925_v18, %v1482_v8  ;;  %v10458_v43 = vadd.f32 %v7989_v58, %v10266_v2 }
 0x1ad   : > { %v2052_v20 = vpack.c.bf16 %v10450_v37, %v10447_v28  ;;  %v7928_v47 = vadd.f32 %v7927_v60, %v7926_v45  ;;  %v8625_v34 = vpop.eup %8624  ;;  %v7992_v54 = vadd.f32 %v7991_v44, %v7990_v31 }
 0x1ae   : > { %8634 = vrcp.f32 %v1916_v51  ;;  %v1917_v48 = vadd.f32 1.0, %v8625_v34  ;;  %v7458_v22 = vmul.f32 -1.442695, %v10458_v43 }
 0x1af   : > { %v10461_v1 = vadd.f32 %v7928_v47, %v1485_v40  ;;  %8144 = vmatmul.mubr.msk.bf16.gmra.mrb[84].mxu1 %vm2081_vm0, %v2052_v20  ;;  %v10465_v33 = vadd.f32 %v7992_v54, %v10270_v5 }
 0x1b0   : > { %v8627_v56 = vpop.eup %8626  ;;  %8636 = vrcp.f32 %v1917_v48  ;;  %v7993_v62 = vpop.f32.mrb[80].mxu0 }
 0x1b1   : > { %8638 = vpow2.f32 %v7458_v22  ;;  %v7459_v2 = vmul.f32 -1.442695, %v10465_v33  ;;  %v7994_v17 = vpop.f32.mrb[81].mxu0  ;;  %v10469_v0 = vmul.f32 %v8627_v56, %v10371_v32 }
 0x1b2   : > { %v8629_v36 = vpop.eup %8628  ;;  %v7995_v53 = vadd.f32 %v7994_v17, %v7993_v62  ;;  %v7996_v61 = vpop.f32.mrb[82].mxu0 }
 0x1b3   : > { %v8631_v52 = vpop.eup %8630  ;;  %v10472_v3 = vmul.f32 %v8629_v36, %v10381_v26  ;;  %8640 = vpow2.f32 %v7459_v2  ;;  %v7997_v5 = vpop.f32.mrb[83].mxu0 }
 0x1b4   : > { %v1918_v12 = vadd.f32 1.0, %v8631_v52  ;;  %v10475_v41 = vadd.f32 %v7995_v53, %v10280_v27  ;;  %v7998_v8 = vadd.f32 %v7997_v5, %v7996_v61 }
 0x1b5   : > { %v8633_v30 = vpop.eup %8632  ;;  %v2053_v7 = vpack.c.bf16 %v10472_v3, %v10469_v0 }
 0x1b6   : > { %8642 = vrcp.f32 %v1918_v12  ;;  %v1919_v14 = vadd.f32 1.0, %v8633_v30  ;;  %v7460_v15 = vmul.f32 -1.442695, %v10475_v41  ;;  %v10481_v32 = vadd.f32 %v7998_v8, %v10286_v42 }
 0x1b7   : > { %8147 = vmatprep.mubr.msk.bf16.mxu1 %vm2081_vm0, %v2053_v7 }
 0x1b8   : > { %v8635_v26 = vpop.eup %8634  ;;  %8644 = vrcp.f32 %v1919_v14  ;;  %v7461_v18 = vmul.f32 -1.442695, %v10481_v32  ;;  %v7999_v27 = vpop.f32.mrb[84].mxu0 }
 0x1b9   : > { %8646 = vpow2.f32 %v7460_v15  ;;  %v8000_v58 = vpop.f32.mrb[85].mxu0  ;;  %v10486_v60 = vmul.f32 %v8635_v26, %v10400_v6 }
 0x1ba   : > { %v8637_v45 = vpop.eup %8636  ;;  %8648 = vpow2.f32 %v7461_v18  ;;  %v8001_v31 = vadd.f32 %v8000_v58, %v7999_v27  ;;  %v8002_v40 = vpop.f32.mrb[86].mxu0 }
 0x1bb   : > { %v8639_v51 = vpop.eup %8638  ;;  %v10489_v42 = vmul.f32 %v8637_v45, %v10410_v38  ;;  %v8003_v44 = vpop.f32.mrb[87].mxu0 }
 0x1bc   : > { %v1920_v20 = vadd.f32 1.0, %v8639_v51  ;;  %v10492_v47 = vadd.f32 %v8001_v31, %v10300_v10  ;;  %v8004_v34 = vadd.f32 %v8003_v44, %v8002_v40 }
 0x1bd   : > { %14268 = vst [vmem:[#allocation5_spill] sm:$0xff] %v10489_v42  ;;  %v8641_v54 = vpop.eup %8640  ;;  %v2054_v48 = vpack.c.bf16 %v10489_v42, %v10486_v60 }
 0x1be   : > { %8650 = vrcp.f32 %v1920_v20  ;;  %v1921_v22 = vadd.f32 1.0, %v8641_v54  ;;  %v7462_v56 = vmul.f32 -1.442695, %v10492_v47  ;;  %v10498_v6 = vadd.f32 %v8004_v34, %v10306_v13 }
 0x1bf   : > { %8148 = vmatmul.mubr.msk.bf16.gmra.mrb[88].mxu1 %vm2081_vm0, %v2054_v48 }
 0x1c0   : > { %v8643_v38 = vpop.eup %8642  ;;  %8652 = vrcp.f32 %v1921_v22  ;;  %v7463_v62 = vmul.f32 -1.442695, %v10498_v6  ;;  %v8005_v10 = vpop.f32.mrb[88].mxu0 }
 0x1c1   : > { %8654 = vpow2.f32 %v7462_v56  ;;  %v8006_v2 = vpop.f32.mrb[89].mxu0  ;;  %v10503_v52 = vmul.f32 %v8643_v38, %v10429_v9 }
 0x1c2   : > { %v8645_v17 = vpop.eup %8644  ;;  %8656 = vpow2.f32 %v7463_v62  ;;  %v8007_v36 = vadd.f32 %v8006_v2, %v8005_v10  ;;  %v8008_v53 = vpop.f32.mrb[90].mxu0 }
 0x1c3   : > { %v8647_v61 = vpop.eup %8646  ;;  %14269 = vst [vmem:[#allocation6_spill] sm:$0xff] %v10503_v52  ;;  %v10506_v13 = vmul.f32 %v8645_v17, %v10439_v59  ;;  %v8009_v5 = vpop.f32.mrb[91].mxu0 }
 0x1c4   : > { %v8649_v12 = vpop.eup %8648  ;;  %v1922_v8 = vadd.f32 1.0, %v8647_v61  ;;  %v10509_v30 = vadd.f32 %v8007_v36, %v10320_v49  ;;  %v8010_v7 = vadd.f32 %v8009_v5, %v8008_v53 }
 0x1c5   : > { %14270 = vst [vmem:[#allocation7_spill] sm:$0xff] %v10506_v13  ;;  %v2055_v14 = vpack.c.bf16 %v10506_v13, %v10503_v52  ;;  %v1923_v15 = vadd.f32 1.0, %v8649_v12 }
 0x1c6   : > { %8658 = vrcp.f32 %v1922_v8  ;;  %v7464_v26 = vmul.f32 -1.442695, %v10509_v30  ;;  %v10515_v9 = vadd.f32 %v8010_v7, %v10326_v55 }
 0x1c7   : > { %8660 = vrcp.f32 %v1923_v15  ;;  %8151 = vmatprep.mubr.msk.bf16.mxu1 %vm2081_vm0, %v2055_v14 }
 0x1c8   : > { %v8651_v59 = vpop.eup %8650  ;;  %8662 = vpow2.f32 %v7464_v26  ;;  %v7465_v18 = vmul.f32 -1.442695, %v10515_v9  ;;  %v8011_v49 = vpop.f32.mrb[92].mxu0 }
 0x1c9   : > { %v8012_v27 = vpop.f32.mrb[93].mxu0  ;;  %v10520_v51 = vmul.f32 %v8651_v59, %v10458_v43 }
 0x1ca   : > { %v8653_v58 = vpop.eup %8652  ;;  %8664 = vpow2.f32 %v7465_v18  ;;  %v8013_v45 = vadd.f32 %v8012_v27, %v8011_v49  ;;  %v8014_v31 = vpop.f32.mrb[94].mxu0 }
 0x1cb   : > { %v8655_v40 = vpop.eup %8654  ;;  %14271 = vst [vmem:[#allocation8_spill] sm:$0xff] %v10520_v51  ;;  %v10523_v55 = vmul.f32 %v8653_v58, %v10465_v33  ;;  %v8015_v44 = vpop.f32.mrb[95].mxu0 }
 0x1cc   : > { %v8657_v20 = vpop.eup %8656  ;;  %v1924_v34 = vadd.f32 1.0, %v8655_v40  ;;  %v10526_v54 = vadd.f32 %v8013_v45, %v10340_v25  ;;  %v8016_v48 = vadd.f32 %v8015_v44, %v8014_v31 }
 0x1cd   : > { %14272 = vst [vmem:[#allocation9_spill] sm:$0xff] %v10523_v55  ;;  %v2056_v22 = vpack.c.bf16 %v10523_v55, %v10520_v51  ;;  %v1925_v56 = vadd.f32 1.0, %v8657_v20 }
 0x1ce   : > { %8666 = vrcp.f32 %v1924_v34  ;;  %v7466_v38 = vmul.f32 -1.442695, %v10526_v54  ;;  %v10532_v43 = vadd.f32 %v8016_v48, %v10349_v46 }
 0x1cf   : > { %8668 = vrcp.f32 %v1925_v56  ;;  %8152 = vmatmul.mubr.msk.bf16.gmra.mrb[92].mxu1 %vm2081_vm0, %v2056_v22 }
 0x1d0   : > { %v8659_v33 = vpop.eup %8658  ;;  %8670 = vpow2.f32 %v7466_v38  ;;  %v7467_v62 = vmul.f32 -1.442695, %v10532_v43  ;;  %v8017_v25 = vpop.f32.mrb[96].mxu0 }
 0x1d1   : > { %v8661_v10 = vpop.eup %8660  ;;  %v8018_v2 = vpop.f32.mrb[97].mxu0  ;;  %v10537_v36 = vmul.f32 %v8659_v33, %v10475_v41 }
 0x1d2   : > { %v8663_v17 = vpop.eup %8662  ;;  %v10540_v53 = vmul.f32 %v8661_v10, %v10481_v32  ;;  %8672 = vpow2.f32 %v7467_v62  ;;  %v8019_v46 = vadd.f32 %v8018_v2, %v8017_v25  ;;  %v8020_v61 = vpop.f32.mrb[98].mxu0 }
 0x1d3   : > { %14273 = vst [vmem:[#allocation10_spill] sm:$0xff] %v10537_v36  ;;  %v1926_v5 = vadd.f32 1.0, %v8663_v17  ;;  %v8021_v12 = vpop.f32.mrb[99].mxu0 }
 0x1d4   : > { %14274 = vst [vmem:[#allocation11_spill] sm:$0xff] %v10540_v53  ;;  %v8665_v8 = vpop.eup %8664  ;;  %v2057_v7 = vpack.c.bf16 %v10540_v53, %v10537_v36  ;;  %v10545_v14 = vadd.f32 %v8019_v46, %v10368_v21  ;;  %v8022_v15 = vadd.f32 %v8021_v12, %v8020_v61 }
 0x1d5   : > { %8674 = vrcp.f32 %v1926_v5  ;;  %v1927_v26 = vadd.f32 1.0, %v8665_v8 }
 0x1d6   : > { %v7468_v41 = vmul.f32 -1.442695, %v10545_v14  ;;  %v10549_v32 = vadd.f32 %v8022_v15, %v10377_v39  ;;  %8155 = vmatprep.mubr.msk.bf16.mxu1 %vm2081_vm0, %v2057_v7 }
 0x1d7   : > { %8676 = vrcp.f32 %v1927_v26 }
 0x1d8   : > { %v8667_v59 = vpop.eup %8666  ;;  %8678 = vpow2.f32 %v7468_v41  ;;  %v7469_v18 = vmul.f32 -1.442695, %v10549_v32  ;;  %v8023_v49 = vpop.f32.mrb[100].mxu0 }
 0x1d9   : > { %v8669_v27 = vpop.eup %8668  ;;  %v8024_v58 = vpop.f32.mrb[101].mxu0  ;;  %v10554_v45 = vmul.f32 %v8667_v59, %v10492_v47 }
 0x1da   : > { %v8671_v21 = vpop.eup %8670  ;;  %v10557_v31 = vmul.f32 %v8669_v27, %v10498_v6  ;;  %8680 = vpow2.f32 %v7469_v18  ;;  %v8025_v39 = vadd.f32 %v8024_v58, %v8023_v49  ;;  %v8026_v40 = vpop.f32.mrb[102].mxu0 }
 0x1db   : > { %14275 = vst [vmem:[#allocation12_spill] sm:$0xff] %v10554_v45  ;;  %v1928_v44 = vadd.f32 1.0, %v8671_v21  ;;  %v8027_v20 = vpop.f32.mrb[103].mxu0 }
 0x1dc   : > { %14276 = vst [vmem:[#allocation13_spill] sm:$0xff] %v10557_v31  ;;  %v8673_v34 = vpop.eup %8672  ;;  %v2058_v48 = vpack.c.bf16 %v10557_v31, %v10554_v45  ;;  %v10562_v22 = vadd.f32 %v8025_v39, %v10397_v29  ;;  %v8028_v56 = vadd.f32 %v8027_v20, %v8026_v40 }
 0x1dd   : > { %8682 = vrcp.f32 %v1928_v44  ;;  %v1929_v38 = vadd.f32 1.0, %v8673_v34 }
 0x1de   : > { %v7470_v47 = vmul.f32 -1.442695, %v10562_v22  ;;  %v10566_v6 = vadd.f32 %v8028_v56, %v10406_v23  ;;  %8156 = vmatmul.mubr.msk.bf16.gmra.mrb[96].mxu1 %vm2081_vm0, %v2058_v48 }
 0x1df   : > { %v8675_v33 = vpop.eup %8674  ;;  %8684 = vrcp.f32 %v1929_v38 }
 0x1e0   : > { %8686 = vpow2.f32 %v7470_v47  ;;  %v7471_v62 = vmul.f32 -1.442695, %v10566_v6  ;;  %v8029_v25 = vpop.f32.mrb[104].mxu0  ;;  %v10571_v17 = vmul.f32 %v8675_v33, %v10509_v30 }
 0x1e1   : > { %v8677_v10 = vpop.eup %8676  ;;  %v8030_v2 = vpop.f32.mrb[105].mxu0 }
 0x1e2   : > { %v8679_v29 = vpop.eup %8678  ;;  %14277 = vst [vmem:[#allocation14_spill] sm:$0xff] %v10571_v17  ;;  %v10574_v46 = vmul.f32 %v8677_v10, %v10515_v9  ;;  %8688 = vpow2.f32 %v7471_v62  ;;  %v8031_v23 = vadd.f32 %v8030_v2, %v8029_v25  ;;  %v8032_v61 = vpop.f32.mrb[106].mxu0 }
 0x1e3   : > { %v1930_v5 = vadd.f32 1.0, %v8679_v29  ;;  %v8033_v12 = vpop.f32.mrb[107].mxu0 }
 0x1e4   : > { %14278 = vst [vmem:[#allocation15_spill] sm:$0xff] %v10574_v46  ;;  %v8681_v8 = vpop.eup %8680  ;;  %v2059_v7 = vpack.c.bf16 %v10574_v46, %v10571_v17  ;;  %v1796_v15 = vadd.f32 %v8031_v23, %v10426_v24  ;;  %v8034_v26 = vadd.f32 %v8033_v12, %v8032_v61 }
 0x1e5   : > { %8690 = vrcp.f32 %v1930_v5  ;;  %v1931_v41 = vadd.f32 1.0, %v8681_v8 }
 0x1e6   : > { %v7472_v59 = vmul.f32 -1.442695, %v1796_v15  ;;  %v1799_v30 = vadd.f32 %v8034_v26, %v10435_v4  ;;  %8159 = vmatprep.mubr.msk.bf16.mxu1 %vm2081_vm0, %v2059_v7 }
 0x1e7   : > { %v8683_v9 = vpop.eup %8682  ;;  %8692 = vrcp.f32 %v1931_v41 }
 0x1e8   : > { %8694 = vpow2.f32 %v7472_v59  ;;  %v7473_v18 = vmul.f32 -1.442695, %v1799_v30  ;;  %v8035_v49 = vpop.f32.mrb[108].mxu0  ;;  %v10582_v39 = vmul.f32 %v8683_v9, %v10526_v54 }
 0x1e9   : > { %v8685_v27 = vpop.eup %8684  ;;  %v8036_v58 = vpop.f32.mrb[109].mxu0 }
 0x1ea   : > { %v8687_v21 = vpop.eup %8686  ;;  %14279 = vst [vmem:[#allocation16_spill] sm:$0xff] %v10582_v39  ;;  %v10585_v24 = vmul.f32 %v8685_v27, %v10532_v43  ;;  %8696 = vpow2.f32 %v7473_v18  ;;  %v8037_v40 = vadd.f32 %v8036_v58, %v8035_v49  ;;  %v8038_v44 = vpop.f32.mrb[110].mxu0 }
 0x1eb   : > { %v1932_v4 = vadd.f32 1.0, %v8687_v21  ;;  %v8039_v20 = vpop.f32.mrb[111].mxu0 }
 0x1ec   : > { %14280 = vst [vmem:[#allocation17_spill] sm:$0xff] %v10585_v24  ;;  %v8689_v34 = vpop.eup %8688  ;;  %v2060_v48 = vpack.c.bf16 %v10585_v24, %v10582_v39  ;;  %v1804_v56 = vadd.f32 %v8037_v40, %v10455_v16  ;;  %v8040_v38 = vadd.f32 %v8039_v20, %v8038_v44  ;;  %v10630_v20 = vld [vmem:[%s14214_s8] sm:$0xff] }
 0x1ed   : > { %8698 = vrcp.f32 %v1932_v4  ;;  %v1933_v47 = vadd.f32 1.0, %v8689_v34 }
 0x1ee   : > { %v7474_v33 = vmul.f32 -1.442695, %v1804_v56  ;;  %v1807_v54 = vadd.f32 %v8040_v38, %v10461_v1  ;;  %8160 = vmatmul.mubr.msk.bf16.gmra.mrb[100].mxu1 %vm2081_vm0, %v2060_v48 }
 0x1ef   : > { %v8691_v43 = vpop.eup %8690  ;;  %8700 = vrcp.f32 %v1933_v47 }
 0x1f0   : > { %8702 = vpow2.f32 %v7474_v33  ;;  %v7475_v62 = vmul.f32 -1.442695, %v1807_v54  ;;  %v10593_v2 = vmul.f32 %v8691_v43, %v10545_v14 }
 0x1f1   : > { %v8693_v25 = vpop.eup %8692 }
 0x1f2   : > { %v8695_v10 = vpop.eup %8694  ;;  %14281 = vst [vmem:[#allocation18_spill] sm:$0xff] %v10593_v2  ;;  %v10596_v29 = vmul.f32 %v8693_v25, %v10549_v32  ;;  %8704 = vpow2.f32 %v7475_v62 }
 0x1f3   : > { %v1934_v16 = vadd.f32 1.0, %v8695_v10 }
 0x1f4   : > { %14282 = vst [vmem:[#allocation19_spill] sm:$0xff] %v10596_v29  ;;  %v8697_v23 = vpop.eup %8696  ;;  %v2061_v1 = vpack.c.bf16 %v10596_v29, %v10593_v2 }
 0x1f5   : > { %8706 = vrcp.f32 %v1934_v16  ;;  %v1935_v61 = vadd.f32 1.0, %v8697_v23 }
 0x1f6   : > { %8163 = vmatprep.mubr.msk.bf16.mxu1 %vm2081_vm0, %v2061_v1 }
 0x1f7   : > { %v8699_v5 = vpop.eup %8698  ;;  %8708 = vrcp.f32 %v1935_v61 }
 0x1f8   : > { %v10602_v14 = vmul.f32 %v8699_v5, %v10562_v22 }
 0x1f9   : > { %v8701_v12 = vpop.eup %8700 }
 0x1fa   : > { %v8703_v8 = vpop.eup %8702  ;;  %14283 = vst [vmem:[#allocation20_spill] sm:$0xff] %v10602_v14  ;;  %v10605_v32 = vmul.f32 %v8701_v12, %v10566_v6 }
 0x1fb   : > { %v1936_v7 = vadd.f32 1.0, %v8703_v8 }
 0x1fc   : > { %14284 = vst [vmem:[#allocation21_spill] sm:$0xff] %v10605_v32  ;;  %v8705_v26 = vpop.eup %8704  ;;  %v2062_v41 = vpack.c.bf16 %v10605_v32, %v10602_v14 }
 0x1fd   : > { %8710 = vrcp.f32 %v1936_v7  ;;  %v1937_v59 = vadd.f32 1.0, %v8705_v26 }
 0x1fe   : > { %8164 = vmatmul.mubr.msk.bf16.gmra.mrb[104].mxu1 %vm2081_vm0, %v2062_v41 }
 0x1ff   : > { %v8707_v9 = vpop.eup %8706  ;;  %8712 = vrcp.f32 %v1937_v59 }
 0x200   : > { %v10610_v49 = vmul.f32 %v8707_v9, %v1796_v15  ;;  %v2065_v15 = vlaneseq }
 0x201   : > { %v8709_v18 = vpop.eup %8708 }
 0x202   : > { %14285 = vst [vmem:[#allocation22_spill] sm:$0xff] %v10610_v49  ;;  %v10612_v27 = vmul.f32 %v8709_v18, %v1799_v30  ;;  %v10624_v4 = vshrl.u32 %v2065_v15, 7 }
 0x204   : > { %14286 = vst [vmem:[#allocation23_spill] sm:$0xff] %v10612_v27  ;;  %v2063_v22 = vpack.c.bf16 %v10612_v27, %v10610_v49  ;;  %v14216_v30 = vsub.s32 0, %v10624_v4  ;;  %v14234_v55 = vsub.s32 1, %v10624_v4 }
 0x206   : > { %8167 = vmatprep.mubr.msk.bf16.mxu1 %vm2081_vm0, %v2063_v22  ;;  %v10635_v34 = vrot.slane %v10630_v20, %v14216_v30 }
 0x207   : > { %v8711_v6 = vpop.eup %8710 }
 0x208   : > { %v10617_v21 = vmul.f32 %v8711_v6, %v1804_v56 }
 0x209   : > { %v8713_v58 = vpop.eup %8712 }
 0x20a   : > { %14287 = vst [vmem:[#allocation24_spill] sm:$0xff] %v10617_v21  ;;  %v10619_v40 = vmul.f32 %v8713_v58, %v1807_v54 }
 0x20c   : > { %14288 = vst [vmem:[#allocation25_spill] sm:$0xff] %v10619_v40  ;;  %v2064_v44 = vpack.c.bf16 %v10619_v40, %v10617_v21 }
 0x20e   : > { %8168 = vmatmul.mubr.msk.bf16.gmra.mrb[108].mxu1 %vm2081_vm0, %v2064_v44 }
 0x271   : > { %v8141_v48 = vpop.f32.mrb[80].mxu1 }
 0x272   : > { %v10638_v56 = vadd.f32 %v8141_v48, %v10635_v34  ;;  %v2164_v38 = vpop.f32.mrb[81].mxu1 }
 0x273   : > { %v10641_v47 = vadd.f32 %v2164_v38, %v10635_v34  ;;  %v8142_v33 = vpop.f32.mrb[82].mxu1 }
 0x274   : > { %v10644_v54 = vadd.f32 %v8142_v33, %v10635_v34  ;;  %v2167_v43 = vpop.f32.mrb[83].mxu1  ;;  %v2298_v62 = vsel %vm2291_vm1, %v10638_v56, 0.0 }
 0x275   : > { %v10649_v25 = vadd.f32 %v2167_v43, %v10635_v34  ;;  %2299 = vadd.xlane.f32.xlu1 %v2298_v62  ;;  %v2292_v10 = vsel %vm2291_vm1, %v10641_v47, 0.0 }
 0x276   : > { %2293 = vadd.xlane.f32.xlu0 %v2292_v10  ;;  %v2301_v16 = vsel %vm2291_vm1, %v10644_v54, 0.0 }
 0x277   : > { %v2295_v23 = vsel %vm2291_vm1, %v10649_v25, 0.0 }
 0x279   : > { %2302 = vadd.xlane.f32.xlu1 %v2301_v16 }
 0x27a   : > { %2296 = vadd.xlane.f32.xlu0 %v2295_v23 }
 0x282   : > { %v8145_v1 = vpop.f32.mrb[84].mxu1 }
 0x283   : > { %v2180_v61 = vpop.f32.mrb[85].mxu1  ;;  %v10661_v7 = vadd.f32 %v8145_v1, %v10635_v34 }
 0x284   : > { %v10658_v5 = vadd.f32 %v2180_v61, %v10635_v34  ;;  %v8146_v12 = vpop.f32.mrb[86].mxu1 }
 0x285   : > { %v2183_v8 = vpop.f32.mrb[87].mxu1  ;;  %v10669_v59 = vadd.f32 %v8146_v12, %v10635_v34  ;;  %v2310_v18 = vsel %vm2291_vm1, %v10661_v7, 0.0 }
 0x286   : > { %v10664_v26 = vadd.f32 %v2183_v8, %v10635_v34  ;;  %v2304_v41 = vsel %vm2291_vm1, %v10658_v5, 0.0 }
 0x287   : > { %2305 = vadd.xlane.f32.xlu0 %v2304_v41  ;;  %v2313_v22 = vsel %vm2291_vm1, %v10669_v59, 0.0 }
 0x288   : > { %v2307_v9 = vsel %vm2291_vm1, %v10664_v26, 0.0 }
 0x289   : > { %2308 = vadd.xlane.f32.xlu1 %v2307_v9 }
 0x28b   : > { %2311 = vadd.xlane.f32.xlu0 %v2310_v18 }
 0x28d   : > { %2314 = vadd.xlane.f32.xlu1 %v2313_v22 }
 0x292   : > { %v8149_v6 = vpop.f32.mrb[88].mxu1 }
 0x293   : > { %v2196_v58 = vpop.f32.mrb[89].mxu1  ;;  %v10681_v38 = vadd.f32 %v8149_v6, %v10635_v34 }
 0x294   : > { %v10678_v44 = vadd.f32 %v2196_v58, %v10635_v34  ;;  %v8150_v15 = vpop.f32.mrb[90].mxu1 }
 0x295   : > { %v2199_v48 = vpop.f32.mrb[91].mxu1  ;;  %v10689_v62 = vadd.f32 %v8150_v15, %v10635_v34  ;;  %v2322_v16 = vsel %vm2291_vm1, %v10681_v38, 0.0 }
 0x296   : > { %v10684_v33 = vadd.f32 %v2199_v48, %v10635_v34  ;;  %v2316_v43 = vsel %vm2291_vm1, %v10678_v44, 0.0 }
 0x297   : > { %2317 = vadd.xlane.f32.xlu0 %v2316_v43  ;;  %v2325_v23 = vsel %vm2291_vm1, %v10689_v62, 0.0 }
 0x298   : > { %v2319_v10 = vsel %vm2291_vm1, %v10684_v33, 0.0 }
 0x299   : > { %2320 = vadd.xlane.f32.xlu1 %v2319_v10 }
 0x29b   : > { %2323 = vadd.xlane.f32.xlu0 %v2322_v16 }
 0x29d   : > { %2326 = vadd.xlane.f32.xlu1 %v2325_v23 }
 0x2a2   : > { %v8153_v1 = vpop.f32.mrb[92].mxu1 }
 0x2a3   : > { %v2212_v61 = vpop.f32.mrb[93].mxu1  ;;  %v10701_v9 = vadd.f32 %v8153_v1, %v10635_v34 }
 0x2a4   : > { %v10698_v12 = vadd.f32 %v2212_v61, %v10635_v34  ;;  %v8154_v8 = vpop.f32.mrb[94].mxu1 }
 0x2a5   : > { %v2215_v41 = vpop.f32.mrb[95].mxu1  ;;  %v10709_v6 = vadd.f32 %v8154_v8, %v10635_v34  ;;  %v2334_v15 = vsel %vm2291_vm1, %v10701_v9, 0.0 }
 0x2a6   : > { %v10704_v18 = vadd.f32 %v2215_v41, %v10635_v34  ;;  %v2328_v22 = vsel %vm2291_vm1, %v10698_v12, 0.0 }
 0x2a7   : > { %2329 = vadd.xlane.f32.xlu0 %v2328_v22  ;;  %v2337_v48 = vsel %vm2291_vm1, %v10709_v6, 0.0 }
 0x2a8   : > { %v2331_v58 = vsel %vm2291_vm1, %v10704_v18, 0.0 }
 0x2a9   : > { %2332 = vadd.xlane.f32.xlu1 %v2331_v58 }
 0x2ab   : > { %2335 = vadd.xlane.f32.xlu0 %v2334_v15 }
 0x2ad   : > { %2338 = vadd.xlane.f32.xlu1 %v2337_v48 }
 0x2b1   : > { %v8157_v43 = vpop.f32.mrb[96].mxu1 }
 0x2b2   : > { %v2228_v10 = vpop.f32.mrb[97].mxu1  ;;  %v10721_v61 = vadd.f32 %v8157_v43, %v10635_v34 }
 0x2b3   : > { %v10718_v16 = vadd.f32 %v2228_v10, %v10635_v34  ;;  %v8158_v23 = vpop.f32.mrb[98].mxu1 }
 0x2b4   : > { %v2231_v1 = vpop.f32.mrb[99].mxu1  ;;  %v10729_v22 = vadd.f32 %v8158_v23, %v10635_v34  ;;  %v2346_v15 = vsel %vm2291_vm1, %v10721_v61, 0.0 }
 0x2b5   : > { %v10724_v8 = vadd.f32 %v2231_v1, %v10635_v34  ;;  %v2340_v41 = vsel %vm2291_vm1, %v10718_v16, 0.0 }
 0x2b6   : > { %2341 = vadd.xlane.f32.xlu0 %v2340_v41  ;;  %v2349_v48 = vsel %vm2291_vm1, %v10729_v22, 0.0 }
 0x2b7   : > { %v2343_v58 = vsel %vm2291_vm1, %v10724_v8, 0.0 }
 0x2b8   : > { %2344 = vadd.xlane.f32.xlu1 %v2343_v58 }
 0x2ba   : > { %2347 = vadd.xlane.f32.xlu0 %v2346_v15 }
 0x2bc   : > { %2350 = vadd.xlane.f32.xlu1 %v2349_v48 }
 0x2c1   : > { %v8161_v43 = vpop.f32.mrb[100].mxu1 }
 0x2c2   : > { %v2244_v10 = vpop.f32.mrb[101].mxu1  ;;  %v10741_v30 = vadd.f32 %v8161_v43, %v10635_v34 }
 0x2c3   : > { %v10738_v1 = vadd.f32 %v2244_v10, %v10635_v34  ;;  %v8162_v41 = vpop.f32.mrb[102].mxu1 }
 0x2c4   : > { %v2247_v23 = vpop.f32.mrb[103].mxu1  ;;  %v10749_v40 = vadd.f32 %v8162_v41, %v10635_v34  ;;  %v2358_v10 = vsel %vm2291_vm1, %v10741_v30, 0.0 }
 0x2c5   : > { %v10744_v58 = vadd.f32 %v2247_v23, %v10635_v34  ;;  %v2352_v15 = vsel %vm2291_vm1, %v10738_v1, 0.0 }
 0x2c6   : > { %2353 = vadd.xlane.f32.xlu0 %v2352_v15  ;;  %v2361_v43 = vsel %vm2291_vm1, %v10749_v40, 0.0 }
 0x2c7   : > { %v2355_v48 = vsel %vm2291_vm1, %v10744_v58, 0.0 }
 0x2c8   : > { %2356 = vadd.xlane.f32.xlu1 %v2355_v48 }
 0x2ca   : > { %2359 = vadd.xlane.f32.xlu0 %v2358_v10 }
 0x2cc   : > { %2362 = vadd.xlane.f32.xlu1 %v2361_v43 }
 0x2d1   : > { %v8165_v23 = vpop.f32.mrb[104].mxu1 }
 0x2d2   : > { %v2260_v21 = vpop.f32.mrb[105].mxu1  ;;  %v10761_v49 = vadd.f32 %v8165_v23, %v10635_v34 }
 0x2d3   : > { %v10758_v27 = vadd.f32 %v2260_v21, %v10635_v34  ;;  %v8166_v15 = vpop.f32.mrb[106].mxu1 }
 0x2d4   : > { %v2263_v41 = vpop.f32.mrb[107].mxu1  ;;  %v10769_v32 = vadd.f32 %v8166_v15, %v10635_v34  ;;  %v2370_v21 = vsel %vm2291_vm1, %v10761_v49, 0.0 }
 0x2d5   : > { %v10764_v48 = vadd.f32 %v2263_v41, %v10635_v34  ;;  %v2364_v10 = vsel %vm2291_vm1, %v10758_v27, 0.0 }
 0x2d6   : > { %2365 = vadd.xlane.f32.xlu0 %v2364_v10  ;;  %v2373_v23 = vsel %vm2291_vm1, %v10769_v32, 0.0 }
 0x2d7   : > { %v2367_v43 = vsel %vm2291_vm1, %v10764_v48, 0.0 }
 0x2d8   : > { %2368 = vadd.xlane.f32.xlu1 %v2367_v43 }
 0x2da   : > { %2371 = vadd.xlane.f32.xlu0 %v2370_v21 }
 0x2dc   : > { %2374 = vadd.xlane.f32.xlu1 %v2373_v23 }
 0x2e1   : > { %v8169_v41 = vpop.f32.mrb[108].mxu1 }
 0x2e2   : > { %v2276_v14 = vpop.f32.mrb[109].mxu1  ;;  %v10781_v2 = vadd.f32 %v8169_v41, %v10635_v34 }
 0x2e3   : > { %v10778_v29 = vadd.f32 %v2276_v14, %v10635_v34  ;;  %v8170_v10 = vpop.f32.mrb[110].mxu1 }
 0x2e4   : > { %v2279_v15 = vpop.f32.mrb[111].mxu1  ;;  %v10789_v24 = vadd.f32 %v8170_v10, %v10635_v34  ;;  %v2382_v14 = vsel %vm2291_vm1, %v10781_v2, 0.0 }
 0x2e5   : > { %v10784_v43 = vadd.f32 %v2279_v15, %v10635_v34  ;;  %v2376_v21 = vsel %vm2291_vm1, %v10778_v29, 0.0 }
 0x2e6   : > { %2377 = vadd.xlane.f32.xlu0 %v2376_v21  ;;  %v2385_v41 = vsel %vm2291_vm1, %v10789_v24, 0.0 }
 0x2e7   : > { %v2379_v23 = vsel %vm2291_vm1, %v10784_v43, 0.0 }
 0x2e8   : > { %2380 = vadd.xlane.f32.xlu1 %v2379_v23 }
 0x2ea   : > { %2383 = vadd.xlane.f32.xlu0 %v2382_v14 }
 0x2ec   : > { %2386 = vadd.xlane.f32.xlu1 %v2385_v41 }
 0x302   : > { %v2300_v15 = vpop.xlane.xlu1 %2299 }
 0x303   : > { %v2391_v39 = vmul.f32 0.015625, %v2300_v15  ;;  %v2294_v46 = vpop.xlane.xlu0 %2293 }
 0x304   : > { %v2389_v17 = vmul.f32 0.015625, %v2294_v46 }
 0x305   : > { %v10798_v21 = vsub.f32 %v10638_v56, %v2391_v39 }
 0x306   : > { %v10801_v34 = vsub.f32 %v10641_v47, %v2389_v17  ;;  %v2303_v10 = vpop.xlane.xlu1 %2302 }
 0x307   : > { %v2392_v23 = vmul.f32 0.015625, %v2303_v10  ;;  %v2297_v31 = vpop.xlane.xlu0 %2296  ;;  %v2455_v39 = vmul.f32 %v10798_v21, %v10798_v21 }
 0x308   : > { %v2390_v45 = vmul.f32 0.015625, %v2297_v31  ;;  %v2453_v14 = vmul.f32 %v10801_v34, %v10801_v34 }
 0x309   : > { %v10806_v53 = vsub.f32 %v10644_v54, %v2392_v23  ;;  %v2491_v31 = vsel %vm2291_vm1, %v2455_v39, 0.0 }
 0x30a   : > { %v10809_v41 = vsub.f32 %v10649_v25, %v2390_v45  ;;  %v2485_v46 = vsel %vm2291_vm1, %v2453_v14, 0.0 }
 0x30b   : > { %2486 = vadd.xlane.f32.xlu0 %v2485_v46  ;;  %v2456_v47 = vmul.f32 %v10806_v53, %v10806_v53 }
 0x30c   : > { %v2454_v17 = vmul.f32 %v10809_v41, %v10809_v41 }
 0x30d   : > { %v2494_v45 = vsel %vm2291_vm1, %v2456_v47, 0.0 }
 0x30e   : > { %v2488_v56 = vsel %vm2291_vm1, %v2454_v17, 0.0 }
 0x30f   : > { %2492 = vadd.xlane.f32.xlu0 %v2491_v31  ;;  %2489 = vadd.xlane.f32.xlu1 %v2488_v56 }
 0x313   : > { %2495 = vadd.xlane.f32.xlu1 %v2494_v45 }
 0x314   : > { %v2306_v54 = vpop.xlane.xlu0 %2305 }
 0x315   : > { %v2393_v25 = vmul.f32 0.015625, %v2306_v54 }
 0x316   : > { %v2309_v15 = vpop.xlane.xlu1 %2308 }
 0x317   : > { %v10822_v10 = vsub.f32 %v10658_v5, %v2393_v25  ;;  %v2394_v23 = vmul.f32 0.015625, %v2309_v15 }
 0x318   : > { %v2312_v14 = vpop.xlane.xlu0 %2311 }
 0x319   : > { %v10825_v46 = vsub.f32 %v10664_v26, %v2394_v23  ;;  %v2395_v39 = vmul.f32 0.015625, %v2312_v14  ;;  %v2457_v17 = vmul.f32 %v10822_v10, %v10822_v10 }
 0x31a   : > { %v2315_v31 = vpop.xlane.xlu1 %2314 }
 0x31b   : > { %v10830_v56 = vsub.f32 %v10661_v7, %v2395_v39  ;;  %v2396_v47 = vmul.f32 0.015625, %v2315_v31  ;;  %v2497_v45 = vsel %vm2291_vm1, %v2457_v17, 0.0  ;;  %v2458_v5 = vmul.f32 %v10825_v46, %v10825_v46 }
 0x31c   : > { %2498 = vadd.xlane.f32.xlu0 %v2497_v45 }
 0x31d   : > { %v10836_v54 = vsub.f32 %v10669_v59, %v2396_v47  ;;  %v2500_v26 = vsel %vm2291_vm1, %v2458_v5, 0.0  ;;  %v2459_v25 = vmul.f32 %v10830_v56, %v10830_v56 }
 0x31e   : > { %2501 = vadd.xlane.f32.xlu1 %v2500_v26 }
 0x31f   : > { %v2503_v15 = vsel %vm2291_vm1, %v2459_v25, 0.0  ;;  %v2460_v7 = vmul.f32 %v10836_v54, %v10836_v54 }
 0x320   : > { %2504 = vadd.xlane.f32.xlu0 %v2503_v15 }
 0x321   : > { %v2506_v23 = vsel %vm2291_vm1, %v2460_v7, 0.0 }
 0x322   : > { %2507 = vadd.xlane.f32.xlu1 %v2506_v23 }
 0x324   : > { %v2318_v14 = vpop.xlane.xlu0 %2317 }
 0x325   : > { %v2397_v39 = vmul.f32 0.015625, %v2318_v14 }
 0x326   : > { %v2321_v17 = vpop.xlane.xlu1 %2320 }
 0x327   : > { %v10846_v59 = vsub.f32 %v10678_v44, %v2397_v39  ;;  %v2398_v31 = vmul.f32 0.015625, %v2321_v17 }
 0x328   : > { %v2324_v47 = vpop.xlane.xlu0 %2323 }
 0x329   : > { %v10849_v45 = vsub.f32 %v10684_v33, %v2398_v31  ;;  %v2399_v5 = vmul.f32 0.015625, %v2324_v47  ;;  %v2461_v26 = vmul.f32 %v10846_v59, %v10846_v59 }
 0x32a   : > { %v2327_v25 = vpop.xlane.xlu1 %2326 }
 0x32b   : > { %v10854_v15 = vsub.f32 %v10681_v38, %v2399_v5  ;;  %v2400_v7 = vmul.f32 0.015625, %v2327_v25  ;;  %v2509_v23 = vsel %vm2291_vm1, %v2461_v26, 0.0  ;;  %v2462_v44 = vmul.f32 %v10849_v45, %v10849_v45 }
 0x32c   : > { %2510 = vadd.xlane.f32.xlu0 %v2509_v23 }
 0x32d   : > { %v10860_v14 = vsub.f32 %v10689_v62, %v2400_v7  ;;  %v2512_v33 = vsel %vm2291_vm1, %v2462_v44, 0.0  ;;  %v2463_v39 = vmul.f32 %v10854_v15, %v10854_v15 }
 0x32e   : > { %2513 = vadd.xlane.f32.xlu1 %v2512_v33 }
 0x32f   : > { %v2515_v17 = vsel %vm2291_vm1, %v2463_v39, 0.0  ;;  %v2464_v38 = vmul.f32 %v10860_v14, %v10860_v14 }
 0x330   : > { %2516 = vadd.xlane.f32.xlu0 %v2515_v17 }
 0x331   : > { %v2518_v31 = vsel %vm2291_vm1, %v2464_v38, 0.0 }
 0x332   : > { %2519 = vadd.xlane.f32.xlu1 %v2518_v31 }
 0x334   : > { %v2330_v47 = vpop.xlane.xlu0 %2329 }
 0x335   : > { %v2401_v5 = vmul.f32 0.015625, %v2330_v47 }
 0x336   : > { %v2333_v26 = vpop.xlane.xlu1 %2332 }
 0x337   : > { %v10870_v62 = vsub.f32 %v10698_v12, %v2401_v5  ;;  %v2402_v25 = vmul.f32 0.015625, %v2333_v26 }
 0x338   : > { %v2336_v7 = vpop.xlane.xlu0 %2335 }
 0x339   : > { %v10873_v23 = vsub.f32 %v10704_v18, %v2402_v25  ;;  %v2403_v44 = vmul.f32 0.015625, %v2336_v7  ;;  %v2465_v33 = vmul.f32 %v10870_v62, %v10870_v62 }
 0x33a   : > { %v2339_v39 = vpop.xlane.xlu1 %2338 }
 0x33b   : > { %v10878_v17 = vsub.f32 %v10701_v9, %v2403_v44  ;;  %v2404_v38 = vmul.f32 0.015625, %v2339_v39  ;;  %v2521_v31 = vsel %vm2291_vm1, %v2465_v33, 0.0  ;;  %v2466_v12 = vmul.f32 %v10873_v23, %v10873_v23 }
 0x33c   : > { %2522 = vadd.xlane.f32.xlu0 %v2521_v31 }
 0x33d   : > { %v10884_v47 = vsub.f32 %v10709_v6, %v2404_v38  ;;  %v2524_v18 = vsel %vm2291_vm1, %v2466_v12, 0.0  ;;  %v2467_v5 = vmul.f32 %v10878_v17, %v10878_v17  ;;  %v8574_v6 = vld [vmem:[%s14210_s4] sm:$0xff]  }
 0x33e   : > { %2525 = vadd.xlane.f32.xlu1 %v2524_v18  ;;  %8171 = vmatprep.subr.bf16.mxu1 %v8574_v6 }
 0x33f   : > { %v2527_v26 = vsel %vm2291_vm1, %v2467_v5, 0.0  ;;  %v2468_v9 = vmul.f32 %v10884_v47, %v10884_v47  ;;  %8172 = vmatpush3.bf16.msra.mxu1 %v8574_v6 }
 0x340   : > { %2528 = vadd.xlane.f32.xlu0 %v2527_v26  ;;  %v8575_v26 = vld [vmem:[%s14210_s4 + $0x8] sm:$0xff]  }
 0x341   : > { %v2530_v25 = vsel %vm2291_vm1, %v2468_v9, 0.0  ;;  %8173 = vmatprep.subr.bf16.mxu1 %v8575_v26 }
 0x342   : > { %2531 = vadd.xlane.f32.xlu1 %v2530_v25 }
 0x343   : > { %v2342_v7 = vpop.xlane.xlu0 %2341  ;;  %8174 = vmatpush3.bf16.msra.mxu1 %v8575_v26 }
 0x344   : > { %v2405_v44 = vmul.f32 0.015625, %v2342_v7 }
 0x345   : > { %v2345_v33 = vpop.xlane.xlu1 %2344 }
 0x346   : > { %v10897_v39 = vsub.f32 %v10718_v16, %v2405_v44  ;;  %v2406_v38 = vmul.f32 0.015625, %v2345_v33 }
 0x347   : > { %v2348_v31 = vpop.xlane.xlu0 %2347 }
 0x348   : > { %v10900_v12 = vsub.f32 %v10724_v8, %v2406_v38  ;;  %v2407_v18 = vmul.f32 0.015625, %v2348_v31  ;;  %v2469_v5 = vmul.f32 %v10897_v39, %v10897_v39 }
 0x349   : > { %v2351_v9 = vpop.xlane.xlu1 %2350 }
 0x34a   : > { %v10908_v25 = vsub.f32 %v10721_v61, %v2407_v18  ;;  %v2408_v16 = vmul.f32 0.015625, %v2351_v9  ;;  %v2533_v7 = vsel %vm2291_vm1, %v2469_v5, 0.0  ;;  %v2470_v44 = vmul.f32 %v10900_v12, %v10900_v12  ;;  %v8576_v61 = vld [vmem:[%s14210_s4 + $0x10] sm:$0xff]   ;;  %v8577_v18 = vld [vmem:[%s14210_s4 + $0x18] sm:$0xff]  }
 0x34b   : > { %2534 = vadd.xlane.f32.xlu0 %v2533_v7  ;;  %8175 = vmatprep.subr.bf16.mxu1 %v8576_v61 }
 0x34c   : > { %v10914_v8 = vsub.f32 %v10729_v22, %v2408_v16  ;;  %v2536_v6 = vsel %vm2291_vm1, %v2470_v44, 0.0  ;;  %v2471_v33 = vmul.f32 %v10908_v25, %v10908_v25  ;;  %8176 = vmatpush3.bf16.msra.mxu1 %v8576_v61 }
 0x34d   : > { %2537 = vadd.xlane.f32.xlu1 %v2536_v6  ;;  %8177 = vmatprep.subr.bf16.mxu1 %v8577_v18 }
 0x34e   : > { %v2539_v38 = vsel %vm2291_vm1, %v2471_v33, 0.0  ;;  %v2472_v31 = vmul.f32 %v10914_v8, %v10914_v8 }
 0x34f   : > { %2540 = vadd.xlane.f32.xlu0 %v2539_v38 }
 0x350   : > { %v2542_v22 = vsel %vm2291_vm1, %v2472_v31, 0.0  ;;  %8178 = vmatpush3.bf16.msra.mxu1 %v8577_v18 }
 0x351   : > { %2543 = vadd.xlane.f32.xlu1 %v2542_v22 }
 0x353   : > { %v2354_v5 = vpop.xlane.xlu0 %2353 }
 0x354   : > { %v2409_v26 = vmul.f32 0.015625, %v2354_v5 }
 0x355   : > { %v2357_v9 = vpop.xlane.xlu1 %2356 }
 0x356   : > { %v10930_v16 = vsub.f32 %v10738_v1, %v2409_v26  ;;  %v2410_v7 = vmul.f32 0.015625, %v2357_v9 }
 0x357   : > { %v2360_v44 = vpop.xlane.xlu0 %2359 }
 0x358   : > { %v10933_v6 = vsub.f32 %v10744_v58, %v2410_v7  ;;  %v2411_v33 = vmul.f32 0.015625, %v2360_v44  ;;  %v2473_v61 = vmul.f32 %v10930_v16, %v10930_v16 }
 0x359   : > { %v2363_v38 = vpop.xlane.xlu1 %2362 }
 0x35a   : > { %v10938_v31 = vsub.f32 %v10741_v30, %v2411_v33  ;;  %v2412_v22 = vmul.f32 0.015625, %v2363_v38  ;;  %v2545_v18 = vsel %vm2291_vm1, %v2473_v61, 0.0  ;;  %v2474_v1 = vmul.f32 %v10933_v6, %v10933_v6 }
 0x35b   : > { %2546 = vadd.xlane.f32.xlu0 %v2545_v18 }
 0x35c   : > { %v10944_v5 = vsub.f32 %v10749_v40, %v2412_v22  ;;  %v2548_v58 = vsel %vm2291_vm1, %v2474_v1, 0.0  ;;  %v2475_v26 = vmul.f32 %v10938_v31, %v10938_v31 }
 0x35d   : > { %2549 = vadd.xlane.f32.xlu1 %v2548_v58 }
 0x35e   : > { %v2551_v9 = vsel %vm2291_vm1, %v2475_v26, 0.0  ;;  %v2476_v30 = vmul.f32 %v10944_v5, %v10944_v5 }
 0x35f   : > { %2552 = vadd.xlane.f32.xlu0 %v2551_v9 }
 0x360   : > { %v2554_v7 = vsel %vm2291_vm1, %v2476_v30, 0.0 }
 0x361   : > { %2555 = vadd.xlane.f32.xlu1 %v2554_v7 }
 0x363   : > { %v2366_v44 = vpop.xlane.xlu0 %2365 }
 0x364   : > { %v2413_v33 = vmul.f32 0.015625, %v2366_v44 }
 0x365   : > { %v2369_v61 = vpop.xlane.xlu1 %2368 }
 0x366   : > { %v10954_v40 = vsub.f32 %v10758_v27, %v2413_v33  ;;  %v2414_v38 = vmul.f32 0.015625, %v2369_v61 }
 0x367   : > { %v2372_v22 = vpop.xlane.xlu0 %2371 }
 0x368   : > { %v10957_v18 = vsub.f32 %v10764_v48, %v2414_v38  ;;  %v2415_v1 = vmul.f32 0.015625, %v2372_v22  ;;  %v2477_v58 = vmul.f32 %v10954_v40, %v10954_v40 }
 0x369   : > { %v2375_v26 = vpop.xlane.xlu1 %2374 }
 0x36a   : > { %v10962_v9 = vsub.f32 %v10761_v49, %v2415_v1  ;;  %v2416_v30 = vmul.f32 0.015625, %v2375_v26  ;;  %v2557_v7 = vsel %vm2291_vm1, %v2477_v58, 0.0  ;;  %v2478_v27 = vmul.f32 %v10957_v18, %v10957_v18 }
 0x36b   : > { %2558 = vadd.xlane.f32.xlu0 %v2557_v7 }
 0x36c   : > { %v10968_v44 = vsub.f32 %v10769_v32, %v2416_v30  ;;  %v2560_v48 = vsel %vm2291_vm1, %v2478_v27, 0.0  ;;  %v2479_v33 = vmul.f32 %v10962_v9, %v10962_v9 }
 0x36d   : > { %2561 = vadd.xlane.f32.xlu1 %v2560_v48 }
 0x36e   : > { %v2563_v61 = vsel %vm2291_vm1, %v2479_v33, 0.0  ;;  %v2480_v49 = vmul.f32 %v10968_v44, %v10968_v44 }
 0x36f   : > { %2564 = vadd.xlane.f32.xlu0 %v2563_v61 }
 0x370   : > { %v2566_v38 = vsel %vm2291_vm1, %v2480_v49, 0.0 }
 0x371   : > { %2567 = vadd.xlane.f32.xlu1 %v2566_v38 }
 0x373   : > { %v2378_v22 = vpop.xlane.xlu0 %2377 }
 0x374   : > { %v2417_v1 = vmul.f32 0.015625, %v2378_v22 }
 0x375   : > { %v2381_v58 = vpop.xlane.xlu1 %2380 }
 0x376   : > { %v10978_v32 = vsub.f32 %v10778_v29, %v2417_v1  ;;  %v2418_v26 = vmul.f32 0.015625, %v2381_v58 }
 0x377   : > { %v2384_v30 = vpop.xlane.xlu0 %2383 }
 0x378   : > { %v10981_v7 = vsub.f32 %v10784_v43, %v2418_v26  ;;  %v2419_v27 = vmul.f32 0.015625, %v2384_v30  ;;  %v2481_v48 = vmul.f32 %v10978_v32, %v10978_v32 }
 0x379   : > { %v2387_v33 = vpop.xlane.xlu1 %2386 }
 0x37a   : > { %v10986_v61 = vsub.f32 %v10781_v2, %v2419_v27  ;;  %v2420_v49 = vmul.f32 0.015625, %v2387_v33  ;;  %v2569_v38 = vsel %vm2291_vm1, %v2481_v48, 0.0  ;;  %v2482_v29 = vmul.f32 %v10981_v7, %v10981_v7 }
 0x37b   : > { %2570 = vadd.xlane.f32.xlu0 %v2569_v38 }
 0x37c   : > { %v10992_v22 = vsub.f32 %v10789_v24, %v2420_v49  ;;  %v2572_v43 = vsel %vm2291_vm1, %v2482_v29, 0.0  ;;  %v2483_v1 = vmul.f32 %v10986_v61, %v10986_v61 }
 0x37d   : > { %2573 = vadd.xlane.f32.xlu1 %v2572_v43 }
 0x37e   : > { %v2575_v58 = vsel %vm2291_vm1, %v2483_v1, 0.0  ;;  %v2484_v2 = vmul.f32 %v10992_v22, %v10992_v22 }
 0x37f   : > { %2576 = vadd.xlane.f32.xlu0 %v2575_v58 }
 0x380   : > { %v2578_v26 = vsel %vm2291_vm1, %v2484_v2, 0.0  ;;  %v14236_v2 = vsub.s32 2, %v10624_v4 }
 0x381   : > { %2579 = vadd.xlane.f32.xlu1 %v2578_v26  ;;  %v11006_v26 = vrot.slane %v10630_v20, %v14234_v55 }
 0x398   : > { %v2487_v30 = vpop.xlane.xlu0 %2486 }
 0x399   : > { %v2581_v27 = vmul.f32 0.015625, %v2487_v30 }
 0x39b   : > { %v2613_v48 = vadd.f32 1e-05, %v2581_v27 }
 0x39c   : > { %v2490_v24 = vpop.xlane.xlu1 %2489  ;;  %v2493_v33 = vpop.xlane.xlu0 %2492 }
 0x39d   : > { %8714 = vrsqrt.f32 %v2613_v48  ;;  %v2582_v49 = vmul.f32 0.015625, %v2490_v24  ;;  %v2583_v38 = vmul.f32 0.015625, %v2493_v33  ;;  %v11012_v48 = vrot.slane %v10630_v20, %v14236_v2 }
 0x39f   : > { %v2614_v29 = vadd.f32 1e-05, %v2582_v49  ;;  %v2615_v36 = vadd.f32 1e-05, %v2583_v38 }
 0x3a0   : > { %v2496_v43 = vpop.xlane.xlu1 %2495 }
 0x3a1   : > { %8716 = vrsqrt.f32 %v2614_v29  ;;  %v2584_v1 = vmul.f32 0.015625, %v2496_v43 }
 0x3a2   : > { %8718 = vrsqrt.f32 %v2615_v36 }
 0x3a3   : > { %v2616_v58 = vadd.f32 1e-05, %v2584_v1 }
 0x3a5   : > { %8720 = vrsqrt.f32 %v2616_v58 }
 0x3a7   : > { %v8715_v30 = vpop.eup %8714 }
 0x3a8   : > { %v2677_v27 = vmul.f32 %v8715_v30, %v10801_v34 }
 0x3a9   : > { %v2499_v24 = vpop.xlane.xlu0 %2498 }
 0x3aa   : > { %v2585_v33 = vmul.f32 0.015625, %v2499_v24  ;;  %v2713_v49 = vmul.f32 %v11006_v26, %v2677_v27 }
 0x3ab   : > { %v2502_v36 = vpop.xlane.xlu1 %2501  ;;  %v8717_v38 = vpop.eup %8716 }
 0x3ac   : > { %v2617_v29 = vadd.f32 1e-05, %v2585_v33  ;;  %v2586_v43 = vmul.f32 0.015625, %v2502_v36  ;;  %v8719_v1 = vpop.eup %8718  ;;  %v2678_v58 = vmul.f32 %v8717_v38, %v10809_v41  ;;  %v11017_v51 = vadd.f32 %v11012_v48, %v2713_v49 }
 0x3ad   : > { %v2505_v55 = vpop.xlane.xlu0 %2504  ;;  %v2679_v34 = vmul.f32 %v8719_v1, %v10798_v21 }
 0x3ae   : > { %8722 = vrsqrt.f32 %v2617_v29  ;;  %v2618_v20 = vadd.f32 1e-05, %v2586_v43  ;;  %v2587_v30 = vmul.f32 0.015625, %v2505_v55  ;;  %v2714_v24 = vmul.f32 %v11006_v26, %v2678_v58 }
 0x3af   : > { %v2508_v2 = vpop.xlane.xlu1 %2507  ;;  %v7494_v27 = vmul.f32 -1.442695, %v11017_v51  ;;  %v8721_v13 = vpop.eup %8720  ;;  %v2715_v33 = vmul.f32 %v11006_v26, %v2679_v34 }
 0x3b0   : > { %8724 = vrsqrt.f32 %v2618_v20  ;;  %v2619_v36 = vadd.f32 1e-05, %v2587_v30  ;;  %v2588_v41 = vmul.f32 0.015625, %v2508_v2  ;;  %v2680_v38 = vmul.f32 %v8721_v13, %v10806_v53 }
 0x3b1   : > { %v11025_v49 = vadd.f32 %v11012_v48, %v2714_v24  ;;  %8726 = vpow2.f32 %v7494_v27  ;;  %v11028_v21 = vadd.f32 %v11012_v48, %v2715_v33 }
 0x3b2   : > { %8728 = vrsqrt.f32 %v2619_v36  ;;  %v2620_v55 = vadd.f32 1e-05, %v2588_v41  ;;  %v2716_v29 = vmul.f32 %v11006_v26, %v2680_v38 }
 0x3b3   : > { %v7495_v43 = vmul.f32 -1.442695, %v11025_v49  ;;  %v7496_v1 = vmul.f32 -1.442695, %v11028_v21 }
 0x3b4   : > { %8730 = vrsqrt.f32 %v2620_v55  ;;  %v11034_v2 = vadd.f32 %v11012_v48, %v2716_v29 }
 0x3b5   : > { %8732 = vpow2.f32 %v7495_v43 }
 0x3b6   : > { %8734 = vpow2.f32 %v7496_v1  ;;  %v7497_v13 = vmul.f32 -1.442695, %v11034_v2 }
 0x3b8   : > { %v8723_v53 = vpop.eup %8722  ;;  %8736 = vpow2.f32 %v7497_v13 }
 0x3b9   : > { %v2681_v58 = vmul.f32 %v8723_v53, %v10822_v10  ;;  %v2511_v20 = vpop.xlane.xlu0 %2510 }
 0x3ba   : > { %v8725_v34 = vpop.eup %8724  ;;  %v2589_v27 = vmul.f32 0.015625, %v2511_v20 }
 0x3bb   : > { %v8727_v30 = vpop.eup %8726  ;;  %v2682_v24 = vmul.f32 %v8725_v34, %v10825_v46  ;;  %v2717_v33 = vmul.f32 %v11006_v26, %v2681_v58  ;;  %v2514_v41 = vpop.xlane.xlu1 %2513 }
 0x3bc   : > { %v8729_v36 = vpop.eup %8728  ;;  %v2877_v38 = vadd.f32 1.0, %v8727_v30  ;;  %v2621_v29 = vadd.f32 1e-05, %v2589_v27  ;;  %v2590_v43 = vmul.f32 0.015625, %v2514_v41 }
 0x3bd   : > { %v2683_v55 = vmul.f32 %v8729_v36, %v10830_v56  ;;  %v2718_v1 = vmul.f32 %v11006_v26, %v2682_v24  ;;  %v2517_v52 = vpop.xlane.xlu0 %2516  ;;  %v11043_v10 = vadd.f32 %v11012_v48, %v2717_v33 }
 0x3be   : > { %v8731_v13 = vpop.eup %8730  ;;  %8738 = vrsqrt.f32 %v2621_v29  ;;  %v2622_v34 = vadd.f32 1e-05, %v2590_v43  ;;  %v2591_v58 = vmul.f32 0.015625, %v2517_v52 }
 0x3bf   : > { %v8733_v53 = vpop.eup %8732  ;;  %v2684_v46 = vmul.f32 %v8731_v13, %v10836_v54  ;;  %v2520_v42 = vpop.xlane.xlu1 %2519  ;;  %8740 = vrcp.f32 %v2877_v38  ;;  %v11047_v56 = vadd.f32 %v11012_v48, %v2718_v1  ;;  %v2719_v24 = vmul.f32 %v11006_v26, %v2683_v55 }
 0x3c0   : > { %v8735_v20 = vpop.eup %8734  ;;  %v2878_v30 = vadd.f32 1.0, %v8733_v53  ;;  %8742 = vrsqrt.f32 %v2622_v34  ;;  %v2623_v36 = vadd.f32 1e-05, %v2591_v58  ;;  %v2592_v33 = vmul.f32 0.015625, %v2520_v42 }
 0x3c1   : > { %v2879_v27 = vadd.f32 1.0, %v8735_v20  ;;  %v2720_v41 = vmul.f32 %v11006_v26, %v2684_v46  ;;  %v11052_v54 = vadd.f32 %v11012_v48, %v2719_v24  ;;  %v7498_v38 = vmul.f32 -1.442695, %v11043_v10 }
 0x3c2   : > { %8744 = vrcp.f32 %v2878_v30  ;;  %v8737_v52 = vpop.eup %8736  ;;  %v2624_v29 = vadd.f32 1e-05, %v2592_v33  ;;  %v7499_v1 = vmul.f32 -1.442695, %v11047_v56 }
 0x3c3   : > { %8746 = vrcp.f32 %v2879_v27  ;;  %v2880_v43 = vadd.f32 1.0, %v8737_v52  ;;  %v11057_v55 = vadd.f32 %v11012_v48, %v2720_v41  ;;  %v7500_v42 = vmul.f32 -1.442695, %v11052_v54 }
 0x3c4   : > { %8748 = vrsqrt.f32 %v2623_v36 }
 0x3c5   : > { %8750 = vrsqrt.f32 %v2624_v29  ;;  %v7501_v13 = vmul.f32 -1.442695, %v11057_v55 }
 0x3c6   : > { %8752 = vrcp.f32 %v2880_v43 }
 0x3c7   : > { %8754 = vpow2.f32 %v7498_v38 }
 0x3c8   : > { %8756 = vpow2.f32 %v7499_v1  ;;  %v8739_v53 = vpop.eup %8738 }
 0x3c9   : > { %8758 = vpow2.f32 %v7500_v42  ;;  %v8741_v46 = vpop.eup %8740  ;;  %v2685_v34 = vmul.f32 %v8739_v53, %v10846_v59  ;;  %v2523_v58 = vpop.xlane.xlu0 %2522 }
 0x3ca   : > { %8760 = vpow2.f32 %v7501_v13  ;;  %v8743_v20 = vpop.eup %8742  ;;  %v2593_v30 = vmul.f32 0.015625, %v2523_v58  ;;  %v2973_v42 = vmul.f32 %v8741_v46, %v11017_v51 }
 0x3cb   : > { %v2686_v27 = vmul.f32 %v8743_v20, %v10849_v45  ;;  %v2526_v36 = vpop.xlane.xlu1 %2525  ;;  %v2721_v33 = vmul.f32 %v11006_v26, %v2685_v34 }
 0x3cc   : > { %v8745_v24 = vpop.eup %8744  ;;  %v2625_v52 = vadd.f32 1e-05, %v2593_v30  ;;  %v2594_v29 = vmul.f32 0.015625, %v2526_v36 }
 0x3cd   : > { %v8747_v41 = vpop.eup %8746  ;;  %v2974_v38 = vmul.f32 %v8745_v24, %v11025_v49  ;;  %v2529_v1 = vpop.xlane.xlu0 %2528  ;;  %v2722_v13 = vmul.f32 %v11006_v26, %v2686_v27  ;;  %v11069_v53 = vadd.f32 %v11012_v48, %v2721_v33 }
 0x3ce   : > { %v8749_v43 = vpop.eup %8748  ;;  %v2975_v59 = vmul.f32 %v8747_v41, %v11028_v21  ;;  %8762 = vrsqrt.f32 %v2625_v52  ;;  %v2626_v34 = vadd.f32 1e-05, %v2594_v29  ;;  %v2595_v20 = vmul.f32 0.015625, %v2529_v1 }
 0x3cf   : > { %v8751_v45 = vpop.eup %8750  ;;  %v2687_v58 = vmul.f32 %v8749_v43, %v10854_v15  ;;  %v2532_v24 = vpop.xlane.xlu1 %2531  ;;  %v3005_v36 = vpack.c.bf16 %v2974_v38, %v2973_v42  ;;  %v11074_v51 = vadd.f32 %v11012_v48, %v2722_v13  ;;  %v7502_v21 = vmul.f32 -1.442695, %v11069_v53 }
 0x3d0   : > { %v8753_v30 = vpop.eup %8752  ;;  %v2688_v49 = vmul.f32 %v8751_v45, %v10860_v14  ;;  %8764 = vrsqrt.f32 %v2626_v34  ;;  %v2627_v27 = vadd.f32 1e-05, %v2595_v20  ;;  %v2596_v33 = vmul.f32 0.015625, %v2532_v24 }
 0x3d1   : > { %v8755_v46 = vpop.eup %8754  ;;  %v2976_v41 = vmul.f32 %v8753_v30, %v11034_v2  ;;  %8179 = vmatprep.mubr.msk.bf16.mxu1 %vm2291_vm1, %v3005_v36  ;;  %8766 = vpow2.f32 %v7502_v21  ;;  %v2723_v14 = vmul.f32 %v11006_v26, %v2687_v58  ;;  %v7503_v20 = vmul.f32 -1.442695, %v11074_v51 }
 0x3d2   : > { %v8757_v15 = vpop.eup %8756  ;;  %v2881_v52 = vadd.f32 1.0, %v8755_v46  ;;  %8768 = vrsqrt.f32 %v2627_v27  ;;  %v2628_v38 = vadd.f32 1e-05, %v2596_v33  ;;  %v2724_v45 = vmul.f32 %v11006_v26, %v2688_v49 }
 0x3d3   : > { %v8759_v29 = vpop.eup %8758  ;;  %v3006_v43 = vpack.c.bf16 %v2976_v41, %v2975_v59  ;;  %v2882_v1 = vadd.f32 1.0, %v8757_v15  ;;  %v11082_v34 = vadd.f32 %v11012_v48, %v2723_v14 }
 0x3d4   : > { %v8761_v42 = vpop.eup %8760  ;;  %8770 = vrcp.f32 %v2881_v52  ;;  %v2883_v13 = vadd.f32 1.0, %v8759_v29  ;;  %v11087_v58 = vadd.f32 %v11012_v48, %v2724_v45 }
 0x3d5   : > { %8772 = vrsqrt.f32 %v2628_v38  ;;  %8180 = vmatmul.mubr.msk.bf16.vlgmr.msra.gmra.mrb[112].mxu1 %vm2291_vm1, %v3006_v43  ;;  %v2884_v2 = vadd.f32 1.0, %v8761_v42  ;;  %v7504_v59 = vmul.f32 -1.442695, %v11082_v34 }
 0x3d6   : > { %8774 = vrcp.f32 %v2882_v1  ;;  %v7505_v30 = vmul.f32 -1.442695, %v11087_v58 }
 0x3d7   : > { %8776 = vrcp.f32 %v2883_v13 }
 0x3d8   : > { %8778 = vrcp.f32 %v2884_v2  ;;  %v8763_v49 = vpop.eup %8762  ;;  %v2535_v24 = vpop.xlane.xlu0 %2534 }
 0x3d9   : > { %8780 = vpow2.f32 %v7503_v20  ;;  %v2689_v36 = vmul.f32 %v8763_v49, %v10870_v62  ;;  %v2597_v21 = vmul.f32 0.015625, %v2535_v24 }
 0x3da   : > { %8782 = vpow2.f32 %v7504_v59  ;;  %v8765_v46 = vpop.eup %8764  ;;  %v2538_v27 = vpop.xlane.xlu1 %2537 }
 0x3db   : > { %8784 = vpow2.f32 %v7505_v30  ;;  %v8767_v33 = vpop.eup %8766  ;;  %v2690_v41 = vmul.f32 %v8765_v46, %v10873_v23  ;;  %v2629_v15 = vadd.f32 1e-05, %v2597_v21  ;;  %v2598_v52 = vmul.f32 0.015625, %v2538_v27 }
 0x3dc   : > { %v2725_v14 = vmul.f32 %v11006_v26, %v2689_v36  ;;  %v8769_v29 = vpop.eup %8768  ;;  %v2541_v38 = vpop.xlane.xlu0 %2540  ;;  %v2885_v43 = vadd.f32 1.0, %v8767_v33 }
 0x3dd   : > { %v2691_v42 = vmul.f32 %v8769_v29, %v10878_v17  ;;  %8786 = vrsqrt.f32 %v2629_v15  ;;  %v2630_v62 = vadd.f32 1e-05, %v2598_v52  ;;  %v2599_v13 = vmul.f32 0.015625, %v2541_v38 }
 0x3de   : > { %v8771_v1 = vpop.eup %8770  ;;  %v2544_v2 = vpop.xlane.xlu1 %2543  ;;  %8788 = vrcp.f32 %v2885_v43  ;;  %v2726_v23 = vmul.f32 %v11006_v26, %v2690_v41  ;;  %v11098_v59 = vadd.f32 %v11012_v48, %v2725_v14 }
 0x3df   : > { %v8773_v45 = vpop.eup %8772  ;;  %v2977_v20 = vmul.f32 %v8771_v1, %v11043_v10  ;;  %8790 = vrsqrt.f32 %v2630_v62  ;;  %v2631_v24 = vadd.f32 1e-05, %v2599_v13  ;;  %v2600_v36 = vmul.f32 0.015625, %v2544_v2 }
 0x3e0   : > { %v8775_v30 = vpop.eup %8774  ;;  %v2692_v49 = vmul.f32 %v8773_v45, %v10884_v47  ;;  %v11103_v46 = vadd.f32 %v11012_v48, %v2726_v23  ;;  %v7506_v10 = vmul.f32 -1.442695, %v11098_v59  ;;  %v2727_v27 = vmul.f32 %v11006_v26, %v2691_v42 }
 0x3e1   : > { %v8777_v17 = vpop.eup %8776  ;;  %v2978_v21 = vmul.f32 %v8775_v30, %v11047_v56  ;;  %8792 = vrsqrt.f32 %v2631_v24  ;;  %v2632_v41 = vadd.f32 1e-05, %v2600_v36 }
 0x3e2   : > { %v8779_v33 = vpop.eup %8778  ;;  %v2979_v15 = vmul.f32 %v8777_v17, %v11052_v54  ;;  %v2728_v47 = vmul.f32 %v11006_v26, %v2692_v49  ;;  %8794 = vpow2.f32 %v7506_v10  ;;  %v7507_v56 = vmul.f32 -1.442695, %v11103_v46 }
 0x3e3   : > { %v8781_v52 = vpop.eup %8780  ;;  %v3007_v14 = vpack.c.bf16 %v2978_v21, %v2977_v20  ;;  %v2980_v29 = vmul.f32 %v8779_v33, %v11057_v55  ;;  %8796 = vrsqrt.f32 %v2632_v41  ;;  %v11112_v1 = vadd.f32 %v11012_v48, %v2727_v27 }
 0x3e4   : > { %v8783_v38 = vpop.eup %8782  ;;  %v2886_v43 = vadd.f32 1.0, %v8781_v52  ;;  %v11115_v42 = vadd.f32 %v11012_v48, %v2728_v47  ;;  %8798 = vpow2.f32 %v7507_v56 }
 0x3e5   : > { %v8785_v62 = vpop.eup %8784  ;;  %8183 = vmatprep.mubr.msk.bf16.mxu1 %vm2291_vm1, %v3007_v14  ;;  %v3008_v54 = vpack.c.bf16 %v2980_v29, %v2979_v15  ;;  %v2887_v13 = vadd.f32 1.0, %v8783_v38  ;;  %v7508_v45 = vmul.f32 -1.442695, %v11112_v1 }
 0x3e6   : > { %8800 = vrcp.f32 %v2886_v43  ;;  %v2888_v55 = vadd.f32 1.0, %v8785_v62  ;;  %v7509_v2 = vmul.f32 -1.442695, %v11115_v42 }
 0x3e7   : > { %8184 = vmatmul.mubr.msk.bf16.gmra.mrb[116].mxu1 %vm2291_vm1, %v3008_v54  ;;  %8802 = vrcp.f32 %v2887_v13  ;;  %v8787_v20 = vpop.eup %8786 }
 0x3e8   : > { %8804 = vrcp.f32 %v2888_v55  ;;  %v8789_v23 = vpop.eup %8788  ;;  %v2693_v30 = vmul.f32 %v8787_v20, %v10897_v39  ;;  %v2547_v49 = vpop.xlane.xlu0 %2546 }
 0x3e9   : > { %8806 = vpow2.f32 %v7508_v45  ;;  %v8791_v24 = vpop.eup %8790  ;;  %v2601_v36 = vmul.f32 0.015625, %v2547_v49  ;;  %v2981_v13 = vmul.f32 %v8789_v23, %v11069_v53 }
 0x3ea   : > { %8808 = vpow2.f32 %v7509_v2  ;;  %v2694_v17 = vmul.f32 %v8791_v24, %v10900_v12  ;;  %v2550_v21 = vpop.xlane.xlu1 %2549  ;;  %v2729_v10 = vmul.f32 %v11006_v26, %v2693_v30 }
 0x3eb   : > { %v8793_v27 = vpop.eup %8792  ;;  %v2633_v33 = vadd.f32 1e-05, %v2601_v36  ;;  %v2602_v41 = vmul.f32 0.015625, %v2550_v21 }
 0x3ec   : > { %v8795_v15 = vpop.eup %8794  ;;  %v2695_v47 = vmul.f32 %v8793_v27, %v10908_v25  ;;  %v2553_v52 = vpop.xlane.xlu0 %2552  ;;  %v2730_v14 = vmul.f32 %v11006_v26, %v2694_v17  ;;  %v11127_v39 = vadd.f32 %v11012_v48, %v2729_v10 }
 0x3ed   : > { %v8797_v29 = vpop.eup %8796  ;;  %8810 = vrsqrt.f32 %v2633_v33  ;;  %v2634_v56 = vadd.f32 1e-05, %v2602_v41  ;;  %v2603_v38 = vmul.f32 0.015625, %v2553_v52  ;;  %v2889_v12 = vadd.f32 1.0, %v8795_v15 }
 0x3ee   : > { %v8799_v43 = vpop.eup %8798  ;;  %v2696_v62 = vmul.f32 %v8797_v29, %v10914_v8  ;;  %v2556_v54 = vpop.xlane.xlu1 %2555  ;;  %v11132_v55 = vadd.f32 %v11012_v48, %v2730_v14  ;;  %v2731_v25 = vmul.f32 %v11006_v26, %v2695_v47  ;;  %v7510_v36 = vmul.f32 -1.442695, %v11127_v39 }
 0x3ef   : > { %8812 = vrsqrt.f32 %v2634_v56  ;;  %v2635_v2 = vadd.f32 1e-05, %v2603_v38  ;;  %v2604_v20 = vmul.f32 0.015625, %v2556_v54  ;;  %v2890_v30 = vadd.f32 1.0, %v8799_v43 }
 0x3f0   : > { %v8801_v45 = vpop.eup %8800  ;;  %8814 = vrcp.f32 %v2889_v12  ;;  %v2732_v8 = vmul.f32 %v11006_v26, %v2696_v62  ;;  %v11140_v21 = vadd.f32 %v11012_v48, %v2731_v25  ;;  %v7511_v47 = vmul.f32 -1.442695, %v11132_v55 }
 0x3f1   : > { %v8803_v49 = vpop.eup %8802  ;;  %v2982_v24 = vmul.f32 %v8801_v45, %v11074_v51  ;;  %8816 = vrsqrt.f32 %v2635_v2  ;;  %v2636_v53 = vadd.f32 1e-05, %v2604_v20 }
 0x3f2   : > { %v8805_v17 = vpop.eup %8804  ;;  %v2983_v23 = vmul.f32 %v8803_v49, %v11082_v34  ;;  %8818 = vrcp.f32 %v2890_v30  ;;  %v11144_v51 = vadd.f32 %v11012_v48, %v2732_v8  ;;  %v7512_v14 = vmul.f32 -1.442695, %v11140_v21 }
 0x3f3   : > { %v8807_v10 = vpop.eup %8806  ;;  %v3009_v27 = vpack.c.bf16 %v2982_v24, %v2981_v13  ;;  %v2984_v33 = vmul.f32 %v8805_v17, %v11087_v58  ;;  %8820 = vrsqrt.f32 %v2636_v53 }
 0x3f4   : > { %v8809_v41 = vpop.eup %8808  ;;  %v2891_v15 = vadd.f32 1.0, %v8807_v10  ;;  %8822 = vpow2.f32 %v7510_v36  ;;  %v7513_v29 = vmul.f32 -1.442695, %v11144_v51 }
 0x3f5   : > { %8187 = vmatprep.mubr.msk.bf16.mxu1 %vm2291_vm1, %v3009_v27  ;;  %v3010_v52 = vpack.c.bf16 %v2984_v33, %v2983_v23  ;;  %v2892_v34 = vadd.f32 1.0, %v8809_v41 }
 0x3f6   : > { %8824 = vrcp.f32 %v2891_v15 }
 0x3f7   : > { %8188 = vmatmul.mubr.msk.bf16.gmra.mrb[120].mxu1 %vm2291_vm1, %v3010_v52  ;;  %8826 = vrcp.f32 %v2892_v34  ;;  %v8811_v58 = vpop.eup %8810 }
 0x3f8   : > { %8828 = vpow2.f32 %v7511_v47  ;;  %v2697_v56 = vmul.f32 %v8811_v58, %v10930_v16  ;;  %v2559_v38 = vpop.xlane.xlu0 %2558 }
 0x3f9   : > { %8830 = vpow2.f32 %v7512_v14  ;;  %v8813_v12 = vpop.eup %8812  ;;  %v2605_v43 = vmul.f32 0.015625, %v2559_v38 }
 0x3fa   : > { %8832 = vpow2.f32 %v7513_v29  ;;  %v8815_v62 = vpop.eup %8814  ;;  %v2698_v54 = vmul.f32 %v8813_v12, %v10933_v6  ;;  %v2562_v13 = vpop.xlane.xlu1 %2561  ;;  %v2733_v25 = vmul.f32 %v11006_v26, %v2697_v56 }
 0x3fb   : > { %v8817_v45 = vpop.eup %8816  ;;  %v2637_v2 = vadd.f32 1e-05, %v2605_v43  ;;  %v2606_v20 = vmul.f32 0.015625, %v2562_v13  ;;  %v2985_v16 = vmul.f32 %v8815_v62, %v11098_v59 }
 0x3fc   : > { %v8819_v30 = vpop.eup %8818  ;;  %v2699_v49 = vmul.f32 %v8817_v45, %v10938_v31  ;;  %v2565_v24 = vpop.xlane.xlu0 %2564  ;;  %v2734_v36 = vmul.f32 %v11006_v26, %v2698_v54  ;;  %v11158_v8 = vadd.f32 %v11012_v48, %v2733_v25 }
 0x3fd   : > { %v8821_v17 = vpop.eup %8820  ;;  %8834 = vrsqrt.f32 %v2637_v2  ;;  %v2638_v6 = vadd.f32 1e-05, %v2606_v20  ;;  %v2607_v53 = vmul.f32 0.015625, %v2565_v24  ;;  %v2986_v23 = vmul.f32 %v8819_v30, %v11103_v46 }
 0x3fe   : > { %v8823_v10 = vpop.eup %8822  ;;  %v2700_v27 = vmul.f32 %v8821_v17, %v10944_v5  ;;  %v2568_v33 = vpop.xlane.xlu1 %2567  ;;  %v11163_v31 = vadd.f32 %v11012_v48, %v2734_v36  ;;  %v7514_v59 = vmul.f32 -1.442695, %v11158_v8  ;;  %v2735_v41 = vmul.f32 %v11006_v26, %v2699_v49 }
 0x3ff   : > { %8836 = vrsqrt.f32 %v2638_v6  ;;  %v2639_v47 = vadd.f32 1e-05, %v2607_v53  ;;  %v2608_v52 = vmul.f32 0.015625, %v2568_v33  ;;  %v3011_v34 = vpack.c.bf16 %v2986_v23, %v2985_v16 }
 0x400   : > { %v8825_v15 = vpop.eup %8824  ;;  %v2893_v46 = vadd.f32 1.0, %v8823_v10  ;;  %8838 = vpow2.f32 %v7514_v59  ;;  %v2736_v38 = vmul.f32 %v11006_v26, %v2700_v27  ;;  %v7515_v62 = vmul.f32 -1.442695, %v11163_v31 }
 0x401   : > { %v8827_v14 = vpop.eup %8826  ;;  %v2987_v29 = vmul.f32 %v8825_v15, %v11112_v1  ;;  %8840 = vrsqrt.f32 %v2639_v47  ;;  %v2640_v5 = vadd.f32 1e-05, %v2608_v52  ;;  %8191 = vmatprep.mubr.msk.bf16.mxu1 %vm2291_vm1, %v3011_v34  ;;  %v11173_v54 = vadd.f32 %v11012_v48, %v2735_v41 }
 0x402   : > { %v8829_v58 = vpop.eup %8828  ;;  %v2988_v56 = vmul.f32 %v8827_v14, %v11115_v42  ;;  %8842 = vrcp.f32 %v2893_v46  ;;  %v11176_v45 = vadd.f32 %v11012_v48, %v2736_v38 }
 0x403   : > { %v8831_v12 = vpop.eup %8830  ;;  %v2894_v43 = vadd.f32 1.0, %v8829_v58  ;;  %8844 = vrsqrt.f32 %v2640_v5  ;;  %v7516_v42 = vmul.f32 -1.442695, %v11173_v54 }
 0x404   : > { %v8833_v1 = vpop.eup %8832  ;;  %v3012_v13 = vpack.c.bf16 %v2988_v56, %v2987_v29  ;;  %v2895_v25 = vadd.f32 1.0, %v8831_v12  ;;  %v7517_v20 = vmul.f32 -1.442695, %v11176_v45 }
 0x405   : > { %8846 = vrcp.f32 %v2894_v43  ;;  %v2896_v2 = vadd.f32 1.0, %v8833_v1 }
 0x406   : > { %8192 = vmatmul.mubr.msk.bf16.gmra.mrb[124].mxu1 %vm2291_vm1, %v3012_v13  ;;  %8848 = vrcp.f32 %v2895_v25 }
 0x407   : > { %8850 = vrcp.f32 %v2896_v2  ;;  %v8835_v30 = vpop.eup %8834 }
 0x408   : > { %8852 = vpow2.f32 %v7515_v62  ;;  %v2701_v49 = vmul.f32 %v8835_v30, %v10954_v40  ;;  %v2571_v24 = vpop.xlane.xlu0 %2570 }
 0x409   : > { %8854 = vpow2.f32 %v7516_v42  ;;  %v8837_v16 = vpop.eup %8836  ;;  %v2609_v36 = vmul.f32 0.015625, %v2571_v24 }
 0x40a   : > { %8856 = vpow2.f32 %v7517_v20  ;;  %v8839_v17 = vpop.eup %8838  ;;  %v2702_v6 = vmul.f32 %v8837_v16, %v10957_v18  ;;  %v2574_v53 = vpop.xlane.xlu1 %2573  ;;  %v2737_v23 = vmul.f32 %v11006_v26, %v2701_v49 }
 0x40b   : > { %v8841_v10 = vpop.eup %8840  ;;  %v2641_v27 = vadd.f32 1e-05, %v2609_v36  ;;  %v2610_v33 = vmul.f32 0.015625, %v2574_v53  ;;  %v2897_v59 = vadd.f32 1.0, %v8839_v17 }
 0x40c   : > { %v8843_v41 = vpop.eup %8842  ;;  %v2703_v15 = vmul.f32 %v8841_v10, %v10962_v9  ;;  %v2577_v47 = vpop.xlane.xlu0 %2576  ;;  %v2738_v40 = vmul.f32 %v11006_v26, %v2702_v6  ;;  %v11187_v52 = vadd.f32 %v11012_v48, %v2737_v23 }
 0x40d   : > { %v8845_v34 = vpop.eup %8844  ;;  %8858 = vrsqrt.f32 %v2641_v27  ;;  %v2642_v14 = vadd.f32 1e-05, %v2610_v33  ;;  %v2611_v18 = vmul.f32 0.015625, %v2577_v47  ;;  %v2989_v29 = vmul.f32 %v8843_v41, %v11127_v39 }
 0x40e   : > { %v2704_v58 = vmul.f32 %v8845_v34, %v10968_v44  ;;  %v2580_v5 = vpop.xlane.xlu1 %2579  ;;  %8860 = vrcp.f32 %v2897_v59  ;;  %v11192_v56 = vadd.f32 %v11012_v48, %v2738_v40  ;;  %v7518_v9 = vmul.f32 -1.442695, %v11187_v52 }
 0x40f   : > { %v8847_v46 = vpop.eup %8846  ;;  %8862 = vrsqrt.f32 %v2642_v14  ;;  %v2643_v12 = vadd.f32 1e-05, %v2611_v18  ;;  %v2612_v43 = vmul.f32 0.015625, %v2580_v5  ;;  %v2739_v44 = vmul.f32 %v11006_v26, %v2703_v15 }
 0x410   : > { %v8849_v38 = vpop.eup %8848  ;;  %v2990_v62 = vmul.f32 %v8847_v46, %v11132_v55  ;;  %8864 = vpow2.f32 %v7518_v9  ;;  %v7519_v39 = vmul.f32 -1.442695, %v11192_v56  ;;  %v2740_v24 = vmul.f32 %v11006_v26, %v2704_v58 }
 0x411   : > { %v8851_v1 = vpop.eup %8850  ;;  %v2991_v13 = vmul.f32 %v8849_v38, %v11140_v21  ;;  %8866 = vrsqrt.f32 %v2643_v12  ;;  %v2644_v2 = vadd.f32 1e-05, %v2612_v43  ;;  %v11202_v55 = vadd.f32 %v11012_v48, %v2739_v44 }
 0x412   : > { %v8853_v25 = vpop.eup %8852  ;;  %v3013_v42 = vpack.c.bf16 %v2990_v62, %v2989_v29  ;;  %v2992_v20 = vmul.f32 %v8851_v1, %v11144_v51  ;;  %8868 = vpow2.f32 %v7519_v39  ;;  %v11206_v6 = vadd.f32 %v11012_v48, %v2740_v24 }
 0x413   : > { %v8855_v30 = vpop.eup %8854  ;;  %v2898_v49 = vadd.f32 1.0, %v8853_v25  ;;  %8870 = vrsqrt.f32 %v2644_v2  ;;  %v7520_v51 = vmul.f32 -1.442695, %v11202_v55 }
 0x414   : > { %v8857_v21 = vpop.eup %8856  ;;  %8195 = vmatprep.mubr.msk.bf16.mxu1 %vm2291_vm1, %v3013_v42  ;;  %v3014_v16 = vpack.c.bf16 %v2992_v20, %v2991_v13  ;;  %v2899_v36 = vadd.f32 1.0, %v8855_v30  ;;  %v7521_v53 = vmul.f32 -1.442695, %v11206_v6 }
 0x415   : > { %8872 = vrcp.f32 %v2898_v49  ;;  %v2900_v17 = vadd.f32 1.0, %v8857_v21 }
 0x416   : > { %8196 = vmatmul.mubr.msk.bf16.gmra.mrb[128].mxu1 %vm2291_vm1, %v3014_v16  ;;  %8874 = vrcp.f32 %v2899_v36 }
 0x417   : > { %8876 = vrcp.f32 %v2900_v17  ;;  %v8859_v23 = vpop.eup %8858 }
 0x418   : > { %8878 = vpow2.f32 %v7520_v51  ;;  %v8861_v10 = vpop.eup %8860  ;;  %v2705_v27 = vmul.f32 %v8859_v23, %v10978_v32 }
 0x419   : > { %8880 = vpow2.f32 %v7521_v53  ;;  %v8863_v33 = vpop.eup %8862  ;;  %v2993_v43 = vmul.f32 %v8861_v10, %v11158_v8 }
 0x41a   : > { %v8865_v59 = vpop.eup %8864  ;;  %v2706_v41 = vmul.f32 %v8863_v33, %v10981_v7  ;;  %v2741_v15 = vmul.f32 %v11006_v26, %v2705_v27 }
 0x41b   : > { %v8867_v47 = vpop.eup %8866  ;;  %v2901_v40 = vadd.f32 1.0, %v8865_v59 }
 0x41c   : > { %v8869_v34 = vpop.eup %8868  ;;  %v2707_v14 = vmul.f32 %v8867_v47, %v10986_v61  ;;  %v2742_v18 = vmul.f32 %v11006_v26, %v2706_v41  ;;  %v2777_v29 = vadd.f32 %v11012_v48, %v2741_v15 }
 0x41d   : > { %v8871_v46 = vpop.eup %8870  ;;  %v2902_v58 = vadd.f32 1.0, %v8869_v34  ;;  %8882 = vrcp.f32 %v2901_v40 }
 0x41e   : > { %v2708_v5 = vmul.f32 %v8871_v46, %v10992_v22  ;;  %v2778_v9 = vadd.f32 %v11012_v48, %v2742_v18  ;;  %v7522_v7 = vmul.f32 -1.442695, %v2777_v29  ;;  %v2743_v38 = vmul.f32 %v11006_v26, %v2707_v14 }
 0x41f   : > { %v8873_v32 = vpop.eup %8872  ;;  %8884 = vrcp.f32 %v2902_v58 }
 0x420   : > { %v8875_v12 = vpop.eup %8874  ;;  %v2994_v61 = vmul.f32 %v8873_v32, %v11163_v31  ;;  %8886 = vpow2.f32 %v7522_v7  ;;  %v7523_v1 = vmul.f32 -1.442695, %v2778_v9  ;;  %v2744_v13 = vmul.f32 %v11006_v26, %v2708_v5  ;;  %v11241_v5 = vld [vmem:[%s14214_s8] sm:$0xff] }
 0x421   : > { %v8877_v62 = vpop.eup %8876  ;;  %v2995_v22 = vmul.f32 %v8875_v12, %v11173_v54  ;;  %v2779_v2 = vadd.f32 %v11012_v48, %v2743_v38  ;;  %v14244_v32 = vsub.s32 3, %v10624_v4 }
 0x422   : > { %v8879_v39 = vpop.eup %8878  ;;  %v3015_v44 = vpack.c.bf16 %v2994_v61, %v2993_v43  ;;  %v2996_v25 = vmul.f32 %v8877_v62, %v11176_v45  ;;  %8888 = vpow2.f32 %v7523_v1  ;;  %v2780_v8 = vadd.f32 %v11012_v48, %v2744_v13 }
 0x423   : > { %v8881_v42 = vpop.eup %8880  ;;  %v2903_v20 = vadd.f32 1.0, %v8879_v39  ;;  %v7524_v49 = vmul.f32 -1.442695, %v2779_v2 }
 0x424   : > { %8199 = vmatprep.mubr.msk.bf16.mxu1 %vm2291_vm1, %v3015_v44  ;;  %v3016_v31 = vpack.c.bf16 %v2996_v25, %v2995_v22  ;;  %v2904_v30 = vadd.f32 1.0, %v8881_v42  ;;  %v7525_v26 = vmul.f32 -1.442695, %v2780_v8 }
 0x425   : > { %8890 = vrcp.f32 %v2903_v20 }
 0x426   : > { %8200 = vmatmul.mubr.msk.bf16.gmra.mrb[132].mxu1 %vm2291_vm1, %v3016_v31  ;;  %8892 = vrcp.f32 %v2904_v30 }
 0x427   : > { %8894 = vpow2.f32 %v7524_v49  ;;  %v8883_v54 = vpop.eup %8882 }
 0x428   : > { %8896 = vpow2.f32 %v7525_v26  ;;  %v2997_v21 = vmul.f32 %v8883_v54, %v11187_v52 }
 0x429   : > { %v8885_v45 = vpop.eup %8884 }
 0x42a   : > { %v8887_v24 = vpop.eup %8886  ;;  %v2998_v16 = vmul.f32 %v8885_v45, %v11192_v56 }
 0x42b   : > { %v2905_v48 = vadd.f32 1.0, %v8887_v24 }
 0x42c   : > { %v8889_v36 = vpop.eup %8888  ;;  %v3017_v17 = vpack.c.bf16 %v2998_v16, %v2997_v21 }
 0x42d   : > { %v2906_v51 = vadd.f32 1.0, %v8889_v36  ;;  %8898 = vrcp.f32 %v2905_v48 }
 0x42e   : > { %8203 = vmatprep.mubr.msk.bf16.mxu1 %vm2291_vm1, %v3017_v17 }
 0x42f   : > { %v8891_v53 = vpop.eup %8890  ;;  %8900 = vrcp.f32 %v2906_v51 }
 0x430   : > { %v8893_v23 = vpop.eup %8892  ;;  %v2999_v27 = vmul.f32 %v8891_v53, %v11202_v55 }
 0x431   : > { %v8895_v10 = vpop.eup %8894  ;;  %v3000_v33 = vmul.f32 %v8893_v23, %v11206_v6 }
 0x432   : > { %v8897_v59 = vpop.eup %8896  ;;  %v2907_v41 = vadd.f32 1.0, %v8895_v10 }
 0x433   : > { %v3018_v52 = vpack.c.bf16 %v3000_v33, %v2999_v27  ;;  %v2908_v15 = vadd.f32 1.0, %v8897_v59 }
 0x434   : > { %8902 = vrcp.f32 %v2907_v41 }
 0x435   : > { %8204 = vmatmul.mubr.msk.bf16.gmra.mrb[136].mxu1 %vm2291_vm1, %v3018_v52  ;;  %8904 = vrcp.f32 %v2908_v15 }
 0x437   : > { %v8899_v56 = vpop.eup %8898 }
 0x438   : > { %v3001_v40 = vmul.f32 %v8899_v56, %v2777_v29  ;;  %v11246_v29 = vrot.slane %v11241_v5, %v14244_v32 }
 0x439   : > { %v8901_v47 = vpop.eup %8900 }
 0x43a   : > { %v3002_v34 = vmul.f32 %v8901_v47, %v2778_v9 }
 0x43c   : > { %v3019_v14 = vpack.c.bf16 %v3002_v34, %v3001_v40 }
 0x43e   : > { %v8903_v18 = vpop.eup %8902  ;;  %8207 = vmatprep.mubr.msk.bf16.mxu1 %vm2291_vm1, %v3019_v14 }
 0x43f   : > { %v8905_v46 = vpop.eup %8904  ;;  %v3003_v55 = vmul.f32 %v8903_v18, %v2779_v2 }
 0x440   : > { %v3004_v58 = vmul.f32 %v8905_v46, %v2780_v8 }
 0x442   : > { %v3020_v6 = vpack.c.bf16 %v3004_v58, %v3003_v55 }
 0x444   : > { %8208 = vmatmul.mubr.msk.bf16.gmra.mrb[140].mxu1 %vm2291_vm1, %v3020_v6 }
 0x4a8   : > { %v8181_v9 = vpop.f32.mrb[112].mxu1 }
 0x4a9   : > { %v3131_v7 = vpop.f32.mrb[113].mxu1  ;;  %v11252_v61 = vadd.f32 %v8181_v9, %v11246_v29 }
 0x4aa   : > { %v11249_v38 = vadd.f32 %v3131_v7, %v11246_v29  ;;  %v8182_v12 = vpop.f32.mrb[114].mxu1 }
 0x4ab   : > { %v3134_v43 = vpop.f32.mrb[115].mxu1  ;;  %v11260_v13 = vadd.f32 %v8182_v12, %v11246_v29  ;;  %v3264_v44 = vsel %vm2081_vm0, %v11252_v61, 0.0 }
 0x4ac   : > { %v11255_v62 = vadd.f32 %v3134_v43, %v11246_v29  ;;  %v3258_v1 = vsel %vm2081_vm0, %v11249_v38, 0.0 }
 0x4ad   : > { %3259 = vadd.xlane.f32.xlu0 %v3258_v1  ;;  %v3267_v22 = vsel %vm2081_vm0, %v11260_v13, 0.0 }
 0x4ae   : > { %v3261_v39 = vsel %vm2081_vm0, %v11255_v62, 0.0 }
 0x4af   : > { %3262 = vadd.xlane.f32.xlu1 %v3261_v39 }
 0x4b1   : > { %3265 = vadd.xlane.f32.xlu0 %v3264_v44 }
 0x4b3   : > { %3268 = vadd.xlane.f32.xlu1 %v3267_v22 }
 0x4ba   : > { %v8185_v25 = vpop.f32.mrb[116].mxu1 }
 0x4bb   : > { %v3147_v2 = vpop.f32.mrb[117].mxu1  ;;  %v11272_v31 = vadd.f32 %v8185_v25, %v11246_v29 }
 0x4bc   : > { %v11269_v42 = vadd.f32 %v3147_v2, %v11246_v29  ;;  %v8186_v20 = vpop.f32.mrb[118].mxu1 }
 0x4bd   : > { %v3150_v8 = vpop.f32.mrb[119].mxu1  ;;  %v11280_v26 = vadd.f32 %v8186_v20, %v11246_v29  ;;  %v3276_v45 = vsel %vm2081_vm0, %v11272_v31, 0.0 }
 0x4be   : > { %v11275_v30 = vadd.f32 %v3150_v8, %v11246_v29  ;;  %v3270_v49 = vsel %vm2081_vm0, %v11269_v42, 0.0 }
 0x4bf   : > { %3271 = vadd.xlane.f32.xlu0 %v3270_v49  ;;  %v3279_v24 = vsel %vm2081_vm0, %v11280_v26, 0.0 }
 0x4c0   : > { %v3273_v54 = vsel %vm2081_vm0, %v11275_v30, 0.0 }
 0x4c1   : > { %3274 = vadd.xlane.f32.xlu1 %v3273_v54 }
 0x4c3   : > { %3277 = vadd.xlane.f32.xlu0 %v3276_v45 }
 0x4c5   : > { %3280 = vadd.xlane.f32.xlu1 %v3279_v24 }
 0x4ca   : > { %v8189_v21 = vpop.f32.mrb[120].mxu1 }
 0x4cb   : > { %v3163_v16 = vpop.f32.mrb[121].mxu1  ;;  %v11292_v51 = vadd.f32 %v8189_v21, %v11246_v29 }
 0x4cc   : > { %v11289_v48 = vadd.f32 %v3163_v16, %v11246_v29  ;;  %v8190_v36 = vpop.f32.mrb[122].mxu1 }
 0x4cd   : > { %v3166_v17 = vpop.f32.mrb[123].mxu1  ;;  %v11300_v10 = vadd.f32 %v8190_v36, %v11246_v29  ;;  %v3288_v33 = vsel %vm2081_vm0, %v11292_v51, 0.0 }
 0x4ce   : > { %v11295_v53 = vadd.f32 %v3166_v17, %v11246_v29  ;;  %v3282_v23 = vsel %vm2081_vm0, %v11289_v48, 0.0 }
 0x4cf   : > { %3283 = vadd.xlane.f32.xlu0 %v3282_v23  ;;  %v3291_v59 = vsel %vm2081_vm0, %v11300_v10, 0.0 }
 0x4d0   : > { %v3285_v27 = vsel %vm2081_vm0, %v11295_v53, 0.0 }
 0x4d1   : > { %3286 = vadd.xlane.f32.xlu1 %v3285_v27 }
 0x4d3   : > { %3289 = vadd.xlane.f32.xlu0 %v3288_v33 }
 0x4d5   : > { %3292 = vadd.xlane.f32.xlu1 %v3291_v59 }
 0x4d9   : > { %v8193_v41 = vpop.f32.mrb[124].mxu1 }
 0x4da   : > { %v3179_v52 = vpop.f32.mrb[125].mxu1  ;;  %v11312_v40 = vadd.f32 %v8193_v41, %v11246_v29 }
 0x4db   : > { %v11309_v15 = vadd.f32 %v3179_v52, %v11246_v29  ;;  %v8194_v56 = vpop.f32.mrb[126].mxu1 }
 0x4dc   : > { %v3182_v47 = vpop.f32.mrb[127].mxu1  ;;  %v11320_v18 = vadd.f32 %v8194_v56, %v11246_v29  ;;  %v3300_v55 = vsel %vm2081_vm0, %v11312_v40, 0.0 }
 0x4dd   : > { %v11315_v34 = vadd.f32 %v3182_v47, %v11246_v29  ;;  %v3294_v14 = vsel %vm2081_vm0, %v11309_v15, 0.0 }
 0x4de   : > { %3295 = vadd.xlane.f32.xlu0 %v3294_v14  ;;  %v3303_v58 = vsel %vm2081_vm0, %v11320_v18, 0.0 }
 0x4df   : > { %v3297_v46 = vsel %vm2081_vm0, %v11315_v34, 0.0 }
 0x4e0   : > { %3298 = vadd.xlane.f32.xlu1 %v3297_v46 }
 0x4e2   : > { %3301 = vadd.xlane.f32.xlu0 %v3300_v55 }
 0x4e4   : > { %3304 = vadd.xlane.f32.xlu1 %v3303_v58 }
 0x4e9   : > { %v8197_v6 = vpop.f32.mrb[128].mxu1 }
 0x4ea   : > { %v3195_v9 = vpop.f32.mrb[129].mxu1  ;;  %v11332_v1 = vadd.f32 %v8197_v6, %v11246_v29 }
 0x4eb   : > { %v11329_v7 = vadd.f32 %v3195_v9, %v11246_v29  ;;  %v8198_v12 = vpop.f32.mrb[130].mxu1 }
 0x4ec   : > { %v3198_v43 = vpop.f32.mrb[131].mxu1  ;;  %v11340_v22 = vadd.f32 %v8198_v12, %v11246_v29  ;;  %v3312_v2 = vsel %vm2081_vm0, %v11332_v1, 0.0 }
 0x4ed   : > { %v11335_v39 = vadd.f32 %v3198_v43, %v11246_v29  ;;  %v3306_v44 = vsel %vm2081_vm0, %v11329_v7, 0.0 }
 0x4ee   : > { %3307 = vadd.xlane.f32.xlu0 %v3306_v44  ;;  %v3315_v20 = vsel %vm2081_vm0, %v11340_v22, 0.0 }
 0x4ef   : > { %v3309_v25 = vsel %vm2081_vm0, %v11335_v39, 0.0 }
 0x4f0   : > { %3310 = vadd.xlane.f32.xlu1 %v3309_v25 }
 0x4f2   : > { %3313 = vadd.xlane.f32.xlu0 %v3312_v2 }
 0x4f4   : > { %3316 = vadd.xlane.f32.xlu1 %v3315_v20 }
 0x4f9   : > { %v8201_v8 = vpop.f32.mrb[132].mxu1 }
 0x4fa   : > { %v3211_v49 = vpop.f32.mrb[133].mxu1  ;;  %v11352_v21 = vadd.f32 %v8201_v8, %v11246_v29 }
 0x4fb   : > { %v11349_v54 = vadd.f32 %v3211_v49, %v11246_v29  ;;  %v8202_v45 = vpop.f32.mrb[134].mxu1 }
 0x4fc   : > { %v3214_v24 = vpop.f32.mrb[135].mxu1  ;;  %v11360_v17 = vadd.f32 %v8202_v45, %v11246_v29  ;;  %v3324_v27 = vsel %vm2081_vm0, %v11352_v21, 0.0 }
 0x4fd   : > { %v11355_v16 = vadd.f32 %v3214_v24, %v11246_v29  ;;  %v3318_v36 = vsel %vm2081_vm0, %v11349_v54, 0.0 }
 0x4fe   : > { %3319 = vadd.xlane.f32.xlu0 %v3318_v36  ;;  %v3327_v33 = vsel %vm2081_vm0, %v11360_v17, 0.0 }
 0x4ff   : > { %v3321_v23 = vsel %vm2081_vm0, %v11355_v16, 0.0 }
 0x500   : > { %3322 = vadd.xlane.f32.xlu1 %v3321_v23 }
 0x502   : > { %3325 = vadd.xlane.f32.xlu0 %v3324_v27 }
 0x504   : > { %3328 = vadd.xlane.f32.xlu1 %v3327_v33 }
 0x508   : > { %v8205_v59 = vpop.f32.mrb[136].mxu1 }
 0x509   : > { %v3227_v41 = vpop.f32.mrb[137].mxu1  ;;  %v11372_v14 = vadd.f32 %v8205_v59, %v11246_v29 }
 0x50a   : > { %v11369_v52 = vadd.f32 %v3227_v41, %v11246_v29  ;;  %v8206_v56 = vpop.f32.mrb[138].mxu1 }
 0x50b   : > { %v3230_v47 = vpop.f32.mrb[139].mxu1  ;;  %v11380_v58 = vadd.f32 %v8206_v56, %v11246_v29  ;;  %v3336_v9 = vsel %vm2081_vm0, %v11372_v14, 0.0 }
 0x50c   : > { %v11375_v46 = vadd.f32 %v3230_v47, %v11246_v29  ;;  %v3330_v55 = vsel %vm2081_vm0, %v11369_v52, 0.0 }
 0x50d   : > { %3331 = vadd.xlane.f32.xlu0 %v3330_v55  ;;  %v3339_v12 = vsel %vm2081_vm0, %v11380_v58, 0.0 }
 0x50e   : > { %v3333_v6 = vsel %vm2081_vm0, %v11375_v46, 0.0 }
 0x50f   : > { %3334 = vadd.xlane.f32.xlu1 %v3333_v6 }
 0x511   : > { %3337 = vadd.xlane.f32.xlu0 %v3336_v9 }
 0x513   : > { %3340 = vadd.xlane.f32.xlu1 %v3339_v12 }
 0x517   : > { %v8209_v43 = vpop.f32.mrb[140].mxu1 }
 0x518   : > { %v3243_v44 = vpop.f32.mrb[141].mxu1  ;;  %v11392_v8 = vadd.f32 %v8209_v43, %v11246_v29 }
 0x519   : > { %v11389_v25 = vadd.f32 %v3243_v44, %v11246_v29  ;;  %v8210_v2 = vpop.f32.mrb[142].mxu1 }
 0x51a   : > { %v3246_v20 = vpop.f32.mrb[143].mxu1  ;;  %v11400_v24 = vadd.f32 %v8210_v2, %v11246_v29  ;;  %v3348_v23 = vsel %vm2081_vm0, %v11392_v8, 0.0 }
 0x51b   : > { %v11395_v49 = vadd.f32 %v3246_v20, %v11246_v29  ;;  %v3342_v45 = vsel %vm2081_vm0, %v11389_v25, 0.0 }
 0x51c   : > { %3343 = vadd.xlane.f32.xlu0 %v3342_v45  ;;  %v3351_v27 = vsel %vm2081_vm0, %v11400_v24, 0.0 }
 0x51d   : > { %v3345_v36 = vsel %vm2081_vm0, %v11395_v49, 0.0 }
 0x51e   : > { %3346 = vadd.xlane.f32.xlu1 %v3345_v36 }
 0x520   : > { %3349 = vadd.xlane.f32.xlu0 %v3348_v23 }
 0x522   : > { %3352 = vadd.xlane.f32.xlu1 %v3351_v27 }
 0x53a   : > { %v3260_v33 = vpop.xlane.xlu0 %3259 }
 0x53b   : > { %v3355_v59 = vmul.f32 0.03125, %v3260_v33 }
 0x53c   : > { %v3263_v41 = vpop.xlane.xlu1 %3262 }
 0x53d   : > { %v11409_v56 = vsub.f32 %v11249_v38, %v3355_v59  ;;  %v3356_v29 = vmul.f32 0.03125, %v3263_v41 }
 0x53e   : > { %v3266_v47 = vpop.xlane.xlu0 %3265 }
 0x53f   : > { %v11412_v55 = vsub.f32 %v11255_v62, %v3356_v29  ;;  %v3357_v6 = vmul.f32 0.03125, %v3266_v47  ;;  %v3419_v9 = vmul.f32 %v11409_v56, %v11409_v56 }
 0x540   : > { %v3269_v12 = vpop.xlane.xlu1 %3268 }
 0x541   : > { %v11417_v43 = vsub.f32 %v11252_v61, %v3357_v6  ;;  %v3358_v44 = vmul.f32 0.03125, %v3269_v12  ;;  %v3451_v2 = vsel %vm2081_vm0, %v3419_v9, 0.0  ;;  %v3420_v38 = vmul.f32 %v11412_v55, %v11412_v55 }
 0x542   : > { %3452 = vadd.xlane.f32.xlu0 %v3451_v2 }
 0x543   : > { %v11423_v20 = vsub.f32 %v11260_v13, %v3358_v44  ;;  %v3454_v62 = vsel %vm2081_vm0, %v3420_v38, 0.0  ;;  %v3421_v45 = vmul.f32 %v11417_v43, %v11417_v43 }
 0x544   : > { %3455 = vadd.xlane.f32.xlu1 %v3454_v62 }
 0x545   : > { %v3457_v36 = vsel %vm2081_vm0, %v3421_v45, 0.0  ;;  %v3422_v61 = vmul.f32 %v11423_v20, %v11423_v20 }
 0x546   : > { %3458 = vadd.xlane.f32.xlu0 %v3457_v36 }
 0x547   : > { %v3460_v23 = vsel %vm2081_vm0, %v3422_v61, 0.0 }
 0x548   : > { %3461 = vadd.xlane.f32.xlu1 %v3460_v23 }
 0x54c   : > { %v3272_v27 = vpop.xlane.xlu0 %3271 }
 0x54d   : > { %v3359_v33 = vmul.f32 0.03125, %v3272_v27 }
 0x54e   : > { %v3275_v59 = vpop.xlane.xlu1 %3274 }
 0x54f   : > { %v11433_v13 = vsub.f32 %v11269_v42, %v3359_v33  ;;  %v3360_v41 = vmul.f32 0.03125, %v3275_v59 }
 0x550   : > { %v3278_v29 = vpop.xlane.xlu0 %3277 }
 0x551   : > { %v11436_v47 = vsub.f32 %v11275_v30, %v3360_v41  ;;  %v3361_v6 = vmul.f32 0.03125, %v3278_v29  ;;  %v3423_v9 = vmul.f32 %v11433_v13, %v11433_v13 }
 0x552   : > { %v3281_v12 = vpop.xlane.xlu1 %3280 }
 0x553   : > { %v11441_v44 = vsub.f32 %v11272_v31, %v3361_v6  ;;  %v3362_v2 = vmul.f32 0.03125, %v3281_v12  ;;  %v3463_v38 = vsel %vm2081_vm0, %v3423_v9, 0.0  ;;  %v3424_v42 = vmul.f32 %v11436_v47, %v11436_v47 }
 0x554   : > { %3464 = vadd.xlane.f32.xlu0 %v3463_v38 }
 0x555   : > { %v11447_v62 = vsub.f32 %v11280_v26, %v3362_v2  ;;  %v3466_v30 = vsel %vm2081_vm0, %v3424_v42, 0.0  ;;  %v3425_v45 = vmul.f32 %v11441_v44, %v11441_v44 }
 0x556   : > { %3467 = vadd.xlane.f32.xlu1 %v3466_v30 }
 0x557   : > { %v3469_v36 = vsel %vm2081_vm0, %v3425_v45, 0.0  ;;  %v3426_v31 = vmul.f32 %v11447_v62, %v11447_v62 }
 0x558   : > { %3470 = vadd.xlane.f32.xlu0 %v3469_v36 }
 0x559   : > { %v3472_v61 = vsel %vm2081_vm0, %v3426_v31, 0.0 }
 0x55a   : > { %3473 = vadd.xlane.f32.xlu1 %v3472_v61 }
 0x55c   : > { %v3284_v23 = vpop.xlane.xlu0 %3283 }
 0x55d   : > { %v3363_v27 = vmul.f32 0.03125, %v3284_v23 }
 0x55e   : > { %v3287_v33 = vpop.xlane.xlu1 %3286 }
 0x55f   : > { %v11457_v26 = vsub.f32 %v11289_v48, %v3363_v27  ;;  %v3364_v59 = vmul.f32 0.03125, %v3287_v33 }
 0x560   : > { %v3290_v41 = vpop.xlane.xlu0 %3289 }
 0x561   : > { %v11460_v29 = vsub.f32 %v11295_v53, %v3364_v59  ;;  %v3365_v6 = vmul.f32 0.03125, %v3290_v41  ;;  %v3427_v9 = vmul.f32 %v11457_v26, %v11457_v26 }
 0x562   : > { %v3293_v12 = vpop.xlane.xlu1 %3292 }
 0x563   : > { %v11465_v2 = vsub.f32 %v11292_v51, %v3365_v6  ;;  %v3366_v38 = vmul.f32 0.03125, %v3293_v12  ;;  %v3475_v42 = vsel %vm2081_vm0, %v3427_v9, 0.0  ;;  %v3428_v48 = vmul.f32 %v11460_v29, %v11460_v29 }
 0x564   : > { %3476 = vadd.xlane.f32.xlu0 %v3475_v42 }
 0x565   : > { %v11471_v30 = vsub.f32 %v11300_v10, %v3366_v38  ;;  %v3478_v53 = vsel %vm2081_vm0, %v3428_v48, 0.0  ;;  %v3429_v45 = vmul.f32 %v11465_v2, %v11465_v2 }
 0x566   : > { %3479 = vadd.xlane.f32.xlu1 %v3478_v53 }
 0x567   : > { %v3481_v36 = vsel %vm2081_vm0, %v3429_v45, 0.0  ;;  %v3430_v51 = vmul.f32 %v11471_v30, %v11471_v30 }
 0x568   : > { %3482 = vadd.xlane.f32.xlu0 %v3481_v36 }
 0x569   : > { %v3484_v31 = vsel %vm2081_vm0, %v3430_v51, 0.0 }
 0x56a   : > { %3485 = vadd.xlane.f32.xlu1 %v3484_v31 }
 0x56b   : > { %v3296_v61 = vpop.xlane.xlu0 %3295 }
 0x56c   : > { %v3367_v23 = vmul.f32 0.03125, %v3296_v61 }
 0x56d   : > { %v3299_v27 = vpop.xlane.xlu1 %3298 }
 0x56e   : > { %v11481_v10 = vsub.f32 %v11309_v15, %v3367_v23  ;;  %v3368_v33 = vmul.f32 0.03125, %v3299_v27 }
 0x56f   : > { %v3302_v59 = vpop.xlane.xlu0 %3301 }
 0x570   : > { %v11484_v41 = vsub.f32 %v11315_v34, %v3368_v33  ;;  %v3369_v6 = vmul.f32 0.03125, %v3302_v59  ;;  %v3431_v9 = vmul.f32 %v11481_v10, %v11481_v10 }
 0x571   : > { %v3305_v12 = vpop.xlane.xlu1 %3304 }
 0x572   : > { %v11489_v38 = vsub.f32 %v11312_v40, %v3369_v6  ;;  %v3370_v42 = vmul.f32 0.03125, %v3305_v12  ;;  %v3487_v48 = vsel %vm2081_vm0, %v3431_v9, 0.0  ;;  %v3432_v15 = vmul.f32 %v11484_v41, %v11484_v41 }
 0x573   : > { %3488 = vadd.xlane.f32.xlu0 %v3487_v48 }
 0x574   : > { %v11495_v53 = vsub.f32 %v11320_v18, %v3370_v42  ;;  %v3490_v34 = vsel %vm2081_vm0, %v3432_v15, 0.0  ;;  %v3433_v45 = vmul.f32 %v11489_v38, %v11489_v38 }
 0x575   : > { %3491 = vadd.xlane.f32.xlu1 %v3490_v34 }
 0x576   : > { %v3493_v36 = vsel %vm2081_vm0, %v3433_v45, 0.0  ;;  %v3434_v40 = vmul.f32 %v11495_v53, %v11495_v53 }
 0x577   : > { %3494 = vadd.xlane.f32.xlu0 %v3493_v36 }
 0x578   : > { %v3496_v51 = vsel %vm2081_vm0, %v3434_v40, 0.0 }
 0x579   : > { %3497 = vadd.xlane.f32.xlu1 %v3496_v51 }
 0x57b   : > { %v3308_v31 = vpop.xlane.xlu0 %3307 }
 0x57c   : > { %v3371_v61 = vmul.f32 0.03125, %v3308_v31 }
 0x57d   : > { %v3311_v23 = vpop.xlane.xlu1 %3310 }
 0x57e   : > { %v11505_v18 = vsub.f32 %v11329_v7, %v3371_v61  ;;  %v3372_v27 = vmul.f32 0.03125, %v3311_v23 }
 0x57f   : > { %v3314_v33 = vpop.xlane.xlu0 %3313 }
 0x580   : > { %v11508_v59 = vsub.f32 %v11335_v39, %v3372_v27  ;;  %v3373_v6 = vmul.f32 0.03125, %v3314_v33  ;;  %v3435_v9 = vmul.f32 %v11505_v18, %v11505_v18 }
 0x581   : > { %v3317_v12 = vpop.xlane.xlu1 %3316 }
 0x582   : > { %v11513_v42 = vsub.f32 %v11332_v1, %v3373_v6  ;;  %v3374_v48 = vmul.f32 0.03125, %v3317_v12  ;;  %v3499_v15 = vsel %vm2081_vm0, %v3435_v9, 0.0  ;;  %v3436_v7 = vmul.f32 %v11508_v59, %v11508_v59 }
 0x583   : > { %3500 = vadd.xlane.f32.xlu0 %v3499_v15 }
 0x584   : > { %v11519_v34 = vsub.f32 %v11340_v22, %v3374_v48  ;;  %v3502_v39 = vsel %vm2081_vm0, %v3436_v7, 0.0  ;;  %v3437_v45 = vmul.f32 %v11513_v42, %v11513_v42 }
 0x585   : > { %3503 = vadd.xlane.f32.xlu1 %v3502_v39 }
 0x586   : > { %v3505_v36 = vsel %vm2081_vm0, %v3437_v45, 0.0  ;;  %v3438_v1 = vmul.f32 %v11519_v34, %v11519_v34 }
 0x587   : > { %3506 = vadd.xlane.f32.xlu0 %v3505_v36 }
 0x588   : > { %v3508_v40 = vsel %vm2081_vm0, %v3438_v1, 0.0 }
 0x589   : > { %3509 = vadd.xlane.f32.xlu1 %v3508_v40 }
 0x58b   : > { %v3320_v51 = vpop.xlane.xlu0 %3319 }
 0x58c   : > { %v3375_v31 = vmul.f32 0.03125, %v3320_v51 }
 0x58d   : > { %v3323_v61 = vpop.xlane.xlu1 %3322 }
 0x58e   : > { %v11529_v22 = vsub.f32 %v11349_v54, %v3375_v31  ;;  %v3376_v23 = vmul.f32 0.03125, %v3323_v61 }
 0x58f   : > { %v3326_v27 = vpop.xlane.xlu0 %3325 }
 0x590   : > { %v11532_v33 = vsub.f32 %v11355_v16, %v3376_v23  ;;  %v3377_v6 = vmul.f32 0.03125, %v3326_v27  ;;  %v3439_v9 = vmul.f32 %v11529_v22, %v11529_v22 }
 0x591   : > { %v3329_v12 = vpop.xlane.xlu1 %3328 }
 0x592   : > { %v11537_v48 = vsub.f32 %v11352_v21, %v3377_v6  ;;  %v3378_v15 = vmul.f32 0.03125, %v3329_v12  ;;  %v3511_v7 = vsel %vm2081_vm0, %v3439_v9, 0.0  ;;  %v3440_v54 = vmul.f32 %v11532_v33, %v11532_v33 }
 0x593   : > { %3512 = vadd.xlane.f32.xlu0 %v3511_v7 }
 0x594   : > { %v11543_v39 = vsub.f32 %v11360_v17, %v3378_v15  ;;  %v3514_v16 = vsel %vm2081_vm0, %v3440_v54, 0.0  ;;  %v3441_v45 = vmul.f32 %v11537_v48, %v11537_v48 }
 0x595   : > { %3515 = vadd.xlane.f32.xlu1 %v3514_v16 }
 0x596   : > { %v3517_v36 = vsel %vm2081_vm0, %v3441_v45, 0.0  ;;  %v3442_v21 = vmul.f32 %v11543_v39, %v11543_v39 }
 0x597   : > { %3518 = vadd.xlane.f32.xlu0 %v3517_v36 }
 0x598   : > { %v3520_v1 = vsel %vm2081_vm0, %v3442_v21, 0.0 }
 0x599   : > { %3521 = vadd.xlane.f32.xlu1 %v3520_v1 }
 0x59a   : > { %v3332_v40 = vpop.xlane.xlu0 %3331 }
 0x59b   : > { %v3379_v51 = vmul.f32 0.03125, %v3332_v40 }
 0x59c   : > { %v3335_v31 = vpop.xlane.xlu1 %3334 }
 0x59d   : > { %v11553_v17 = vsub.f32 %v11369_v52, %v3379_v51  ;;  %v3380_v61 = vmul.f32 0.03125, %v3335_v31 }
 0x59e   : > { %v3338_v23 = vpop.xlane.xlu0 %3337 }
 0x59f   : > { %v11556_v27 = vsub.f32 %v11375_v46, %v3380_v61  ;;  %v3381_v6 = vmul.f32 0.03125, %v3338_v23  ;;  %v3443_v9 = vmul.f32 %v11553_v17, %v11553_v17 }
 0x5a0   : > { %v3341_v12 = vpop.xlane.xlu1 %3340 }
 0x5a1   : > { %v11561_v15 = vsub.f32 %v11372_v14, %v3381_v6  ;;  %v3382_v7 = vmul.f32 0.03125, %v3341_v12  ;;  %v3523_v54 = vsel %vm2081_vm0, %v3443_v9, 0.0  ;;  %v3444_v52 = vmul.f32 %v11556_v27, %v11556_v27 }
 0x5a2   : > { %3524 = vadd.xlane.f32.xlu0 %v3523_v54 }
 0x5a3   : > { %v11567_v16 = vsub.f32 %v11380_v58, %v3382_v7  ;;  %v3526_v46 = vsel %vm2081_vm0, %v3444_v52, 0.0  ;;  %v3445_v45 = vmul.f32 %v11561_v15, %v11561_v15 }
 0x5a4   : > { %3527 = vadd.xlane.f32.xlu1 %v3526_v46 }
 0x5a5   : > { %v3529_v36 = vsel %vm2081_vm0, %v3445_v45, 0.0  ;;  %v3446_v14 = vmul.f32 %v11567_v16, %v11567_v16 }
 0x5a6   : > { %3530 = vadd.xlane.f32.xlu0 %v3529_v36 }
 0x5a7   : > { %v3532_v21 = vsel %vm2081_vm0, %v3446_v14, 0.0 }
 0x5a8   : > { %3533 = vadd.xlane.f32.xlu1 %v3532_v21 }
 0x5a9   : > { %v3344_v1 = vpop.xlane.xlu0 %3343 }
 0x5aa   : > { %v3383_v40 = vmul.f32 0.03125, %v3344_v1 }
 0x5ab   : > { %v3347_v51 = vpop.xlane.xlu1 %3346 }
 0x5ac   : > { %v11577_v58 = vsub.f32 %v11389_v25, %v3383_v40  ;;  %v3384_v31 = vmul.f32 0.03125, %v3347_v51 }
 0x5ad   : > { %v3350_v61 = vpop.xlane.xlu0 %3349 }
 0x5ae   : > { %v11580_v23 = vsub.f32 %v11395_v49, %v3384_v31  ;;  %v3385_v6 = vmul.f32 0.03125, %v3350_v61  ;;  %v3447_v9 = vmul.f32 %v11577_v58, %v11577_v58 }
 0x5af   : > { %v3353_v12 = vpop.xlane.xlu1 %3352 }
 0x5b0   : > { %v11585_v7 = vsub.f32 %v11392_v8, %v3385_v6  ;;  %v3386_v54 = vmul.f32 0.03125, %v3353_v12  ;;  %v3535_v52 = vsel %vm2081_vm0, %v3447_v9, 0.0  ;;  %v3448_v25 = vmul.f32 %v11580_v23, %v11580_v23 }
 0x5b1   : > { %3536 = vadd.xlane.f32.xlu0 %v3535_v52 }
 0x5b2   : > { %v11591_v46 = vsub.f32 %v11400_v24, %v3386_v54  ;;  %v3538_v49 = vsel %vm2081_vm0, %v3448_v25, 0.0  ;;  %v3449_v45 = vmul.f32 %v11585_v7, %v11585_v7  ;;  %v14243_v25 = vsub.s32 4, %v10624_v4 }
 0x5b3   : > { %3539 = vadd.xlane.f32.xlu1 %v3538_v49  ;;  %v14240_v49 = vsub.s32 5, %v10624_v4 }
 0x5b4   : > { %v3541_v36 = vsel %vm2081_vm0, %v3449_v45, 0.0  ;;  %v3450_v8 = vmul.f32 %v11591_v46, %v11591_v46  ;;  %v11605_v45 = vrot.slane %v11241_v5, %v14243_v25 }
 0x5b5   : > { %3542 = vadd.xlane.f32.xlu0 %v3541_v36 }
 0x5b6   : > { %v3544_v14 = vsel %vm2081_vm0, %v3450_v8, 0.0 }
 0x5b7   : > { %3545 = vadd.xlane.f32.xlu1 %v3544_v14  ;;  %v11611_v14 = vrot.slane %v11241_v5, %v14240_v49 }
 0x5cf   : > { %v3453_v21 = vpop.xlane.xlu0 %3452 }
 0x5d0   : > { %v3547_v1 = vmul.f32 0.03125, %v3453_v21 }
 0x5d1   : > { %v3456_v40 = vpop.xlane.xlu1 %3455 }
 0x5d2   : > { %v3579_v24 = vadd.f32 1e-05, %v3547_v1  ;;  %v3548_v51 = vmul.f32 0.03125, %v3456_v40 }
 0x5d3   : > { %v3459_v31 = vpop.xlane.xlu0 %3458 }
 0x5d4   : > { %8906 = vrsqrt.f32 %v3579_v24  ;;  %v3580_v61 = vadd.f32 1e-05, %v3548_v51  ;;  %v3549_v6 = vmul.f32 0.03125, %v3459_v31 }
 0x5d5   : > { %v3462_v9 = vpop.xlane.xlu1 %3461 }
 0x5d6   : > { %8908 = vrsqrt.f32 %v3580_v61  ;;  %v3581_v12 = vadd.f32 1e-05, %v3549_v6  ;;  %v3550_v54 = vmul.f32 0.03125, %v3462_v9 }
 0x5d8   : > { %8910 = vrsqrt.f32 %v3581_v12  ;;  %v3582_v52 = vadd.f32 1e-05, %v3550_v54 }
 0x5da   : > { %8912 = vrsqrt.f32 %v3582_v52 }
 0x5de   : > { %v8907_v36 = vpop.eup %8906 }
 0x5df   : > { %v3643_v8 = vmul.f32 %v8907_v36, %v11409_v56 }
 0x5e0   : > { %v8909_v21 = vpop.eup %8908 }
 0x5e1   : > { %v3465_v1 = vpop.xlane.xlu0 %3464  ;;  %v3679_v40 = vmul.f32 %v11605_v45, %v3643_v8  ;;  %v3644_v24 = vmul.f32 %v8909_v21, %v11412_v55 }
 0x5e2   : > { %v8911_v51 = vpop.eup %8910  ;;  %v3551_v31 = vmul.f32 0.03125, %v3465_v1 }
 0x5e3   : > { %v3468_v61 = vpop.xlane.xlu1 %3467  ;;  %v3715_v6 = vadd.f32 %v11611_v14, %v3679_v40  ;;  %v3680_v9 = vmul.f32 %v11605_v45, %v3644_v24  ;;  %v3645_v56 = vmul.f32 %v8911_v51, %v11417_v43 }
 0x5e4   : > { %v8913_v12 = vpop.eup %8912  ;;  %v3583_v54 = vadd.f32 1e-05, %v3551_v31  ;;  %v3552_v52 = vmul.f32 0.03125, %v3468_v61 }
 0x5e5   : > { %v3471_v5 = vpop.xlane.xlu0 %3470  ;;  %v11619_v36 = vadd.f32 %v3715_v6, %v10360_v19  ;;  %v3716_v8 = vadd.f32 %v11611_v14, %v3680_v9  ;;  %v3681_v55 = vmul.f32 %v11605_v45, %v3645_v56  ;;  %v3646_v21 = vmul.f32 %v8913_v12, %v11423_v20 }
 0x5e6   : > { %8914 = vrsqrt.f32 %v3583_v54  ;;  %v3584_v1 = vadd.f32 1e-05, %v3552_v52  ;;  %v3553_v40 = vmul.f32 0.03125, %v3471_v5 }
 0x5e7   : > { %v3474_v49 = vpop.xlane.xlu1 %3473  ;;  %v3779_v43 = vsel %vm2081_vm0, %v11619_v36, 0.0  ;;  %v11627_v24 = vadd.f32 %v3716_v8, %v10363_v57  ;;  %v3717_v51 = vadd.f32 %v11611_v14, %v3681_v55  ;;  %v3682_v19 = vmul.f32 %v11605_v45, %v3646_v21 }
 0x5e8   : > { %8916 = vrsqrt.f32 %v3584_v1  ;;  %v3585_v31 = vadd.f32 1e-05, %v3553_v40  ;;  %v3554_v61 = vmul.f32 0.03125, %v3474_v49  ;;  %3780 = vadd.xlane.f32.xlu0 %v3779_v43 }
 0x5e9   : > { %v3782_v20 = vsel %vm2081_vm0, %v11627_v24, 0.0  ;;  %v11634_v6 = vadd.f32 %v3717_v51, %v10389_v63  ;;  %v3718_v9 = vadd.f32 %v11611_v14, %v3682_v19 }
 0x5ea   : > { %8918 = vrsqrt.f32 %v3585_v31  ;;  %v3586_v56 = vadd.f32 1e-05, %v3554_v61  ;;  %3783 = vadd.xlane.f32.xlu1 %v3782_v20 }
 0x5eb   : > { %v3785_v57 = vsel %vm2081_vm0, %v11634_v6, 0.0  ;;  %v11640_v12 = vadd.f32 %v3718_v9, %v10392_v50 }
 0x5ec   : > { %8920 = vrsqrt.f32 %v3586_v56  ;;  %3786 = vadd.xlane.f32.xlu0 %v3785_v57 }
 0x5ed   : > { %v3788_v49 = vsel %vm2081_vm0, %v11640_v12, 0.0 }
 0x5ee   : > { %3789 = vadd.xlane.f32.xlu1 %v3788_v49 }
 0x5f0   : > { %v8915_v54 = vpop.eup %8914 }
 0x5f1   : > { %v3477_v63 = vpop.xlane.xlu0 %3476  ;;  %v3647_v52 = vmul.f32 %v8915_v54, %v11433_v13 }
 0x5f2   : > { %v8917_v5 = vpop.eup %8916  ;;  %v3555_v8 = vmul.f32 0.03125, %v3477_v63 }
 0x5f3   : > { %v3480_v55 = vpop.xlane.xlu1 %3479  ;;  %v3683_v21 = vmul.f32 %v11605_v45, %v3647_v52  ;;  %v3648_v1 = vmul.f32 %v8917_v5, %v11436_v47 }
 0x5f4   : > { %v8919_v40 = vpop.eup %8918  ;;  %v3587_v50 = vadd.f32 1e-05, %v3555_v8  ;;  %v3556_v43 = vmul.f32 0.03125, %v3480_v55 }
 0x5f5   : > { %v3483_v51 = vpop.xlane.xlu0 %3482  ;;  %v3719_v19 = vadd.f32 %v11611_v14, %v3683_v21  ;;  %v3684_v31 = vmul.f32 %v11605_v45, %v3648_v1  ;;  %v3649_v61 = vmul.f32 %v8919_v40, %v11441_v44 }
 0x5f6   : > { %v8921_v20 = vpop.eup %8920  ;;  %8922 = vrsqrt.f32 %v3587_v50  ;;  %v3588_v13 = vadd.f32 1e-05, %v3556_v43  ;;  %v3557_v9 = vmul.f32 0.03125, %v3483_v51 }
 0x5f7   : > { %v3486_v56 = vpop.xlane.xlu1 %3485  ;;  %v11651_v57 = vadd.f32 %v3719_v19, %v10418_v35  ;;  %v3720_v47 = vadd.f32 %v11611_v14, %v3684_v31  ;;  %v3685_v49 = vmul.f32 %v11605_v45, %v3649_v61  ;;  %v3650_v54 = vmul.f32 %v8921_v20, %v11447_v62 }
 0x5f8   : > { %8924 = vrsqrt.f32 %v3588_v13  ;;  %v3589_v63 = vadd.f32 1e-05, %v3557_v9  ;;  %v3558_v52 = vmul.f32 0.03125, %v3486_v56 }
 0x5f9   : > { %v3791_v44 = vsel %vm2081_vm0, %v11651_v57, 0.0  ;;  %v11659_v5 = vadd.f32 %v3720_v47, %v10421_v11  ;;  %v3721_v8 = vadd.f32 %v11611_v14, %v3685_v49  ;;  %v3686_v35 = vmul.f32 %v11605_v45, %v3650_v54 }
 0x5fa   : > { %8926 = vrsqrt.f32 %v3589_v63  ;;  %v3590_v55 = vadd.f32 1e-05, %v3558_v52  ;;  %3792 = vadd.xlane.f32.xlu0 %v3791_v44 }
 0x5fb   : > { %v3794_v21 = vsel %vm2081_vm0, %v11659_v5, 0.0  ;;  %v11666_v62 = vadd.f32 %v3721_v8, %v10447_v28  ;;  %v3722_v1 = vadd.f32 %v11611_v14, %v3686_v35 }
 0x5fc   : > { %8928 = vrsqrt.f32 %v3590_v55  ;;  %3795 = vadd.xlane.f32.xlu1 %v3794_v21 }
 0x5fd   : > { %v3797_v11 = vsel %vm2081_vm0, %v11666_v62, 0.0  ;;  %v11672_v40 = vadd.f32 %v3722_v1, %v10450_v37 }
 0x5fe   : > { %3798 = vadd.xlane.f32.xlu0 %v3797_v11 }
 0x5ff   : > { %v3800_v50 = vsel %vm2081_vm0, %v11672_v40, 0.0 }
 0x600   : > { %v8923_v43 = vpop.eup %8922  ;;  %3801 = vadd.xlane.f32.xlu1 %v3800_v50  ;;  %v3489_v51 = vpop.xlane.xlu0 %3488 }
 0x601   : > { %v3559_v19 = vmul.f32 0.03125, %v3489_v51  ;;  %v3651_v28 = vmul.f32 %v8923_v43, %v11457_v26 }
 0x602   : > { %v8925_v31 = vpop.eup %8924  ;;  %v3492_v61 = vpop.xlane.xlu1 %3491 }
 0x603   : > { %v3591_v20 = vadd.f32 1e-05, %v3559_v19  ;;  %v3560_v13 = vmul.f32 0.03125, %v3492_v61  ;;  %v3687_v9 = vmul.f32 %v11605_v45, %v3651_v28  ;;  %v3652_v56 = vmul.f32 %v8925_v31, %v11460_v29  ;;  %v14289_v61 = vld [vmem:[#allocation5_spill] sm:$0xff] }
 0x604   : > { %v8927_v37 = vpop.eup %8926  ;;  %v3495_v47 = vpop.xlane.xlu0 %3494 }
 0x605   : > { %8930 = vrsqrt.f32 %v3591_v20  ;;  %v3592_v49 = vadd.f32 1e-05, %v3560_v13  ;;  %v3561_v54 = vmul.f32 0.03125, %v3495_v47  ;;  %v3723_v63 = vadd.f32 %v11611_v14, %v3687_v9 }
 0x606   : > { %v8929_v52 = vpop.eup %8928  ;;  %v3498_v44 = vpop.xlane.xlu1 %3497  ;;  %v3688_v8 = vmul.f32 %v11605_v45, %v3652_v56  ;;  %v3653_v26 = vmul.f32 %v8927_v37, %v11465_v2 }
 0x607   : > { %8932 = vrsqrt.f32 %v3592_v49  ;;  %v3593_v35 = vadd.f32 1e-05, %v3561_v54  ;;  %v3562_v55 = vmul.f32 0.03125, %v3498_v44  ;;  %v11683_v21 = vadd.f32 %v3723_v63, %v10469_v0 }
 0x608   : > { %v3724_v29 = vadd.f32 %v11611_v14, %v3688_v8  ;;  %v3689_v1 = vmul.f32 %v11605_v45, %v3653_v26  ;;  %v3654_v11 = vmul.f32 %v8929_v52, %v11471_v30 }
 0x609   : > { %8934 = vrsqrt.f32 %v3593_v35  ;;  %v3594_v50 = vadd.f32 1e-05, %v3562_v55  ;;  %v3803_v43 = vsel %vm2081_vm0, %v11683_v21, 0.0 }
 0x60a   : > { %3804 = vadd.xlane.f32.xlu0 %v3803_v43  ;;  %v11691_v2 = vadd.f32 %v3724_v29, %v10472_v3  ;;  %v3725_v51 = vadd.f32 %v11611_v14, %v3689_v1  ;;  %v3690_v0 = vmul.f32 %v11605_v45, %v3654_v11 }
 0x60b   : > { %8936 = vrsqrt.f32 %v3594_v50  ;;  %v14290_v50 = vld [vmem:[#allocation6_spill] sm:$0xff] }
 0x60c   : > { %v3806_v19 = vsel %vm2081_vm0, %v11691_v2, 0.0  ;;  %v11698_v28 = vadd.f32 %v3725_v51, %v10486_v60  ;;  %v3726_v30 = vadd.f32 %v11611_v14, %v3690_v0 }
 0x60d   : > { %3807 = vadd.xlane.f32.xlu1 %v3806_v19 }
 0x60e   : > { %v3809_v31 = vsel %vm2081_vm0, %v11698_v28, 0.0  ;;  %v11704_v3 = vadd.f32 %v3726_v30, %v14289_v61 }
 0x60f   : > { %v8931_v20 = vpop.eup %8930  ;;  %3810 = vadd.xlane.f32.xlu0 %v3809_v31  ;;  %v14291_v31 = vld [vmem:[#allocation7_spill] sm:$0xff] }
 0x610   : > { %v3812_v13 = vsel %vm2081_vm0, %v11704_v3, 0.0  ;;  %v3501_v9 = vpop.xlane.xlu0 %3500  ;;  %v3655_v56 = vmul.f32 %v8931_v20, %v11481_v10 }
 0x611   : > { %v8933_v37 = vpop.eup %8932  ;;  %3813 = vadd.xlane.f32.xlu1 %v3812_v13  ;;  %v3563_v60 = vmul.f32 0.03125, %v3501_v9 }
 0x612   : > { %v3504_v47 = vpop.xlane.xlu1 %3503  ;;  %v3691_v49 = vmul.f32 %v11605_v45, %v3655_v56  ;;  %v3656_v54 = vmul.f32 %v8933_v37, %v11484_v41 }
 0x613   : > { %v8935_v63 = vpop.eup %8934  ;;  %v3595_v52 = vadd.f32 1e-05, %v3563_v60  ;;  %v3564_v44 = vmul.f32 0.03125, %v3504_v47 }
 0x614   : > { %v3507_v8 = vpop.xlane.xlu0 %3506  ;;  %v3727_v26 = vadd.f32 %v11611_v14, %v3691_v49  ;;  %v3692_v35 = vmul.f32 %v11605_v45, %v3656_v54  ;;  %v3657_v55 = vmul.f32 %v8935_v63, %v11489_v38  ;;  %v14293_v49 = vld [vmem:[#allocation9_spill] sm:$0xff] }
 0x615   : > { %v8937_v29 = vpop.eup %8936  ;;  %8938 = vrsqrt.f32 %v3595_v52  ;;  %v3596_v10 = vadd.f32 1e-05, %v3564_v44  ;;  %v3565_v1 = vmul.f32 0.03125, %v3507_v8 }
 0x616   : > { %v3510_v11 = vpop.xlane.xlu1 %3509  ;;  %v11715_v43 = vadd.f32 %v3727_v26, %v14290_v50  ;;  %v3728_v41 = vadd.f32 %v11611_v14, %v3692_v35  ;;  %v3693_v51 = vmul.f32 %v11605_v45, %v3657_v55  ;;  %v3658_v0 = vmul.f32 %v8937_v29, %v11495_v53  ;;  %v14292_v53 = vld [vmem:[#allocation8_spill] sm:$0xff] }
 0x617   : > { %8940 = vrsqrt.f32 %v3596_v10  ;;  %v3597_v19 = vadd.f32 1e-05, %v3565_v1  ;;  %v3566_v30 = vmul.f32 0.03125, %v3510_v11 }
 0x618   : > { %v3815_v38 = vsel %vm2081_vm0, %v11715_v43, 0.0  ;;  %v11723_v61 = vadd.f32 %v3728_v41, %v14291_v31  ;;  %v3729_v20 = vadd.f32 %v11611_v14, %v3693_v51  ;;  %v3694_v13 = vmul.f32 %v11605_v45, %v3658_v0 }
 0x619   : > { %8942 = vrsqrt.f32 %v3597_v19  ;;  %v3598_v9 = vadd.f32 1e-05, %v3566_v30  ;;  %3816 = vadd.xlane.f32.xlu0 %v3815_v38 }
 0x61a   : > { %v3818_v56 = vsel %vm2081_vm0, %v11723_v61, 0.0  ;;  %v11730_v37 = vadd.f32 %v3729_v20, %v14292_v53  ;;  %v3730_v60 = vadd.f32 %v11611_v14, %v3694_v13  ;;  %v14294_v20 = vld [vmem:[#allocation10_spill] sm:$0xff] }
 0x61b   : > { %8944 = vrsqrt.f32 %v3598_v9  ;;  %3819 = vadd.xlane.f32.xlu1 %v3818_v56 }
 0x61c   : > { %v3821_v47 = vsel %vm2081_vm0, %v11730_v37, 0.0  ;;  %v11736_v54 = vadd.f32 %v3730_v60, %v14293_v49 }
 0x61d   : > { %3822 = vadd.xlane.f32.xlu0 %v3821_v47  ;;  %v14295_v47 = vld [vmem:[#allocation11_spill] sm:$0xff] }
 0x61e   : > { %v3824_v63 = vsel %vm2081_vm0, %v11736_v54, 0.0 }
 0x61f   : > { %v8939_v52 = vpop.eup %8938  ;;  %3825 = vadd.xlane.f32.xlu1 %v3824_v63 }
 0x620   : > { %v3513_v44 = vpop.xlane.xlu0 %3512  ;;  %v3659_v8 = vmul.f32 %v8939_v52, %v11505_v18 }
 0x621   : > { %v8941_v26 = vpop.eup %8940  ;;  %v3567_v35 = vmul.f32 0.03125, %v3513_v44 }
 0x622   : > { %v3516_v55 = vpop.xlane.xlu1 %3515  ;;  %v3695_v29 = vmul.f32 %v11605_v45, %v3659_v8  ;;  %v3660_v10 = vmul.f32 %v8941_v26, %v11508_v59 }
 0x623   : > { %v8943_v1 = vpop.eup %8942  ;;  %v3599_v11 = vadd.f32 1e-05, %v3567_v35  ;;  %v3568_v50 = vmul.f32 0.03125, %v3516_v55 }
 0x624   : > { %v3519_v41 = vpop.xlane.xlu0 %3518  ;;  %v3731_v51 = vadd.f32 %v11611_v14, %v3695_v29  ;;  %v3696_v0 = vmul.f32 %v11605_v45, %v3660_v10  ;;  %v3661_v19 = vmul.f32 %v8943_v1, %v11513_v42  ;;  %v14297_v29 = vld [vmem:[#allocation13_spill] sm:$0xff] }
 0x625   : > { %v8945_v30 = vpop.eup %8944  ;;  %8946 = vrsqrt.f32 %v3599_v11  ;;  %v3600_v18 = vadd.f32 1e-05, %v3568_v50  ;;  %v3569_v38 = vmul.f32 0.03125, %v3519_v41 }
 0x626   : > { %v3522_v31 = vpop.xlane.xlu1 %3521  ;;  %v11747_v13 = vadd.f32 %v3731_v51, %v14294_v20  ;;  %v3732_v59 = vadd.f32 %v11611_v14, %v3696_v0  ;;  %v3697_v9 = vmul.f32 %v11605_v45, %v3661_v19  ;;  %v3662_v56 = vmul.f32 %v8945_v30, %v11519_v34  ;;  %v14296_v34 = vld [vmem:[#allocation12_spill] sm:$0xff] }
 0x627   : > { %8948 = vrsqrt.f32 %v3600_v18  ;;  %v3601_v53 = vadd.f32 1e-05, %v3569_v38  ;;  %v3570_v60 = vmul.f32 0.03125, %v3522_v31 }
 0x628   : > { %v3827_v42 = vsel %vm2081_vm0, %v11747_v13, 0.0  ;;  %v11755_v49 = vadd.f32 %v3732_v59, %v14295_v47  ;;  %v3733_v63 = vadd.f32 %v11611_v14, %v3697_v9  ;;  %v3698_v52 = vmul.f32 %v11605_v45, %v3662_v56 }
 0x629   : > { %8950 = vrsqrt.f32 %v3601_v53  ;;  %v3602_v44 = vadd.f32 1e-05, %v3570_v60  ;;  %3828 = vadd.xlane.f32.xlu0 %v3827_v42 }
 0x62a   : > { %v3830_v8 = vsel %vm2081_vm0, %v11755_v49, 0.0  ;;  %v11762_v26 = vadd.f32 %v3733_v63, %v14296_v34  ;;  %v3734_v35 = vadd.f32 %v11611_v14, %v3698_v52 }
 0x62b   : > { %8952 = vrsqrt.f32 %v3602_v44  ;;  %3831 = vadd.xlane.f32.xlu1 %v3830_v8  ;;  %v14298_v44 = vld [vmem:[#allocation14_spill] sm:$0xff] }
 0x62c   : > { %v3833_v55 = vsel %vm2081_vm0, %v11762_v26, 0.0  ;;  %v11768_v10 = vadd.f32 %v3734_v35, %v14297_v29 }
 0x62d   : > { %3834 = vadd.xlane.f32.xlu0 %v3833_v55 }
 0x62e   : > { %v3836_v1 = vsel %vm2081_vm0, %v11768_v10, 0.0 }
 0x62f   : > { %v8947_v11 = vpop.eup %8946  ;;  %3837 = vadd.xlane.f32.xlu1 %v3836_v1  ;;  %v3525_v50 = vpop.xlane.xlu0 %3524  ;;  %v14299_v1 = vld [vmem:[#allocation15_spill] sm:$0xff] }
 0x630   : > { %v3571_v41 = vmul.f32 0.03125, %v3525_v50  ;;  %v3663_v51 = vmul.f32 %v8947_v11, %v11529_v22 }
 0x631   : > { %v8949_v0 = vpop.eup %8948  ;;  %v3528_v19 = vpop.xlane.xlu1 %3527 }
 0x632   : > { %v3603_v30 = vadd.f32 1e-05, %v3571_v41  ;;  %v3572_v18 = vmul.f32 0.03125, %v3528_v19  ;;  %v3699_v38 = vmul.f32 %v11605_v45, %v3663_v51  ;;  %v3664_v31 = vmul.f32 %v8949_v0, %v11532_v33  ;;  %v14300_v51 = vld [vmem:[#allocation16_spill] sm:$0xff] }
 0x633   : > { %v8951_v20 = vpop.eup %8950  ;;  %v3531_v59 = vpop.xlane.xlu0 %3530 }
 0x634   : > { %8954 = vrsqrt.f32 %v3603_v30  ;;  %v3604_v9 = vadd.f32 1e-05, %v3572_v18  ;;  %v3573_v56 = vmul.f32 0.03125, %v3531_v59  ;;  %v3735_v53 = vadd.f32 %v11611_v14, %v3699_v38  ;;  %v14301_v30 = vld [vmem:[#allocation17_spill] sm:$0xff] }
 0x635   : > { %v8953_v60 = vpop.eup %8952  ;;  %v3534_v42 = vpop.xlane.xlu1 %3533  ;;  %v3700_v47 = vmul.f32 %v11605_v45, %v3664_v31  ;;  %v3665_v22 = vmul.f32 %v8951_v20, %v11537_v48 }
 0x636   : > { %8956 = vrsqrt.f32 %v3604_v9  ;;  %v3605_v63 = vadd.f32 1e-05, %v3573_v56  ;;  %v3574_v52 = vmul.f32 0.03125, %v3534_v42  ;;  %v11779_v8 = vadd.f32 %v3735_v53, %v14298_v44 }
 0x637   : > { %v3736_v33 = vadd.f32 %v11611_v14, %v3700_v47  ;;  %v3701_v34 = vmul.f32 %v11605_v45, %v3665_v22  ;;  %v3666_v35 = vmul.f32 %v8953_v60, %v11543_v39 }
 0x638   : > { %8958 = vrsqrt.f32 %v3605_v63  ;;  %v3606_v55 = vadd.f32 1e-05, %v3574_v52  ;;  %v3839_v29 = vsel %vm2081_vm0, %v11779_v8, 0.0 }
 0x639   : > { %3840 = vadd.xlane.f32.xlu0 %v3839_v29  ;;  %v11787_v48 = vadd.f32 %v3736_v33, %v14299_v1  ;;  %v3737_v11 = vadd.f32 %v11611_v14, %v3701_v34  ;;  %v3702_v50 = vmul.f32 %v11605_v45, %v3666_v35 }
 0x63a   : > { %8960 = vrsqrt.f32 %v3606_v55 }
 0x63b   : > { %v3842_v41 = vsel %vm2081_vm0, %v11787_v48, 0.0  ;;  %v11794_v0 = vadd.f32 %v3737_v11, %v14300_v51  ;;  %v3738_v39 = vadd.f32 %v11611_v14, %v3702_v50  ;;  %v14302_v50 = vld [vmem:[#allocation18_spill] sm:$0xff] }
 0x63c   : > { %3843 = vadd.xlane.f32.xlu1 %v3842_v41 }
 0x63d   : > { %v3845_v19 = vsel %vm2081_vm0, %v11794_v0, 0.0  ;;  %v11800_v18 = vadd.f32 %v3738_v39, %v14301_v30 }
 0x63e   : > { %v8955_v38 = vpop.eup %8954  ;;  %3846 = vadd.xlane.f32.xlu0 %v3845_v19  ;;  %v3537_v31 = vpop.xlane.xlu0 %3536 }
 0x63f   : > { %v3848_v20 = vsel %vm2081_vm0, %v11800_v18, 0.0  ;;  %v3575_v59 = vmul.f32 0.03125, %v3537_v31  ;;  %v3667_v9 = vmul.f32 %v8955_v38, %v11553_v17  ;;  %v14303_v38 = vld [vmem:[#allocation19_spill] sm:$0xff] }
 0x640   : > { %v8957_v56 = vpop.eup %8956  ;;  %3849 = vadd.xlane.f32.xlu1 %v3848_v20  ;;  %v3540_v53 = vpop.xlane.xlu1 %3539 }
 0x641   : > { %v3607_v60 = vadd.f32 1e-05, %v3575_v59  ;;  %v3576_v42 = vmul.f32 0.03125, %v3540_v53  ;;  %v3703_v47 = vmul.f32 %v11605_v45, %v3667_v9  ;;  %v3668_v22 = vmul.f32 %v8957_v56, %v11556_v27  ;;  %v14304_v9 = vld [vmem:[#allocation20_spill] sm:$0xff] }
 0x642   : > { %v8959_v63 = vpop.eup %8958  ;;  %v3543_v52 = vpop.xlane.xlu0 %3542 }
 0x643   : > { %8962 = vrsqrt.f32 %v3607_v60  ;;  %v3608_v44 = vadd.f32 1e-05, %v3576_v42  ;;  %v3577_v33 = vmul.f32 0.03125, %v3543_v52  ;;  %v3739_v34 = vadd.f32 %v11611_v14, %v3703_v47  ;;  %v14305_v60 = vld [vmem:[#allocation21_spill] sm:$0xff] }
 0x644   : > { %v8961_v35 = vpop.eup %8960  ;;  %v3546_v55 = vpop.xlane.xlu1 %3545  ;;  %v3704_v17 = vmul.f32 %v11605_v45, %v3668_v22  ;;  %v3669_v29 = vmul.f32 %v8959_v63, %v11561_v15 }
 0x645   : > { %8964 = vrsqrt.f32 %v3608_v44  ;;  %v3609_v1 = vadd.f32 1e-05, %v3577_v33  ;;  %v3578_v11 = vmul.f32 0.03125, %v3546_v55  ;;  %v11811_v41 = vadd.f32 %v3739_v34, %v14302_v50 }
 0x646   : > { %v3740_v27 = vadd.f32 %v11611_v14, %v3704_v17  ;;  %v3705_v51 = vmul.f32 %v11605_v45, %v3669_v29  ;;  %v3670_v39 = vmul.f32 %v8961_v35, %v11567_v16 }
 0x647   : > { %8966 = vrsqrt.f32 %v3609_v1  ;;  %v3610_v19 = vadd.f32 1e-05, %v3578_v11  ;;  %v3851_v30 = vsel %vm2081_vm0, %v11811_v41, 0.0  ;;  %v14306_v1 = vld [vmem:[#allocation22_spill] sm:$0xff] }
 0x648   : > { %3852 = vadd.xlane.f32.xlu0 %v3851_v30  ;;  %v11819_v15 = vadd.f32 %v3740_v27, %v14303_v38  ;;  %v3741_v31 = vadd.f32 %v11611_v14, %v3705_v51  ;;  %v3706_v20 = vmul.f32 %v11605_v45, %v3670_v39  ;;  %v14307_v51 = vld [vmem:[#allocation23_spill] sm:$0xff]  ;;  %v14308_v38 = vld [vmem:[#allocation24_spill] sm:$0xff] }
 0x649   : > { %8968 = vrsqrt.f32 %v3610_v19 }
 0x64a   : > { %v3854_v59 = vsel %vm2081_vm0, %v11819_v15, 0.0  ;;  %v11826_v56 = vadd.f32 %v3741_v31, %v14304_v9  ;;  %v3742_v16 = vadd.f32 %v11611_v14, %v3706_v20 }
 0x64b   : > { %3855 = vadd.xlane.f32.xlu1 %v3854_v59  ;;  %v14309_v59 = vld [vmem:[#allocation25_spill] sm:$0xff] }
 0x64c   : > { %v3857_v53 = vsel %vm2081_vm0, %v11826_v56, 0.0  ;;  %v11832_v42 = vadd.f32 %v3742_v16, %v14305_v60  ;;  %v8578_v16 = vld [vmem:[%s14211_s5] sm:$0xff]  }
 0x64d   : > { %v8963_v47 = vpop.eup %8962  ;;  %3858 = vadd.xlane.f32.xlu0 %v3857_v53  ;;  %8211 = vmatprep.subr.bf16.mxu0 %v8578_v16 }
 0x64e   : > { %v3860_v22 = vsel %vm2081_vm0, %v11832_v42, 0.0  ;;  %v3671_v63 = vmul.f32 %v8963_v47, %v11577_v58  ;;  %8212 = vmatpush3.bf16.msra.mxu0 %v8578_v16 }
 0x64f   : > { %v8965_v52 = vpop.eup %8964  ;;  %3861 = vadd.xlane.f32.xlu1 %v3860_v22 }
 0x650   : > { %v3707_v44 = vmul.f32 %v11605_v45, %v3671_v63  ;;  %v3672_v33 = vmul.f32 %v8965_v52, %v11580_v23 }
 0x651   : > { %v8967_v34 = vpop.eup %8966 }
 0x652   : > { %v3743_v35 = vadd.f32 %v11611_v14, %v3707_v44  ;;  %v3708_v55 = vmul.f32 %v11605_v45, %v3672_v33  ;;  %v3673_v17 = vmul.f32 %v8967_v34, %v11585_v7 }
 0x653   : > { %v8969_v29 = vpop.eup %8968 }
 0x654   : > { %v11843_v11 = vadd.f32 %v3743_v35, %v14306_v1  ;;  %v3744_v50 = vadd.f32 %v11611_v14, %v3708_v55  ;;  %v3709_v58 = vmul.f32 %v11605_v45, %v3673_v17  ;;  %v3674_v27 = vmul.f32 %v8969_v29, %v11591_v46 }
 0x656   : > { %v3863_v23 = vsel %vm2081_vm0, %v11843_v11, 0.0  ;;  %v11851_v39 = vadd.f32 %v3744_v50, %v14307_v51  ;;  %v3745_v19 = vadd.f32 %v11611_v14, %v3709_v58  ;;  %v3710_v7 = vmul.f32 %v11605_v45, %v3674_v27 }
 0x657   : > { %3864 = vadd.xlane.f32.xlu0 %v3863_v23 }
 0x658   : > { %v3866_v30 = vsel %vm2081_vm0, %v11851_v39, 0.0  ;;  %v11858_v31 = vadd.f32 %v3745_v19, %v14308_v38  ;;  %v3746_v20 = vadd.f32 %v11611_v14, %v3710_v7 }
 0x659   : > { %3867 = vadd.xlane.f32.xlu1 %v3866_v30 }
 0x65a   : > { %v3869_v46 = vsel %vm2081_vm0, %v11858_v31, 0.0  ;;  %v11864_v9 = vadd.f32 %v3746_v20, %v14309_v59 }
 0x65b   : > { %3870 = vadd.xlane.f32.xlu0 %v3869_v46 }
 0x65c   : > { %v3872_v45 = vsel %vm2081_vm0, %v11864_v9, 0.0 }
 0x65d   : > { %3873 = vadd.xlane.f32.xlu1 %v3872_v45 }
 0x675   : > { %v3781_v53 = vpop.xlane.xlu0 %3780 }
 0x676   : > { %v3875_v14 = vmul.f32 0.03125, %v3781_v53 }
 0x677   : > { %v3784_v60 = vpop.xlane.xlu1 %3783 }
 0x678   : > { %v11872_v47 = vsub.f32 %v11619_v36, %v3875_v14  ;;  %v3876_v22 = vmul.f32 0.03125, %v3784_v60 }
 0x679   : > { %v3787_v63 = vpop.xlane.xlu0 %3786 }
 0x67a   : > { %v11875_v52 = vsub.f32 %v11627_v24, %v3876_v22  ;;  %v3877_v44 = vmul.f32 0.03125, %v3787_v63  ;;  %v3939_v33 = vmul.f32 %v11872_v47, %v11872_v47 }
 0x67b   : > { %v3790_v34 = vpop.xlane.xlu1 %3789 }
 0x67c   : > { %v11880_v35 = vsub.f32 %v11634_v6, %v3877_v44  ;;  %v3878_v55 = vmul.f32 0.03125, %v3790_v34  ;;  %v3971_v17 = vsel %vm2081_vm0, %v3939_v33, 0.0  ;;  %v3940_v36 = vmul.f32 %v11875_v52, %v11875_v52 }
 0x67d   : > { %3972 = vadd.xlane.f32.xlu0 %v3971_v17 }
 0x67e   : > { %v11886_v29 = vsub.f32 %v11640_v12, %v3878_v55  ;;  %v3974_v24 = vsel %vm2081_vm0, %v3940_v36, 0.0  ;;  %v3941_v1 = vmul.f32 %v11880_v35, %v11880_v35 }
 0x67f   : > { %3975 = vadd.xlane.f32.xlu1 %v3974_v24 }
 0x680   : > { %v3977_v50 = vsel %vm2081_vm0, %v3941_v1, 0.0  ;;  %v3942_v6 = vmul.f32 %v11886_v29, %v11886_v29 }
 0x681   : > { %3978 = vadd.xlane.f32.xlu0 %v3977_v50 }
 0x682   : > { %v3980_v58 = vsel %vm2081_vm0, %v3942_v6, 0.0 }
 0x683   : > { %3981 = vadd.xlane.f32.xlu1 %v3980_v58 }
 0x687   : > { %v3793_v27 = vpop.xlane.xlu0 %3792 }
 0x688   : > { %v3879_v23 = vmul.f32 0.03125, %v3793_v27 }
 0x689   : > { %v3796_v51 = vpop.xlane.xlu1 %3795 }
 0x68a   : > { %v11896_v12 = vsub.f32 %v11651_v57, %v3879_v23  ;;  %v3880_v19 = vmul.f32 0.03125, %v3796_v51 }
 0x68b   : > { %v3799_v7 = vpop.xlane.xlu0 %3798 }
 0x68c   : > { %v11899_v30 = vsub.f32 %v11659_v5, %v3880_v19  ;;  %v3881_v38 = vmul.f32 0.03125, %v3799_v7  ;;  %v3943_v20 = vmul.f32 %v11896_v12, %v11896_v12 }
 0x68d   : > { %v3802_v46 = vpop.xlane.xlu1 %3801 }
 0x68e   : > { %v11904_v59 = vsub.f32 %v11666_v62, %v3881_v38  ;;  %v3882_v45 = vmul.f32 0.03125, %v3802_v46  ;;  %v3983_v16 = vsel %vm2081_vm0, %v3943_v20, 0.0  ;;  %v3944_v57 = vmul.f32 %v11899_v30, %v11899_v30 }
 0x68f   : > { %3984 = vadd.xlane.f32.xlu0 %v3983_v16 }
 0x690   : > { %v11910_v53 = vsub.f32 %v11672_v40, %v3882_v45  ;;  %v3986_v5 = vsel %vm2081_vm0, %v3944_v57, 0.0  ;;  %v3945_v14 = vmul.f32 %v11904_v59, %v11904_v59 }
 0x691   : > { %3987 = vadd.xlane.f32.xlu1 %v3986_v5 }
 0x692   : > { %v3989_v60 = vsel %vm2081_vm0, %v3945_v14, 0.0  ;;  %v3946_v62 = vmul.f32 %v11910_v53, %v11910_v53 }
 0x693   : > { %3990 = vadd.xlane.f32.xlu0 %v3989_v60 }
 0x694   : > { %v3992_v22 = vsel %vm2081_vm0, %v3946_v62, 0.0 }
 0x695   : > { %3993 = vadd.xlane.f32.xlu1 %v3992_v22 }
 0x697   : > { %v3805_v63 = vpop.xlane.xlu0 %3804 }
 0x698   : > { %v3883_v44 = vmul.f32 0.03125, %v3805_v63 }
 0x69a   : > { %v11920_v40 = vsub.f32 %v11683_v21, %v3883_v44  ;;  %v3808_v33 = vpop.xlane.xlu1 %3807 }
 0x69b   : > { %v3884_v34 = vmul.f32 0.03125, %v3808_v33 }
 0x69c   : > { %v3811_v55 = vpop.xlane.xlu0 %3810  ;;  %v3947_v17 = vmul.f32 %v11920_v40, %v11920_v40 }
 0x69d   : > { %v11925_v36 = vsub.f32 %v11691_v2, %v3884_v34  ;;  %v3885_v24 = vmul.f32 0.03125, %v3811_v55 }
 0x69e   : > { %v3814_v1 = vpop.xlane.xlu1 %3813  ;;  %v3995_v50 = vsel %vm2081_vm0, %v3947_v17, 0.0 }
 0x69f   : > { %v11929_v6 = vsub.f32 %v11698_v28, %v3885_v24  ;;  %v3886_v58 = vmul.f32 0.03125, %v3814_v1  ;;  %3996 = vadd.xlane.f32.xlu0 %v3995_v50  ;;  %v3948_v21 = vmul.f32 %v11925_v36, %v11925_v36 }
 0x6a1   : > { %v11934_v27 = vsub.f32 %v11704_v3, %v3886_v58  ;;  %v3998_v23 = vsel %vm2081_vm0, %v3948_v21, 0.0  ;;  %v3949_v2 = vmul.f32 %v11929_v6, %v11929_v6 }
 0x6a2   : > { %3999 = vadd.xlane.f32.xlu1 %v3998_v23 }
 0x6a3   : > { %v4001_v51 = vsel %vm2081_vm0, %v3949_v2, 0.0  ;;  %v3950_v28 = vmul.f32 %v11934_v27, %v11934_v27 }
 0x6a4   : > { %4002 = vadd.xlane.f32.xlu0 %v4001_v51 }
 0x6a5   : > { %v4004_v19 = vsel %vm2081_vm0, %v3950_v28, 0.0 }
 0x6a6   : > { %4005 = vadd.xlane.f32.xlu1 %v4004_v19  ;;  %v3817_v7 = vpop.xlane.xlu0 %3816 }
 0x6a7   : > { %v3887_v38 = vmul.f32 0.03125, %v3817_v7 }
 0x6a8   : > { %v3820_v20 = vpop.xlane.xlu1 %3819 }
 0x6a9   : > { %v11944_v3 = vsub.f32 %v11715_v43, %v3887_v38  ;;  %v3888_v46 = vmul.f32 0.03125, %v3820_v20 }
 0x6aa   : > { %v3823_v45 = vpop.xlane.xlu0 %3822 }
 0x6ab   : > { %v11947_v16 = vsub.f32 %v11723_v61, %v3888_v46  ;;  %v3889_v57 = vmul.f32 0.03125, %v3823_v45  ;;  %v3951_v5 = vmul.f32 %v11944_v3, %v11944_v3 }
 0x6ac   : > { %v3826_v14 = vpop.xlane.xlu1 %3825 }
 0x6ad   : > { %v11952_v60 = vsub.f32 %v11730_v37, %v3889_v57  ;;  %v3890_v62 = vmul.f32 0.03125, %v3826_v14  ;;  %v4007_v22 = vsel %vm2081_vm0, %v3951_v5, 0.0  ;;  %v3952_v43 = vmul.f32 %v11947_v16, %v11947_v16 }
 0x6ae   : > { %4008 = vadd.xlane.f32.xlu0 %v4007_v22 }
 0x6af   : > { %v11958_v63 = vsub.f32 %v11736_v54, %v3890_v62  ;;  %v4010_v61 = vsel %vm2081_vm0, %v3952_v43, 0.0  ;;  %v3953_v44 = vmul.f32 %v11952_v60, %v11952_v60 }
 0x6b0   : > { %4011 = vadd.xlane.f32.xlu1 %v4010_v61 }
 0x6b1   : > { %v4013_v33 = vsel %vm2081_vm0, %v3953_v44, 0.0  ;;  %v3954_v37 = vmul.f32 %v11958_v63, %v11958_v63 }
 0x6b2   : > { %4014 = vadd.xlane.f32.xlu0 %v4013_v33 }
 0x6b3   : > { %v4016_v34 = vsel %vm2081_vm0, %v3954_v37, 0.0 }
 0x6b4   : > { %4017 = vadd.xlane.f32.xlu1 %v4016_v34 }
 0x6b6   : > { %v3829_v55 = vpop.xlane.xlu0 %3828 }
 0x6b7   : > { %v3891_v17 = vmul.f32 0.03125, %v3829_v55 }
 0x6b8   : > { %v3832_v24 = vpop.xlane.xlu1 %3831 }
 0x6b9   : > { %v11968_v54 = vsub.f32 %v11747_v13, %v3891_v17  ;;  %v3892_v1 = vmul.f32 0.03125, %v3832_v24 }
 0x6ba   : > { %v3835_v50 = vpop.xlane.xlu0 %3834 }
 0x6bb   : > { %v11971_v58 = vsub.f32 %v11755_v49, %v3892_v1  ;;  %v3893_v21 = vmul.f32 0.03125, %v3835_v50  ;;  %v3955_v23 = vmul.f32 %v11968_v54, %v11968_v54 }
 0x6bc   : > { %v3838_v2 = vpop.xlane.xlu1 %3837 }
 0x6bd   : > { %v11976_v51 = vsub.f32 %v11762_v26, %v3893_v21  ;;  %v3894_v28 = vmul.f32 0.03125, %v3838_v2  ;;  %v4019_v19 = vsel %vm2081_vm0, %v3955_v23, 0.0  ;;  %v3956_v13 = vmul.f32 %v11971_v58, %v11971_v58 }
 0x6be   : > { %4020 = vadd.xlane.f32.xlu0 %v4019_v19 }
 0x6bf   : > { %v11982_v7 = vsub.f32 %v11768_v10, %v3894_v28  ;;  %v4022_v49 = vsel %vm2081_vm0, %v3956_v13, 0.0  ;;  %v3957_v38 = vmul.f32 %v11976_v51, %v11976_v51  ;;  %v8579_v10 = vld [vmem:[%s14211_s5 + $0x8] sm:$0xff]  }
 0x6c0   : > { %4023 = vadd.xlane.f32.xlu1 %v4022_v49  ;;  %8213 = vmatprep.subr.bf16.mxu0 %v8579_v10 }
 0x6c1   : > { %v4025_v20 = vsel %vm2081_vm0, %v3957_v38, 0.0  ;;  %v3958_v26 = vmul.f32 %v11982_v7, %v11982_v7  ;;  %8214 = vmatpush3.bf16.msra.mxu0 %v8579_v10 }
 0x6c2   : > { %4026 = vadd.xlane.f32.xlu0 %v4025_v20 }
 0x6c3   : > { %v4028_v46 = vsel %vm2081_vm0, %v3958_v26, 0.0 }
 0x6c4   : > { %4029 = vadd.xlane.f32.xlu1 %v4028_v46 }
 0x6c6   : > { %v3841_v45 = vpop.xlane.xlu0 %3840 }
 0x6c7   : > { %v3895_v57 = vmul.f32 0.03125, %v3841_v45 }
 0x6c9   : > { %v11995_v5 = vsub.f32 %v11779_v8, %v3895_v57  ;;  %v3844_v14 = vpop.xlane.xlu1 %3843 }
 0x6ca   : > { %v3896_v62 = vmul.f32 0.03125, %v3844_v14 }
 0x6cb   : > { %v3847_v22 = vpop.xlane.xlu0 %3846  ;;  %v3959_v43 = vmul.f32 %v11995_v5, %v11995_v5 }
 0x6cc   : > { %v12000_v61 = vsub.f32 %v11787_v48, %v3896_v62  ;;  %v3897_v44 = vmul.f32 0.03125, %v3847_v22 }
 0x6cd   : > { %v3850_v33 = vpop.xlane.xlu1 %3849  ;;  %v4031_v37 = vsel %vm2081_vm0, %v3959_v43, 0.0 }
 0x6ce   : > { %v12004_v34 = vsub.f32 %v11794_v0, %v3897_v44  ;;  %v3898_v55 = vmul.f32 0.03125, %v3850_v33  ;;  %4032 = vadd.xlane.f32.xlu0 %v4031_v37  ;;  %v3960_v8 = vmul.f32 %v12000_v61, %v12000_v61 }
 0x6d0   : > { %v12009_v17 = vsub.f32 %v11800_v18, %v3898_v55  ;;  %v4034_v24 = vsel %vm2081_vm0, %v3960_v8, 0.0  ;;  %v3961_v48 = vmul.f32 %v12004_v34, %v12004_v34 }
 0x6d1   : > { %4035 = vadd.xlane.f32.xlu1 %v4034_v24 }
 0x6d2   : > { %v4037_v1 = vsel %vm2081_vm0, %v3961_v48, 0.0  ;;  %v3962_v0 = vmul.f32 %v12009_v17, %v12009_v17 }
 0x6d3   : > { %4038 = vadd.xlane.f32.xlu0 %v4037_v1 }
 0x6d4   : > { %v4040_v50 = vsel %vm2081_vm0, %v3962_v0, 0.0 }
 0x6d5   : > { %4041 = vadd.xlane.f32.xlu1 %v4040_v50  ;;  %v3853_v21 = vpop.xlane.xlu0 %3852 }
 0x6d6   : > { %v3899_v23 = vmul.f32 0.03125, %v3853_v21 }
 0x6d8   : > { %v12019_v18 = vsub.f32 %v11811_v41, %v3899_v23  ;;  %v3856_v2 = vpop.xlane.xlu1 %3855 }
 0x6d9   : > { %v3900_v28 = vmul.f32 0.03125, %v3856_v2 }
 0x6da   : > { %v3859_v19 = vpop.xlane.xlu0 %3858  ;;  %v3963_v13 = vmul.f32 %v12019_v18, %v12019_v18 }
 0x6db   : > { %v12024_v49 = vsub.f32 %v11819_v15, %v3900_v28  ;;  %v3901_v38 = vmul.f32 0.03125, %v3859_v19 }
 0x6dc   : > { %v3862_v20 = vpop.xlane.xlu1 %3861  ;;  %v4043_v26 = vsel %vm2081_vm0, %v3963_v13, 0.0 }
 0x6dd   : > { %v12028_v46 = vsub.f32 %v11826_v56, %v3901_v38  ;;  %v3902_v10 = vmul.f32 0.03125, %v3862_v20  ;;  %4044 = vadd.xlane.f32.xlu0 %v4043_v26  ;;  %v3964_v41 = vmul.f32 %v12024_v49, %v12024_v49 }
 0x6df   : > { %v12033_v45 = vsub.f32 %v11832_v42, %v3902_v10  ;;  %v4046_v57 = vsel %vm2081_vm0, %v3964_v41, 0.0  ;;  %v3965_v15 = vmul.f32 %v12028_v46, %v12028_v46 }
 0x6e0   : > { %4047 = vadd.xlane.f32.xlu1 %v4046_v57 }
 0x6e1   : > { %v4049_v14 = vsel %vm2081_vm0, %v3965_v15, 0.0  ;;  %v3966_v56 = vmul.f32 %v12033_v45, %v12033_v45 }
 0x6e2   : > { %4050 = vadd.xlane.f32.xlu0 %v4049_v14 }
 0x6e3   : > { %v4052_v62 = vsel %vm2081_vm0, %v3966_v56, 0.0 }
 0x6e4   : > { %4053 = vadd.xlane.f32.xlu1 %v4052_v62  ;;  %v3865_v22 = vpop.xlane.xlu0 %3864  ;;  %v14242_v62 = vsub.s32 6, %v10624_v4 }
 0x6e5   : > { %v3903_v43 = vmul.f32 0.03125, %v3865_v22  ;;  %v14241_v22 = vsub.s32 7, %v10624_v4 }
 0x6e6   : > { %v3868_v44 = vpop.xlane.xlu1 %3867 }
 0x6e7   : > { %v12043_v42 = vsub.f32 %v11843_v11, %v3903_v43  ;;  %v3904_v33 = vmul.f32 0.03125, %v3868_v44  ;;  %v9611_v43 = vld [vmem:[%s14214_s8] sm:$0xff] }
 0x6e8   : > { %v3871_v37 = vpop.xlane.xlu0 %3870  ;;  %v12073_v44 = vrot.slane %v9611_v43, %v14242_v62 }
 0x6e9   : > { %v12046_v55 = vsub.f32 %v11851_v39, %v3904_v33  ;;  %v3905_v8 = vmul.f32 0.03125, %v3871_v37  ;;  %v3967_v24 = vmul.f32 %v12043_v42, %v12043_v42 }
 0x6ea   : > { %v3874_v48 = vpop.xlane.xlu1 %3873 }
 0x6eb   : > { %v12051_v1 = vsub.f32 %v11858_v31, %v3905_v8  ;;  %v3906_v0 = vmul.f32 0.03125, %v3874_v48  ;;  %v4055_v50 = vsel %vm2081_vm0, %v3967_v24, 0.0  ;;  %v3968_v11 = vmul.f32 %v12046_v55, %v12046_v55 }
 0x6ec   : > { %4056 = vadd.xlane.f32.xlu0 %v4055_v50  ;;  %v12078_v8 = vrot.slane %v9611_v43, %v14241_v22 }
 0x6ed   : > { %v12057_v21 = vsub.f32 %v11864_v9, %v3906_v0  ;;  %v4058_v39 = vsel %vm2081_vm0, %v3968_v11, 0.0  ;;  %v3969_v23 = vmul.f32 %v12051_v1, %v12051_v1 }
 0x6ee   : > { %4059 = vadd.xlane.f32.xlu1 %v4058_v39 }
 0x6ef   : > { %v4061_v2 = vsel %vm2081_vm0, %v3969_v23, 0.0  ;;  %v3970_v31 = vmul.f32 %v12057_v21, %v12057_v21 }
 0x6f0   : > { %4062 = vadd.xlane.f32.xlu0 %v4061_v2 }
 0x6f1   : > { %v4064_v28 = vsel %vm2081_vm0, %v3970_v31, 0.0 }
 0x6f2   : > { %4065 = vadd.xlane.f32.xlu1 %v4064_v28 }
 0x70a   : > { %v3973_v19 = vpop.xlane.xlu0 %3972 }
 0x70b   : > { %v4067_v13 = vmul.f32 0.03125, %v3973_v19 }
 0x70c   : > { %v3976_v38 = vpop.xlane.xlu1 %3975 }
 0x70d   : > { %v4099_v9 = vadd.f32 1e-05, %v4067_v13  ;;  %v4068_v20 = vmul.f32 0.03125, %v3976_v38 }
 0x70e   : > { %v3979_v26 = vpop.xlane.xlu0 %3978 }
 0x70f   : > { %8970 = vrsqrt.f32 %v4099_v9  ;;  %v4100_v10 = vadd.f32 1e-05, %v4068_v20  ;;  %v4069_v41 = vmul.f32 0.03125, %v3979_v26 }
 0x710   : > { %v3982_v57 = vpop.xlane.xlu1 %3981 }
 0x711   : > { %8972 = vrsqrt.f32 %v4100_v10  ;;  %v4101_v15 = vadd.f32 1e-05, %v4069_v41  ;;  %v4070_v14 = vmul.f32 0.03125, %v3982_v57 }
 0x713   : > { %8974 = vrsqrt.f32 %v4101_v15  ;;  %v4102_v56 = vadd.f32 1e-05, %v4070_v14 }
 0x715   : > { %8976 = vrsqrt.f32 %v4102_v56 }
 0x719   : > { %v8971_v33 = vpop.eup %8970 }
 0x71a   : > { %v4163_v37 = vmul.f32 %v8971_v33, %v11872_v47 }
 0x71b   : > { %v8973_v24 = vpop.eup %8972 }
 0x71c   : > { %v4164_v48 = vmul.f32 %v8973_v24, %v11875_v52  ;;  %v3985_v0 = vpop.xlane.xlu0 %3984  ;;  %v4199_v50 = vmul.f32 %v12073_v44, %v4163_v37 }
 0x71d   : > { %v8975_v11 = vpop.eup %8974  ;;  %v4071_v39 = vmul.f32 0.03125, %v3985_v0 }
 0x71e   : > { %v4165_v23 = vmul.f32 %v8975_v11, %v11880_v35  ;;  %v3988_v2 = vpop.xlane.xlu1 %3987  ;;  %v4200_v31 = vmul.f32 %v12073_v44, %v4164_v48  ;;  %v12085_v28 = vadd.f32 %v12078_v8, %v4199_v50 }
 0x71f   : > { %v8977_v47 = vpop.eup %8976  ;;  %v4103_v19 = vadd.f32 1e-05, %v4071_v39  ;;  %v4072_v13 = vmul.f32 0.03125, %v3988_v2 }
 0x720   : > { %v4201_v38 = vmul.f32 %v12073_v44, %v4165_v23  ;;  %v4166_v52 = vmul.f32 %v8977_v47, %v11886_v29  ;;  %v3991_v9 = vpop.xlane.xlu0 %3990  ;;  %v12090_v20 = vadd.f32 %v12078_v8, %v4200_v31  ;;  %v7546_v26 = vmul.f32 -1.442695, %v12085_v28 }
 0x721   : > { %8978 = vrsqrt.f32 %v4103_v19  ;;  %v4104_v35 = vadd.f32 1e-05, %v4072_v13  ;;  %v4073_v10 = vmul.f32 0.03125, %v3991_v9 }
 0x722   : > { %v12094_v41 = vadd.f32 %v12078_v8, %v4201_v38  ;;  %v4202_v57 = vmul.f32 %v12073_v44, %v4166_v52  ;;  %v3994_v15 = vpop.xlane.xlu1 %3993  ;;  %8980 = vpow2.f32 %v7546_v26  ;;  %v7547_v14 = vmul.f32 -1.442695, %v12090_v20 }
 0x723   : > { %8982 = vrsqrt.f32 %v4104_v35  ;;  %v4105_v29 = vadd.f32 1e-05, %v4073_v10  ;;  %v4074_v56 = vmul.f32 0.03125, %v3994_v15 }
 0x724   : > { %v7548_v43 = vmul.f32 -1.442695, %v12094_v41  ;;  %v12100_v33 = vadd.f32 %v12078_v8, %v4202_v57  ;;  %8984 = vpow2.f32 %v7547_v14 }
 0x725   : > { %8986 = vrsqrt.f32 %v4105_v29  ;;  %v4106_v37 = vadd.f32 1e-05, %v4074_v56 }
 0x726   : > { %8988 = vpow2.f32 %v7548_v43  ;;  %v7549_v24 = vmul.f32 -1.442695, %v12100_v33 }
 0x727   : > { %8990 = vrsqrt.f32 %v4106_v37 }
 0x728   : > { %8992 = vpow2.f32 %v7549_v24 }
 0x72b   : > { %v8979_v48 = vpop.eup %8978 }
 0x72c   : > { %v8981_v0 = vpop.eup %8980  ;;  %v4167_v50 = vmul.f32 %v8979_v48, %v11896_v12  ;;  %v3997_v11 = vpop.xlane.xlu0 %3996 }
 0x72d   : > { %v8983_v39 = vpop.eup %8982  ;;  %v4075_v23 = vmul.f32 0.03125, %v3997_v11  ;;  %v4363_v2 = vadd.f32 1.0, %v8981_v0 }
 0x72e   : > { %v8985_v31 = vpop.eup %8984  ;;  %v4168_v47 = vmul.f32 %v8983_v39, %v11899_v30  ;;  %v4203_v19 = vmul.f32 %v12073_v44, %v4167_v50 }
 0x72f   : > { %v8987_v13 = vpop.eup %8986  ;;  %v4107_v38 = vadd.f32 1e-05, %v4075_v23  ;;  %v4000_v52 = vpop.xlane.xlu1 %3999  ;;  %v4364_v9 = vadd.f32 1.0, %v8985_v31  ;;  %8994 = vrcp.f32 %v4363_v2 }
 0x730   : > { %v8989_v26 = vpop.eup %8988  ;;  %v4169_v35 = vmul.f32 %v8987_v13, %v11904_v59  ;;  %v4076_v10 = vmul.f32 0.03125, %v4000_v52  ;;  %v4204_v12 = vmul.f32 %v12073_v44, %v4168_v47  ;;  %v12109_v57 = vadd.f32 %v12078_v8, %v4203_v19 }
 0x731   : > { %v8991_v15 = vpop.eup %8990  ;;  %v4365_v14 = vadd.f32 1.0, %v8989_v26  ;;  %8996 = vrsqrt.f32 %v4107_v38  ;;  %v4003_v30 = vpop.xlane.xlu0 %4002 }
 0x732   : > { %v8993_v29 = vpop.eup %8992  ;;  %v4170_v56 = vmul.f32 %v8991_v15, %v11910_v53  ;;  %v4108_v43 = vadd.f32 1e-05, %v4076_v10  ;;  %v4077_v37 = vmul.f32 0.03125, %v4003_v30  ;;  %8998 = vrcp.f32 %v4364_v9 }
 0x733   : > { %9000 = vrcp.f32 %v4365_v14  ;;  %v4366_v24 = vadd.f32 1.0, %v8993_v29  ;;  %v4006_v48 = vpop.xlane.xlu1 %4005  ;;  %v12113_v59 = vadd.f32 %v12078_v8, %v4204_v12  ;;  %v7550_v0 = vmul.f32 -1.442695, %v12109_v57 }
 0x734   : > { %9002 = vrsqrt.f32 %v4108_v43  ;;  %v4109_v50 = vadd.f32 1e-05, %v4077_v37  ;;  %v4078_v11 = vmul.f32 0.03125, %v4006_v48  ;;  %v4205_v39 = vmul.f32 %v12073_v44, %v4169_v35 }
 0x735   : > { %9004 = vrcp.f32 %v4366_v24  ;;  %v7551_v23 = vmul.f32 -1.442695, %v12113_v59  ;;  %v4206_v53 = vmul.f32 %v12073_v44, %v4170_v56 }
 0x736   : > { %9006 = vrsqrt.f32 %v4109_v50  ;;  %v4110_v2 = vadd.f32 1e-05, %v4078_v11  ;;  %v12120_v31 = vadd.f32 %v12078_v8, %v4205_v39 }
 0x737   : > { %9008 = vpow2.f32 %v7550_v0  ;;  %v12123_v47 = vadd.f32 %v12078_v8, %v4206_v53 }
 0x738   : > { %9010 = vrsqrt.f32 %v4110_v2  ;;  %v7552_v19 = vmul.f32 -1.442695, %v12120_v31 }
 0x739   : > { %v8995_v13 = vpop.eup %8994  ;;  %9012 = vpow2.f32 %v7551_v23  ;;  %v7553_v38 = vmul.f32 -1.442695, %v12123_v47 }
 0x73a   : > { %9014 = vpow2.f32 %v7552_v19  ;;  %v12129_v14 = vmul.f32 %v8995_v13, %v12085_v28 }
 0x73b   : > { %v8997_v52 = vpop.eup %8996  ;;  %v4009_v9 = vpop.xlane.xlu0 %4008  ;;  %9016 = vpow2.f32 %v7553_v38 }
 0x73c   : > { %v8999_v26 = vpop.eup %8998  ;;  %v4171_v35 = vmul.f32 %v8997_v52, %v11920_v40  ;;  %v4079_v10 = vmul.f32 0.03125, %v4009_v9 }
 0x73d   : > { %v9001_v12 = vpop.eup %9000  ;;  %v4012_v15 = vpop.xlane.xlu1 %4011  ;;  %v12132_v30 = vmul.f32 %v8999_v26, %v12090_v20 }
 0x73e   : > { %v9003_v29 = vpop.eup %9002  ;;  %v4111_v56 = vadd.f32 1e-05, %v4079_v10  ;;  %v4080_v43 = vmul.f32 0.03125, %v4012_v15  ;;  %v4207_v37 = vmul.f32 %v12073_v44, %v4171_v35  ;;  %v12139_v50 = vmul.f32 %v9001_v12, %v12094_v41 }
 0x73f   : > { %v9005_v24 = vpop.eup %9004  ;;  %v4172_v48 = vmul.f32 %v9003_v29, %v11925_v36  ;;  %v4015_v0 = vpop.xlane.xlu0 %4014  ;;  %v4503_v40 = vpack.c.bf16 %v12132_v30, %v12129_v14 }
 0x740   : > { %v9007_v28 = vpop.eup %9006  ;;  %9018 = vrsqrt.f32 %v4111_v56  ;;  %v4112_v11 = vadd.f32 1e-05, %v4080_v43  ;;  %v4081_v20 = vmul.f32 0.03125, %v4015_v0  ;;  %v12142_v39 = vmul.f32 %v9005_v24, %v12100_v33 }
 0x741   : > { %v9009_v23 = vpop.eup %9008  ;;  %v4173_v53 = vmul.f32 %v9007_v28, %v11929_v6  ;;  %v4018_v2 = vpop.xlane.xlu1 %4017  ;;  %8215 = vmatprep.mubr.msk.bf16.mxu0 %vm2081_vm0, %v4503_v40  ;;  %v4208_v36 = vmul.f32 %v12073_v44, %v4172_v48  ;;  %v12148_v19 = vadd.f32 %v12078_v8, %v4207_v37 }
 0x742   : > { %v9011_v41 = vpop.eup %9010  ;;  %9020 = vrsqrt.f32 %v4112_v11  ;;  %v4113_v13 = vadd.f32 1e-05, %v4081_v20  ;;  %v4082_v38 = vmul.f32 0.03125, %v4018_v2  ;;  %v4504_v52 = vpack.c.bf16 %v12142_v39, %v12139_v50 }
 0x743   : > { %v9013_v33 = vpop.eup %9012  ;;  %v4174_v9 = vmul.f32 %v9011_v41, %v11934_v27  ;;  %v4367_v26 = vadd.f32 1.0, %v9009_v23  ;;  %v12154_v6 = vadd.f32 %v12078_v8, %v4208_v36  ;;  %v4209_v15 = vmul.f32 %v12073_v44, %v4173_v53 }
 0x744   : > { %v9015_v35 = vpop.eup %9014  ;;  %9022 = vrsqrt.f32 %v4113_v13  ;;  %v4114_v10 = vadd.f32 1e-05, %v4082_v38  ;;  %8216 = vmatmul.mubr.msk.bf16.vlgmr.msra.gmra.mrb[112].mxu0 %vm2081_vm0, %v4504_v52  ;;  %v4368_v12 = vadd.f32 1.0, %v9013_v33  ;;  %v7554_v27 = vmul.f32 -1.442695, %v12148_v19 }
 0x745   : > { %v9017_v29 = vpop.eup %9016  ;;  %9024 = vrcp.f32 %v4367_v26  ;;  %v4369_v56 = vadd.f32 1.0, %v9015_v35  ;;  %v4210_v43 = vmul.f32 %v12073_v44, %v4174_v9  ;;  %v12161_v24 = vadd.f32 %v12078_v8, %v4209_v15 }
 0x746   : > { %9026 = vrsqrt.f32 %v4114_v10  ;;  %v4370_v37 = vadd.f32 1.0, %v9017_v29  ;;  %v7555_v48 = vmul.f32 -1.442695, %v12154_v6 }
 0x747   : > { %9028 = vrcp.f32 %v4368_v12  ;;  %v12165_v0 = vadd.f32 %v12078_v8, %v4210_v43  ;;  %v7556_v40 = vmul.f32 -1.442695, %v12161_v24 }
 0x748   : > { %9030 = vrcp.f32 %v4369_v56 }
 0x749   : > { %9032 = vrcp.f32 %v4370_v37  ;;  %v7557_v28 = vmul.f32 -1.442695, %v12165_v0 }
 0x74a   : > { %v9019_v11 = vpop.eup %9018  ;;  %9034 = vpow2.f32 %v7554_v27 }
 0x74b   : > { %v4175_v20 = vmul.f32 %v9019_v11, %v11944_v3  ;;  %v4021_v23 = vpop.xlane.xlu0 %4020  ;;  %9036 = vpow2.f32 %v7555_v48 }
 0x74c   : > { %v9021_v53 = vpop.eup %9020  ;;  %v4083_v2 = vmul.f32 0.03125, %v4021_v23  ;;  %9038 = vpow2.f32 %v7556_v40 }
 0x74d   : > { %v4176_v36 = vmul.f32 %v9021_v53, %v11947_v16  ;;  %v4024_v41 = vpop.xlane.xlu1 %4023  ;;  %9040 = vpow2.f32 %v7557_v28  ;;  %v4211_v13 = vmul.f32 %v12073_v44, %v4175_v20 }
 0x74e   : > { %v9023_v38 = vpop.eup %9022  ;;  %v4115_v52 = vadd.f32 1e-05, %v4083_v2  ;;  %v4084_v33 = vmul.f32 0.03125, %v4024_v41 }
 0x74f   : > { %v9025_v9 = vpop.eup %9024  ;;  %v4177_v26 = vmul.f32 %v9023_v38, %v11952_v60  ;;  %v4027_v35 = vpop.xlane.xlu0 %4026  ;;  %v4212_v3 = vmul.f32 %v12073_v44, %v4176_v36  ;;  %v12175_v10 = vadd.f32 %v12078_v8, %v4211_v13 }
 0x750   : > { %v9027_v12 = vpop.eup %9026  ;;  %9042 = vrsqrt.f32 %v4115_v52  ;;  %v4116_v15 = vadd.f32 1e-05, %v4084_v33  ;;  %v4085_v16 = vmul.f32 0.03125, %v4027_v35  ;;  %v12178_v29 = vmul.f32 %v9025_v9, %v12109_v57 }
 0x751   : > { %v9029_v56 = vpop.eup %9028  ;;  %v4178_v43 = vmul.f32 %v9027_v12, %v11958_v63  ;;  %v4030_v37 = vpop.xlane.xlu1 %4029  ;;  %v12182_v27 = vadd.f32 %v12078_v8, %v4212_v3  ;;  %v7558_v60 = vmul.f32 -1.442695, %v12175_v10  ;;  %v4213_v48 = vmul.f32 %v12073_v44, %v4177_v26 }
 0x752   : > { %v9031_v40 = vpop.eup %9030  ;;  %9044 = vrsqrt.f32 %v4116_v15  ;;  %v4117_v28 = vadd.f32 1e-05, %v4085_v16  ;;  %v4086_v11 = vmul.f32 0.03125, %v4030_v37  ;;  %v12187_v20 = vmul.f32 %v9029_v56, %v12113_v59 }
 0x753   : > { %v9033_v57 = vpop.eup %9032  ;;  %v12190_v23 = vmul.f32 %v9031_v40, %v12120_v31  ;;  %9046 = vpow2.f32 %v7558_v60  ;;  %v7559_v63 = vmul.f32 -1.442695, %v12182_v27  ;;  %v4214_v53 = vmul.f32 %v12073_v44, %v4178_v43 }
 0x754   : > { %v9035_v2 = vpop.eup %9034  ;;  %9048 = vrsqrt.f32 %v4117_v28  ;;  %v4118_v36 = vadd.f32 1e-05, %v4086_v11  ;;  %v4505_v41 = vpack.c.bf16 %v12187_v20, %v12178_v29  ;;  %v12197_v13 = vmul.f32 %v9033_v57, %v12123_v47 }
 0x755   : > { %v9037_v59 = vpop.eup %9036  ;;  %v4371_v38 = vadd.f32 1.0, %v9035_v2  ;;  %9050 = vpow2.f32 %v7559_v63  ;;  %v12200_v31 = vadd.f32 %v12078_v8, %v4213_v48  ;;  %v12203_v52 = vadd.f32 %v12078_v8, %v4214_v53 }
 0x756   : > { %v9039_v33 = vpop.eup %9038  ;;  %9052 = vrsqrt.f32 %v4118_v36  ;;  %8219 = vmatprep.mubr.msk.bf16.mxu0 %vm2081_vm0, %v4505_v41  ;;  %v4506_v9 = vpack.c.bf16 %v12197_v13, %v12190_v23  ;;  %v4372_v26 = vadd.f32 1.0, %v9037_v59 }
 0x757   : > { %v9041_v35 = vpop.eup %9040  ;;  %9054 = vrcp.f32 %v4371_v38  ;;  %v4373_v47 = vadd.f32 1.0, %v9039_v33  ;;  %v7560_v3 = vmul.f32 -1.442695, %v12200_v31  ;;  %v7561_v15 = vmul.f32 -1.442695, %v12203_v52 }
 0x758   : > { %8220 = vmatmul.mubr.msk.bf16.gmra.mrb[116].mxu0 %vm2081_vm0, %v4506_v9  ;;  %9056 = vrcp.f32 %v4372_v26  ;;  %v4374_v12 = vadd.f32 1.0, %v9041_v35 }
 0x759   : > { %9058 = vrcp.f32 %v4373_v47 }
 0x75a   : > { %v9043_v16 = vpop.eup %9042  ;;  %9060 = vrcp.f32 %v4374_v12 }
 0x75b   : > { %v4179_v56 = vmul.f32 %v9043_v16, %v11968_v54  ;;  %v4033_v43 = vpop.xlane.xlu0 %4032  ;;  %9062 = vpow2.f32 %v7560_v3 }
 0x75c   : > { %v9045_v37 = vpop.eup %9044  ;;  %v4087_v60 = vmul.f32 0.03125, %v4033_v43  ;;  %9064 = vpow2.f32 %v7561_v15 }
 0x75d   : > { %v9047_v48 = vpop.eup %9046  ;;  %v4180_v40 = vmul.f32 %v9045_v37, %v11971_v58  ;;  %v4215_v28 = vmul.f32 %v12073_v44, %v4179_v56 }
 0x75e   : > { %v9049_v11 = vpop.eup %9048  ;;  %v4119_v57 = vadd.f32 1e-05, %v4087_v60  ;;  %v4036_v63 = vpop.xlane.xlu1 %4035  ;;  %v4375_v53 = vadd.f32 1.0, %v9047_v48 }
 0x75f   : > { %v9051_v2 = vpop.eup %9050  ;;  %v4088_v36 = vmul.f32 0.03125, %v4036_v63  ;;  %v4216_v41 = vmul.f32 %v12073_v44, %v4180_v40  ;;  %v12216_v54 = vadd.f32 %v12078_v8, %v4215_v28  ;;  %v4181_v38 = vmul.f32 %v9049_v11, %v11976_v51 }
 0x760   : > { %v9053_v59 = vpop.eup %9052  ;;  %9066 = vrsqrt.f32 %v4119_v57  ;;  %v4039_v33 = vpop.xlane.xlu0 %4038  ;;  %v4376_v9 = vadd.f32 1.0, %v9051_v2 }
 0x761   : > { %v9055_v58 = vpop.eup %9054  ;;  %v4182_v26 = vmul.f32 %v9053_v59, %v11982_v7  ;;  %v4120_v35 = vadd.f32 1e-05, %v4088_v36  ;;  %v4089_v47 = vmul.f32 0.03125, %v4039_v33  ;;  %9068 = vrcp.f32 %v4375_v53 }
 0x762   : > { %v9057_v3 = vpop.eup %9056  ;;  %v4042_v12 = vpop.xlane.xlu1 %4041  ;;  %v12221_v15 = vmul.f32 %v9055_v58, %v12148_v19  ;;  %9070 = vrcp.f32 %v4376_v9  ;;  %v12224_v16 = vadd.f32 %v12078_v8, %v4216_v41  ;;  %v7562_v51 = vmul.f32 -1.442695, %v12216_v54 }
 0x763   : > { %v9059_v56 = vpop.eup %9058  ;;  %9072 = vrsqrt.f32 %v4120_v35  ;;  %v4121_v43 = vadd.f32 1e-05, %v4089_v47  ;;  %v4090_v37 = vmul.f32 0.03125, %v4042_v12  ;;  %v12228_v7 = vmul.f32 %v9057_v3, %v12154_v6 }
 0x764   : > { %v9061_v60 = vpop.eup %9060  ;;  %v12231_v48 = vmul.f32 %v9059_v56, %v12161_v24  ;;  %9074 = vpow2.f32 %v7562_v51  ;;  %v7563_v19 = vmul.f32 -1.442695, %v12224_v16  ;;  %v4217_v40 = vmul.f32 %v12073_v44, %v4181_v38 }
 0x765   : > { %v9063_v28 = vpop.eup %9062  ;;  %9076 = vrsqrt.f32 %v4121_v43  ;;  %v4122_v11 = vadd.f32 1e-05, %v4090_v37  ;;  %v4507_v57 = vpack.c.bf16 %v12228_v7, %v12221_v15  ;;  %v12238_v63 = vmul.f32 %v9061_v60, %v12165_v0 }
 0x766   : > { %v9065_v6 = vpop.eup %9064  ;;  %v4377_v53 = vadd.f32 1.0, %v9063_v28  ;;  %9078 = vpow2.f32 %v7563_v19  ;;  %v4218_v24 = vmul.f32 %v12073_v44, %v4182_v26  ;;  %v12242_v2 = vadd.f32 %v12078_v8, %v4217_v40 }
 0x767   : > { %14310 = vst [vmem:[#allocation5_spill] sm:$0xff] %v12238_v63  ;;  %9080 = vrsqrt.f32 %v4122_v11  ;;  %8223 = vmatprep.mubr.msk.bf16.mxu0 %vm2081_vm0, %v4507_v57  ;;  %v4508_v36 = vpack.c.bf16 %v12238_v63, %v12231_v48  ;;  %v4378_v41 = vadd.f32 1.0, %v9065_v6 }
 0x768   : > { %9082 = vrcp.f32 %v4377_v53  ;;  %v12248_v59 = vadd.f32 %v12078_v8, %v4218_v24  ;;  %v7564_v0 = vmul.f32 -1.442695, %v12242_v2 }
 0x769   : > { %8224 = vmatmul.mubr.msk.bf16.gmra.mrb[120].mxu0 %vm2081_vm0, %v4508_v36  ;;  %9084 = vrcp.f32 %v4378_v41 }
 0x76a   : > { %v9067_v38 = vpop.eup %9066  ;;  %v4045_v33 = vpop.xlane.xlu0 %4044  ;;  %9086 = vpow2.f32 %v7564_v0  ;;  %v7565_v9 = vmul.f32 -1.442695, %v12248_v59 }
 0x76b   : > { %v9069_v58 = vpop.eup %9068  ;;  %v4183_v26 = vmul.f32 %v9067_v38, %v11995_v5  ;;  %v4091_v35 = vmul.f32 0.03125, %v4045_v33 }
 0x76c   : > { %v9071_v47 = vpop.eup %9070  ;;  %9088 = vpow2.f32 %v7565_v9  ;;  %v12255_v56 = vmul.f32 %v9069_v58, %v12175_v10 }
 0x76d   : > { %v9073_v3 = vpop.eup %9072  ;;  %v4123_v12 = vadd.f32 1e-05, %v4091_v35  ;;  %v4048_v51 = vpop.xlane.xlu1 %4047  ;;  %v12258_v43 = vmul.f32 %v9071_v47, %v12182_v27  ;;  %v4219_v37 = vmul.f32 %v12073_v44, %v4183_v26 }
 0x76e   : > { %14311 = vst [vmem:[#allocation6_spill] sm:$0xff] %v12255_v56  ;;  %v9075_v60 = vpop.eup %9074  ;;  %v4184_v19 = vmul.f32 %v9073_v3, %v12000_v61  ;;  %v4092_v40 = vmul.f32 0.03125, %v4048_v51 }
 0x76f   : > { %14312 = vst [vmem:[#allocation7_spill] sm:$0xff] %v12258_v43  ;;  %v9077_v28 = vpop.eup %9076  ;;  %9090 = vrsqrt.f32 %v4123_v12  ;;  %v4051_v5 = vpop.xlane.xlu0 %4050  ;;  %v4509_v11 = vpack.c.bf16 %v12258_v43, %v12255_v56  ;;  %v4379_v57 = vadd.f32 1.0, %v9075_v60  ;;  %v12265_v6 = vadd.f32 %v12078_v8, %v4219_v37 }
 0x770   : > { %v9079_v10 = vpop.eup %9078  ;;  %v4185_v27 = vmul.f32 %v9077_v28, %v12004_v34  ;;  %v4124_v53 = vadd.f32 1e-05, %v4092_v40  ;;  %v4093_v24 = vmul.f32 0.03125, %v4051_v5  ;;  %v4220_v36 = vmul.f32 %v12073_v44, %v4184_v19 }
 0x771   : > { %v9081_v41 = vpop.eup %9080  ;;  %v4054_v61 = vpop.xlane.xlu1 %4053  ;;  %8227 = vmatprep.mubr.msk.bf16.mxu0 %vm2081_vm0, %v4509_v11  ;;  %v4380_v0 = vadd.f32 1.0, %v9079_v10  ;;  %9092 = vrcp.f32 %v4379_v57  ;;  %v7566_v38 = vmul.f32 -1.442695, %v12265_v6 }
 0x772   : > { %v9083_v33 = vpop.eup %9082  ;;  %v4186_v9 = vmul.f32 %v9081_v41, %v12009_v17  ;;  %9094 = vrsqrt.f32 %v4124_v53  ;;  %v4125_v58 = vadd.f32 1e-05, %v4093_v24  ;;  %v4094_v26 = vmul.f32 0.03125, %v4054_v61 }
 0x773   : > { %v9085_v35 = vpop.eup %9084  ;;  %v12273_v34 = vmul.f32 %v9083_v33, %v12200_v31  ;;  %9096 = vrcp.f32 %v4380_v0  ;;  %v12276_v47 = vadd.f32 %v12078_v8, %v4220_v36  ;;  %v4221_v3 = vmul.f32 %v12073_v44, %v4185_v27 }
 0x774   : > { %v9087_v12 = vpop.eup %9086  ;;  %9098 = vrsqrt.f32 %v4125_v58  ;;  %v4126_v51 = vadd.f32 1e-05, %v4094_v26  ;;  %v12280_v37 = vmul.f32 %v9085_v35, %v12203_v52  ;;  %v4222_v17 = vmul.f32 %v12073_v44, %v4186_v9 }
 0x775   : > { %14313 = vst [vmem:[#allocation8_spill] sm:$0xff] %v12273_v34  ;;  %v4381_v60 = vadd.f32 1.0, %v9087_v12  ;;  %9100 = vpow2.f32 %v7566_v38  ;;  %v7567_v19 = vmul.f32 -1.442695, %v12276_v47  ;;  %v12285_v31 = vadd.f32 %v12078_v8, %v4221_v3 }
 0x776   : > { %14314 = vst [vmem:[#allocation9_spill] sm:$0xff] %v12280_v37  ;;  %v9089_v40 = vpop.eup %9088  ;;  %9102 = vrsqrt.f32 %v4126_v51  ;;  %v4510_v28 = vpack.c.bf16 %v12280_v37, %v12273_v34  ;;  %v12290_v5 = vadd.f32 %v12078_v8, %v4222_v17 }
 0x777   : > { %v4382_v11 = vadd.f32 1.0, %v9089_v40  ;;  %9104 = vrcp.f32 %v4381_v60  ;;  %v7568_v52 = vmul.f32 -1.442695, %v12285_v31 }
 0x778   : > { %8228 = vmatmul.mubr.msk.bf16.gmra.mrb[124].mxu0 %vm2081_vm0, %v4510_v28  ;;  %9106 = vpow2.f32 %v7567_v19  ;;  %v7569_v57 = vmul.f32 -1.442695, %v12290_v5 }
 0x779   : > { %v9091_v10 = vpop.eup %9090  ;;  %v4057_v27 = vpop.xlane.xlu0 %4056  ;;  %9108 = vrcp.f32 %v4382_v11 }
 0x77a   : > { %v4187_v53 = vmul.f32 %v9091_v10, %v12019_v18  ;;  %v4095_v24 = vmul.f32 0.03125, %v4057_v27  ;;  %9110 = vpow2.f32 %v7568_v52 }
 0x77b   : > { %v9093_v36 = vpop.eup %9092  ;;  %v4060_v41 = vpop.xlane.xlu1 %4059  ;;  %9112 = vpow2.f32 %v7569_v57 }
 0x77c   : > { %v9095_v61 = vpop.eup %9094  ;;  %v4127_v0 = vadd.f32 1e-05, %v4095_v24  ;;  %v4096_v38 = vmul.f32 0.03125, %v4060_v41  ;;  %v4223_v33 = vmul.f32 %v12073_v44, %v4187_v53  ;;  %v12299_v35 = vmul.f32 %v9093_v36, %v12216_v54 }
 0x77d   : > { %v9097_v9 = vpop.eup %9096  ;;  %v4188_v58 = vmul.f32 %v9095_v61, %v12024_v49  ;;  %v4063_v26 = vpop.xlane.xlu0 %4062 }
 0x77e   : > { %14315 = vst [vmem:[#allocation10_spill] sm:$0xff] %v12299_v35  ;;  %v9099_v3 = vpop.eup %9098  ;;  %9114 = vrsqrt.f32 %v4127_v0  ;;  %v4128_v18 = vadd.f32 1e-05, %v4096_v38  ;;  %v4097_v12 = vmul.f32 0.03125, %v4063_v26  ;;  %v12302_v51 = vmul.f32 %v9097_v9, %v12224_v16 }
 0x77f   : > { %v9101_v17 = vpop.eup %9100  ;;  %v4189_v60 = vmul.f32 %v9099_v3, %v12028_v46  ;;  %v4066_v19 = vpop.xlane.xlu1 %4065  ;;  %v4224_v40 = vmul.f32 %v12073_v44, %v4188_v58  ;;  %v12307_v28 = vadd.f32 %v12078_v8, %v4223_v33 }
 0x780   : > { %14316 = vst [vmem:[#allocation11_spill] sm:$0xff] %v12302_v51  ;;  %v9103_v49 = vpop.eup %9102  ;;  %9116 = vrsqrt.f32 %v4128_v18  ;;  %v4129_v54 = vadd.f32 1e-05, %v4097_v12  ;;  %v4098_v11 = vmul.f32 0.03125, %v4066_v19  ;;  %v4511_v52 = vpack.c.bf16 %v12302_v51, %v12299_v35 }
 0x781   : > { %v9105_v57 = vpop.eup %9104  ;;  %v4190_v16 = vmul.f32 %v9103_v49, %v12033_v45  ;;  %v4383_v10 = vadd.f32 1.0, %v9101_v17  ;;  %v12313_v27 = vadd.f32 %v12078_v8, %v4224_v40  ;;  %v7570_v24 = vmul.f32 -1.442695, %v12307_v28 }
 0x782   : > { %v9107_v46 = vpop.eup %9106  ;;  %9118 = vrsqrt.f32 %v4129_v54  ;;  %v4130_v53 = vadd.f32 1e-05, %v4098_v11  ;;  %8231 = vmatprep.mubr.msk.bf16.mxu0 %vm2081_vm0, %v4511_v52  ;;  %v4225_v36 = vmul.f32 %v12073_v44, %v4189_v60  ;;  %v12320_v45 = vmul.f32 %v9105_v57, %v12242_v2 }
 0x783   : > { %v9109_v41 = vpop.eup %9108  ;;  %v4384_v61 = vadd.f32 1.0, %v9107_v46  ;;  %9120 = vrcp.f32 %v4383_v10  ;;  %v4226_v0 = vmul.f32 %v12073_v44, %v4190_v16  ;;  %v7571_v3 = vmul.f32 -1.442695, %v12313_v27 }
 0x784   : > { %v9111_v38 = vpop.eup %9110  ;;  %9122 = vrsqrt.f32 %v4130_v53  ;;  %14317 = vst [vmem:[#allocation12_spill] sm:$0xff] %v12320_v45  ;;  %v12323_v33 = vmul.f32 %v9109_v41, %v12248_v59  ;;  %v12326_v9 = vadd.f32 %v12078_v8, %v4225_v36 }
 0x785   : > { %v9113_v58 = vpop.eup %9112  ;;  %9124 = vrcp.f32 %v4384_v61  ;;  %v4385_v26 = vadd.f32 1.0, %v9111_v38  ;;  %v12330_v18 = vadd.f32 %v12078_v8, %v4226_v0 }
 0x786   : > { %14318 = vst [vmem:[#allocation13_spill] sm:$0xff] %v12323_v33  ;;  %v4512_v12 = vpack.c.bf16 %v12323_v33, %v12320_v45  ;;  %v4386_v17 = vadd.f32 1.0, %v9113_v58  ;;  %9126 = vpow2.f32 %v7570_v24  ;;  %v7572_v2 = vmul.f32 -1.442695, %v12326_v9 }
 0x787   : > { %9128 = vrcp.f32 %v4385_v26  ;;  %v7573_v59 = vmul.f32 -1.442695, %v12330_v18 }
 0x788   : > { %v9115_v60 = vpop.eup %9114  ;;  %8232 = vmatmul.mubr.msk.bf16.gmra.mrb[128].mxu0 %vm2081_vm0, %v4512_v12  ;;  %9130 = vrcp.f32 %v4386_v17 }
 0x789   : > { %v4191_v19 = vmul.f32 %v9115_v60, %v12043_v42  ;;  %9132 = vpow2.f32 %v7571_v3 }
 0x78a   : > { %v9117_v40 = vpop.eup %9116  ;;  %9134 = vpow2.f32 %v7572_v2 }
 0x78b   : > { %v4192_v49 = vmul.f32 %v9117_v40, %v12046_v55  ;;  %9136 = vpow2.f32 %v7573_v59  ;;  %v4227_v54 = vmul.f32 %v12073_v44, %v4191_v19 }
 0x78c   : > { %v9119_v11 = vpop.eup %9118 }
 0x78d   : > { %v9121_v52 = vpop.eup %9120  ;;  %v4193_v57 = vmul.f32 %v9119_v11, %v12051_v1  ;;  %v4228_v16 = vmul.f32 %v12073_v44, %v4192_v49  ;;  %v12343_v10 = vadd.f32 %v12078_v8, %v4227_v54 }
 0x78e   : > { %v9123_v46 = vpop.eup %9122  ;;  %v12350_v61 = vmul.f32 %v9121_v52, %v12265_v6 }
 0x78f   : > { %v9125_v53 = vpop.eup %9124  ;;  %v4194_v42 = vmul.f32 %v9123_v46, %v12057_v21  ;;  %v4264_v24 = vadd.f32 %v12078_v8, %v4228_v16  ;;  %v7574_v55 = vmul.f32 -1.442695, %v12343_v10  ;;  %v4229_v36 = vmul.f32 %v12073_v44, %v4193_v57 }
 0x790   : > { %v9127_v41 = vpop.eup %9126  ;;  %14319 = vst [vmem:[#allocation14_spill] sm:$0xff] %v12350_v61  ;;  %v12353_v1 = vmul.f32 %v9125_v53, %v12276_v47 }
 0x791   : > { %v9129_v0 = vpop.eup %9128  ;;  %v4387_v38 = vadd.f32 1.0, %v9127_v41  ;;  %9138 = vpow2.f32 %v7574_v55  ;;  %v7575_v58 = vmul.f32 -1.442695, %v4264_v24  ;;  %v4230_v26 = vmul.f32 %v12073_v44, %v4194_v42 }
 0x792   : > { %14320 = vst [vmem:[#allocation15_spill] sm:$0xff] %v12353_v1  ;;  %v9131_v21 = vpop.eup %9130  ;;  %v4513_v3 = vpack.c.bf16 %v12353_v1, %v12350_v61  ;;  %v4265_v12 = vadd.f32 %v12078_v8, %v4229_v36  ;;  %v12360_v2 = vmul.f32 %v9129_v0, %v12285_v31 }
 0x793   : > { %v9133_v17 = vpop.eup %9132  ;;  %v12363_v6 = vmul.f32 %v9131_v21, %v12290_v5  ;;  %9140 = vrcp.f32 %v4387_v38  ;;  %v4266_v47 = vadd.f32 %v12078_v8, %v4230_v26 }
 0x794   : > { %14321 = vst [vmem:[#allocation16_spill] sm:$0xff] %v12360_v2  ;;  %v9135_v59 = vpop.eup %9134  ;;  %8235 = vmatprep.mubr.msk.bf16.mxu0 %vm2081_vm0, %v4513_v3  ;;  %v4388_v44 = vadd.f32 1.0, %v9133_v17  ;;  %9142 = vpow2.f32 %v7575_v58  ;;  %v7576_v49 = vmul.f32 -1.442695, %v4265_v12 }
 0x795   : > { %14322 = vst [vmem:[#allocation17_spill] sm:$0xff] %v12363_v6  ;;  %v9137_v60 = vpop.eup %9136  ;;  %v4514_v19 = vpack.c.bf16 %v12363_v6, %v12360_v2  ;;  %v4389_v40 = vadd.f32 1.0, %v9135_v59  ;;  %v7577_v54 = vmul.f32 -1.442695, %v4266_v47 }
 0x796   : > { %9144 = vrcp.f32 %v4388_v44  ;;  %v4390_v31 = vadd.f32 1.0, %v9137_v60 }
 0x797   : > { %8236 = vmatmul.mubr.msk.bf16.gmra.mrb[132].mxu0 %vm2081_vm0, %v4514_v19  ;;  %9146 = vrcp.f32 %v4389_v40 }
 0x798   : > { %9148 = vrcp.f32 %v4390_v31 }
 0x799   : > { %9150 = vpow2.f32 %v7576_v49 }
 0x79a   : > { %9152 = vpow2.f32 %v7577_v54 }
 0x79b   : > { %v9139_v8 = vpop.eup %9138 }
 0x79c   : > { %v4391_v5 = vadd.f32 1.0, %v9139_v8 }
 0x79d   : > { %v9141_v11 = vpop.eup %9140 }
 0x79e   : > { %v9143_v52 = vpop.eup %9142  ;;  %9154 = vrcp.f32 %v4391_v5  ;;  %v12371_v53 = vmul.f32 %v9141_v11, %v12307_v28 }
 0x79f   : > { %v4392_v57 = vadd.f32 1.0, %v9143_v52 }
 0x7a0   : > { %v9145_v16 = vpop.eup %9144  ;;  %14323 = vst [vmem:[#allocation18_spill] sm:$0xff] %v12371_v53 }
 0x7a1   : > { %v9147_v46 = vpop.eup %9146  ;;  %v12374_v42 = vmul.f32 %v9145_v16, %v12313_v27  ;;  %9156 = vrcp.f32 %v4392_v57 }
 0x7a2   : > { %v9149_v55 = vpop.eup %9148  ;;  %v12379_v0 = vmul.f32 %v9147_v46, %v12326_v9 }
 0x7a3   : > { %14324 = vst [vmem:[#allocation19_spill] sm:$0xff] %v12374_v42  ;;  %v9151_v36 = vpop.eup %9150  ;;  %v4515_v41 = vpack.c.bf16 %v12374_v42, %v12371_v53  ;;  %v12382_v38 = vmul.f32 %v9149_v55, %v12330_v18 }
 0x7a4   : > { %14325 = vst [vmem:[#allocation20_spill] sm:$0xff] %v12379_v0  ;;  %v9153_v58 = vpop.eup %9152  ;;  %v4393_v26 = vadd.f32 1.0, %v9151_v36 }
 0x7a5   : > { %14326 = vst [vmem:[#allocation21_spill] sm:$0xff] %v12382_v38  ;;  %8239 = vmatprep.mubr.msk.bf16.mxu0 %vm2081_vm0, %v4515_v41  ;;  %v4516_v28 = vpack.c.bf16 %v12382_v38, %v12379_v0  ;;  %v4394_v27 = vadd.f32 1.0, %v9153_v58 }
 0x7a6   : > { %9158 = vrcp.f32 %v4393_v26 }
 0x7a7   : > { %8240 = vmatmul.mubr.msk.bf16.gmra.mrb[136].mxu0 %vm2081_vm0, %v4516_v28  ;;  %9160 = vrcp.f32 %v4394_v27 }
 0x7a8   : > { %v9155_v21 = vpop.eup %9154 }
 0x7a9   : > { %v12389_v9 = vmul.f32 %v9155_v21, %v12343_v10  ;;  %v12406_v10 = vld [vmem:[%s14214_s8 + $0x8] sm:$0xff] }
 0x7ab   : > { %v9157_v3 = vpop.eup %9156  ;;  %14327 = vst [vmem:[#allocation22_spill] sm:$0xff] %v12389_v9 }
 0x7ac   : > { %v12391_v17 = vmul.f32 %v9157_v3, %v4264_v24  ;;  %v14331_v24 = vsub.s32 0, %v10624_v4 }
 0x7ae   : > { %14328 = vst [vmem:[#allocation23_spill] sm:$0xff] %v12391_v17  ;;  %v4517_v18 = vpack.c.bf16 %v12391_v17, %v12389_v9  ;;  %v12411_v49 = vrot.slane %v12406_v10, %v14331_v24 }
 0x7b0   : > { %v9159_v59 = vpop.eup %9158  ;;  %8243 = vmatprep.mubr.msk.bf16.mxu0 %vm2081_vm0, %v4517_v18 }
 0x7b1   : > { %v9161_v44 = vpop.eup %9160  ;;  %v12396_v60 = vmul.f32 %v9159_v59, %v4265_v12 }
 0x7b2   : > { %v12398_v19 = vmul.f32 %v9161_v44, %v4266_v47 }
 0x7b3   : > { %14329 = vst [vmem:[#allocation24_spill] sm:$0xff] %v12396_v60 }
 0x7b4   : > { %14330 = vst [vmem:[#allocation25_spill] sm:$0xff] %v12398_v19  ;;  %v4518_v40 = vpack.c.bf16 %v12398_v19, %v12396_v60 }
 0x7b6   : > { %8244 = vmatmul.mubr.msk.bf16.gmra.mrb[140].mxu0 %vm2081_vm0, %v4518_v40 }
 0x817   : > { %v8217_v31 = vpop.f32.mrb[112].mxu0 }
 0x818   : > { %v4617_v12 = vpop.f32.mrb[113].mxu0  ;;  %v12417_v5 = vadd.f32 %v8217_v31, %v12411_v49 }
 0x819   : > { %v12414_v47 = vadd.f32 %v4617_v12, %v12411_v49  ;;  %v8218_v54 = vpop.f32.mrb[114].mxu0 }
 0x81a   : > { %v4620_v8 = vpop.f32.mrb[115].mxu0  ;;  %v12425_v57 = vadd.f32 %v8218_v54, %v12411_v49  ;;  %v4750_v46 = vsel %vm2291_vm1, %v12417_v5, 0.0 }
 0x81b   : > { %v12420_v11 = vadd.f32 %v4620_v8, %v12411_v49  ;;  %v4744_v52 = vsel %vm2291_vm1, %v12414_v47, 0.0 }
 0x81c   : > { %4745 = vadd.xlane.f32.xlu0 %v4744_v52  ;;  %v4753_v55 = vsel %vm2291_vm1, %v12425_v57, 0.0 }
 0x81d   : > { %v4747_v16 = vsel %vm2291_vm1, %v12420_v11, 0.0 }
 0x81e   : > { %4748 = vadd.xlane.f32.xlu1 %v4747_v16 }
 0x820   : > { %4751 = vadd.xlane.f32.xlu0 %v4750_v46 }
 0x822   : > { %4754 = vadd.xlane.f32.xlu1 %v4753_v55 }
 0x82b   : > { %v8221_v36 = vpop.f32.mrb[116].mxu0 }
 0x82c   : > { %v4633_v41 = vpop.f32.mrb[117].mxu0  ;;  %v12437_v27 = vadd.f32 %v8221_v36, %v12411_v49 }
 0x82d   : > { %v12434_v58 = vadd.f32 %v4633_v41, %v12411_v49  ;;  %v8222_v26 = vpop.f32.mrb[118].mxu0 }
 0x82e   : > { %v4636_v28 = vpop.f32.mrb[119].mxu0  ;;  %v12445_v18 = vadd.f32 %v8222_v26, %v12411_v49  ;;  %v4762_v44 = vsel %vm2291_vm1, %v12437_v27, 0.0 }
 0x82f   : > { %v12440_v21 = vadd.f32 %v4636_v28, %v12411_v49  ;;  %v4756_v3 = vsel %vm2291_vm1, %v12434_v58, 0.0 }
 0x830   : > { %4757 = vadd.xlane.f32.xlu0 %v4756_v3  ;;  %v4765_v40 = vsel %vm2291_vm1, %v12445_v18, 0.0 }
 0x831   : > { %v4759_v59 = vsel %vm2291_vm1, %v12440_v21, 0.0 }
 0x832   : > { %4760 = vadd.xlane.f32.xlu1 %v4759_v59 }
 0x834   : > { %4763 = vadd.xlane.f32.xlu0 %v4762_v44 }
 0x836   : > { %4766 = vadd.xlane.f32.xlu1 %v4765_v40 }
 0x83c   : > { %v8225_v24 = vpop.f32.mrb[120].mxu0 }
 0x83d   : > { %v4649_v31 = vpop.f32.mrb[121].mxu0  ;;  %v12457_v52 = vadd.f32 %v8225_v24, %v12411_v49 }
 0x83e   : > { %v12454_v12 = vadd.f32 %v4649_v31, %v12411_v49  ;;  %v8226_v54 = vpop.f32.mrb[122].mxu0 }
 0x83f   : > { %v4652_v8 = vpop.f32.mrb[123].mxu0  ;;  %v12465_v55 = vadd.f32 %v8226_v54, %v12411_v49  ;;  %v4774_v41 = vsel %vm2291_vm1, %v12457_v52, 0.0 }
 0x840   : > { %v12460_v16 = vadd.f32 %v4652_v8, %v12411_v49  ;;  %v4768_v46 = vsel %vm2291_vm1, %v12454_v12, 0.0 }
 0x841   : > { %4769 = vadd.xlane.f32.xlu0 %v4768_v46  ;;  %v4777_v26 = vsel %vm2291_vm1, %v12465_v55, 0.0 }
 0x842   : > { %v4771_v36 = vsel %vm2291_vm1, %v12460_v16, 0.0 }
 0x843   : > { %4772 = vadd.xlane.f32.xlu1 %v4771_v36 }
 0x845   : > { %4775 = vadd.xlane.f32.xlu0 %v4774_v41 }
 0x847   : > { %4778 = vadd.xlane.f32.xlu1 %v4777_v26 }
 0x84b   : > { %v8229_v28 = vpop.f32.mrb[124].mxu0 }
 0x84c   : > { %v4665_v3 = vpop.f32.mrb[125].mxu0  ;;  %v12477_v24 = vadd.f32 %v8229_v28, %v12411_v49 }
 0x84d   : > { %v12474_v59 = vadd.f32 %v4665_v3, %v12411_v49  ;;  %v8230_v44 = vpop.f32.mrb[126].mxu0 }
 0x84e   : > { %v4668_v40 = vpop.f32.mrb[127].mxu0  ;;  %v12485_v8 = vadd.f32 %v8230_v44, %v12411_v49  ;;  %v4786_v36 = vsel %vm2291_vm1, %v12477_v24, 0.0 }
 0x84f   : > { %v12480_v31 = vadd.f32 %v4668_v40, %v12411_v49  ;;  %v4780_v54 = vsel %vm2291_vm1, %v12474_v59, 0.0 }
 0x850   : > { %4781 = vadd.xlane.f32.xlu0 %v4780_v54  ;;  %v4789_v41 = vsel %vm2291_vm1, %v12485_v8, 0.0 }
 0x851   : > { %v4783_v46 = vsel %vm2291_vm1, %v12480_v31, 0.0 }
 0x852   : > { %4784 = vadd.xlane.f32.xlu1 %v4783_v46 }
 0x854   : > { %4787 = vadd.xlane.f32.xlu0 %v4786_v36 }
 0x856   : > { %4790 = vadd.xlane.f32.xlu1 %v4789_v41 }
 0x85b   : > { %v8233_v26 = vpop.f32.mrb[128].mxu0 }
 0x85c   : > { %v4681_v28 = vpop.f32.mrb[129].mxu0  ;;  %v12497_v54 = vadd.f32 %v8233_v26, %v12411_v49 }
 0x85d   : > { %v12494_v3 = vadd.f32 %v4681_v28, %v12411_v49  ;;  %v8234_v40 = vpop.f32.mrb[130].mxu0 }
 0x85e   : > { %v4684_v44 = vpop.f32.mrb[131].mxu0  ;;  %v12505_v22 = vadd.f32 %v8234_v40, %v12411_v49  ;;  %v4798_v28 = vsel %vm2291_vm1, %v12497_v54, 0.0 }
 0x85f   : > { %v12500_v46 = vadd.f32 %v4684_v44, %v12411_v49  ;;  %v4792_v36 = vsel %vm2291_vm1, %v12494_v3, 0.0 }
 0x860   : > { %4793 = vadd.xlane.f32.xlu0 %v4792_v36  ;;  %v4801_v26 = vsel %vm2291_vm1, %v12505_v22, 0.0 }
 0x861   : > { %v4795_v41 = vsel %vm2291_vm1, %v12500_v46, 0.0 }
 0x862   : > { %4796 = vadd.xlane.f32.xlu1 %v4795_v41 }
 0x864   : > { %4799 = vadd.xlane.f32.xlu0 %v4798_v28 }
 0x866   : > { %4802 = vadd.xlane.f32.xlu1 %v4801_v26 }
 0x86a   : > { %v8237_v44 = vpop.f32.mrb[132].mxu0 }
 0x86b   : > { %v4697_v62 = vpop.f32.mrb[133].mxu0  ;;  %v12517_v32 = vadd.f32 %v8237_v44, %v12411_v49 }
 0x86c   : > { %v12514_v25 = vadd.f32 %v4697_v62, %v12411_v49  ;;  %v8238_v36 = vpop.f32.mrb[134].mxu0 }
 0x86d   : > { %v4700_v40 = vpop.f32.mrb[135].mxu0  ;;  %v12525_v19 = vadd.f32 %v8238_v36, %v12411_v49  ;;  %v4810_v62 = vsel %vm2291_vm1, %v12517_v32, 0.0 }
 0x86e   : > { %v12520_v41 = vadd.f32 %v4700_v40, %v12411_v49  ;;  %v4804_v28 = vsel %vm2291_vm1, %v12514_v25, 0.0 }
 0x86f   : > { %4805 = vadd.xlane.f32.xlu0 %v4804_v28  ;;  %v4813_v44 = vsel %vm2291_vm1, %v12525_v19, 0.0 }
 0x870   : > { %v4807_v26 = vsel %vm2291_vm1, %v12520_v41, 0.0 }
 0x871   : > { %4808 = vadd.xlane.f32.xlu1 %v4807_v26 }
 0x873   : > { %4811 = vadd.xlane.f32.xlu0 %v4810_v62 }
 0x875   : > { %4814 = vadd.xlane.f32.xlu1 %v4813_v44 }
 0x87a   : > { %v8241_v40 = vpop.f32.mrb[136].mxu0 }
 0x87b   : > { %v4713_v60 = vpop.f32.mrb[137].mxu0  ;;  %v12537_v9 = vadd.f32 %v8241_v40, %v12411_v49 }
 0x87c   : > { %v12534_v17 = vadd.f32 %v4713_v60, %v12411_v49  ;;  %v8242_v28 = vpop.f32.mrb[138].mxu0 }
 0x87d   : > { %v4716_v36 = vpop.f32.mrb[139].mxu0  ;;  %v12545_v38 = vadd.f32 %v8242_v28, %v12411_v49  ;;  %v4822_v60 = vsel %vm2291_vm1, %v12537_v9, 0.0 }
 0x87e   : > { %v12540_v26 = vadd.f32 %v4716_v36, %v12411_v49  ;;  %v4816_v62 = vsel %vm2291_vm1, %v12534_v17, 0.0 }
 0x87f   : > { %4817 = vadd.xlane.f32.xlu0 %v4816_v62  ;;  %v4825_v40 = vsel %vm2291_vm1, %v12545_v38, 0.0 }
 0x880   : > { %v4819_v44 = vsel %vm2291_vm1, %v12540_v26, 0.0 }
 0x881   : > { %4820 = vadd.xlane.f32.xlu1 %v4819_v44 }
 0x883   : > { %4823 = vadd.xlane.f32.xlu0 %v4822_v60 }
 0x885   : > { %4826 = vadd.xlane.f32.xlu1 %v4825_v40 }
 0x889   : > { %v8245_v36 = vpop.f32.mrb[140].mxu0 }
 0x88a   : > { %v4729_v0 = vpop.f32.mrb[141].mxu0  ;;  %v12557_v53 = vadd.f32 %v8245_v36, %v12411_v49 }
 0x88b   : > { %v12554_v42 = vadd.f32 %v4729_v0, %v12411_v49  ;;  %v8246_v62 = vpop.f32.mrb[142].mxu0 }
 0x88c   : > { %v4732_v28 = vpop.f32.mrb[143].mxu0  ;;  %v12565_v6 = vadd.f32 %v8246_v62, %v12411_v49  ;;  %v4834_v0 = vsel %vm2291_vm1, %v12557_v53, 0.0 }
 0x88d   : > { %v12560_v44 = vadd.f32 %v4732_v28, %v12411_v49  ;;  %v4828_v60 = vsel %vm2291_vm1, %v12554_v42, 0.0 }
 0x88e   : > { %4829 = vadd.xlane.f32.xlu0 %v4828_v60  ;;  %v4837_v36 = vsel %vm2291_vm1, %v12565_v6, 0.0 }
 0x88f   : > { %v4831_v40 = vsel %vm2291_vm1, %v12560_v44, 0.0 }
 0x890   : > { %4832 = vadd.xlane.f32.xlu1 %v4831_v40 }
 0x892   : > { %4835 = vadd.xlane.f32.xlu0 %v4834_v0 }
 0x894   : > { %4838 = vadd.xlane.f32.xlu1 %v4837_v36 }
 0x8a9   : > { %v4746_v28 = vpop.xlane.xlu0 %4745 }
 0x8aa   : > { %v4840_v2 = vmul.f32 0.015625, %v4746_v28 }
 0x8ab   : > { %v4749_v1 = vpop.xlane.xlu1 %4748 }
 0x8ac   : > { %v12574_v60 = vsub.f32 %v12414_v47, %v4840_v2  ;;  %v4841_v49 = vmul.f32 0.015625, %v4749_v1 }
 0x8ad   : > { %v4752_v62 = vpop.xlane.xlu0 %4751 }
 0x8ae   : > { %v12577_v61 = vsub.f32 %v12420_v11, %v4841_v49  ;;  %v4842_v40 = vmul.f32 0.015625, %v4752_v62  ;;  %v4904_v33 = vmul.f32 %v12574_v60, %v12574_v60 }
 0x8af   : > { %v4755_v0 = vpop.xlane.xlu1 %4754 }
 0x8b0   : > { %v12582_v45 = vsub.f32 %v12417_v5, %v4842_v40  ;;  %v4843_v36 = vmul.f32 0.015625, %v4755_v0  ;;  %v4936_v28 = vsel %vm2291_vm1, %v4904_v33, 0.0  ;;  %v4905_v2 = vmul.f32 %v12577_v61, %v12577_v61 }
 0x8b1   : > { %4937 = vadd.xlane.f32.xlu0 %v4936_v28 }
 0x8b2   : > { %v12588_v1 = vsub.f32 %v12425_v57, %v4843_v36  ;;  %v4939_v47 = vsel %vm2291_vm1, %v4905_v2, 0.0  ;;  %v4906_v11 = vmul.f32 %v12582_v45, %v12582_v45 }
 0x8b3   : > { %4940 = vadd.xlane.f32.xlu1 %v4939_v47 }
 0x8b4   : > { %v4942_v49 = vsel %vm2291_vm1, %v4906_v11, 0.0  ;;  %v4907_v5 = vmul.f32 %v12588_v1, %v12588_v1 }
 0x8b5   : > { %4943 = vadd.xlane.f32.xlu0 %v4942_v49 }
 0x8b6   : > { %v4945_v33 = vsel %vm2291_vm1, %v4907_v5, 0.0 }
 0x8b7   : > { %4946 = vadd.xlane.f32.xlu1 %v4945_v33 }
 0x8bd   : > { %v4758_v62 = vpop.xlane.xlu0 %4757 }
 0x8be   : > { %v4844_v40 = vmul.f32 0.015625, %v4758_v62 }
 0x8bf   : > { %v4761_v0 = vpop.xlane.xlu1 %4760 }
 0x8c0   : > { %v12598_v57 = vsub.f32 %v12434_v58, %v4844_v40  ;;  %v4845_v36 = vmul.f32 0.015625, %v4761_v0 }
 0x8c1   : > { %v4764_v28 = vpop.xlane.xlu0 %4763 }
 0x8c2   : > { %v12601_v2 = vsub.f32 %v12440_v21, %v4845_v36  ;;  %v4846_v47 = vmul.f32 0.015625, %v4764_v28  ;;  %v4908_v11 = vmul.f32 %v12598_v57, %v12598_v57 }
 0x8c3   : > { %v4767_v51 = vpop.xlane.xlu1 %4766 }
 0x8c4   : > { %v12606_v49 = vsub.f32 %v12437_v27, %v4846_v47  ;;  %v4847_v5 = vmul.f32 0.015625, %v4767_v51  ;;  %v4948_v33 = vsel %vm2291_vm1, %v4908_v11, 0.0  ;;  %v4909_v58 = vmul.f32 %v12601_v2, %v12601_v2 }
 0x8c5   : > { %4949 = vadd.xlane.f32.xlu0 %v4948_v33 }
 0x8c6   : > { %v12612_v62 = vsub.f32 %v12445_v18, %v4847_v5  ;;  %v4951_v21 = vsel %vm2291_vm1, %v4909_v58, 0.0  ;;  %v4910_v40 = vmul.f32 %v12606_v49, %v12606_v49 }
 0x8c7   : > { %4952 = vadd.xlane.f32.xlu1 %v4951_v21 }
 0x8c8   : > { %v4954_v0 = vsel %vm2291_vm1, %v4910_v40, 0.0  ;;  %v4911_v51 = vmul.f32 %v12612_v62, %v12612_v62 }
 0x8c9   : > { %4955 = vadd.xlane.f32.xlu0 %v4954_v0 }
 0x8ca   : > { %v4957_v27 = vsel %vm2291_vm1, %v4911_v51, 0.0 }
 0x8cb   : > { %4958 = vadd.xlane.f32.xlu1 %v4957_v27 }
 0x8ce   : > { %v4770_v36 = vpop.xlane.xlu0 %4769 }
 0x8cf   : > { %v4848_v28 = vmul.f32 0.015625, %v4770_v36 }
 0x8d0   : > { %v4773_v47 = vpop.xlane.xlu1 %4772 }
 0x8d1   : > { %v12622_v18 = vsub.f32 %v12454_v12, %v4848_v28  ;;  %v4849_v11 = vmul.f32 0.015625, %v4773_v47 }
 0x8d2   : > { %v4776_v5 = vpop.xlane.xlu0 %4775 }
 0x8d3   : > { %v12625_v33 = vsub.f32 %v12460_v16, %v4849_v11  ;;  %v4850_v58 = vmul.f32 0.015625, %v4776_v5  ;;  %v4912_v21 = vmul.f32 %v12622_v18, %v12622_v18 }
 0x8d4   : > { %v4779_v40 = vpop.xlane.xlu1 %4778 }
 0x8d5   : > { %v12630_v0 = vsub.f32 %v12457_v52, %v4850_v58  ;;  %v4851_v51 = vmul.f32 0.015625, %v4779_v40  ;;  %v4960_v27 = vsel %vm2291_vm1, %v4912_v21, 0.0  ;;  %v4913_v12 = vmul.f32 %v12625_v33, %v12625_v33 }
 0x8d6   : > { %4961 = vadd.xlane.f32.xlu0 %v4960_v27 }
 0x8d7   : > { %v12636_v36 = vsub.f32 %v12465_v55, %v4851_v51  ;;  %v4963_v16 = vsel %vm2291_vm1, %v4913_v12, 0.0  ;;  %v4914_v28 = vmul.f32 %v12630_v0, %v12630_v0 }
 0x8d8   : > { %4964 = vadd.xlane.f32.xlu1 %v4963_v16 }
 0x8d9   : > { %v4966_v47 = vsel %vm2291_vm1, %v4914_v28, 0.0  ;;  %v4915_v52 = vmul.f32 %v12636_v36, %v12636_v36 }
 0x8da   : > { %4967 = vadd.xlane.f32.xlu0 %v4966_v47 }
 0x8db   : > { %v4969_v11 = vsel %vm2291_vm1, %v4915_v52, 0.0 }
 0x8dc   : > { %4970 = vadd.xlane.f32.xlu1 %v4969_v11 }
 0x8dd   : > { %v4782_v5 = vpop.xlane.xlu0 %4781 }
 0x8de   : > { %v4852_v58 = vmul.f32 0.015625, %v4782_v5 }
 0x8df   : > { %v4785_v21 = vpop.xlane.xlu1 %4784 }
 0x8e0   : > { %v12646_v55 = vsub.f32 %v12474_v59, %v4852_v58  ;;  %v4853_v40 = vmul.f32 0.015625, %v4785_v21 }
 0x8e1   : > { %v4788_v51 = vpop.xlane.xlu0 %4787 }
 0x8e2   : > { %v12649_v27 = vsub.f32 %v12480_v31, %v4853_v40  ;;  %v4854_v12 = vmul.f32 0.015625, %v4788_v51  ;;  %v4916_v16 = vmul.f32 %v12646_v55, %v12646_v55 }
 0x8e3   : > { %v4791_v28 = vpop.xlane.xlu1 %4790 }
 0x8e4   : > { %v12654_v47 = vsub.f32 %v12477_v24, %v4854_v12  ;;  %v4855_v52 = vmul.f32 0.015625, %v4791_v28  ;;  %v4972_v11 = vsel %vm2291_vm1, %v4916_v16, 0.0  ;;  %v4917_v59 = vmul.f32 %v12649_v27, %v12649_v27 }
 0x8e5   : > { %4973 = vadd.xlane.f32.xlu0 %v4972_v11 }
 0x8e6   : > { %v12660_v5 = vsub.f32 %v12485_v8, %v4855_v52  ;;  %v4975_v31 = vsel %vm2291_vm1, %v4917_v59, 0.0  ;;  %v4918_v58 = vmul.f32 %v12654_v47, %v12654_v47  ;;  %v8580_v52 = vld [vmem:[%s14212_s6] sm:$0xff]  }
 0x8e7   : > { %4976 = vadd.xlane.f32.xlu1 %v4975_v31  ;;  %8247 = vmatprep.subr.bf16.mxu1 %v8580_v52 }
 0x8e8   : > { %v4978_v21 = vsel %vm2291_vm1, %v4918_v58, 0.0  ;;  %v4919_v24 = vmul.f32 %v12660_v5, %v12660_v5  ;;  %8248 = vmatpush3.bf16.msra.mxu1 %v8580_v52 }
 0x8e9   : > { %4979 = vadd.xlane.f32.xlu0 %v4978_v21 }
 0x8ea   : > { %v4981_v40 = vsel %vm2291_vm1, %v4919_v24, 0.0 }
 0x8eb   : > { %4982 = vadd.xlane.f32.xlu1 %v4981_v40 }
 0x8ed   : > { %v4794_v51 = vpop.xlane.xlu0 %4793 }
 0x8ee   : > { %v4856_v12 = vmul.f32 0.015625, %v4794_v51 }
 0x8ef   : > { %v4797_v16 = vpop.xlane.xlu1 %4796 }
 0x8f0   : > { %v12670_v8 = vsub.f32 %v12494_v3, %v4856_v12  ;;  %v4857_v28 = vmul.f32 0.015625, %v4797_v16 }
 0x8f1   : > { %v4800_v11 = vpop.xlane.xlu0 %4799 }
 0x8f2   : > { %v12676_v59 = vsub.f32 %v12500_v46, %v4857_v28  ;;  %v4858_v31 = vmul.f32 0.015625, %v4800_v11  ;;  %v4920_v58 = vmul.f32 %v12670_v8, %v12670_v8  ;;  %v8581_v46 = vld [vmem:[%s14212_s6 + $0x8] sm:$0xff]   ;;  %v8582_v11 = vld [vmem:[%s14212_s6 + $0x10] sm:$0xff]  }
 0x8f3   : > { %v4803_v21 = vpop.xlane.xlu1 %4802  ;;  %8249 = vmatprep.subr.bf16.mxu1 %v8581_v46 }
 0x8f4   : > { %v12681_v24 = vsub.f32 %v12497_v54, %v4858_v31  ;;  %v4859_v3 = vmul.f32 0.015625, %v4803_v21  ;;  %v4984_v40 = vsel %vm2291_vm1, %v4920_v58, 0.0  ;;  %v4921_v51 = vmul.f32 %v12676_v59, %v12676_v59  ;;  %8250 = vmatpush3.bf16.msra.mxu1 %v8581_v46  ;;  %v8583_v58 = vld [vmem:[%s14212_s6 + $0x18] sm:$0xff]  }
 0x8f5   : > { %4985 = vadd.xlane.f32.xlu0 %v4984_v40  ;;  %8251 = vmatprep.subr.bf16.mxu1 %v8582_v11 }
 0x8f6   : > { %v12690_v12 = vsub.f32 %v12505_v22, %v4859_v3  ;;  %v4987_v16 = vsel %vm2291_vm1, %v4921_v51, 0.0  ;;  %v4922_v54 = vmul.f32 %v12681_v24, %v12681_v24 }
 0x8f7   : > { %4988 = vadd.xlane.f32.xlu1 %v4987_v16 }
 0x8f8   : > { %v4990_v28 = vsel %vm2291_vm1, %v4922_v54, 0.0  ;;  %v4923_v52 = vmul.f32 %v12690_v12, %v12690_v12  ;;  %8252 = vmatpush3.bf16.msra.mxu1 %v8582_v11 }
 0x8f9   : > { %4991 = vadd.xlane.f32.xlu0 %v4990_v28  ;;  %8253 = vmatprep.subr.bf16.mxu1 %v8583_v58 }
 0x8fa   : > { %v4993_v22 = vsel %vm2291_vm1, %v4923_v52, 0.0 }
 0x8fb   : > { %4994 = vadd.xlane.f32.xlu1 %v4993_v22 }
 0x8fc   : > { %v4806_v31 = vpop.xlane.xlu0 %4805  ;;  %8254 = vmatpush3.bf16.msra.mxu1 %v8583_v58 }
 0x8fd   : > { %v4860_v21 = vmul.f32 0.015625, %v4806_v31 }
 0x8fe   : > { %v4809_v3 = vpop.xlane.xlu1 %4808 }
 0x8ff   : > { %v12706_v40 = vsub.f32 %v12514_v25, %v4860_v21  ;;  %v4861_v51 = vmul.f32 0.015625, %v4809_v3 }
 0x900   : > { %v4812_v46 = vpop.xlane.xlu0 %4811 }
 0x901   : > { %v12709_v16 = vsub.f32 %v12520_v41, %v4861_v51  ;;  %v4862_v54 = vmul.f32 0.015625, %v4812_v46  ;;  %v4924_v28 = vmul.f32 %v12706_v40, %v12706_v40 }
 0x902   : > { %v4815_v52 = vpop.xlane.xlu1 %4814 }
 0x903   : > { %v12714_v11 = vsub.f32 %v12517_v32, %v4862_v54  ;;  %v4863_v22 = vmul.f32 0.015625, %v4815_v52  ;;  %v4996_v31 = vsel %vm2291_vm1, %v4924_v28, 0.0  ;;  %v4925_v25 = vmul.f32 %v12709_v16, %v12709_v16 }
 0x904   : > { %4997 = vadd.xlane.f32.xlu0 %v4996_v31 }
 0x905   : > { %v12720_v58 = vsub.f32 %v12525_v19, %v4863_v22  ;;  %v4999_v41 = vsel %vm2291_vm1, %v4925_v25, 0.0  ;;  %v4926_v21 = vmul.f32 %v12714_v11, %v12714_v11 }
 0x906   : > { %5000 = vadd.xlane.f32.xlu1 %v4999_v41 }
 0x907   : > { %v5002_v3 = vsel %vm2291_vm1, %v4926_v21, 0.0  ;;  %v4927_v32 = vmul.f32 %v12720_v58, %v12720_v58 }
 0x908   : > { %5003 = vadd.xlane.f32.xlu0 %v5002_v3 }
 0x909   : > { %v5005_v51 = vsel %vm2291_vm1, %v4927_v32, 0.0 }
 0x90a   : > { %5006 = vadd.xlane.f32.xlu1 %v5005_v51 }
 0x90c   : > { %v4818_v46 = vpop.xlane.xlu0 %4817 }
 0x90d   : > { %v4864_v54 = vmul.f32 0.015625, %v4818_v46 }
 0x90e   : > { %v4821_v28 = vpop.xlane.xlu1 %4820 }
 0x90f   : > { %v12730_v19 = vsub.f32 %v12534_v17, %v4864_v54  ;;  %v4865_v52 = vmul.f32 0.015625, %v4821_v28 }
 0x910   : > { %v4824_v22 = vpop.xlane.xlu0 %4823 }
 0x911   : > { %v12733_v31 = vsub.f32 %v12540_v26, %v4865_v52  ;;  %v4866_v25 = vmul.f32 0.015625, %v4824_v22  ;;  %v4928_v41 = vmul.f32 %v12730_v19, %v12730_v19 }
 0x912   : > { %v4827_v21 = vpop.xlane.xlu1 %4826 }
 0x913   : > { %v12738_v3 = vsub.f32 %v12537_v9, %v4866_v25  ;;  %v4867_v32 = vmul.f32 0.015625, %v4827_v21  ;;  %v5008_v51 = vsel %vm2291_vm1, %v4928_v41, 0.0  ;;  %v4929_v17 = vmul.f32 %v12733_v31, %v12733_v31 }
 0x914   : > { %5009 = vadd.xlane.f32.xlu0 %v5008_v51 }
 0x915   : > { %v12744_v46 = vsub.f32 %v12545_v38, %v4867_v32  ;;  %v5011_v26 = vsel %vm2291_vm1, %v4929_v17, 0.0  ;;  %v4930_v54 = vmul.f32 %v12738_v3, %v12738_v3 }
 0x916   : > { %5012 = vadd.xlane.f32.xlu1 %v5011_v26 }
 0x917   : > { %v5014_v28 = vsel %vm2291_vm1, %v4930_v54, 0.0  ;;  %v4931_v9 = vmul.f32 %v12744_v46, %v12744_v46 }
 0x918   : > { %5015 = vadd.xlane.f32.xlu0 %v5014_v28 }
 0x919   : > { %v5017_v52 = vsel %vm2291_vm1, %v4931_v9, 0.0 }
 0x91a   : > { %5018 = vadd.xlane.f32.xlu1 %v5017_v52 }
 0x91b   : > { %v4830_v22 = vpop.xlane.xlu0 %4829 }
 0x91c   : > { %v4868_v25 = vmul.f32 0.015625, %v4830_v22 }
 0x91d   : > { %v4833_v41 = vpop.xlane.xlu1 %4832 }
 0x91e   : > { %v12754_v38 = vsub.f32 %v12554_v42, %v4868_v25  ;;  %v4869_v21 = vmul.f32 0.015625, %v4833_v41 }
 0x91f   : > { %v4836_v32 = vpop.xlane.xlu0 %4835 }
 0x920   : > { %v12757_v51 = vsub.f32 %v12560_v44, %v4869_v21  ;;  %v4870_v17 = vmul.f32 0.015625, %v4836_v32  ;;  %v4932_v26 = vmul.f32 %v12754_v38, %v12754_v38 }
 0x921   : > { %v4839_v54 = vpop.xlane.xlu1 %4838 }
 0x922   : > { %v12762_v28 = vsub.f32 %v12557_v53, %v4870_v17  ;;  %v4871_v9 = vmul.f32 0.015625, %v4839_v54  ;;  %v5020_v52 = vsel %vm2291_vm1, %v4932_v26, 0.0  ;;  %v4933_v42 = vmul.f32 %v12757_v51, %v12757_v51 }
 0x923   : > { %5021 = vadd.xlane.f32.xlu0 %v5020_v52 }
 0x924   : > { %v12768_v22 = vsub.f32 %v12565_v6, %v4871_v9  ;;  %v5023_v44 = vsel %vm2291_vm1, %v4933_v42, 0.0  ;;  %v4934_v25 = vmul.f32 %v12762_v28, %v12762_v28 }
 0x925   : > { %5024 = vadd.xlane.f32.xlu1 %v5023_v44 }
 0x926   : > { %v5026_v41 = vsel %vm2291_vm1, %v4934_v25, 0.0  ;;  %v4935_v53 = vmul.f32 %v12768_v22, %v12768_v22 }
 0x927   : > { %5027 = vadd.xlane.f32.xlu0 %v5026_v41  ;;  %v14332_v41 = vsub.s32 1, %v10624_v4 }
 0x928   : > { %v5029_v21 = vsel %vm2291_vm1, %v4935_v53, 0.0 }
 0x929   : > { %5030 = vadd.xlane.f32.xlu1 %v5029_v21  ;;  %v12780_v53 = vrot.slane %v12406_v10, %v14332_v41 }
 0x93e   : > { %v4938_v32 = vpop.xlane.xlu0 %4937 }
 0x93f   : > { %v5032_v17 = vmul.f32 0.015625, %v4938_v32 }
 0x940   : > { %v4941_v26 = vpop.xlane.xlu1 %4940 }
 0x941   : > { %v5064_v6 = vadd.f32 1e-05, %v5032_v17  ;;  %v5033_v54 = vmul.f32 0.015625, %v4941_v26  ;;  %v14333_v17 = vsub.s32 2, %v10624_v4 }
 0x942   : > { %v4944_v9 = vpop.xlane.xlu0 %4943 }
 0x943   : > { %9162 = vrsqrt.f32 %v5064_v6  ;;  %v5065_v52 = vadd.f32 1e-05, %v5033_v54  ;;  %v5034_v42 = vmul.f32 0.015625, %v4944_v9  ;;  %v12786_v26 = vrot.slane %v12406_v10, %v14333_v17 }
 0x944   : > { %v4947_v35 = vpop.xlane.xlu1 %4946 }
 0x945   : > { %9164 = vrsqrt.f32 %v5065_v52  ;;  %v5066_v44 = vadd.f32 1e-05, %v5034_v42  ;;  %v5035_v25 = vmul.f32 0.015625, %v4947_v35 }
 0x947   : > { %9166 = vrsqrt.f32 %v5066_v44  ;;  %v5067_v37 = vadd.f32 1e-05, %v5035_v25 }
 0x949   : > { %9168 = vrsqrt.f32 %v5067_v37 }
 0x94d   : > { %v9163_v21 = vpop.eup %9162 }
 0x94e   : > { %v5128_v32 = vmul.f32 %v9163_v21, %v12574_v60 }
 0x94f   : > { %v9165_v6 = vpop.eup %9164 }
 0x950   : > { %v5129_v54 = vmul.f32 %v9165_v6, %v12577_v61  ;;  %v5164_v35 = vmul.f32 %v12780_v53, %v5128_v32 }
 0x951   : > { %v9167_v9 = vpop.eup %9166 }
 0x952   : > { %v5130_v37 = vmul.f32 %v9167_v9, %v12582_v45  ;;  %v4950_v52 = vpop.xlane.xlu0 %4949  ;;  %v5165_v42 = vmul.f32 %v12780_v53, %v5129_v54  ;;  %v12793_v44 = vadd.f32 %v12786_v26, %v5164_v35 }
 0x953   : > { %v9169_v60 = vpop.eup %9168  ;;  %v5036_v25 = vmul.f32 0.015625, %v4950_v52 }
 0x954   : > { %v5166_v41 = vmul.f32 %v12780_v53, %v5130_v37  ;;  %v5131_v10 = vmul.f32 %v9169_v60, %v12588_v1  ;;  %v4953_v21 = vpop.xlane.xlu1 %4952  ;;  %v12798_v61 = vadd.f32 %v12786_v26, %v5165_v42  ;;  %v7596_v32 = vmul.f32 -1.442695, %v12793_v44 }
 0x955   : > { %v5068_v17 = vadd.f32 1e-05, %v5036_v25  ;;  %v5037_v45 = vmul.f32 0.015625, %v4953_v21 }
 0x956   : > { %v12802_v6 = vadd.f32 %v12786_v26, %v5166_v41  ;;  %v5167_v54 = vmul.f32 %v12780_v53, %v5131_v10  ;;  %v4956_v35 = vpop.xlane.xlu0 %4955  ;;  %9170 = vpow2.f32 %v7596_v32  ;;  %v7597_v9 = vmul.f32 -1.442695, %v12798_v61 }
 0x957   : > { %9172 = vrsqrt.f32 %v5068_v17  ;;  %v5069_v37 = vadd.f32 1e-05, %v5037_v45  ;;  %v5038_v1 = vmul.f32 0.015625, %v4956_v35 }
 0x958   : > { %v7598_v52 = vmul.f32 -1.442695, %v12802_v6  ;;  %v12808_v42 = vadd.f32 %v12786_v26, %v5167_v54  ;;  %v4959_v60 = vpop.xlane.xlu1 %4958  ;;  %9174 = vpow2.f32 %v7597_v9 }
 0x959   : > { %9176 = vrsqrt.f32 %v5069_v37  ;;  %v5070_v25 = vadd.f32 1e-05, %v5038_v1  ;;  %v5039_v41 = vmul.f32 0.015625, %v4959_v60 }
 0x95a   : > { %9178 = vpow2.f32 %v7598_v52  ;;  %v7599_v10 = vmul.f32 -1.442695, %v12808_v42 }
 0x95b   : > { %9180 = vrsqrt.f32 %v5070_v25  ;;  %v5071_v21 = vadd.f32 1e-05, %v5039_v41 }
 0x95c   : > { %9182 = vpow2.f32 %v7599_v10 }
 0x95d   : > { %9184 = vrsqrt.f32 %v5071_v21 }
 0x960   : > { %v9171_v32 = vpop.eup %9170 }
 0x961   : > { %v9173_v17 = vpop.eup %9172  ;;  %v5328_v45 = vadd.f32 1.0, %v9171_v32 }
 0x962   : > { %v9175_v35 = vpop.eup %9174  ;;  %v5132_v34 = vmul.f32 %v9173_v17, %v12598_v57 }
 0x963   : > { %v9177_v54 = vpop.eup %9176  ;;  %v4962_v43 = vpop.xlane.xlu0 %4961  ;;  %v5329_v56 = vadd.f32 1.0, %v9175_v35  ;;  %9186 = vrcp.f32 %v5328_v45 }
 0x964   : > { %v9179_v9 = vpop.eup %9178  ;;  %v5133_v37 = vmul.f32 %v9177_v54, %v12601_v2  ;;  %v5040_v1 = vmul.f32 0.015625, %v4962_v43  ;;  %v5168_v52 = vmul.f32 %v12780_v53, %v5132_v34 }
 0x965   : > { %v9181_v60 = vpop.eup %9180  ;;  %v5330_v25 = vadd.f32 1.0, %v9179_v9  ;;  %v4965_v41 = vpop.xlane.xlu1 %4964  ;;  %9188 = vrcp.f32 %v5329_v56 }
 0x966   : > { %v9183_v10 = vpop.eup %9182  ;;  %v5134_v21 = vmul.f32 %v9181_v60, %v12606_v49  ;;  %v5072_v32 = vadd.f32 1e-05, %v5040_v1  ;;  %v5041_v63 = vmul.f32 0.015625, %v4965_v41  ;;  %v5169_v57 = vmul.f32 %v12780_v53, %v5133_v37 }
 0x967   : > { %v9185_v17 = vpop.eup %9184  ;;  %9190 = vrcp.f32 %v5330_v25  ;;  %v5331_v45 = vadd.f32 1.0, %v9183_v10  ;;  %v4968_v35 = vpop.xlane.xlu0 %4967  ;;  %v12817_v2 = vadd.f32 %v12786_v26, %v5168_v52 }
 0x968   : > { %v5135_v43 = vmul.f32 %v9185_v17, %v12612_v62  ;;  %9192 = vrsqrt.f32 %v5072_v32  ;;  %v5073_v34 = vadd.f32 1e-05, %v5041_v63  ;;  %v5042_v54 = vmul.f32 0.015625, %v4968_v35 }
 0x969   : > { %9194 = vrcp.f32 %v5331_v45  ;;  %v4971_v56 = vpop.xlane.xlu1 %4970  ;;  %v12821_v49 = vadd.f32 %v12786_v26, %v5169_v57  ;;  %v7600_v9 = vmul.f32 -1.442695, %v12817_v2  ;;  %v5170_v37 = vmul.f32 %v12780_v53, %v5134_v21 }
 0x96a   : > { %9196 = vrsqrt.f32 %v5073_v34  ;;  %v5074_v1 = vadd.f32 1e-05, %v5042_v54  ;;  %v5043_v60 = vmul.f32 0.015625, %v4971_v56  ;;  %v5171_v52 = vmul.f32 %v12780_v53, %v5135_v43 }
 0x96b   : > { %9198 = vpow2.f32 %v7600_v9  ;;  %v7601_v62 = vmul.f32 -1.442695, %v12821_v49  ;;  %v12828_v63 = vadd.f32 %v12786_v26, %v5170_v37 }
 0x96c   : > { %9200 = vrsqrt.f32 %v5074_v1  ;;  %v5075_v25 = vadd.f32 1e-05, %v5043_v60  ;;  %v12831_v41 = vadd.f32 %v12786_v26, %v5171_v52 }
 0x96d   : > { %v9187_v10 = vpop.eup %9186  ;;  %9202 = vpow2.f32 %v7601_v62  ;;  %v7602_v21 = vmul.f32 -1.442695, %v12828_v63 }
 0x96e   : > { %9204 = vrsqrt.f32 %v5075_v25  ;;  %v7603_v32 = vmul.f32 -1.442695, %v12831_v41  ;;  %v5424_v17 = vmul.f32 %v9187_v10, %v12793_v44 }
 0x96f   : > { %v9189_v57 = vpop.eup %9188  ;;  %9206 = vpow2.f32 %v7602_v21 }
 0x970   : > { %v5425_v45 = vmul.f32 %v9189_v57, %v12798_v61  ;;  %9208 = vpow2.f32 %v7603_v32 }
 0x971   : > { %v9191_v35 = vpop.eup %9190 }
 0x972   : > { %v9193_v43 = vpop.eup %9192  ;;  %v4974_v34 = vpop.xlane.xlu0 %4973  ;;  %v5456_v54 = vpack.c.bf16 %v5425_v45, %v5424_v17  ;;  %v5426_v52 = vmul.f32 %v9191_v35, %v12802_v6 }
 0x973   : > { %v9195_v56 = vpop.eup %9194  ;;  %v5136_v9 = vmul.f32 %v9193_v43, %v12622_v18  ;;  %v5044_v37 = vmul.f32 0.015625, %v4974_v34 }
 0x974   : > { %v9197_v1 = vpop.eup %9196  ;;  %v4977_v60 = vpop.xlane.xlu1 %4976  ;;  %8255 = vmatprep.mubr.msk.bf16.mxu1 %vm2291_vm1, %v5456_v54  ;;  %v5427_v62 = vmul.f32 %v9195_v56, %v12808_v42 }
 0x975   : > { %v9199_v44 = vpop.eup %9198  ;;  %v5137_v61 = vmul.f32 %v9197_v1, %v12625_v33  ;;  %v5076_v25 = vadd.f32 1e-05, %v5044_v37  ;;  %v5045_v10 = vmul.f32 0.015625, %v4977_v60  ;;  %v5172_v21 = vmul.f32 %v12780_v53, %v5136_v9 }
 0x976   : > { %v9201_v32 = vpop.eup %9200  ;;  %v4980_v57 = vpop.xlane.xlu0 %4979  ;;  %v5457_v17 = vpack.c.bf16 %v5427_v62, %v5426_v52  ;;  %v5332_v18 = vadd.f32 1.0, %v9199_v44 }
 0x977   : > { %v9203_v45 = vpop.eup %9202  ;;  %v5138_v43 = vmul.f32 %v9201_v32, %v12630_v0  ;;  %9210 = vrsqrt.f32 %v5076_v25  ;;  %v5077_v34 = vadd.f32 1e-05, %v5045_v10  ;;  %v5046_v54 = vmul.f32 0.015625, %v4980_v57 }
 0x978   : > { %v9205_v6 = vpop.eup %9204  ;;  %v4983_v35 = vpop.xlane.xlu1 %4982  ;;  %8256 = vmatmul.mubr.msk.bf16.vlgmr.msra.gmra.mrb[144].mxu1 %vm2291_vm1, %v5457_v17  ;;  %v5333_v42 = vadd.f32 1.0, %v9203_v45  ;;  %9212 = vrcp.f32 %v5332_v18  ;;  %v5173_v33 = vmul.f32 %v12780_v53, %v5137_v61  ;;  %v12847_v56 = vadd.f32 %v12786_v26, %v5172_v21 }
 0x979   : > { %v9207_v9 = vpop.eup %9206  ;;  %v5139_v37 = vmul.f32 %v9205_v6, %v12636_v36  ;;  %9214 = vrsqrt.f32 %v5077_v34  ;;  %v5078_v1 = vadd.f32 1e-05, %v5046_v54  ;;  %v5047_v0 = vmul.f32 0.015625, %v4983_v35 }
 0x97a   : > { %v9209_v60 = vpop.eup %9208  ;;  %9216 = vrcp.f32 %v5333_v42  ;;  %v5334_v52 = vadd.f32 1.0, %v9207_v9  ;;  %v12851_v62 = vadd.f32 %v12786_v26, %v5173_v33  ;;  %v7604_v44 = vmul.f32 -1.442695, %v12847_v56 }
 0x97b   : > { %9218 = vrsqrt.f32 %v5078_v1  ;;  %v5079_v25 = vadd.f32 1e-05, %v5047_v0  ;;  %v5335_v61 = vadd.f32 1.0, %v9209_v60  ;;  %v5174_v10 = vmul.f32 %v12780_v53, %v5138_v43 }
 0x97c   : > { %9220 = vrcp.f32 %v5334_v52  ;;  %v7605_v21 = vmul.f32 -1.442695, %v12851_v62  ;;  %v5175_v36 = vmul.f32 %v12780_v53, %v5139_v37 }
 0x97d   : > { %9222 = vrsqrt.f32 %v5079_v25  ;;  %v12858_v32 = vadd.f32 %v12786_v26, %v5174_v10 }
 0x97e   : > { %9224 = vrcp.f32 %v5335_v61  ;;  %v12861_v57 = vadd.f32 %v12786_v26, %v5175_v36 }
 0x97f   : > { %9226 = vpow2.f32 %v7604_v44  ;;  %v7606_v17 = vmul.f32 -1.442695, %v12858_v32 }
 0x980   : > { %9228 = vpow2.f32 %v7605_v21  ;;  %v7607_v18 = vmul.f32 -1.442695, %v12861_v57 }
 0x981   : > { %v9211_v45 = vpop.eup %9210  ;;  %9230 = vpow2.f32 %v7606_v17 }
 0x982   : > { %v9213_v43 = vpop.eup %9212  ;;  %v5140_v34 = vmul.f32 %v9211_v45, %v12646_v55  ;;  %v4986_v54 = vpop.xlane.xlu0 %4985  ;;  %9232 = vpow2.f32 %v7607_v18 }
 0x983   : > { %v9215_v6 = vpop.eup %9214  ;;  %v5048_v35 = vmul.f32 0.015625, %v4986_v54  ;;  %v5428_v52 = vmul.f32 %v9213_v43, %v12817_v2 }
 0x984   : > { %v9217_v42 = vpop.eup %9216  ;;  %v5141_v33 = vmul.f32 %v9215_v6, %v12649_v27  ;;  %v4989_v9 = vpop.xlane.xlu1 %4988  ;;  %v5176_v37 = vmul.f32 %v12780_v53, %v5140_v34 }
 0x985   : > { %v9219_v1 = vpop.eup %9218  ;;  %v5080_v0 = vadd.f32 1e-05, %v5048_v35  ;;  %v5049_v60 = vmul.f32 0.015625, %v4989_v9  ;;  %v5429_v44 = vmul.f32 %v9217_v42, %v12821_v49 }
 0x986   : > { %v9221_v25 = vpop.eup %9220  ;;  %v5142_v55 = vmul.f32 %v9219_v1, %v12654_v47  ;;  %v4992_v61 = vpop.xlane.xlu0 %4991  ;;  %v5177_v10 = vmul.f32 %v12780_v53, %v5141_v33  ;;  %v12873_v21 = vadd.f32 %v12786_v26, %v5176_v37 }
 0x987   : > { %v9223_v27 = vpop.eup %9222  ;;  %9234 = vrsqrt.f32 %v5080_v0  ;;  %v5081_v36 = vadd.f32 1e-05, %v5049_v60  ;;  %v5050_v17 = vmul.f32 0.015625, %v4992_v61  ;;  %v5458_v18 = vpack.c.bf16 %v5429_v44, %v5428_v52 }
 0x988   : > { %v9225_v45 = vpop.eup %9224  ;;  %v5143_v34 = vmul.f32 %v9223_v27, %v12660_v5  ;;  %v4995_v2 = vpop.xlane.xlu1 %4994  ;;  %v5430_v49 = vmul.f32 %v9221_v25, %v12828_v63  ;;  %v12878_v43 = vadd.f32 %v12786_v26, %v5177_v10  ;;  %v7608_v47 = vmul.f32 -1.442695, %v12873_v21 }
 0x989   : > { %v9227_v54 = vpop.eup %9226  ;;  %9236 = vrsqrt.f32 %v5081_v36  ;;  %v5082_v6 = vadd.f32 1e-05, %v5050_v17  ;;  %v5051_v35 = vmul.f32 0.015625, %v4995_v2  ;;  %8259 = vmatprep.mubr.msk.bf16.mxu1 %vm2291_vm1, %v5458_v18  ;;  %v5431_v42 = vmul.f32 %v9225_v45, %v12831_v41 }
 0x98a   : > { %v9229_v33 = vpop.eup %9228  ;;  %v5336_v9 = vadd.f32 1.0, %v9227_v54  ;;  %9238 = vpow2.f32 %v7608_v47  ;;  %v5178_v5 = vmul.f32 %v12780_v53, %v5142_v55  ;;  %v5179_v44 = vmul.f32 %v12780_v53, %v5143_v34 }
 0x98b   : > { %v9231_v37 = vpop.eup %9230  ;;  %9240 = vrsqrt.f32 %v5082_v6  ;;  %v5083_v63 = vadd.f32 1e-05, %v5051_v35  ;;  %v5459_v1 = vpack.c.bf16 %v5431_v42, %v5430_v49  ;;  %v5337_v0 = vadd.f32 1.0, %v9229_v33 }
 0x98c   : > { %v9233_v60 = vpop.eup %9232  ;;  %9242 = vrcp.f32 %v5336_v9  ;;  %v5338_v52 = vadd.f32 1.0, %v9231_v37  ;;  %v12886_v25 = vadd.f32 %v12786_v26, %v5178_v5  ;;  %v7609_v61 = vmul.f32 -1.442695, %v12878_v43 }
 0x98d   : > { %9244 = vrsqrt.f32 %v5083_v63  ;;  %8260 = vmatmul.mubr.msk.bf16.gmra.mrb[148].mxu1 %vm2291_vm1, %v5459_v1  ;;  %v5339_v41 = vadd.f32 1.0, %v9233_v60  ;;  %v12891_v55 = vadd.f32 %v12786_v26, %v5179_v44 }
 0x98e   : > { %9246 = vrcp.f32 %v5337_v0  ;;  %v7610_v10 = vmul.f32 -1.442695, %v12886_v25 }
 0x98f   : > { %9248 = vrcp.f32 %v5338_v52  ;;  %v7611_v27 = vmul.f32 -1.442695, %v12891_v55 }
 0x990   : > { %9250 = vrcp.f32 %v5339_v41 }
 0x991   : > { %v9235_v36 = vpop.eup %9234  ;;  %v4998_v17 = vpop.xlane.xlu0 %4997  ;;  %9252 = vpow2.f32 %v7609_v61 }
 0x992   : > { %v5144_v18 = vmul.f32 %v9235_v36, %v12670_v8  ;;  %v5052_v45 = vmul.f32 0.015625, %v4998_v17  ;;  %9254 = vpow2.f32 %v7610_v10 }
 0x993   : > { %v9237_v34 = vpop.eup %9236  ;;  %v5001_v2 = vpop.xlane.xlu1 %5000  ;;  %9256 = vpow2.f32 %v7611_v27 }
 0x994   : > { %v9239_v49 = vpop.eup %9238  ;;  %v5145_v47 = vmul.f32 %v9237_v34, %v12676_v59  ;;  %v5084_v54 = vadd.f32 1e-05, %v5052_v45  ;;  %v5053_v6 = vmul.f32 0.015625, %v5001_v2  ;;  %v5180_v35 = vmul.f32 %v12780_v53, %v5144_v18 }
 0x995   : > { %v9241_v42 = vpop.eup %9240  ;;  %v5004_v33 = vpop.xlane.xlu0 %5003  ;;  %v5340_v9 = vadd.f32 1.0, %v9239_v49 }
 0x996   : > { %v9243_v5 = vpop.eup %9242  ;;  %v5146_v37 = vmul.f32 %v9241_v42, %v12681_v24  ;;  %9258 = vrsqrt.f32 %v5084_v54  ;;  %v5085_v8 = vadd.f32 1e-05, %v5053_v6  ;;  %v5054_v63 = vmul.f32 0.015625, %v5004_v33 }
 0x997   : > { %v9245_v1 = vpop.eup %9244  ;;  %v5007_v0 = vpop.xlane.xlu1 %5006  ;;  %v5432_v60 = vmul.f32 %v9243_v5, %v12847_v56  ;;  %9260 = vrcp.f32 %v5340_v9  ;;  %v5181_v59 = vmul.f32 %v12780_v53, %v5145_v47  ;;  %v12902_v52 = vadd.f32 %v12786_v26, %v5180_v35 }
 0x998   : > { %v9247_v44 = vpop.eup %9246  ;;  %v5147_v41 = vmul.f32 %v9245_v1, %v12690_v12  ;;  %9262 = vrsqrt.f32 %v5085_v8  ;;  %v5086_v61 = vadd.f32 1e-05, %v5054_v63  ;;  %v5055_v10 = vmul.f32 0.015625, %v5007_v0 }
 0x999   : > { %v9249_v24 = vpop.eup %9248  ;;  %v5433_v27 = vmul.f32 %v9247_v44, %v12851_v62  ;;  %v12907_v36 = vadd.f32 %v12786_v26, %v5181_v59  ;;  %v7612_v56 = vmul.f32 -1.442695, %v12902_v52  ;;  %v5182_v17 = vmul.f32 %v12780_v53, %v5146_v37 }
 0x99a   : > { %v9251_v18 = vpop.eup %9250  ;;  %9264 = vrsqrt.f32 %v5086_v61  ;;  %v5087_v45 = vadd.f32 1e-05, %v5055_v10  ;;  %v5434_v34 = vmul.f32 %v9249_v24, %v12858_v32  ;;  %v5183_v12 = vmul.f32 %v12780_v53, %v5147_v41 }
 0x99b   : > { %v9253_v2 = vpop.eup %9252  ;;  %v5460_v49 = vpack.c.bf16 %v5433_v27, %v5432_v60  ;;  %v5435_v47 = vmul.f32 %v9251_v18, %v12861_v57  ;;  %9266 = vpow2.f32 %v7612_v56  ;;  %v7613_v62 = vmul.f32 -1.442695, %v12907_v36 }
 0x99c   : > { %v9255_v54 = vpop.eup %9254  ;;  %9268 = vrsqrt.f32 %v5087_v45  ;;  %v5341_v6 = vadd.f32 1.0, %v9253_v2  ;;  %v12916_v35 = vadd.f32 %v12786_v26, %v5182_v17  ;;  %v12919_v42 = vadd.f32 %v12786_v26, %v5183_v12 }
 0x99d   : > { %v9257_v33 = vpop.eup %9256  ;;  %8263 = vmatprep.mubr.msk.bf16.mxu1 %vm2291_vm1, %v5460_v49  ;;  %v5461_v32 = vpack.c.bf16 %v5435_v47, %v5434_v34  ;;  %v5342_v9 = vadd.f32 1.0, %v9255_v54  ;;  %9270 = vpow2.f32 %v7613_v62 }
 0x99e   : > { %9272 = vrcp.f32 %v5341_v6  ;;  %v5343_v57 = vadd.f32 1.0, %v9257_v33  ;;  %v7614_v5 = vmul.f32 -1.442695, %v12916_v35  ;;  %v7615_v37 = vmul.f32 -1.442695, %v12919_v42 }
 0x99f   : > { %8264 = vmatmul.mubr.msk.bf16.gmra.mrb[152].mxu1 %vm2291_vm1, %v5461_v32  ;;  %9274 = vrcp.f32 %v5342_v9 }
 0x9a0   : > { %v9259_v8 = vpop.eup %9258  ;;  %9276 = vrcp.f32 %v5343_v57 }
 0x9a1   : > { %v9261_v63 = vpop.eup %9260  ;;  %v5148_v1 = vmul.f32 %v9259_v8, %v12706_v40  ;;  %v5010_v0 = vpop.xlane.xlu0 %5009  ;;  %9278 = vpow2.f32 %v7614_v5 }
 0x9a2   : > { %v9263_v60 = vpop.eup %9262  ;;  %v5056_v59 = vmul.f32 0.015625, %v5010_v0  ;;  %9280 = vpow2.f32 %v7615_v37  ;;  %v5436_v54 = vmul.f32 %v9261_v63, %v12873_v21 }
 0x9a3   : > { %v5149_v44 = vmul.f32 %v9263_v60, %v12709_v16  ;;  %v5013_v41 = vpop.xlane.xlu1 %5012  ;;  %v5184_v61 = vmul.f32 %v12780_v53, %v5148_v1 }
 0x9a4   : > { %v9265_v10 = vpop.eup %9264  ;;  %v5088_v24 = vadd.f32 1e-05, %v5056_v59  ;;  %v5057_v27 = vmul.f32 0.015625, %v5013_v41 }
 0x9a5   : > { %v9267_v56 = vpop.eup %9266  ;;  %v5150_v17 = vmul.f32 %v9265_v10, %v12714_v11  ;;  %v5016_v18 = vpop.xlane.xlu0 %5015  ;;  %v5185_v45 = vmul.f32 %v12780_v53, %v5149_v44  ;;  %v12931_v40 = vadd.f32 %v12786_v26, %v5184_v61 }
 0x9a6   : > { %v9269_v34 = vpop.eup %9268  ;;  %9282 = vrsqrt.f32 %v5088_v24  ;;  %v5089_v12 = vadd.f32 1e-05, %v5057_v27  ;;  %v5058_v2 = vmul.f32 0.015625, %v5016_v18  ;;  %v5344_v16 = vadd.f32 1.0, %v9267_v56 }
 0x9a7   : > { %v9271_v49 = vpop.eup %9270  ;;  %v5151_v47 = vmul.f32 %v9269_v34, %v12720_v58  ;;  %v5019_v62 = vpop.xlane.xlu1 %5018  ;;  %v12936_v6 = vadd.f32 %v12786_v26, %v5185_v45  ;;  %v5186_v11 = vmul.f32 %v12780_v53, %v5150_v17  ;;  %v7616_v8 = vmul.f32 -1.442695, %v12931_v40 }
 0x9a8   : > { %v9273_v33 = vpop.eup %9272  ;;  %9284 = vrsqrt.f32 %v5089_v12  ;;  %v5090_v32 = vadd.f32 1e-05, %v5058_v2  ;;  %v5059_v9 = vmul.f32 0.015625, %v5019_v62  ;;  %v5345_v57 = vadd.f32 1.0, %v9271_v49 }
 0x9a9   : > { %v9275_v5 = vpop.eup %9274  ;;  %v5437_v37 = vmul.f32 %v9273_v33, %v12878_v43  ;;  %9286 = vrcp.f32 %v5344_v16  ;;  %v5187_v58 = vmul.f32 %v12780_v53, %v5151_v47  ;;  %v12944_v0 = vadd.f32 %v12786_v26, %v5186_v11 }
 0x9aa   : > { %v9277_v1 = vpop.eup %9276  ;;  %9288 = vrsqrt.f32 %v5090_v32  ;;  %v5091_v21 = vadd.f32 1e-05, %v5059_v9  ;;  %v5438_v63 = vmul.f32 %v9275_v5, %v12886_v25  ;;  %v7617_v10 = vmul.f32 -1.442695, %v12936_v6 }
 0x9ab   : > { %v9279_v60 = vpop.eup %9278  ;;  %v5462_v59 = vpack.c.bf16 %v5437_v37, %v5436_v54  ;;  %v5439_v44 = vmul.f32 %v9277_v1, %v12891_v55  ;;  %9290 = vrcp.f32 %v5345_v57  ;;  %v12948_v43 = vadd.f32 %v12786_v26, %v5187_v58 }
 0x9ac   : > { %v9281_v41 = vpop.eup %9280  ;;  %9292 = vrsqrt.f32 %v5091_v21  ;;  %v5346_v61 = vadd.f32 1.0, %v9279_v60  ;;  %v7618_v27 = vmul.f32 -1.442695, %v12944_v0 }
 0x9ad   : > { %8267 = vmatprep.mubr.msk.bf16.mxu1 %vm2291_vm1, %v5462_v59  ;;  %v5463_v24 = vpack.c.bf16 %v5439_v44, %v5438_v63  ;;  %v5347_v25 = vadd.f32 1.0, %v9281_v41  ;;  %9294 = vpow2.f32 %v7616_v8  ;;  %v7619_v56 = vmul.f32 -1.442695, %v12948_v43 }
 0x9ae   : > { %9296 = vrcp.f32 %v5346_v61 }
 0x9af   : > { %8268 = vmatmul.mubr.msk.bf16.gmra.mrb[156].mxu1 %vm2291_vm1, %v5463_v24  ;;  %9298 = vrcp.f32 %v5347_v25 }
 0x9b0   : > { %v9283_v55 = vpop.eup %9282  ;;  %v5022_v17 = vpop.xlane.xlu0 %5021  ;;  %9300 = vpow2.f32 %v7617_v10 }
 0x9b1   : > { %v5152_v18 = vmul.f32 %v9283_v55, %v12730_v19  ;;  %v5060_v45 = vmul.f32 0.015625, %v5022_v17  ;;  %9302 = vpow2.f32 %v7618_v27 }
 0x9b2   : > { %v9285_v34 = vpop.eup %9284  ;;  %v5025_v12 = vpop.xlane.xlu1 %5024  ;;  %9304 = vpow2.f32 %v7619_v56 }
 0x9b3   : > { %v9287_v2 = vpop.eup %9286  ;;  %v5153_v16 = vmul.f32 %v9285_v34, %v12733_v31  ;;  %v5092_v49 = vadd.f32 1e-05, %v5060_v45  ;;  %v5061_v47 = vmul.f32 0.015625, %v5025_v12  ;;  %v5188_v62 = vmul.f32 %v12780_v53, %v5152_v18 }
 0x9b4   : > { %v9289_v54 = vpop.eup %9288  ;;  %v5028_v11 = vpop.xlane.xlu0 %5027  ;;  %v5440_v37 = vmul.f32 %v9287_v2, %v12902_v52 }
 0x9b5   : > { %v9291_v33 = vpop.eup %9290  ;;  %v5154_v32 = vmul.f32 %v9289_v54, %v12738_v3  ;;  %9306 = vrsqrt.f32 %v5092_v49  ;;  %v5093_v9 = vadd.f32 1e-05, %v5061_v47  ;;  %v5062_v19 = vmul.f32 0.015625, %v5028_v11 }
 0x9b6   : > { %v9293_v57 = vpop.eup %9292  ;;  %v5031_v5 = vpop.xlane.xlu1 %5030  ;;  %v5441_v8 = vmul.f32 %v9291_v33, %v12907_v36  ;;  %v5189_v31 = vmul.f32 %v12780_v53, %v5153_v16  ;;  %v12963_v58 = vadd.f32 %v12786_v26, %v5188_v62 }
 0x9b7   : > { %v9295_v1 = vpop.eup %9294  ;;  %v5155_v21 = vmul.f32 %v9293_v57, %v12744_v46  ;;  %9308 = vrsqrt.f32 %v5093_v9  ;;  %v5094_v63 = vadd.f32 1e-05, %v5062_v19  ;;  %v5063_v3 = vmul.f32 0.015625, %v5031_v5 }
 0x9b8   : > { %v9297_v60 = vpop.eup %9296  ;;  %v5464_v59 = vpack.c.bf16 %v5441_v8, %v5440_v37  ;;  %v5348_v44 = vadd.f32 1.0, %v9295_v1  ;;  %v12967_v41 = vadd.f32 %v12786_v26, %v5189_v31  ;;  %v7620_v52 = vmul.f32 -1.442695, %v12963_v58 }
 0x9b9   : > { %v9299_v36 = vpop.eup %9298  ;;  %9310 = vrsqrt.f32 %v5094_v63  ;;  %v5095_v61 = vadd.f32 1e-05, %v5063_v3  ;;  %v5190_v10 = vmul.f32 %v12780_v53, %v5154_v32  ;;  %v5442_v46 = vmul.f32 %v9297_v60, %v12916_v35 }
 0x9ba   : > { %v9301_v24 = vpop.eup %9300  ;;  %8271 = vmatprep.mubr.msk.bf16.mxu1 %vm2291_vm1, %v5464_v59  ;;  %v5443_v25 = vmul.f32 %v9299_v36, %v12919_v42  ;;  %9312 = vrcp.f32 %v5348_v44  ;;  %v5191_v27 = vmul.f32 %v12780_v53, %v5155_v21  ;;  %v7621_v17 = vmul.f32 -1.442695, %v12967_v41 }
 0x9bb   : > { %v9303_v56 = vpop.eup %9302  ;;  %9314 = vrsqrt.f32 %v5095_v61  ;;  %v5349_v55 = vadd.f32 1.0, %v9301_v24  ;;  %v12977_v18 = vadd.f32 %v12786_v26, %v5190_v10 }
 0x9bc   : > { %v9305_v45 = vpop.eup %9304  ;;  %v5465_v34 = vpack.c.bf16 %v5443_v25, %v5442_v46  ;;  %v5350_v12 = vadd.f32 1.0, %v9303_v56  ;;  %9316 = vpow2.f32 %v7620_v52  ;;  %v12980_v2 = vadd.f32 %v12786_v26, %v5191_v27 }
 0x9bd   : > { %9318 = vrcp.f32 %v5349_v55  ;;  %v5351_v35 = vadd.f32 1.0, %v9305_v45  ;;  %v7622_v42 = vmul.f32 -1.442695, %v12977_v18 }
 0x9be   : > { %8272 = vmatmul.mubr.msk.bf16.gmra.mrb[160].mxu1 %vm2291_vm1, %v5465_v34  ;;  %9320 = vrcp.f32 %v5350_v12  ;;  %v7623_v16 = vmul.f32 -1.442695, %v12980_v2 }
 0x9bf   : > { %v9307_v49 = vpop.eup %9306  ;;  %9322 = vrcp.f32 %v5351_v35 }
 0x9c0   : > { %v5156_v47 = vmul.f32 %v9307_v49, %v12754_v38  ;;  %9324 = vpow2.f32 %v7621_v17 }
 0x9c1   : > { %v9309_v62 = vpop.eup %9308  ;;  %9326 = vpow2.f32 %v7622_v42 }
 0x9c2   : > { %v5157_v54 = vmul.f32 %v9309_v62, %v12757_v51  ;;  %9328 = vpow2.f32 %v7623_v16  ;;  %v5192_v11 = vmul.f32 %v12780_v53, %v5156_v47 }
 0x9c3   : > { %v9311_v33 = vpop.eup %9310 }
 0x9c4   : > { %v9313_v32 = vpop.eup %9312  ;;  %v5158_v9 = vmul.f32 %v9311_v33, %v12762_v28  ;;  %v5193_v19 = vmul.f32 %v12780_v53, %v5157_v54  ;;  %v12991_v57 = vadd.f32 %v12786_v26, %v5192_v11 }
 0x9c5   : > { %v9315_v5 = vpop.eup %9314  ;;  %v5444_v21 = vmul.f32 %v9313_v32, %v12931_v40 }
 0x9c6   : > { %v9317_v37 = vpop.eup %9316  ;;  %v5159_v38 = vmul.f32 %v9315_v5, %v12768_v22  ;;  %v5229_v8 = vadd.f32 %v12786_v26, %v5193_v19  ;;  %v7624_v51 = vmul.f32 -1.442695, %v12991_v57  ;;  %v5194_v31 = vmul.f32 %v12780_v53, %v5158_v9 }
 0x9c7   : > { %v9319_v1 = vpop.eup %9318  ;;  %v5352_v63 = vadd.f32 1.0, %v9317_v37 }
 0x9c8   : > { %v9321_v28 = vpop.eup %9320  ;;  %v5445_v3 = vmul.f32 %v9319_v1, %v12936_v6  ;;  %9330 = vpow2.f32 %v7624_v51  ;;  %v7625_v60 = vmul.f32 -1.442695, %v5229_v8  ;;  %v5195_v59 = vmul.f32 %v12780_v53, %v5159_v38  ;;  %v13018_v1 = vld [vmem:[%s14214_s8 + $0x8] sm:$0xff] }
 0x9c9   : > { %v9323_v44 = vpop.eup %9322  ;;  %v5446_v22 = vmul.f32 %v9321_v28, %v12944_v0  ;;  %v5230_v52 = vadd.f32 %v12786_v26, %v5194_v31 }
 0x9ca   : > { %v9325_v36 = vpop.eup %9324  ;;  %v5466_v61 = vpack.c.bf16 %v5445_v3, %v5444_v21  ;;  %v5447_v10 = vmul.f32 %v9323_v44, %v12948_v43  ;;  %9332 = vpow2.f32 %v7625_v60  ;;  %v5231_v40 = vadd.f32 %v12786_v26, %v5195_v59 }
 0x9cb   : > { %v9327_v24 = vpop.eup %9326  ;;  %v5353_v46 = vadd.f32 1.0, %v9325_v36  ;;  %9334 = vrcp.f32 %v5352_v63  ;;  %v7626_v27 = vmul.f32 -1.442695, %v5230_v52  ;;  %v14334_v21 = vsub.s32 3, %v10624_v4 }
 0x9cc   : > { %v9329_v6 = vpop.eup %9328  ;;  %8275 = vmatprep.mubr.msk.bf16.mxu1 %vm2291_vm1, %v5466_v61  ;;  %v5467_v25 = vpack.c.bf16 %v5447_v10, %v5446_v22  ;;  %v5354_v53 = vadd.f32 1.0, %v9327_v24  ;;  %v7627_v56 = vmul.f32 -1.442695, %v5231_v40 }
 0x9cd   : > { %9336 = vrcp.f32 %v5353_v46  ;;  %v5355_v0 = vadd.f32 1.0, %v9329_v6 }
 0x9ce   : > { %8276 = vmatmul.mubr.msk.bf16.gmra.mrb[164].mxu1 %vm2291_vm1, %v5467_v25  ;;  %9338 = vrcp.f32 %v5354_v53 }
 0x9cf   : > { %9340 = vrcp.f32 %v5355_v0 }
 0x9d0   : > { %9342 = vpow2.f32 %v7626_v27 }
 0x9d1   : > { %9344 = vpow2.f32 %v7627_v56 }
 0x9d2   : > { %v9331_v43 = vpop.eup %9330 }
 0x9d3   : > { %v5356_v26 = vadd.f32 1.0, %v9331_v43 }
 0x9d4   : > { %v9333_v55 = vpop.eup %9332 }
 0x9d5   : > { %v9335_v17 = vpop.eup %9334  ;;  %v5357_v45 = vadd.f32 1.0, %v9333_v55  ;;  %9346 = vrcp.f32 %v5356_v26 }
 0x9d6   : > { %v5448_v35 = vmul.f32 %v9335_v17, %v12963_v58 }
 0x9d7   : > { %v9337_v34 = vpop.eup %9336  ;;  %9348 = vrcp.f32 %v5357_v45 }
 0x9d8   : > { %v9339_v12 = vpop.eup %9338  ;;  %v5449_v42 = vmul.f32 %v9337_v34, %v12967_v41 }
 0x9d9   : > { %v9341_v16 = vpop.eup %9340  ;;  %v5450_v62 = vmul.f32 %v9339_v12, %v12977_v18 }
 0x9da   : > { %v9343_v49 = vpop.eup %9342  ;;  %v5468_v47 = vpack.c.bf16 %v5449_v42, %v5448_v35  ;;  %v5451_v54 = vmul.f32 %v9341_v16, %v12980_v2 }
 0x9db   : > { %v9345_v11 = vpop.eup %9344  ;;  %v5358_v33 = vadd.f32 1.0, %v9343_v49 }
 0x9dc   : > { %8279 = vmatprep.mubr.msk.bf16.mxu1 %vm2291_vm1, %v5468_v47  ;;  %v5469_v32 = vpack.c.bf16 %v5451_v54, %v5450_v62  ;;  %v5359_v9 = vadd.f32 1.0, %v9345_v11 }
 0x9dd   : > { %9350 = vrcp.f32 %v5358_v33 }
 0x9de   : > { %8280 = vmatmul.mubr.msk.bf16.gmra.mrb[168].mxu1 %vm2291_vm1, %v5469_v32  ;;  %9352 = vrcp.f32 %v5359_v9 }
 0x9df   : > { %v9347_v58 = vpop.eup %9346 }
 0x9e0   : > { %v5452_v41 = vmul.f32 %v9347_v58, %v12991_v57  ;;  %v13023_v57 = vrot.slane %v13018_v1, %v14334_v21 }
 0x9e1   : > { %v9349_v19 = vpop.eup %9348 }
 0x9e2   : > { %v5453_v5 = vmul.f32 %v9349_v19, %v5229_v8 }
 0x9e4   : > { %v5470_v37 = vpack.c.bf16 %v5453_v5, %v5452_v41 }
 0x9e6   : > { %8283 = vmatprep.mubr.msk.bf16.mxu1 %vm2291_vm1, %v5470_v37 }
 0x9e7   : > { %v9351_v18 = vpop.eup %9350 }
 0x9e8   : > { %v9353_v2 = vpop.eup %9352  ;;  %v5454_v38 = vmul.f32 %v9351_v18, %v5230_v52 }
 0x9e9   : > { %v5455_v51 = vmul.f32 %v9353_v2, %v5231_v40 }
 0x9eb   : > { %v5471_v31 = vpack.c.bf16 %v5455_v51, %v5454_v38 }
 0x9ed   : > { %8284 = vmatmul.mubr.msk.bf16.gmra.mrb[172].mxu1 %vm2291_vm1, %v5471_v31 }
 0xa4b   : > { %v8257_v8 = vpop.f32.mrb[144].mxu1 }
 0xa4c   : > { %v5582_v63 = vpop.f32.mrb[145].mxu1  ;;  %v13029_v59 = vadd.f32 %v8257_v8, %v13023_v57 }
 0xa4d   : > { %v13026_v28 = vadd.f32 %v5582_v63, %v13023_v57  ;;  %v8258_v3 = vpop.f32.mrb[146].mxu1 }
 0xa4e   : > { %v5585_v60 = vpop.f32.mrb[147].mxu1  ;;  %v13037_v52 = vadd.f32 %v8258_v3, %v13023_v57  ;;  %v5715_v61 = vsel %vm2081_vm0, %v13029_v59, 0.0 }
 0xa4f   : > { %v13032_v44 = vadd.f32 %v5585_v60, %v13023_v57  ;;  %v5709_v22 = vsel %vm2081_vm0, %v13026_v28, 0.0 }
 0xa50   : > { %5710 = vadd.xlane.f32.xlu0 %v5709_v22  ;;  %v5718_v10 = vsel %vm2081_vm0, %v13037_v52, 0.0 }
 0xa51   : > { %v5712_v36 = vsel %vm2081_vm0, %v13032_v44, 0.0 }
 0xa52   : > { %5713 = vadd.xlane.f32.xlu1 %v5712_v36 }
 0xa54   : > { %5716 = vadd.xlane.f32.xlu0 %v5715_v61 }
 0xa56   : > { %5719 = vadd.xlane.f32.xlu1 %v5718_v10 }
 0xa60   : > { %v8261_v40 = vpop.f32.mrb[148].mxu1 }
 0xa61   : > { %v5598_v24 = vpop.f32.mrb[149].mxu1  ;;  %v13049_v53 = vadd.f32 %v8261_v40, %v13023_v57 }
 0xa62   : > { %v13046_v46 = vadd.f32 %v5598_v24, %v13023_v57  ;;  %v8262_v6 = vpop.f32.mrb[150].mxu1 }
 0xa63   : > { %v5601_v25 = vpop.f32.mrb[151].mxu1  ;;  %v13057_v56 = vadd.f32 %v8262_v6, %v13023_v57  ;;  %v5727_v26 = vsel %vm2081_vm0, %v13049_v53, 0.0 }
 0xa64   : > { %v13052_v27 = vadd.f32 %v5601_v25, %v13023_v57  ;;  %v5721_v0 = vsel %vm2081_vm0, %v13046_v46, 0.0 }
 0xa65   : > { %5722 = vadd.xlane.f32.xlu0 %v5721_v0  ;;  %v5730_v55 = vsel %vm2081_vm0, %v13057_v56, 0.0 }
 0xa66   : > { %v5724_v43 = vsel %vm2081_vm0, %v13052_v27, 0.0 }
 0xa67   : > { %5725 = vadd.xlane.f32.xlu1 %v5724_v43 }
 0xa69   : > { %5728 = vadd.xlane.f32.xlu0 %v5727_v26 }
 0xa6b   : > { %5731 = vadd.xlane.f32.xlu1 %v5730_v55 }
 0xa72   : > { %v8265_v17 = vpop.f32.mrb[152].mxu1 }
 0xa73   : > { %v5614_v45 = vpop.f32.mrb[153].mxu1  ;;  %v13069_v42 = vadd.f32 %v8265_v17, %v13023_v57 }
 0xa74   : > { %v13066_v34 = vadd.f32 %v5614_v45, %v13023_v57  ;;  %v8266_v12 = vpop.f32.mrb[154].mxu1 }
 0xa75   : > { %v5617_v35 = vpop.f32.mrb[155].mxu1  ;;  %v13077_v47 = vadd.f32 %v8266_v12, %v13023_v57  ;;  %v5739_v54 = vsel %vm2081_vm0, %v13069_v42, 0.0 }
 0xa76   : > { %v13072_v16 = vadd.f32 %v5617_v35, %v13023_v57  ;;  %v5733_v49 = vsel %vm2081_vm0, %v13066_v34, 0.0 }
 0xa77   : > { %5734 = vadd.xlane.f32.xlu0 %v5733_v49  ;;  %v5742_v11 = vsel %vm2081_vm0, %v13077_v47, 0.0 }
 0xa78   : > { %v5736_v62 = vsel %vm2081_vm0, %v13072_v16, 0.0 }
 0xa79   : > { %5737 = vadd.xlane.f32.xlu1 %v5736_v62 }
 0xa7b   : > { %5740 = vadd.xlane.f32.xlu0 %v5739_v54 }
 0xa7d   : > { %5743 = vadd.xlane.f32.xlu1 %v5742_v11 }
 0xa82   : > { %v8269_v33 = vpop.f32.mrb[156].mxu1 }
 0xa83   : > { %v5630_v32 = vpop.f32.mrb[157].mxu1  ;;  %v13089_v41 = vadd.f32 %v8269_v33, %v13023_v57 }
 0xa84   : > { %v13086_v9 = vadd.f32 %v5630_v32, %v13023_v57  ;;  %v8270_v58 = vpop.f32.mrb[158].mxu1 }
 0xa85   : > { %v5633_v19 = vpop.f32.mrb[159].mxu1  ;;  %v13097_v18 = vadd.f32 %v8270_v58, %v13023_v57  ;;  %v5751_v38 = vsel %vm2081_vm0, %v13089_v41, 0.0 }
 0xa86   : > { %v13092_v5 = vadd.f32 %v5633_v19, %v13023_v57  ;;  %v5745_v37 = vsel %vm2081_vm0, %v13086_v9, 0.0 }
 0xa87   : > { %5746 = vadd.xlane.f32.xlu0 %v5745_v37  ;;  %v5754_v51 = vsel %vm2081_vm0, %v13097_v18, 0.0 }
 0xa88   : > { %v5748_v2 = vsel %vm2081_vm0, %v13092_v5, 0.0 }
 0xa89   : > { %5749 = vadd.xlane.f32.xlu1 %v5748_v2 }
 0xa8b   : > { %5752 = vadd.xlane.f32.xlu0 %v5751_v38 }
 0xa8d   : > { %5755 = vadd.xlane.f32.xlu1 %v5754_v51 }
 0xa91   : > { %v8273_v31 = vpop.f32.mrb[160].mxu1 }
 0xa92   : > { %v5646_v21 = vpop.f32.mrb[161].mxu1  ;;  %v13109_v60 = vadd.f32 %v8273_v31, %v13023_v57 }
 0xa93   : > { %v13106_v8 = vadd.f32 %v5646_v21, %v13023_v57  ;;  %v8274_v63 = vpop.f32.mrb[162].mxu1 }
 0xa94   : > { %v5649_v3 = vpop.f32.mrb[163].mxu1  ;;  %v13117_v61 = vadd.f32 %v8274_v63, %v13023_v57  ;;  %v5763_v40 = vsel %vm2081_vm0, %v13109_v60, 0.0 }
 0xa95   : > { %v13112_v22 = vadd.f32 %v5649_v3, %v13023_v57  ;;  %v5757_v36 = vsel %vm2081_vm0, %v13106_v8, 0.0 }
 0xa96   : > { %5758 = vadd.xlane.f32.xlu0 %v5757_v36  ;;  %v5766_v24 = vsel %vm2081_vm0, %v13117_v61, 0.0 }
 0xa97   : > { %v5760_v10 = vsel %vm2081_vm0, %v13112_v22, 0.0 }
 0xa98   : > { %5761 = vadd.xlane.f32.xlu1 %v5760_v10 }
 0xa9a   : > { %5764 = vadd.xlane.f32.xlu0 %v5763_v40 }
 0xa9c   : > { %5767 = vadd.xlane.f32.xlu1 %v5766_v24 }
 0xaa1   : > { %v8277_v6 = vpop.f32.mrb[164].mxu1 }
 0xaa2   : > { %v5662_v25 = vpop.f32.mrb[165].mxu1  ;;  %v13129_v55 = vadd.f32 %v8277_v6, %v13023_v57 }
 0xaa3   : > { %v13126_v0 = vadd.f32 %v5662_v25, %v13023_v57  ;;  %v8278_v43 = vpop.f32.mrb[166].mxu1 }
 0xaa4   : > { %v5665_v26 = vpop.f32.mrb[167].mxu1  ;;  %v13137_v12 = vadd.f32 %v8278_v43, %v13023_v57  ;;  %v5775_v49 = vsel %vm2081_vm0, %v13129_v55, 0.0 }
 0xaa5   : > { %v13132_v17 = vadd.f32 %v5665_v26, %v13023_v57  ;;  %v5769_v45 = vsel %vm2081_vm0, %v13126_v0, 0.0 }
 0xaa6   : > { %5770 = vadd.xlane.f32.xlu0 %v5769_v45  ;;  %v5778_v62 = vsel %vm2081_vm0, %v13137_v12, 0.0 }
 0xaa7   : > { %v5772_v35 = vsel %vm2081_vm0, %v13132_v17, 0.0 }
 0xaa8   : > { %5773 = vadd.xlane.f32.xlu1 %v5772_v35 }
 0xaaa   : > { %5776 = vadd.xlane.f32.xlu0 %v5775_v49 }
 0xaac   : > { %5779 = vadd.xlane.f32.xlu1 %v5778_v62 }
 0xab1   : > { %v8281_v54 = vpop.f32.mrb[168].mxu1 }
 0xab2   : > { %v5678_v11 = vpop.f32.mrb[169].mxu1  ;;  %v13149_v19 = vadd.f32 %v8281_v54, %v13023_v57 }
 0xab3   : > { %v13146_v33 = vadd.f32 %v5678_v11, %v13023_v57  ;;  %v8282_v32 = vpop.f32.mrb[170].mxu1 }
 0xab4   : > { %v5681_v58 = vpop.f32.mrb[171].mxu1  ;;  %v13157_v38 = vadd.f32 %v8282_v32, %v13023_v57  ;;  %v5787_v31 = vsel %vm2081_vm0, %v13149_v19, 0.0 }
 0xab5   : > { %v13152_v37 = vadd.f32 %v5681_v58, %v13023_v57  ;;  %v5781_v2 = vsel %vm2081_vm0, %v13146_v33, 0.0 }
 0xab6   : > { %5782 = vadd.xlane.f32.xlu0 %v5781_v2  ;;  %v5790_v21 = vsel %vm2081_vm0, %v13157_v38, 0.0 }
 0xab7   : > { %v5784_v51 = vsel %vm2081_vm0, %v13152_v37, 0.0 }
 0xab8   : > { %5785 = vadd.xlane.f32.xlu1 %v5784_v51 }
 0xaba   : > { %5788 = vadd.xlane.f32.xlu0 %v5787_v31 }
 0xabc   : > { %5791 = vadd.xlane.f32.xlu1 %v5790_v21 }
 0xac0   : > { %v8285_v63 = vpop.f32.mrb[172].mxu1 }
 0xac1   : > { %v5694_v3 = vpop.f32.mrb[173].mxu1  ;;  %v13169_v24 = vadd.f32 %v8285_v63, %v13023_v57 }
 0xac2   : > { %v13166_v36 = vadd.f32 %v5694_v3, %v13023_v57  ;;  %v8286_v10 = vpop.f32.mrb[174].mxu1 }
 0xac3   : > { %v5697_v40 = vpop.f32.mrb[175].mxu1  ;;  %v13177_v43 = vadd.f32 %v8286_v10, %v13023_v57  ;;  %v5799_v45 = vsel %vm2081_vm0, %v13169_v24, 0.0 }
 0xac4   : > { %v13172_v6 = vadd.f32 %v5697_v40, %v13023_v57  ;;  %v5793_v25 = vsel %vm2081_vm0, %v13166_v36, 0.0 }
 0xac5   : > { %5794 = vadd.xlane.f32.xlu0 %v5793_v25  ;;  %v5802_v35 = vsel %vm2081_vm0, %v13177_v43, 0.0 }
 0xac6   : > { %v5796_v26 = vsel %vm2081_vm0, %v13172_v6, 0.0 }
 0xac7   : > { %5797 = vadd.xlane.f32.xlu1 %v5796_v26 }
 0xac9   : > { %5800 = vadd.xlane.f32.xlu0 %v5799_v45 }
 0xacb   : > { %5803 = vadd.xlane.f32.xlu1 %v5802_v35 }
 0xadd   : > { %v5711_v49 = vpop.xlane.xlu0 %5710 }
 0xade   : > { %v5805_v62 = vmul.f32 0.03125, %v5711_v49 }
 0xadf   : > { %v5714_v54 = vpop.xlane.xlu1 %5713 }
 0xae0   : > { %v13186_v11 = vsub.f32 %v13026_v28, %v5805_v62  ;;  %v5806_v57 = vmul.f32 0.03125, %v5714_v54 }
 0xae1   : > { %v5717_v32 = vpop.xlane.xlu0 %5716 }
 0xae2   : > { %v13189_v58 = vsub.f32 %v13032_v44, %v5806_v57  ;;  %v5807_v2 = vmul.f32 0.03125, %v5717_v32  ;;  %v5869_v51 = vmul.f32 %v13186_v11, %v13186_v11 }
 0xae3   : > { %v5720_v31 = vpop.xlane.xlu1 %5719 }
 0xae4   : > { %v13194_v21 = vsub.f32 %v13029_v59, %v5807_v2  ;;  %v5808_v63 = vmul.f32 0.03125, %v5720_v31  ;;  %v5901_v3 = vsel %vm2081_vm0, %v5869_v51, 0.0  ;;  %v5870_v28 = vmul.f32 %v13189_v58, %v13189_v58 }
 0xae5   : > { %5902 = vadd.xlane.f32.xlu0 %v5901_v3 }
 0xae6   : > { %v13200_v10 = vsub.f32 %v13037_v52, %v5808_v63  ;;  %v5904_v44 = vsel %vm2081_vm0, %v5870_v28, 0.0  ;;  %v5871_v40 = vmul.f32 %v13194_v21, %v13194_v21 }
 0xae7   : > { %5905 = vadd.xlane.f32.xlu1 %v5904_v44 }
 0xae8   : > { %v5907_v25 = vsel %vm2081_vm0, %v5871_v40, 0.0  ;;  %v5872_v59 = vmul.f32 %v13200_v10, %v13200_v10 }
 0xae9   : > { %5908 = vadd.xlane.f32.xlu0 %v5907_v25 }
 0xaea   : > { %v5910_v26 = vsel %vm2081_vm0, %v5872_v59, 0.0 }
 0xaeb   : > { %5911 = vadd.xlane.f32.xlu1 %v5910_v26 }
 0xaf2   : > { %v5723_v45 = vpop.xlane.xlu0 %5722 }
 0xaf3   : > { %v5809_v35 = vmul.f32 0.03125, %v5723_v45 }
 0xaf4   : > { %v5726_v49 = vpop.xlane.xlu1 %5725 }
 0xaf5   : > { %v13210_v52 = vsub.f32 %v13046_v46, %v5809_v35  ;;  %v5810_v62 = vmul.f32 0.03125, %v5726_v49 }
 0xaf6   : > { %v5729_v54 = vpop.xlane.xlu0 %5728 }
 0xaf7   : > { %v13213_v57 = vsub.f32 %v13052_v27, %v5810_v62  ;;  %v5811_v32 = vmul.f32 0.03125, %v5729_v54  ;;  %v5873_v2 = vmul.f32 %v13210_v52, %v13210_v52 }
 0xaf8   : > { %v5732_v51 = vpop.xlane.xlu1 %5731 }
 0xaf9   : > { %v13218_v31 = vsub.f32 %v13049_v53, %v5811_v32  ;;  %v5812_v63 = vmul.f32 0.03125, %v5732_v51  ;;  %v5913_v3 = vsel %vm2081_vm0, %v5873_v2, 0.0  ;;  %v5874_v46 = vmul.f32 %v13213_v57, %v13213_v57 }
 0xafa   : > { %5914 = vadd.xlane.f32.xlu0 %v5913_v3 }
 0xafb   : > { %v13224_v28 = vsub.f32 %v13057_v56, %v5812_v63  ;;  %v5916_v27 = vsel %vm2081_vm0, %v5874_v46, 0.0  ;;  %v5875_v44 = vmul.f32 %v13218_v31, %v13218_v31 }
 0xafc   : > { %5917 = vadd.xlane.f32.xlu1 %v5916_v27 }
 0xafd   : > { %v5919_v40 = vsel %vm2081_vm0, %v5875_v44, 0.0  ;;  %v5876_v53 = vmul.f32 %v13224_v28, %v13224_v28 }
 0xafe   : > { %5920 = vadd.xlane.f32.xlu0 %v5919_v40 }
 0xaff   : > { %v5922_v25 = vsel %vm2081_vm0, %v5876_v53, 0.0 }
 0xb00   : > { %5923 = vadd.xlane.f32.xlu1 %v5922_v25 }
 0xb04   : > { %v5735_v59 = vpop.xlane.xlu0 %5734 }
 0xb05   : > { %v5813_v26 = vmul.f32 0.03125, %v5735_v59 }
 0xb06   : > { %v5738_v45 = vpop.xlane.xlu1 %5737 }
 0xb07   : > { %v13234_v56 = vsub.f32 %v13066_v34, %v5813_v26  ;;  %v5814_v35 = vmul.f32 0.03125, %v5738_v45 }
 0xb08   : > { %v5741_v49 = vpop.xlane.xlu0 %5740 }
 0xb09   : > { %v13237_v62 = vsub.f32 %v13072_v16, %v5814_v35  ;;  %v5815_v54 = vmul.f32 0.03125, %v5741_v49  ;;  %v5877_v32 = vmul.f32 %v13234_v56, %v13234_v56 }
 0xb0a   : > { %v5744_v2 = vpop.xlane.xlu1 %5743 }
 0xb0b   : > { %v13242_v51 = vsub.f32 %v13069_v42, %v5815_v54  ;;  %v5816_v63 = vmul.f32 0.03125, %v5744_v2  ;;  %v5925_v3 = vsel %vm2081_vm0, %v5877_v32, 0.0  ;;  %v5878_v34 = vmul.f32 %v13237_v62, %v13237_v62 }
 0xb0c   : > { %5926 = vadd.xlane.f32.xlu0 %v5925_v3 }
 0xb0d   : > { %v13248_v46 = vsub.f32 %v13077_v47, %v5816_v63  ;;  %v5928_v16 = vsel %vm2081_vm0, %v5878_v34, 0.0  ;;  %v5879_v27 = vmul.f32 %v13242_v51, %v13242_v51 }
 0xb0e   : > { %5929 = vadd.xlane.f32.xlu1 %v5928_v16 }
 0xb0f   : > { %v5931_v44 = vsel %vm2081_vm0, %v5879_v27, 0.0  ;;  %v5880_v42 = vmul.f32 %v13248_v46, %v13248_v46 }
 0xb10   : > { %5932 = vadd.xlane.f32.xlu0 %v5931_v44 }
 0xb11   : > { %v5934_v40 = vsel %vm2081_vm0, %v5880_v42, 0.0 }
 0xb12   : > { %5935 = vadd.xlane.f32.xlu1 %v5934_v40 }
 0xb14   : > { %v5747_v53 = vpop.xlane.xlu0 %5746 }
 0xb15   : > { %v5817_v25 = vmul.f32 0.03125, %v5747_v53 }
 0xb16   : > { %v5750_v59 = vpop.xlane.xlu1 %5749 }
 0xb17   : > { %v13258_v47 = vsub.f32 %v13086_v9, %v5817_v25  ;;  %v5818_v26 = vmul.f32 0.03125, %v5750_v59 }
 0xb18   : > { %v5753_v45 = vpop.xlane.xlu0 %5752 }
 0xb19   : > { %v13261_v35 = vsub.f32 %v13092_v5, %v5818_v26  ;;  %v5819_v49 = vmul.f32 0.03125, %v5753_v45  ;;  %v5881_v54 = vmul.f32 %v13258_v47, %v13258_v47 }
 0xb1a   : > { %v5756_v32 = vpop.xlane.xlu1 %5755 }
 0xb1b   : > { %v13266_v2 = vsub.f32 %v13089_v41, %v5819_v49  ;;  %v5820_v63 = vmul.f32 0.03125, %v5756_v32  ;;  %v5937_v3 = vsel %vm2081_vm0, %v5881_v54, 0.0  ;;  %v5882_v9 = vmul.f32 %v13261_v35, %v13261_v35 }
 0xb1c   : > { %5938 = vadd.xlane.f32.xlu0 %v5937_v3 }
 0xb1d   : > { %v13272_v34 = vsub.f32 %v13097_v18, %v5820_v63  ;;  %v5940_v5 = vsel %vm2081_vm0, %v5882_v9, 0.0  ;;  %v5883_v16 = vmul.f32 %v13266_v2, %v13266_v2 }
 0xb1e   : > { %5941 = vadd.xlane.f32.xlu1 %v5940_v5 }
 0xb1f   : > { %v5943_v27 = vsel %vm2081_vm0, %v5883_v16, 0.0  ;;  %v5884_v41 = vmul.f32 %v13272_v34, %v13272_v34 }
 0xb20   : > { %5944 = vadd.xlane.f32.xlu0 %v5943_v27 }
 0xb21   : > { %v5946_v44 = vsel %vm2081_vm0, %v5884_v41, 0.0 }
 0xb22   : > { %5947 = vadd.xlane.f32.xlu1 %v5946_v44 }
 0xb23   : > { %v5759_v42 = vpop.xlane.xlu0 %5758 }
 0xb24   : > { %v5821_v40 = vmul.f32 0.03125, %v5759_v42 }
 0xb25   : > { %v5762_v53 = vpop.xlane.xlu1 %5761 }
 0xb26   : > { %v13282_v18 = vsub.f32 %v13106_v8, %v5821_v40  ;;  %v5822_v25 = vmul.f32 0.03125, %v5762_v53 }
 0xb27   : > { %v5765_v59 = vpop.xlane.xlu0 %5764 }
 0xb28   : > { %v13285_v26 = vsub.f32 %v13112_v22, %v5822_v25  ;;  %v5823_v45 = vmul.f32 0.03125, %v5765_v59  ;;  %v5885_v49 = vmul.f32 %v13282_v18, %v13282_v18 }
 0xb29   : > { %v5768_v54 = vpop.xlane.xlu1 %5767 }
 0xb2a   : > { %v13290_v32 = vsub.f32 %v13109_v60, %v5823_v45  ;;  %v5824_v63 = vmul.f32 0.03125, %v5768_v54  ;;  %v5949_v3 = vsel %vm2081_vm0, %v5885_v49, 0.0  ;;  %v5886_v8 = vmul.f32 %v13285_v26, %v13285_v26 }
 0xb2b   : > { %5950 = vadd.xlane.f32.xlu0 %v5949_v3 }
 0xb2c   : > { %v13296_v9 = vsub.f32 %v13117_v61, %v5824_v63  ;;  %v5952_v22 = vsel %vm2081_vm0, %v5886_v8, 0.0  ;;  %v5887_v5 = vmul.f32 %v13290_v32, %v13290_v32 }
 0xb2d   : > { %5953 = vadd.xlane.f32.xlu1 %v5952_v22 }
 0xb2e   : > { %v5955_v16 = vsel %vm2081_vm0, %v5887_v5, 0.0  ;;  %v5888_v60 = vmul.f32 %v13296_v9, %v13296_v9 }
 0xb2f   : > { %5956 = vadd.xlane.f32.xlu0 %v5955_v16 }
 0xb30   : > { %v5958_v27 = vsel %vm2081_vm0, %v5888_v60, 0.0 }
 0xb31   : > { %5959 = vadd.xlane.f32.xlu1 %v5958_v27 }
 0xb33   : > { %v5771_v41 = vpop.xlane.xlu0 %5770 }
 0xb34   : > { %v5825_v44 = vmul.f32 0.03125, %v5771_v41 }
 0xb35   : > { %v5774_v42 = vpop.xlane.xlu1 %5773 }
 0xb36   : > { %v13306_v61 = vsub.f32 %v13126_v0, %v5825_v44  ;;  %v5826_v40 = vmul.f32 0.03125, %v5774_v42 }
 0xb37   : > { %v5777_v53 = vpop.xlane.xlu0 %5776 }
 0xb38   : > { %v13309_v25 = vsub.f32 %v13132_v17, %v5826_v40  ;;  %v5827_v59 = vmul.f32 0.03125, %v5777_v53  ;;  %v5889_v45 = vmul.f32 %v13306_v61, %v13306_v61 }
 0xb39   : > { %v5780_v49 = vpop.xlane.xlu1 %5779 }
 0xb3a   : > { %v13314_v54 = vsub.f32 %v13129_v55, %v5827_v59  ;;  %v5828_v63 = vmul.f32 0.03125, %v5780_v49  ;;  %v5961_v3 = vsel %vm2081_vm0, %v5889_v45, 0.0  ;;  %v5890_v0 = vmul.f32 %v13309_v25, %v13309_v25 }
 0xb3b   : > { %5962 = vadd.xlane.f32.xlu0 %v5961_v3 }
 0xb3c   : > { %v13320_v8 = vsub.f32 %v13137_v12, %v5828_v63  ;;  %v5964_v17 = vsel %vm2081_vm0, %v5890_v0, 0.0  ;;  %v5891_v22 = vmul.f32 %v13314_v54, %v13314_v54 }
 0xb3d   : > { %5965 = vadd.xlane.f32.xlu1 %v5964_v17 }
 0xb3e   : > { %v5967_v5 = vsel %vm2081_vm0, %v5891_v22, 0.0  ;;  %v5892_v55 = vmul.f32 %v13320_v8, %v13320_v8 }
 0xb3f   : > { %5968 = vadd.xlane.f32.xlu0 %v5967_v5 }
 0xb40   : > { %v5970_v16 = vsel %vm2081_vm0, %v5892_v55, 0.0 }
 0xb41   : > { %5971 = vadd.xlane.f32.xlu1 %v5970_v16 }
 0xb43   : > { %v5783_v60 = vpop.xlane.xlu0 %5782 }
 0xb44   : > { %v5829_v27 = vmul.f32 0.03125, %v5783_v60 }
 0xb45   : > { %v5786_v41 = vpop.xlane.xlu1 %5785 }
 0xb46   : > { %v13330_v12 = vsub.f32 %v13146_v33, %v5829_v27  ;;  %v5830_v44 = vmul.f32 0.03125, %v5786_v41 }
 0xb47   : > { %v5789_v42 = vpop.xlane.xlu0 %5788 }
 0xb48   : > { %v13333_v40 = vsub.f32 %v13152_v37, %v5830_v44  ;;  %v5831_v53 = vmul.f32 0.03125, %v5789_v42  ;;  %v5893_v59 = vmul.f32 %v13330_v12, %v13330_v12 }
 0xb49   : > { %v5792_v45 = vpop.xlane.xlu1 %5791 }
 0xb4a   : > { %v13338_v49 = vsub.f32 %v13149_v19, %v5831_v53  ;;  %v5832_v63 = vmul.f32 0.03125, %v5792_v45  ;;  %v5973_v3 = vsel %vm2081_vm0, %v5893_v59, 0.0  ;;  %v5894_v33 = vmul.f32 %v13333_v40, %v13333_v40 }
 0xb4b   : > { %5974 = vadd.xlane.f32.xlu0 %v5973_v3 }
 0xb4c   : > { %v13344_v0 = vsub.f32 %v13157_v38, %v5832_v63  ;;  %v5976_v37 = vsel %vm2081_vm0, %v5894_v33, 0.0  ;;  %v5895_v17 = vmul.f32 %v13338_v49, %v13338_v49 }
 0xb4d   : > { %5977 = vadd.xlane.f32.xlu1 %v5976_v37 }
 0xb4e   : > { %v5979_v22 = vsel %vm2081_vm0, %v5895_v17, 0.0  ;;  %v5896_v19 = vmul.f32 %v13344_v0, %v13344_v0 }
 0xb4f   : > { %5980 = vadd.xlane.f32.xlu0 %v5979_v22 }
 0xb50   : > { %v5982_v5 = vsel %vm2081_vm0, %v5896_v19, 0.0 }
 0xb51   : > { %5983 = vadd.xlane.f32.xlu1 %v5982_v5 }
 0xb52   : > { %v5795_v55 = vpop.xlane.xlu0 %5794 }
 0xb53   : > { %v5833_v16 = vmul.f32 0.03125, %v5795_v55 }
 0xb54   : > { %v5798_v60 = vpop.xlane.xlu1 %5797 }
 0xb55   : > { %v13354_v38 = vsub.f32 %v13166_v36, %v5833_v16  ;;  %v5834_v27 = vmul.f32 0.03125, %v5798_v60 }
 0xb56   : > { %v5801_v41 = vpop.xlane.xlu0 %5800 }
 0xb57   : > { %v13357_v44 = vsub.f32 %v13172_v6, %v5834_v27  ;;  %v5835_v42 = vmul.f32 0.03125, %v5801_v41  ;;  %v5897_v53 = vmul.f32 %v13354_v38, %v13354_v38 }
 0xb58   : > { %v5804_v59 = vpop.xlane.xlu1 %5803 }
 0xb59   : > { %v13362_v45 = vsub.f32 %v13169_v24, %v5835_v42  ;;  %v5836_v63 = vmul.f32 0.03125, %v5804_v59  ;;  %v5985_v3 = vsel %vm2081_vm0, %v5897_v53, 0.0  ;;  %v5898_v36 = vmul.f32 %v13357_v44, %v13357_v44 }
 0xb5a   : > { %5986 = vadd.xlane.f32.xlu0 %v5985_v3  ;;  %v14335_v3 = vsub.s32 4, %v10624_v4 }
 0xb5b   : > { %v13368_v33 = vsub.f32 %v13177_v43, %v5836_v63  ;;  %v5988_v6 = vsel %vm2081_vm0, %v5898_v36, 0.0  ;;  %v5899_v37 = vmul.f32 %v13362_v45, %v13362_v45 }
 0xb5c   : > { %5989 = vadd.xlane.f32.xlu1 %v5988_v6  ;;  %v13380_v36 = vrot.slane %v13018_v1, %v14335_v3 }
 0xb5d   : > { %v5991_v17 = vsel %vm2081_vm0, %v5899_v37, 0.0  ;;  %v5900_v24 = vmul.f32 %v13368_v33, %v13368_v33 }
 0xb5e   : > { %5992 = vadd.xlane.f32.xlu0 %v5991_v17  ;;  %v14336_v17 = vsub.s32 5, %v10624_v4 }
 0xb5f   : > { %v5994_v22 = vsel %vm2081_vm0, %v5900_v24, 0.0 }
 0xb60   : > { %5995 = vadd.xlane.f32.xlu1 %v5994_v22  ;;  %v13386_v24 = vrot.slane %v13018_v1, %v14336_v17 }
 0xb72   : > { %v5903_v19 = vpop.xlane.xlu0 %5902 }
 0xb73   : > { %v5997_v5 = vmul.f32 0.03125, %v5903_v19 }
 0xb74   : > { %v5906_v55 = vpop.xlane.xlu1 %5905 }
 0xb75   : > { %v6029_v43 = vadd.f32 1e-05, %v5997_v5  ;;  %v5998_v16 = vmul.f32 0.03125, %v5906_v55 }
 0xb76   : > { %v5909_v60 = vpop.xlane.xlu0 %5908 }
 0xb77   : > { %9354 = vrsqrt.f32 %v6029_v43  ;;  %v6030_v27 = vadd.f32 1e-05, %v5998_v16  ;;  %v5999_v41 = vmul.f32 0.03125, %v5909_v60 }
 0xb78   : > { %v5912_v42 = vpop.xlane.xlu1 %5911 }
 0xb79   : > { %9356 = vrsqrt.f32 %v6030_v27  ;;  %v6031_v53 = vadd.f32 1e-05, %v5999_v41  ;;  %v6000_v59 = vmul.f32 0.03125, %v5912_v42 }
 0xb7b   : > { %9358 = vrsqrt.f32 %v6031_v53  ;;  %v6032_v63 = vadd.f32 1e-05, %v6000_v59 }
 0xb7d   : > { %9360 = vrsqrt.f32 %v6032_v63 }
 0xb81   : > { %v9355_v6 = vpop.eup %9354 }
 0xb82   : > { %v6093_v37 = vmul.f32 %v9355_v6, %v13186_v11 }
 0xb83   : > { %v9357_v22 = vpop.eup %9356 }
 0xb84   : > { %v6129_v19 = vmul.f32 %v13380_v36, %v6093_v37  ;;  %v6094_v5 = vmul.f32 %v9357_v22, %v13189_v58 }
 0xb85   : > { %v9359_v55 = vpop.eup %9358 }
 0xb86   : > { %v6165_v43 = vadd.f32 %v13386_v24, %v6129_v19  ;;  %v6130_v16 = vmul.f32 %v13380_v36, %v6094_v5  ;;  %v6095_v60 = vmul.f32 %v9359_v55, %v13194_v21 }
 0xb87   : > { %v9361_v27 = vpop.eup %9360  ;;  %v5915_v41 = vpop.xlane.xlu0 %5914 }
 0xb88   : > { %v6001_v11 = vmul.f32 0.03125, %v5915_v41  ;;  %v13394_v42 = vadd.f32 %v6165_v43, %v12129_v14  ;;  %v6166_v1 = vadd.f32 %v13386_v24, %v6130_v16  ;;  %v6131_v53 = vmul.f32 %v13380_v36, %v6095_v60 }
 0xb89   : > { %v5918_v59 = vpop.xlane.xlu1 %5917  ;;  %v6096_v58 = vmul.f32 %v9361_v27, %v13200_v10 }
 0xb8a   : > { %v6033_v63 = vadd.f32 1e-05, %v6001_v11  ;;  %v6002_v3 = vmul.f32 0.03125, %v5918_v59  ;;  %v6229_v6 = vsel %vm2081_vm0, %v13394_v42, 0.0  ;;  %v13402_v21 = vadd.f32 %v6166_v1, %v12132_v30 }
 0xb8b   : > { %v5921_v37 = vpop.xlane.xlu0 %5920  ;;  %6230 = vadd.xlane.f32.xlu0 %v6229_v6  ;;  %v6167_v14 = vadd.f32 %v13386_v24, %v6131_v53  ;;  %v6132_v17 = vmul.f32 %v13380_v36, %v6096_v58 }
 0xb8c   : > { %9362 = vrsqrt.f32 %v6033_v63  ;;  %v6034_v22 = vadd.f32 1e-05, %v6002_v3  ;;  %v6003_v19 = vmul.f32 0.03125, %v5921_v37  ;;  %v6232_v10 = vsel %vm2081_vm0, %v13402_v21, 0.0 }
 0xb8d   : > { %v5924_v5 = vpop.xlane.xlu1 %5923  ;;  %6233 = vadd.xlane.f32.xlu1 %v6232_v10  ;;  %v13409_v55 = vadd.f32 %v6167_v14, %v12139_v50  ;;  %v6168_v30 = vadd.f32 %v13386_v24, %v6132_v17 }
 0xb8e   : > { %9364 = vrsqrt.f32 %v6034_v22  ;;  %v6035_v43 = vadd.f32 1e-05, %v6003_v19  ;;  %v6004_v16 = vmul.f32 0.03125, %v5924_v5 }
 0xb8f   : > { %v6235_v60 = vsel %vm2081_vm0, %v13409_v55, 0.0  ;;  %v13415_v27 = vadd.f32 %v6168_v30, %v12142_v39 }
 0xb90   : > { %9366 = vrsqrt.f32 %v6035_v43  ;;  %v6036_v41 = vadd.f32 1e-05, %v6004_v16  ;;  %6236 = vadd.xlane.f32.xlu0 %v6235_v60 }
 0xb91   : > { %v6238_v11 = vsel %vm2081_vm0, %v13415_v27, 0.0 }
 0xb92   : > { %9368 = vrsqrt.f32 %v6036_v41  ;;  %6239 = vadd.xlane.f32.xlu1 %v6238_v11 }
 0xb96   : > { %v9363_v50 = vpop.eup %9362 }
 0xb97   : > { %v6097_v1 = vmul.f32 %v9363_v50, %v13210_v52 }
 0xb98   : > { %v9365_v53 = vpop.eup %9364 }
 0xb99   : > { %v5927_v59 = vpop.xlane.xlu0 %5926  ;;  %v6133_v58 = vmul.f32 %v13380_v36, %v6097_v1  ;;  %v6098_v63 = vmul.f32 %v9365_v53, %v13213_v57 }
 0xb9a   : > { %v9367_v3 = vpop.eup %9366  ;;  %v6005_v39 = vmul.f32 0.03125, %v5927_v59 }
 0xb9b   : > { %v5930_v6 = vpop.xlane.xlu1 %5929  ;;  %v6169_v37 = vadd.f32 %v13386_v24, %v6133_v58  ;;  %v6134_v14 = vmul.f32 %v13380_v36, %v6098_v63  ;;  %v6099_v17 = vmul.f32 %v9367_v3, %v13218_v31 }
 0xb9c   : > { %v9369_v22 = vpop.eup %9368  ;;  %v6037_v19 = vadd.f32 1e-05, %v6005_v39  ;;  %v6006_v10 = vmul.f32 0.03125, %v5930_v6 }
 0xb9d   : > { %v5933_v5 = vpop.xlane.xlu0 %5932  ;;  %v13426_v52 = vadd.f32 %v6169_v37, %v12178_v29  ;;  %v6170_v30 = vadd.f32 %v13386_v24, %v6134_v14  ;;  %v6135_v57 = vmul.f32 %v13380_v36, %v6099_v17  ;;  %v6100_v43 = vmul.f32 %v9369_v22, %v13224_v28 }
 0xb9e   : > { %9370 = vrsqrt.f32 %v6037_v19  ;;  %v6038_v16 = vadd.f32 1e-05, %v6006_v10  ;;  %v6007_v60 = vmul.f32 0.03125, %v5933_v5 }
 0xb9f   : > { %v5936_v41 = vpop.xlane.xlu1 %5935  ;;  %v6241_v31 = vsel %vm2081_vm0, %v13426_v52, 0.0  ;;  %v13434_v11 = vadd.f32 %v6170_v30, %v12187_v20  ;;  %v6171_v50 = vadd.f32 %v13386_v24, %v6135_v57  ;;  %v6136_v29 = vmul.f32 %v13380_v36, %v6100_v43 }
 0xba0   : > { %9372 = vrsqrt.f32 %v6038_v16  ;;  %v6039_v1 = vadd.f32 1e-05, %v6007_v60  ;;  %v6008_v53 = vmul.f32 0.03125, %v5936_v41  ;;  %6242 = vadd.xlane.f32.xlu0 %v6241_v31 }
 0xba1   : > { %v6244_v28 = vsel %vm2081_vm0, %v13434_v11, 0.0  ;;  %v13441_v59 = vadd.f32 %v6171_v50, %v12190_v23  ;;  %v6172_v58 = vadd.f32 %v13386_v24, %v6136_v29 }
 0xba2   : > { %9374 = vrsqrt.f32 %v6039_v1  ;;  %v6040_v63 = vadd.f32 1e-05, %v6008_v53  ;;  %6245 = vadd.xlane.f32.xlu1 %v6244_v28 }
 0xba3   : > { %v6247_v20 = vsel %vm2081_vm0, %v13441_v59, 0.0  ;;  %v13447_v3 = vadd.f32 %v6172_v58, %v12197_v13 }
 0xba4   : > { %9376 = vrsqrt.f32 %v6040_v63  ;;  %6248 = vadd.xlane.f32.xlu0 %v6247_v20 }
 0xba5   : > { %v6250_v39 = vsel %vm2081_vm0, %v13447_v3, 0.0 }
 0xba6   : > { %6251 = vadd.xlane.f32.xlu1 %v6250_v39 }
 0xba8   : > { %v9371_v6 = vpop.eup %9370 }
 0xba9   : > { %v5939_v23 = vpop.xlane.xlu0 %5938  ;;  %v6101_v37 = vmul.f32 %v9371_v6, %v13234_v56 }
 0xbaa   : > { %v9373_v14 = vpop.eup %9372  ;;  %v6009_v17 = vmul.f32 0.03125, %v5939_v23 }
 0xbab   : > { %v5942_v22 = vpop.xlane.xlu1 %5941  ;;  %v6137_v19 = vmul.f32 %v13380_v36, %v6101_v37  ;;  %v6102_v10 = vmul.f32 %v9373_v14, %v13237_v62  ;;  %v14337_v37 = vld [vmem:[#allocation5_spill] sm:$0xff] }
 0xbac   : > { %v9375_v5 = vpop.eup %9374  ;;  %v6041_v13 = vadd.f32 1e-05, %v6009_v17  ;;  %v6010_v30 = vmul.f32 0.03125, %v5942_v22 }
 0xbad   : > { %v5945_v57 = vpop.xlane.xlu0 %5944  ;;  %v6173_v43 = vadd.f32 %v13386_v24, %v6137_v19  ;;  %v6138_v16 = vmul.f32 %v13380_v36, %v6102_v10  ;;  %v6103_v60 = vmul.f32 %v9375_v5, %v13242_v51 }
 0xbae   : > { %v9377_v41 = vpop.eup %9376  ;;  %9378 = vrsqrt.f32 %v6041_v13  ;;  %v6042_v56 = vadd.f32 1e-05, %v6010_v30  ;;  %v6011_v31 = vmul.f32 0.03125, %v5945_v57 }
 0xbaf   : > { %v5948_v50 = vpop.xlane.xlu1 %5947  ;;  %v13458_v29 = vadd.f32 %v6173_v43, %v12221_v15  ;;  %v6174_v62 = vadd.f32 %v13386_v24, %v6138_v16  ;;  %v6139_v1 = vmul.f32 %v13380_v36, %v6103_v60  ;;  %v6104_v53 = vmul.f32 %v9377_v41, %v13248_v46 }
 0xbb0   : > { %9380 = vrsqrt.f32 %v6042_v56  ;;  %v6043_v28 = vadd.f32 1e-05, %v6011_v31  ;;  %v6012_v58 = vmul.f32 0.03125, %v5948_v50 }
 0xbb1   : > { %v6253_v51 = vsel %vm2081_vm0, %v13458_v29, 0.0  ;;  %v13466_v63 = vadd.f32 %v6174_v62, %v12228_v7  ;;  %v6175_v20 = vadd.f32 %v13386_v24, %v6139_v1  ;;  %v6140_v15 = vmul.f32 %v13380_v36, %v6104_v53 }
 0xbb2   : > { %9382 = vrsqrt.f32 %v6043_v28  ;;  %v6044_v39 = vadd.f32 1e-05, %v6012_v58  ;;  %6254 = vadd.xlane.f32.xlu0 %v6253_v51  ;;  %v14338_v51 = vld [vmem:[#allocation6_spill] sm:$0xff] }
 0xbb3   : > { %v6256_v6 = vsel %vm2081_vm0, %v13466_v63, 0.0  ;;  %v13473_v46 = vadd.f32 %v6175_v20, %v12231_v48  ;;  %v6176_v23 = vadd.f32 %v13386_v24, %v6140_v15 }
 0xbb4   : > { %9384 = vrsqrt.f32 %v6044_v39  ;;  %6257 = vadd.xlane.f32.xlu1 %v6256_v6 }
 0xbb5   : > { %v6259_v7 = vsel %vm2081_vm0, %v13473_v46, 0.0  ;;  %v13479_v14 = vadd.f32 %v6176_v23, %v14337_v37 }
 0xbb6   : > { %6260 = vadd.xlane.f32.xlu0 %v6259_v7  ;;  %v14339_v7 = vld [vmem:[#allocation7_spill] sm:$0xff] }
 0xbb7   : > { %v6262_v17 = vsel %vm2081_vm0, %v13479_v14, 0.0 }
 0xbb8   : > { %v9379_v22 = vpop.eup %9378  ;;  %6263 = vadd.xlane.f32.xlu1 %v6262_v17  ;;  %v5951_v19 = vpop.xlane.xlu0 %5950 }
 0xbb9   : > { %v6013_v10 = vmul.f32 0.03125, %v5951_v19  ;;  %v6105_v48 = vmul.f32 %v9379_v22, %v13258_v47  ;;  %v14340_v19 = vld [vmem:[#allocation8_spill] sm:$0xff] }
 0xbba   : > { %v9381_v5 = vpop.eup %9380  ;;  %v5954_v13 = vpop.xlane.xlu1 %5953 }
 0xbbb   : > { %v6045_v30 = vadd.f32 1e-05, %v6013_v10  ;;  %v6014_v57 = vmul.f32 0.03125, %v5954_v13  ;;  %v6141_v43 = vmul.f32 %v13380_v36, %v6105_v48  ;;  %v6106_v16 = vmul.f32 %v9381_v5, %v13261_v35  ;;  %v14341_v5 = vld [vmem:[#allocation9_spill] sm:$0xff] }
 0xbbc   : > { %v9383_v60 = vpop.eup %9382  ;;  %v5957_v41 = vpop.xlane.xlu0 %5956 }
 0xbbd   : > { %9386 = vrsqrt.f32 %v6045_v30  ;;  %v6046_v56 = vadd.f32 1e-05, %v6014_v57  ;;  %v6015_v31 = vmul.f32 0.03125, %v5957_v41  ;;  %v6177_v50 = vadd.f32 %v13386_v24, %v6141_v43 }
 0xbbe   : > { %v9385_v62 = vpop.eup %9384  ;;  %v5960_v1 = vpop.xlane.xlu1 %5959  ;;  %v6142_v53 = vmul.f32 %v13380_v36, %v6106_v16  ;;  %v6107_v47 = vmul.f32 %v9383_v60, %v13266_v2 }
 0xbbf   : > { %9388 = vrsqrt.f32 %v6046_v56  ;;  %v6047_v28 = vadd.f32 1e-05, %v6015_v31  ;;  %v6016_v58 = vmul.f32 0.03125, %v5960_v1  ;;  %v13490_v20 = vadd.f32 %v6177_v50, %v14338_v51 }
 0xbc0   : > { %v6178_v35 = vadd.f32 %v13386_v24, %v6142_v53  ;;  %v6143_v15 = vmul.f32 %v13380_v36, %v6107_v47  ;;  %v6108_v39 = vmul.f32 %v9385_v62, %v13272_v34 }
 0xbc1   : > { %9390 = vrsqrt.f32 %v6047_v28  ;;  %v6048_v6 = vadd.f32 1e-05, %v6016_v58  ;;  %v6265_v23 = vsel %vm2081_vm0, %v13490_v20, 0.0 }
 0xbc2   : > { %6266 = vadd.xlane.f32.xlu0 %v6265_v23  ;;  %v13498_v2 = vadd.f32 %v6178_v35, %v14339_v7  ;;  %v6179_v37 = vadd.f32 %v13386_v24, %v6143_v15  ;;  %v6144_v17 = vmul.f32 %v13380_v36, %v6108_v39 }
 0xbc3   : > { %9392 = vrsqrt.f32 %v6048_v6  ;;  %v14342_v6 = vld [vmem:[#allocation10_spill] sm:$0xff] }
 0xbc4   : > { %v6268_v22 = vsel %vm2081_vm0, %v13498_v2, 0.0  ;;  %v13505_v10 = vadd.f32 %v6179_v37, %v14340_v19  ;;  %v6180_v34 = vadd.f32 %v13386_v24, %v6144_v17  ;;  %v14343_v19 = vld [vmem:[#allocation11_spill] sm:$0xff] }
 0xbc5   : > { %6269 = vadd.xlane.f32.xlu1 %v6268_v22 }
 0xbc6   : > { %v6271_v48 = vsel %vm2081_vm0, %v13505_v10, 0.0  ;;  %v13511_v13 = vadd.f32 %v6180_v34, %v14341_v5 }
 0xbc7   : > { %v9387_v30 = vpop.eup %9386  ;;  %6272 = vadd.xlane.f32.xlu0 %v6271_v48 }
 0xbc8   : > { %v6274_v57 = vsel %vm2081_vm0, %v13511_v13, 0.0  ;;  %v5963_v43 = vpop.xlane.xlu0 %5962  ;;  %v6109_v16 = vmul.f32 %v9387_v30, %v13282_v18 }
 0xbc9   : > { %v9389_v60 = vpop.eup %9388  ;;  %6275 = vadd.xlane.f32.xlu1 %v6274_v57  ;;  %v6017_v41 = vmul.f32 0.03125, %v5963_v43 }
 0xbca   : > { %v5966_v56 = vpop.xlane.xlu1 %5965  ;;  %v6145_v31 = vmul.f32 %v13380_v36, %v6109_v16  ;;  %v6110_v50 = vmul.f32 %v9389_v60, %v13285_v26 }
 0xbcb   : > { %v9391_v62 = vpop.eup %9390  ;;  %v6049_v1 = vadd.f32 1e-05, %v6017_v41  ;;  %v6018_v53 = vmul.f32 0.03125, %v5966_v56  ;;  %v14345_v41 = vld [vmem:[#allocation13_spill] sm:$0xff] }
 0xbcc   : > { %v5969_v47 = vpop.xlane.xlu0 %5968  ;;  %v6181_v28 = vadd.f32 %v13386_v24, %v6145_v31  ;;  %v6146_v58 = vmul.f32 %v13380_v36, %v6110_v50  ;;  %v6111_v51 = vmul.f32 %v9391_v62, %v13290_v32 }
 0xbcd   : > { %v9393_v35 = vpop.eup %9392  ;;  %9394 = vrsqrt.f32 %v6049_v1  ;;  %v6050_v18 = vadd.f32 1e-05, %v6018_v53  ;;  %v6019_v15 = vmul.f32 0.03125, %v5969_v47 }
 0xbce   : > { %v5972_v39 = vpop.xlane.xlu1 %5971  ;;  %v13522_v23 = vadd.f32 %v6181_v28, %v14342_v6  ;;  %v6182_v26 = vadd.f32 %v13386_v24, %v6146_v58  ;;  %v6147_v7 = vmul.f32 %v13380_v36, %v6111_v51  ;;  %v6112_v37 = vmul.f32 %v9393_v35, %v13296_v9  ;;  %v14344_v9 = vld [vmem:[#allocation12_spill] sm:$0xff] }
 0xbcf   : > { %9396 = vrsqrt.f32 %v6050_v18  ;;  %v6051_v17 = vadd.f32 1e-05, %v6019_v15  ;;  %v6020_v22 = vmul.f32 0.03125, %v5972_v39 }
 0xbd0   : > { %v6277_v32 = vsel %vm2081_vm0, %v13522_v23, 0.0  ;;  %v13530_v34 = vadd.f32 %v6182_v26, %v14343_v19  ;;  %v6183_v48 = vadd.f32 %v13386_v24, %v6147_v7  ;;  %v6148_v5 = vmul.f32 %v13380_v36, %v6112_v37 }
 0xbd1   : > { %9398 = vrsqrt.f32 %v6051_v17  ;;  %v6052_v30 = vadd.f32 1e-05, %v6020_v22  ;;  %6278 = vadd.xlane.f32.xlu0 %v6277_v32  ;;  %v14346_v32 = vld [vmem:[#allocation14_spill] sm:$0xff] }
 0xbd2   : > { %v6280_v57 = vsel %vm2081_vm0, %v13530_v34, 0.0  ;;  %v13537_v43 = vadd.f32 %v6183_v48, %v14344_v9  ;;  %v6184_v16 = vadd.f32 %v13386_v24, %v6148_v5  ;;  %v14347_v9 = vld [vmem:[#allocation15_spill] sm:$0xff] }
 0xbd3   : > { %9400 = vrsqrt.f32 %v6052_v30  ;;  %6281 = vadd.xlane.f32.xlu1 %v6280_v57 }
 0xbd4   : > { %v6283_v60 = vsel %vm2081_vm0, %v13537_v43, 0.0  ;;  %v13543_v56 = vadd.f32 %v6184_v16, %v14345_v41 }
 0xbd5   : > { %6284 = vadd.xlane.f32.xlu0 %v6283_v60 }
 0xbd6   : > { %v6286_v31 = vsel %vm2081_vm0, %v13543_v56, 0.0 }
 0xbd7   : > { %v9395_v50 = vpop.eup %9394  ;;  %6287 = vadd.xlane.f32.xlu1 %v6286_v31 }
 0xbd8   : > { %v5975_v62 = vpop.xlane.xlu0 %5974  ;;  %v6113_v1 = vmul.f32 %v9395_v50, %v13306_v61 }
 0xbd9   : > { %v9397_v53 = vpop.eup %9396  ;;  %v6021_v47 = vmul.f32 0.03125, %v5975_v62 }
 0xbda   : > { %v5978_v28 = vpop.xlane.xlu1 %5977  ;;  %v6149_v58 = vmul.f32 %v13380_v36, %v6113_v1  ;;  %v6114_v51 = vmul.f32 %v9397_v53, %v13309_v25 }
 0xbdb   : > { %v9399_v35 = vpop.eup %9398  ;;  %v6053_v18 = vadd.f32 1e-05, %v6021_v47  ;;  %v6022_v15 = vmul.f32 0.03125, %v5978_v28  ;;  %v14349_v47 = vld [vmem:[#allocation17_spill] sm:$0xff] }
 0xbdc   : > { %v5981_v39 = vpop.xlane.xlu0 %5980  ;;  %v6185_v6 = vadd.f32 %v13386_v24, %v6149_v58  ;;  %v6150_v26 = vmul.f32 %v13380_v36, %v6114_v51  ;;  %v6115_v7 = vmul.f32 %v9399_v35, %v13314_v54 }
 0xbdd   : > { %v9401_v37 = vpop.eup %9400  ;;  %9402 = vrsqrt.f32 %v6053_v18  ;;  %v6054_v61 = vadd.f32 1e-05, %v6022_v15  ;;  %v6023_v17 = vmul.f32 0.03125, %v5981_v39 }
 0xbde   : > { %v5984_v22 = vpop.xlane.xlu1 %5983  ;;  %v13554_v19 = vadd.f32 %v6185_v6, %v14346_v32  ;;  %v6186_v25 = vadd.f32 %v13386_v24, %v6150_v26  ;;  %v6151_v48 = vmul.f32 %v13380_v36, %v6115_v7  ;;  %v6116_v5 = vmul.f32 %v9401_v37, %v13320_v8  ;;  %v14348_v8 = vld [vmem:[#allocation16_spill] sm:$0xff] }
 0xbdf   : > { %9404 = vrsqrt.f32 %v6054_v61  ;;  %v6055_v30 = vadd.f32 1e-05, %v6023_v17  ;;  %v6024_v57 = vmul.f32 0.03125, %v5984_v22 }
 0xbe0   : > { %v6289_v54 = vsel %vm2081_vm0, %v13554_v19, 0.0  ;;  %v13562_v16 = vadd.f32 %v6186_v25, %v14347_v9  ;;  %v6187_v60 = vadd.f32 %v13386_v24, %v6151_v48  ;;  %v6152_v41 = vmul.f32 %v13380_v36, %v6116_v5 }
 0xbe1   : > { %9406 = vrsqrt.f32 %v6055_v30  ;;  %v6056_v31 = vadd.f32 1e-05, %v6024_v57  ;;  %6290 = vadd.xlane.f32.xlu0 %v6289_v54 }
 0xbe2   : > { %v6292_v50 = vsel %vm2081_vm0, %v13562_v16, 0.0  ;;  %v13569_v62 = vadd.f32 %v6187_v60, %v14348_v8  ;;  %v6188_v1 = vadd.f32 %v13386_v24, %v6152_v41  ;;  %v14350_v60 = vld [vmem:[#allocation18_spill] sm:$0xff] }
 0xbe3   : > { %9408 = vrsqrt.f32 %v6056_v31  ;;  %6293 = vadd.xlane.f32.xlu1 %v6292_v50 }
 0xbe4   : > { %v6295_v53 = vsel %vm2081_vm0, %v13569_v62, 0.0  ;;  %v13575_v28 = vadd.f32 %v6188_v1, %v14349_v47 }
 0xbe5   : > { %6296 = vadd.xlane.f32.xlu0 %v6295_v53  ;;  %v14351_v53 = vld [vmem:[#allocation19_spill] sm:$0xff] }
 0xbe6   : > { %v6298_v58 = vsel %vm2081_vm0, %v13575_v28, 0.0 }
 0xbe7   : > { %v9403_v51 = vpop.eup %9402  ;;  %6299 = vadd.xlane.f32.xlu1 %v6298_v58  ;;  %v5987_v35 = vpop.xlane.xlu0 %5986 }
 0xbe8   : > { %v6025_v18 = vmul.f32 0.03125, %v5987_v35  ;;  %v6117_v15 = vmul.f32 %v9403_v51, %v13330_v12  ;;  %v14352_v35 = vld [vmem:[#allocation20_spill] sm:$0xff] }
 0xbe9   : > { %v9405_v39 = vpop.eup %9404  ;;  %v5990_v6 = vpop.xlane.xlu1 %5989 }
 0xbea   : > { %v6057_v26 = vadd.f32 1e-05, %v6025_v18  ;;  %v6026_v7 = vmul.f32 0.03125, %v5990_v6  ;;  %v6153_v37 = vmul.f32 %v13380_v36, %v6117_v15  ;;  %v6118_v61 = vmul.f32 %v9405_v39, %v13333_v40  ;;  %v14353_v39 = vld [vmem:[#allocation21_spill] sm:$0xff] }
 0xbeb   : > { %v9407_v17 = vpop.eup %9406  ;;  %v5993_v22 = vpop.xlane.xlu0 %5992 }
 0xbec   : > { %9410 = vrsqrt.f32 %v6057_v26  ;;  %v6058_v32 = vadd.f32 1e-05, %v6026_v7  ;;  %v6027_v25 = vmul.f32 0.03125, %v5993_v22  ;;  %v6189_v48 = vadd.f32 %v13386_v24, %v6153_v37 }
 0xbed   : > { %v9409_v5 = vpop.eup %9408  ;;  %v5996_v30 = vpop.xlane.xlu1 %5995  ;;  %v6154_v57 = vmul.f32 %v13380_v36, %v6118_v61  ;;  %v6119_v12 = vmul.f32 %v9407_v17, %v13338_v49 }
 0xbee   : > { %9412 = vrsqrt.f32 %v6058_v32  ;;  %v6059_v54 = vadd.f32 1e-05, %v6027_v25  ;;  %v6028_v9 = vmul.f32 0.03125, %v5996_v30  ;;  %v13586_v41 = vadd.f32 %v6189_v48, %v14350_v60  ;;  %v14355_v60 = vld [vmem:[#allocation23_spill] sm:$0xff] }
 0xbef   : > { %v6190_v40 = vadd.f32 %v13386_v24, %v6154_v57  ;;  %v6155_v31 = vmul.f32 %v13380_v36, %v6119_v12  ;;  %v6120_v50 = vmul.f32 %v9409_v5, %v13344_v0  ;;  %v14354_v57 = vld [vmem:[#allocation22_spill] sm:$0xff] }
 0xbf0   : > { %9414 = vrsqrt.f32 %v6059_v54  ;;  %v6060_v8 = vadd.f32 1e-05, %v6028_v9  ;;  %v6301_v1 = vsel %vm2081_vm0, %v13586_v41, 0.0 }
 0xbf1   : > { %6302 = vadd.xlane.f32.xlu0 %v6301_v1  ;;  %v13594_v49 = vadd.f32 %v6190_v40, %v14351_v53  ;;  %v6191_v47 = vadd.f32 %v13386_v24, %v6155_v31  ;;  %v6156_v58 = vmul.f32 %v13380_v36, %v6120_v50 }
 0xbf2   : > { %9416 = vrsqrt.f32 %v6060_v8  ;;  %v14356_v8 = vld [vmem:[#allocation24_spill] sm:$0xff] }
 0xbf3   : > { %v6304_v51 = vsel %vm2081_vm0, %v13594_v49, 0.0  ;;  %v13601_v18 = vadd.f32 %v6191_v47, %v14352_v35  ;;  %v6192_v0 = vadd.f32 %v13386_v24, %v6156_v58  ;;  %v14357_v47 = vld [vmem:[#allocation25_spill] sm:$0xff] }
 0xbf4   : > { %6305 = vadd.xlane.f32.xlu1 %v6304_v51 }
 0xbf5   : > { %v6307_v15 = vsel %vm2081_vm0, %v13601_v18, 0.0  ;;  %v13607_v6 = vadd.f32 %v6192_v0, %v14353_v39 }
 0xbf6   : > { %v9411_v26 = vpop.eup %9410  ;;  %6308 = vadd.xlane.f32.xlu0 %v6307_v15 }
 0xbf7   : > { %v6310_v7 = vsel %vm2081_vm0, %v13607_v6, 0.0  ;;  %v6121_v37 = vmul.f32 %v9411_v26, %v13354_v38 }
 0xbf8   : > { %v9413_v61 = vpop.eup %9412  ;;  %6311 = vadd.xlane.f32.xlu1 %v6310_v7 }
 0xbf9   : > { %v6157_v17 = vmul.f32 %v13380_v36, %v6121_v37  ;;  %v6122_v22 = vmul.f32 %v9413_v61, %v13357_v44 }
 0xbfa   : > { %v9415_v32 = vpop.eup %9414 }
 0xbfb   : > { %v6193_v25 = vadd.f32 %v13386_v24, %v6157_v17  ;;  %v6158_v48 = vmul.f32 %v13380_v36, %v6122_v22  ;;  %v6123_v5 = vmul.f32 %v9415_v32, %v13362_v45 }
 0xbfc   : > { %v9417_v30 = vpop.eup %9416 }
 0xbfd   : > { %v13618_v12 = vadd.f32 %v6193_v25, %v14354_v57  ;;  %v6194_v54 = vadd.f32 %v13386_v24, %v6158_v48  ;;  %v6159_v38 = vmul.f32 %v13380_v36, %v6123_v5  ;;  %v6124_v9 = vmul.f32 %v9417_v30, %v13368_v33 }
 0xbff   : > { %v6313_v44 = vsel %vm2081_vm0, %v13618_v12, 0.0  ;;  %v13626_v40 = vadd.f32 %v6194_v54, %v14355_v60  ;;  %v6195_v31 = vadd.f32 %v13386_v24, %v6159_v38  ;;  %v6160_v45 = vmul.f32 %v13380_v36, %v6124_v9 }
 0xc00   : > { %6314 = vadd.xlane.f32.xlu0 %v6313_v44 }
 0xc01   : > { %v6316_v50 = vsel %vm2081_vm0, %v13626_v40, 0.0  ;;  %v13633_v1 = vadd.f32 %v6195_v31, %v14356_v8  ;;  %v6196_v53 = vadd.f32 %v13386_v24, %v6160_v45 }
 0xc02   : > { %6317 = vadd.xlane.f32.xlu1 %v6316_v50 }
 0xc03   : > { %v6319_v33 = vsel %vm2081_vm0, %v13633_v1, 0.0  ;;  %v13639_v58 = vadd.f32 %v6196_v53, %v14357_v47 }
 0xc04   : > { %6320 = vadd.xlane.f32.xlu0 %v6319_v33 }
 0xc05   : > { %v6322_v36 = vsel %vm2081_vm0, %v13639_v58, 0.0 }
 0xc06   : > { %6323 = vadd.xlane.f32.xlu1 %v6322_v36 }
 0xc18   : > { %v6231_v51 = vpop.xlane.xlu0 %6230 }
 0xc19   : > { %v6325_v35 = vmul.f32 0.03125, %v6231_v51 }
 0xc1a   : > { %v6234_v0 = vpop.xlane.xlu1 %6233 }
 0xc1b   : > { %v13644_v15 = vsub.f32 %v13394_v42, %v6325_v35  ;;  %v6326_v39 = vmul.f32 0.03125, %v6234_v0 }
 0xc1d   : > { %v13647_v24 = vsub.f32 %v13402_v21, %v6326_v39  ;;  %v6237_v26 = vpop.xlane.xlu0 %6236  ;;  %v6389_v7 = vmul.f32 %v13644_v15, %v13644_v15 }
 0xc1e   : > { %v6327_v37 = vmul.f32 0.03125, %v6237_v26 }
 0xc1f   : > { %v6240_v61 = vpop.xlane.xlu1 %6239  ;;  %v6421_v17 = vsel %vm2081_vm0, %v6389_v7, 0.0  ;;  %v6390_v22 = vmul.f32 %v13647_v24, %v13647_v24 }
 0xc20   : > { %v13655_v32 = vsub.f32 %v13409_v55, %v6327_v37  ;;  %v6328_v42 = vmul.f32 0.03125, %v6240_v61  ;;  %6422 = vadd.xlane.f32.xlu0 %v6421_v17 }
 0xc21   : > { %v6424_v25 = vsel %vm2081_vm0, %v6390_v22, 0.0 }
 0xc22   : > { %v13659_v21 = vsub.f32 %v13415_v27, %v6328_v42  ;;  %6425 = vadd.xlane.f32.xlu1 %v6424_v25  ;;  %v6391_v48 = vmul.f32 %v13655_v32, %v13655_v32 }
 0xc24   : > { %v6427_v5 = vsel %vm2081_vm0, %v6391_v48, 0.0  ;;  %v6392_v30 = vmul.f32 %v13659_v21, %v13659_v21 }
 0xc25   : > { %6428 = vadd.xlane.f32.xlu0 %v6427_v5 }
 0xc26   : > { %v6430_v55 = vsel %vm2081_vm0, %v6392_v30, 0.0 }
 0xc27   : > { %6431 = vadd.xlane.f32.xlu1 %v6430_v55 }
 0xc2d   : > { %v6243_v57 = vpop.xlane.xlu0 %6242 }
 0xc2e   : > { %v6329_v54 = vmul.f32 0.03125, %v6243_v57 }
 0xc2f   : > { %v6246_v38 = vpop.xlane.xlu1 %6245 }
 0xc30   : > { %v13668_v9 = vsub.f32 %v13426_v52, %v6329_v54  ;;  %v6330_v27 = vmul.f32 0.03125, %v6246_v38 }
 0xc31   : > { %v6249_v44 = vpop.xlane.xlu0 %6248 }
 0xc32   : > { %v13671_v60 = vsub.f32 %v13434_v11, %v6330_v27  ;;  %v6331_v31 = vmul.f32 0.03125, %v6249_v44  ;;  %v6393_v45 = vmul.f32 %v13668_v9, %v13668_v9 }
 0xc33   : > { %v6252_v50 = vpop.xlane.xlu1 %6251 }
 0xc34   : > { %v13676_v8 = vsub.f32 %v13441_v59, %v6331_v31  ;;  %v6332_v53 = vmul.f32 0.03125, %v6252_v50  ;;  %v6433_v33 = vsel %vm2081_vm0, %v6393_v45, 0.0  ;;  %v6394_v52 = vmul.f32 %v13671_v60, %v13671_v60 }
 0xc35   : > { %6434 = vadd.xlane.f32.xlu0 %v6433_v33 }
 0xc36   : > { %v13682_v47 = vsub.f32 %v13447_v3, %v6332_v53  ;;  %v6436_v11 = vsel %vm2081_vm0, %v6394_v52, 0.0  ;;  %v6395_v36 = vmul.f32 %v13676_v8, %v13676_v8 }
 0xc37   : > { %6437 = vadd.xlane.f32.xlu1 %v6436_v11 }
 0xc38   : > { %v6439_v51 = vsel %vm2081_vm0, %v6395_v36, 0.0  ;;  %v6396_v59 = vmul.f32 %v13682_v47, %v13682_v47 }
 0xc39   : > { %6440 = vadd.xlane.f32.xlu0 %v6439_v51 }
 0xc3a   : > { %v6442_v35 = vsel %vm2081_vm0, %v6396_v59, 0.0 }
 0xc3b   : > { %6443 = vadd.xlane.f32.xlu1 %v6442_v35 }
 0xc3f   : > { %v6255_v0 = vpop.xlane.xlu0 %6254 }
 0xc40   : > { %v6333_v39 = vmul.f32 0.03125, %v6255_v0 }
 0xc41   : > { %v6258_v26 = vpop.xlane.xlu1 %6257 }
 0xc42   : > { %v13692_v3 = vsub.f32 %v13458_v29, %v6333_v39  ;;  %v6334_v7 = vmul.f32 0.03125, %v6258_v26 }
 0xc43   : > { %v6261_v37 = vpop.xlane.xlu0 %6260 }
 0xc44   : > { %v13695_v61 = vsub.f32 %v13466_v63, %v6334_v7  ;;  %v6335_v17 = vmul.f32 0.03125, %v6261_v37  ;;  %v6397_v22 = vmul.f32 %v13692_v3, %v13692_v3 }
 0xc45   : > { %v6264_v42 = vpop.xlane.xlu1 %6263 }
 0xc46   : > { %v13700_v25 = vsub.f32 %v13473_v46, %v6335_v17  ;;  %v6336_v48 = vmul.f32 0.03125, %v6264_v42  ;;  %v6445_v5 = vsel %vm2081_vm0, %v6397_v22, 0.0  ;;  %v6398_v29 = vmul.f32 %v13695_v61, %v13695_v61 }
 0xc47   : > { %6446 = vadd.xlane.f32.xlu0 %v6445_v5 }
 0xc48   : > { %v13706_v30 = vsub.f32 %v13479_v14, %v6336_v48  ;;  %v6448_v63 = vsel %vm2081_vm0, %v6398_v29, 0.0  ;;  %v6399_v55 = vmul.f32 %v13700_v25, %v13700_v25 }
 0xc49   : > { %6449 = vadd.xlane.f32.xlu1 %v6448_v63 }
 0xc4a   : > { %v6451_v57 = vsel %vm2081_vm0, %v6399_v55, 0.0  ;;  %v6400_v46 = vmul.f32 %v13706_v30, %v13706_v30 }
 0xc4b   : > { %6452 = vadd.xlane.f32.xlu0 %v6451_v57 }
 0xc4c   : > { %v6454_v54 = vsel %vm2081_vm0, %v6400_v46, 0.0 }
 0xc4d   : > { %6455 = vadd.xlane.f32.xlu1 %v6454_v54 }
 0xc4f   : > { %v6267_v38 = vpop.xlane.xlu0 %6266 }
 0xc50   : > { %v6337_v27 = vmul.f32 0.03125, %v6267_v38 }
 0xc52   : > { %v13716_v14 = vsub.f32 %v13490_v20, %v6337_v27  ;;  %v6270_v44 = vpop.xlane.xlu1 %6269 }
 0xc53   : > { %v6338_v31 = vmul.f32 0.03125, %v6270_v44  ;;  %v8585_v44 = vld [vmem:[%s14213_s7 + $0x8] sm:$0xff]  }
 0xc54   : > { %v6273_v45 = vpop.xlane.xlu0 %6272  ;;  %v6401_v50 = vmul.f32 %v13716_v14, %v13716_v14 }
 0xc55   : > { %v13721_v53 = vsub.f32 %v13498_v2, %v6338_v31  ;;  %v6339_v33 = vmul.f32 0.03125, %v6273_v45 }
 0xc56   : > { %v6276_v52 = vpop.xlane.xlu1 %6275  ;;  %v6457_v11 = vsel %vm2081_vm0, %v6401_v50, 0.0 }
 0xc57   : > { %v13725_v36 = vsub.f32 %v13505_v10, %v6339_v33  ;;  %v6340_v51 = vmul.f32 0.03125, %v6276_v52  ;;  %6458 = vadd.xlane.f32.xlu0 %v6457_v11  ;;  %v6402_v20 = vmul.f32 %v13721_v53, %v13721_v53 }
 0xc59   : > { %v13730_v59 = vsub.f32 %v13511_v13, %v6340_v51  ;;  %v6460_v35 = vsel %vm2081_vm0, %v6402_v20, 0.0  ;;  %v6403_v2 = vmul.f32 %v13725_v36, %v13725_v36 }
 0xc5a   : > { %6461 = vadd.xlane.f32.xlu1 %v6460_v35 }
 0xc5b   : > { %v6463_v0 = vsel %vm2081_vm0, %v6403_v2, 0.0  ;;  %v6404_v10 = vmul.f32 %v13730_v59, %v13730_v59 }
 0xc5c   : > { %6464 = vadd.xlane.f32.xlu0 %v6463_v0 }
 0xc5d   : > { %v6466_v39 = vsel %vm2081_vm0, %v6404_v10, 0.0 }
 0xc5e   : > { %6467 = vadd.xlane.f32.xlu1 %v6466_v39  ;;  %v6279_v26 = vpop.xlane.xlu0 %6278 }
 0xc5f   : > { %v6341_v7 = vmul.f32 0.03125, %v6279_v26 }
 0xc60   : > { %v6282_v37 = vpop.xlane.xlu1 %6281 }
 0xc61   : > { %v13740_v13 = vsub.f32 %v13522_v23, %v6341_v7  ;;  %v6342_v17 = vmul.f32 0.03125, %v6282_v37 }
 0xc62   : > { %v6285_v22 = vpop.xlane.xlu0 %6284 }
 0xc63   : > { %v13743_v42 = vsub.f32 %v13530_v34, %v6342_v17  ;;  %v6343_v48 = vmul.f32 0.03125, %v6285_v22  ;;  %v6405_v5 = vmul.f32 %v13740_v13, %v13740_v13 }
 0xc64   : > { %v6288_v29 = vpop.xlane.xlu1 %6287 }
 0xc65   : > { %v13748_v63 = vsub.f32 %v13537_v43, %v6343_v48  ;;  %v6344_v55 = vmul.f32 0.03125, %v6288_v29  ;;  %v6469_v57 = vsel %vm2081_vm0, %v6405_v5, 0.0  ;;  %v6406_v23 = vmul.f32 %v13743_v42, %v13743_v42  ;;  %v8584_v43 = vld [vmem:[%s14213_s7] sm:$0xff]  }
 0xc66   : > { %6470 = vadd.xlane.f32.xlu0 %v6469_v57  ;;  %8287 = vmatprep.subr.bf16.mxu0 %v8584_v43 }
 0xc67   : > { %v13754_v46 = vsub.f32 %v13543_v56, %v6344_v55  ;;  %v6472_v34 = vsel %vm2081_vm0, %v6406_v23, 0.0  ;;  %v6407_v54 = vmul.f32 %v13748_v63, %v13748_v63  ;;  %8288 = vmatpush3.bf16.msra.mxu0 %v8584_v43 }
 0xc68   : > { %6473 = vadd.xlane.f32.xlu1 %v6472_v34  ;;  %8289 = vmatprep.subr.bf16.mxu0 %v8585_v44 }
 0xc69   : > { %v6475_v38 = vsel %vm2081_vm0, %v6407_v54, 0.0  ;;  %v6408_v27 = vmul.f32 %v13754_v46, %v13754_v46 }
 0xc6a   : > { %6476 = vadd.xlane.f32.xlu0 %v6475_v38 }
 0xc6b   : > { %v6478_v56 = vsel %vm2081_vm0, %v6408_v27, 0.0  ;;  %8290 = vmatpush3.bf16.msra.mxu0 %v8585_v44 }
 0xc6c   : > { %6479 = vadd.xlane.f32.xlu1 %v6478_v56 }
 0xc6e   : > { %v6291_v31 = vpop.xlane.xlu0 %6290 }
 0xc6f   : > { %v6345_v45 = vmul.f32 0.03125, %v6291_v31 }
 0xc70   : > { %v6294_v50 = vpop.xlane.xlu1 %6293 }
 0xc71   : > { %v13770_v33 = vsub.f32 %v13554_v19, %v6345_v45  ;;  %v6346_v52 = vmul.f32 0.03125, %v6294_v50 }
 0xc72   : > { %v6297_v11 = vpop.xlane.xlu0 %6296 }
 0xc73   : > { %v13773_v51 = vsub.f32 %v13562_v16, %v6346_v52  ;;  %v6347_v20 = vmul.f32 0.03125, %v6297_v11  ;;  %v6409_v35 = vmul.f32 %v13770_v33, %v13770_v33 }
 0xc74   : > { %v6300_v2 = vpop.xlane.xlu1 %6299 }
 0xc75   : > { %v13778_v0 = vsub.f32 %v13569_v62, %v6347_v20  ;;  %v6348_v10 = vmul.f32 0.03125, %v6300_v2  ;;  %v6481_v39 = vsel %vm2081_vm0, %v6409_v35, 0.0  ;;  %v6410_v19 = vmul.f32 %v13773_v51, %v13773_v51 }
 0xc76   : > { %6482 = vadd.xlane.f32.xlu0 %v6481_v39 }
 0xc77   : > { %v13784_v26 = vsub.f32 %v13575_v28, %v6348_v10  ;;  %v6484_v16 = vsel %vm2081_vm0, %v6410_v19, 0.0  ;;  %v6411_v7 = vmul.f32 %v13778_v0, %v13778_v0 }
 0xc78   : > { %6485 = vadd.xlane.f32.xlu1 %v6484_v16 }
 0xc79   : > { %v6487_v37 = vsel %vm2081_vm0, %v6411_v7, 0.0  ;;  %v6412_v62 = vmul.f32 %v13784_v26, %v13784_v26 }
 0xc7a   : > { %6488 = vadd.xlane.f32.xlu0 %v6487_v37 }
 0xc7b   : > { %v6490_v17 = vsel %vm2081_vm0, %v6412_v62, 0.0 }
 0xc7c   : > { %6491 = vadd.xlane.f32.xlu1 %v6490_v17 }
 0xc7e   : > { %v6303_v22 = vpop.xlane.xlu0 %6302 }
 0xc7f   : > { %v6349_v48 = vmul.f32 0.03125, %v6303_v22 }
 0xc81   : > { %v13794_v28 = vsub.f32 %v13586_v41, %v6349_v48  ;;  %v6306_v5 = vpop.xlane.xlu1 %6305 }
 0xc82   : > { %v6350_v29 = vmul.f32 0.03125, %v6306_v5 }
 0xc83   : > { %v6309_v55 = vpop.xlane.xlu0 %6308  ;;  %v6413_v57 = vmul.f32 %v13794_v28, %v13794_v28 }
 0xc84   : > { %v13799_v23 = vsub.f32 %v13594_v49, %v6350_v29  ;;  %v6351_v34 = vmul.f32 0.03125, %v6309_v55 }
 0xc85   : > { %v6312_v54 = vpop.xlane.xlu1 %6311  ;;  %v6493_v43 = vsel %vm2081_vm0, %v6413_v57, 0.0 }
 0xc86   : > { %v13803_v38 = vsub.f32 %v13601_v18, %v6351_v34  ;;  %v6352_v27 = vmul.f32 0.03125, %v6312_v54  ;;  %6494 = vadd.xlane.f32.xlu0 %v6493_v43  ;;  %v6414_v41 = vmul.f32 %v13799_v23, %v13799_v23 }
 0xc88   : > { %v13808_v56 = vsub.f32 %v13607_v6, %v6352_v27  ;;  %v6496_v44 = vsel %vm2081_vm0, %v6414_v41, 0.0  ;;  %v6415_v49 = vmul.f32 %v13803_v38, %v13803_v38 }
 0xc89   : > { %6497 = vadd.xlane.f32.xlu1 %v6496_v44 }
 0xc8a   : > { %v6499_v31 = vsel %vm2081_vm0, %v6415_v49, 0.0  ;;  %v6416_v18 = vmul.f32 %v13808_v56, %v13808_v56 }
 0xc8b   : > { %6500 = vadd.xlane.f32.xlu0 %v6499_v31  ;;  %v9613_v31 = vld [vmem:[%s14214_s8 + $0x8] sm:$0xff] }
 0xc8c   : > { %v6502_v45 = vsel %vm2081_vm0, %v6416_v18, 0.0  ;;  %v14358_v18 = vsub.s32 6, %v10624_v4 }
 0xc8d   : > { %6503 = vadd.xlane.f32.xlu1 %v6502_v45  ;;  %v6315_v50 = vpop.xlane.xlu0 %6314 }
 0xc8e   : > { %v6353_v52 = vmul.f32 0.03125, %v6315_v50  ;;  %v13846_v45 = vrot.slane %v9613_v31, %v14358_v18 }
 0xc8f   : > { %v6318_v11 = vpop.xlane.xlu1 %6317 }
 0xc90   : > { %v13818_v6 = vsub.f32 %v13618_v12, %v6353_v52  ;;  %v6354_v20 = vmul.f32 0.03125, %v6318_v11  ;;  %v14359_v11 = vsub.s32 7, %v10624_v4 }
 0xc91   : > { %v6321_v35 = vpop.xlane.xlu0 %6320 }
 0xc92   : > { %v13821_v2 = vsub.f32 %v13626_v40, %v6354_v20  ;;  %v6355_v10 = vmul.f32 0.03125, %v6321_v35  ;;  %v6417_v39 = vmul.f32 %v13818_v6, %v13818_v6  ;;  %v13851_v20 = vrot.slane %v9613_v31, %v14359_v11 }
 0xc93   : > { %v6324_v19 = vpop.xlane.xlu1 %6323 }
 0xc94   : > { %v13826_v16 = vsub.f32 %v13633_v1, %v6355_v10  ;;  %v6356_v7 = vmul.f32 0.03125, %v6324_v19  ;;  %v6505_v37 = vsel %vm2081_vm0, %v6417_v39, 0.0  ;;  %v6418_v12 = vmul.f32 %v13821_v2, %v13821_v2 }
 0xc95   : > { %6506 = vadd.xlane.f32.xlu0 %v6505_v37 }
 0xc96   : > { %v13832_v62 = vsub.f32 %v13639_v58, %v6356_v7  ;;  %v6508_v40 = vsel %vm2081_vm0, %v6418_v12, 0.0  ;;  %v6419_v17 = vmul.f32 %v13826_v16, %v13826_v16 }
 0xc97   : > { %6509 = vadd.xlane.f32.xlu1 %v6508_v40 }
 0xc98   : > { %v6511_v22 = vsel %vm2081_vm0, %v6419_v17, 0.0  ;;  %v6420_v1 = vmul.f32 %v13832_v62, %v13832_v62 }
 0xc99   : > { %6512 = vadd.xlane.f32.xlu0 %v6511_v22 }
 0xc9a   : > { %v6514_v48 = vsel %vm2081_vm0, %v6420_v1, 0.0 }
 0xc9b   : > { %6515 = vadd.xlane.f32.xlu1 %v6514_v48 }
 0xcad   : > { %v6423_v5 = vpop.xlane.xlu0 %6422 }
 0xcae   : > { %v6517_v29 = vmul.f32 0.03125, %v6423_v5 }
 0xcaf   : > { %v6426_v55 = vpop.xlane.xlu1 %6425 }
 0xcb0   : > { %v6549_v58 = vadd.f32 1e-05, %v6517_v29  ;;  %v6518_v57 = vmul.f32 0.03125, %v6426_v55 }
 0xcb2   : > { %9418 = vrsqrt.f32 %v6549_v58  ;;  %v6550_v34 = vadd.f32 1e-05, %v6518_v57  ;;  %v6429_v54 = vpop.xlane.xlu0 %6428 }
 0xcb3   : > { %v6519_v43 = vmul.f32 0.03125, %v6429_v54 }
 0xcb4   : > { %9420 = vrsqrt.f32 %v6550_v34  ;;  %v6432_v27 = vpop.xlane.xlu1 %6431 }
 0xcb5   : > { %v6551_v41 = vadd.f32 1e-05, %v6519_v43  ;;  %v6520_v44 = vmul.f32 0.03125, %v6432_v27 }
 0xcb7   : > { %9422 = vrsqrt.f32 %v6551_v41  ;;  %v6552_v49 = vadd.f32 1e-05, %v6520_v44 }
 0xcb9   : > { %9424 = vrsqrt.f32 %v6552_v49 }
 0xcbc   : > { %v9419_v50 = vpop.eup %9418 }
 0xcbd   : > { %v6613_v52 = vmul.f32 %v9419_v50, %v13644_v15 }
 0xcbe   : > { %v9421_v35 = vpop.eup %9420 }
 0xcbf   : > { %v6614_v10 = vmul.f32 %v9421_v35, %v13647_v24  ;;  %v6649_v39 = vmul.f32 %v13846_v45, %v6613_v52 }
 0xcc1   : > { %v9423_v19 = vpop.eup %9422  ;;  %v6650_v7 = vmul.f32 %v13846_v45, %v6614_v10  ;;  %v13857_v37 = vadd.f32 %v13851_v20, %v6649_v39 }
 0xcc2   : > { %v6615_v12 = vmul.f32 %v9423_v19, %v13655_v32  ;;  %v6435_v40 = vpop.xlane.xlu0 %6434 }
 0xcc3   : > { %v9425_v17 = vpop.eup %9424  ;;  %v6521_v15 = vmul.f32 0.03125, %v6435_v40  ;;  %v13861_v4 = vadd.f32 %v13851_v20, %v6650_v7  ;;  %v7648_v22 = vmul.f32 -1.442695, %v13857_v37 }
 0xcc4   : > { %v6651_v24 = vmul.f32 %v13846_v45, %v6615_v12  ;;  %v6616_v1 = vmul.f32 %v9425_v17, %v13659_v21  ;;  %v6438_v48 = vpop.xlane.xlu1 %6437 }
 0xcc5   : > { %v6553_v5 = vadd.f32 1e-05, %v6521_v15  ;;  %v6522_v29 = vmul.f32 0.03125, %v6438_v48  ;;  %9426 = vpow2.f32 %v7648_v22  ;;  %v7649_v55 = vmul.f32 -1.442695, %v13861_v4 }
 0xcc6   : > { %v13868_v32 = vadd.f32 %v13851_v20, %v6651_v24  ;;  %v6652_v58 = vmul.f32 %v13846_v45, %v6616_v1  ;;  %v6441_v57 = vpop.xlane.xlu0 %6440 }
 0xcc7   : > { %9428 = vrsqrt.f32 %v6553_v5  ;;  %v6554_v34 = vadd.f32 1e-05, %v6522_v29  ;;  %v6523_v54 = vmul.f32 0.03125, %v6441_v57 }
 0xcc8   : > { %v7650_v43 = vmul.f32 -1.442695, %v13868_v32  ;;  %v13873_v27 = vadd.f32 %v13851_v20, %v6652_v58  ;;  %v6444_v21 = vpop.xlane.xlu1 %6443  ;;  %9430 = vpow2.f32 %v7649_v55 }
 0xcc9   : > { %9432 = vrsqrt.f32 %v6554_v34  ;;  %v6555_v41 = vadd.f32 1e-05, %v6523_v54  ;;  %v6524_v44 = vmul.f32 0.03125, %v6444_v21 }
 0xcca   : > { %9434 = vpow2.f32 %v7650_v43  ;;  %v7651_v49 = vmul.f32 -1.442695, %v13873_v27 }
 0xccb   : > { %9436 = vrsqrt.f32 %v6555_v41  ;;  %v6556_v31 = vadd.f32 1e-05, %v6524_v44 }
 0xccc   : > { %9438 = vpow2.f32 %v7651_v49 }
 0xccd   : > { %9440 = vrsqrt.f32 %v6556_v31 }
 0xccf   : > { %v9427_v18 = vpop.eup %9426 }
 0xcd0   : > { %v6813_v50 = vadd.f32 1.0, %v9427_v18 }
 0xcd1   : > { %v9429_v52 = vpop.eup %9428 }
 0xcd2   : > { %v9431_v11 = vpop.eup %9430  ;;  %v6617_v35 = vmul.f32 %v9429_v52, %v13668_v9  ;;  %9442 = vrcp.f32 %v6813_v50 }
 0xcd3   : > { %v9433_v10 = vpop.eup %9432  ;;  %v6814_v39 = vadd.f32 1.0, %v9431_v11 }
 0xcd4   : > { %v9435_v19 = vpop.eup %9434  ;;  %v6618_v7 = vmul.f32 %v9433_v10, %v13671_v60  ;;  %v6447_v12 = vpop.xlane.xlu0 %6446  ;;  %v6653_v40 = vmul.f32 %v13846_v45, %v6617_v35 }
 0xcd5   : > { %v9437_v17 = vpop.eup %9436  ;;  %v6815_v15 = vadd.f32 1.0, %v9435_v19  ;;  %v6525_v22 = vmul.f32 0.03125, %v6447_v12  ;;  %9444 = vrcp.f32 %v6814_v39 }
 0xcd6   : > { %v9439_v24 = vpop.eup %9438  ;;  %v6619_v1 = vmul.f32 %v9437_v17, %v13676_v8  ;;  %v6450_v48 = vpop.xlane.xlu1 %6449  ;;  %v6654_v5 = vmul.f32 %v13846_v45, %v6618_v7  ;;  %v13882_v9 = vadd.f32 %v13851_v20, %v6653_v40 }
 0xcd7   : > { %v9441_v29 = vpop.eup %9440  ;;  %9446 = vrcp.f32 %v6815_v15  ;;  %v6816_v55 = vadd.f32 1.0, %v9439_v24  ;;  %v6557_v60 = vadd.f32 1e-05, %v6525_v22  ;;  %v6526_v58 = vmul.f32 0.03125, %v6450_v48 }
 0xcd8   : > { %v6620_v57 = vmul.f32 %v9441_v29, %v13682_v47  ;;  %v6453_v34 = vpop.xlane.xlu0 %6452  ;;  %v13886_v54 = vadd.f32 %v13851_v20, %v6654_v5  ;;  %v7652_v43 = vmul.f32 -1.442695, %v13882_v9  ;;  %v6655_v8 = vmul.f32 %v13846_v45, %v6619_v1 }
 0xcd9   : > { %9448 = vrcp.f32 %v6816_v55  ;;  %v6558_v21 = vadd.f32 1e-05, %v6526_v58  ;;  %v6527_v41 = vmul.f32 0.03125, %v6453_v34 }
 0xcda   : > { %9450 = vrsqrt.f32 %v6557_v60  ;;  %v6456_v44 = vpop.xlane.xlu1 %6455  ;;  %v7653_v49 = vmul.f32 -1.442695, %v13886_v54  ;;  %v6656_v31 = vmul.f32 %v13846_v45, %v6620_v57  ;;  %v13893_v18 = vadd.f32 %v13851_v20, %v6655_v8 }
 0xcdb   : > { %9452 = vrsqrt.f32 %v6558_v21  ;;  %v6559_v47 = vadd.f32 1e-05, %v6527_v41  ;;  %v6528_v50 = vmul.f32 0.03125, %v6456_v44 }
 0xcdc   : > { %9454 = vpow2.f32 %v7652_v43  ;;  %v13896_v52 = vadd.f32 %v13851_v20, %v6656_v31  ;;  %v7654_v11 = vmul.f32 -1.442695, %v13893_v18  ;;  %v9443_v35 = vpop.eup %9442 }
 0xcdd   : > { %9456 = vrsqrt.f32 %v6559_v47  ;;  %v6560_v10 = vadd.f32 1e-05, %v6528_v50  ;;  %v6909_v7 = vmul.f32 %v9443_v35, %v13857_v37 }
 0xcde   : > { %9458 = vpow2.f32 %v7653_v49  ;;  %v7655_v39 = vmul.f32 -1.442695, %v13896_v52 }
 0xcdf   : > { %v9445_v19 = vpop.eup %9444  ;;  %9460 = vrsqrt.f32 %v6560_v10 }
 0xce0   : > { %v6910_v12 = vmul.f32 %v9445_v19, %v13861_v4  ;;  %9462 = vpow2.f32 %v7654_v11 }
 0xce1   : > { %v9447_v40 = vpop.eup %9446  ;;  %9464 = vpow2.f32 %v7655_v39 }
 0xce2   : > { %v6941_v17 = vpack.c.bf16 %v6910_v12, %v6909_v7  ;;  %v6911_v24 = vmul.f32 %v9447_v40, %v13868_v32 }
 0xce3   : > { %v9449_v15 = vpop.eup %9448 }
 0xce4   : > { %v9451_v22 = vpop.eup %9450  ;;  %v6912_v1 = vmul.f32 %v9449_v15, %v13873_v27  ;;  %v6459_v48 = vpop.xlane.xlu0 %6458  ;;  %8291 = vmatprep.mubr.msk.bf16.mxu0 %vm2081_vm0, %v6941_v17 }
 0xce5   : > { %v9453_v5 = vpop.eup %9452  ;;  %v6621_v29 = vmul.f32 %v9451_v22, %v13692_v3  ;;  %v6529_v55 = vmul.f32 0.03125, %v6459_v48 }
 0xce6   : > { %v9455_v37 = vpop.eup %9454  ;;  %v6622_v4 = vmul.f32 %v9453_v5, %v13695_v61  ;;  %v6942_v60 = vpack.c.bf16 %v6912_v1, %v6911_v24 }
 0xce7   : > { %v9457_v58 = vpop.eup %9456  ;;  %v6561_v57 = vadd.f32 1e-05, %v6529_v55  ;;  %v6462_v34 = vpop.xlane.xlu1 %6461  ;;  %v6817_v43 = vadd.f32 1.0, %v9455_v37  ;;  %v6657_v8 = vmul.f32 %v13846_v45, %v6621_v29 }
 0xce8   : > { %v9459_v32 = vpop.eup %9458  ;;  %v6530_v21 = vmul.f32 0.03125, %v6462_v34  ;;  %8292 = vmatmul.mubr.msk.bf16.vlgmr.msra.gmra.mrb[144].mxu0 %vm2081_vm0, %v6942_v60  ;;  %v6658_v27 = vmul.f32 %v13846_v45, %v6622_v4  ;;  %v6623_v3 = vmul.f32 %v9457_v58, %v13700_v25 }
 0xce9   : > { %v9461_v41 = vpop.eup %9460  ;;  %9466 = vrsqrt.f32 %v6561_v57  ;;  %v6465_v44 = vpop.xlane.xlu0 %6464  ;;  %v6818_v49 = vadd.f32 1.0, %v9459_v32  ;;  %v13912_v61 = vadd.f32 %v13851_v20, %v6657_v8 }
 0xcea   : > { %v9463_v31 = vpop.eup %9462  ;;  %v6624_v47 = vmul.f32 %v9461_v41, %v13706_v30  ;;  %v6562_v50 = vadd.f32 1e-05, %v6530_v21  ;;  %v6531_v11 = vmul.f32 0.03125, %v6465_v44  ;;  %9468 = vrcp.f32 %v6817_v43 }
 0xceb   : > { %v9465_v35 = vpop.eup %9464  ;;  %v6468_v10 = vpop.xlane.xlu1 %6467  ;;  %9470 = vrcp.f32 %v6818_v49  ;;  %v6819_v39 = vadd.f32 1.0, %v9463_v31  ;;  %v13916_v19 = vadd.f32 %v13851_v20, %v6658_v27  ;;  %v7656_v40 = vmul.f32 -1.442695, %v13912_v61 }
 0xcec   : > { %9472 = vrsqrt.f32 %v6562_v50  ;;  %v6563_v25 = vadd.f32 1e-05, %v6531_v11  ;;  %v6532_v7 = vmul.f32 0.03125, %v6468_v10  ;;  %v6820_v12 = vadd.f32 1.0, %v9465_v35 }
 0xced   : > { %9474 = vrcp.f32 %v6819_v39  ;;  %v6659_v17 = vmul.f32 %v13846_v45, %v6623_v3  ;;  %v6660_v30 = vmul.f32 %v13846_v45, %v6624_v47  ;;  %v7657_v22 = vmul.f32 -1.442695, %v13916_v19 }
 0xcee   : > { %9476 = vrsqrt.f32 %v6563_v25  ;;  %v6564_v15 = vadd.f32 1e-05, %v6532_v7 }
 0xcef   : > { %9478 = vrcp.f32 %v6820_v12  ;;  %v13923_v24 = vadd.f32 %v13851_v20, %v6659_v17  ;;  %v13926_v1 = vadd.f32 %v13851_v20, %v6660_v30 }
 0xcf0   : > { %9480 = vrsqrt.f32 %v6564_v15 }
 0xcf1   : > { %9482 = vpow2.f32 %v7656_v40  ;;  %v7658_v48 = vmul.f32 -1.442695, %v13923_v24  ;;  %v7659_v5 = vmul.f32 -1.442695, %v13926_v1 }
 0xcf2   : > { %9484 = vpow2.f32 %v7657_v22 }
 0xcf3   : > { %v9467_v29 = vpop.eup %9466  ;;  %v6471_v55 = vpop.xlane.xlu0 %6470  ;;  %9486 = vpow2.f32 %v7658_v48 }
 0xcf4   : > { %v9469_v37 = vpop.eup %9468  ;;  %v6625_v4 = vmul.f32 %v9467_v29, %v13716_v14  ;;  %v6533_v60 = vmul.f32 0.03125, %v6471_v55  ;;  %9488 = vpow2.f32 %v7659_v5 }
 0xcf5   : > { %v9471_v58 = vpop.eup %9470  ;;  %v6474_v57 = vpop.xlane.xlu1 %6473  ;;  %v6913_v34 = vmul.f32 %v9469_v37, %v13882_v9 }
 0xcf6   : > { %v9473_v43 = vpop.eup %9472  ;;  %v6565_v8 = vadd.f32 1e-05, %v6533_v60  ;;  %v6534_v32 = vmul.f32 0.03125, %v6474_v57  ;;  %v6914_v21 = vmul.f32 %v9471_v58, %v13886_v54  ;;  %v6661_v27 = vmul.f32 %v13846_v45, %v6625_v4 }
 0xcf7   : > { %v9475_v41 = vpop.eup %9474  ;;  %v6626_v3 = vmul.f32 %v9473_v43, %v13721_v53  ;;  %v6477_v44 = vpop.xlane.xlu0 %6476 }
 0xcf8   : > { %v9477_v49 = vpop.eup %9476  ;;  %9490 = vrsqrt.f32 %v6565_v8  ;;  %v6566_v14 = vadd.f32 1e-05, %v6534_v32  ;;  %v6535_v31 = vmul.f32 0.03125, %v6477_v44  ;;  %v6943_v47 = vpack.c.bf16 %v6914_v21, %v6913_v34 }
 0xcf9   : > { %v9479_v50 = vpop.eup %9478  ;;  %v6627_v11 = vmul.f32 %v9477_v49, %v13725_v36  ;;  %v6480_v9 = vpop.xlane.xlu1 %6479  ;;  %v6915_v35 = vmul.f32 %v9475_v41, %v13893_v18  ;;  %v6662_v10 = vmul.f32 %v13846_v45, %v6626_v3  ;;  %v13939_v54 = vadd.f32 %v13851_v20, %v6661_v27 }
 0xcfa   : > { %v9481_v39 = vpop.eup %9480  ;;  %9492 = vrsqrt.f32 %v6566_v14  ;;  %v6567_v53 = vadd.f32 1e-05, %v6535_v31  ;;  %v6536_v25 = vmul.f32 0.03125, %v6480_v9  ;;  %8295 = vmatprep.mubr.msk.bf16.mxu0 %vm2081_vm0, %v6943_v47  ;;  %v6916_v7 = vmul.f32 %v9479_v50, %v13896_v52 }
 0xcfb   : > { %v9483_v12 = vpop.eup %9482  ;;  %v6628_v40 = vmul.f32 %v9481_v39, %v13730_v59  ;;  %v13945_v36 = vadd.f32 %v13851_v20, %v6662_v10  ;;  %v7660_v18 = vmul.f32 -1.442695, %v13939_v54  ;;  %v6663_v17 = vmul.f32 %v13846_v45, %v6627_v11 }
 0xcfc   : > { %v9485_v30 = vpop.eup %9484  ;;  %9494 = vrsqrt.f32 %v6567_v53  ;;  %v6568_v15 = vadd.f32 1e-05, %v6536_v25  ;;  %v6944_v22 = vpack.c.bf16 %v6916_v7, %v6915_v35  ;;  %v6821_v48 = vadd.f32 1.0, %v9483_v12 }
 0xcfd   : > { %v9487_v5 = vpop.eup %9486  ;;  %v6822_v29 = vadd.f32 1.0, %v9485_v30  ;;  %9496 = vpow2.f32 %v7660_v18  ;;  %v6664_v52 = vmul.f32 %v13846_v45, %v6628_v40  ;;  %v13952_v37 = vadd.f32 %v13851_v20, %v6663_v17 }
 0xcfe   : > { %v9489_v55 = vpop.eup %9488  ;;  %9498 = vrsqrt.f32 %v6568_v15  ;;  %8296 = vmatmul.mubr.msk.bf16.gmra.mrb[148].mxu0 %vm2081_vm0, %v6944_v22  ;;  %v6823_v59 = vadd.f32 1.0, %v9487_v5  ;;  %v7661_v60 = vmul.f32 -1.442695, %v13945_v36 }
 0xcff   : > { %9500 = vrcp.f32 %v6821_v48  ;;  %v6824_v4 = vadd.f32 1.0, %v9489_v55  ;;  %v13956_v58 = vadd.f32 %v13851_v20, %v6664_v52  ;;  %v7662_v57 = vmul.f32 -1.442695, %v13952_v37 }
 0xd00   : > { %9502 = vrcp.f32 %v6822_v29 }
 0xd01   : > { %9504 = vrcp.f32 %v6823_v59  ;;  %v7663_v34 = vmul.f32 -1.442695, %v13956_v58 }
 0xd02   : > { %v9491_v43 = vpop.eup %9490  ;;  %9506 = vrcp.f32 %v6824_v4 }
 0xd03   : > { %v6629_v8 = vmul.f32 %v9491_v43, %v13740_v13  ;;  %v6483_v32 = vpop.xlane.xlu0 %6482  ;;  %9508 = vpow2.f32 %v7661_v60 }
 0xd04   : > { %v9493_v21 = vpop.eup %9492  ;;  %v6537_v27 = vmul.f32 0.03125, %v6483_v32  ;;  %9510 = vpow2.f32 %v7662_v57 }
 0xd05   : > { %v6630_v41 = vmul.f32 %v9493_v21, %v13743_v42  ;;  %v6486_v3 = vpop.xlane.xlu1 %6485  ;;  %9512 = vpow2.f32 %v7663_v34  ;;  %v6665_v44 = vmul.f32 %v13846_v45, %v6629_v8 }
 0xd06   : > { %v9495_v49 = vpop.eup %9494  ;;  %v6569_v14 = vadd.f32 1e-05, %v6537_v27  ;;  %v6538_v31 = vmul.f32 0.03125, %v6486_v3 }
 0xd07   : > { %v9497_v47 = vpop.eup %9496  ;;  %v6631_v50 = vmul.f32 %v9495_v49, %v13748_v63  ;;  %v6489_v11 = vpop.xlane.xlu0 %6488  ;;  %v6666_v13 = vmul.f32 %v13846_v45, %v6630_v41  ;;  %v13966_v9 = vadd.f32 %v13851_v20, %v6665_v44 }
 0xd08   : > { %v9499_v35 = vpop.eup %9498  ;;  %9514 = vrsqrt.f32 %v6569_v14  ;;  %v6570_v10 = vadd.f32 1e-05, %v6538_v31  ;;  %v6539_v42 = vmul.f32 0.03125, %v6489_v11  ;;  %v6825_v39 = vadd.f32 1.0, %v9497_v47 }
 0xd09   : > { %v9501_v53 = vpop.eup %9500  ;;  %v6632_v25 = vmul.f32 %v9499_v35, %v13754_v46  ;;  %v6492_v7 = vpop.xlane.xlu1 %6491  ;;  %v13970_v12 = vadd.f32 %v13851_v20, %v6666_v13  ;;  %v7664_v63 = vmul.f32 -1.442695, %v13966_v9  ;;  %v6667_v40 = vmul.f32 %v13846_v45, %v6631_v50 }
 0xd0a   : > { %v9503_v18 = vpop.eup %9502  ;;  %9516 = vrsqrt.f32 %v6570_v10  ;;  %v6571_v17 = vadd.f32 1e-05, %v6539_v42  ;;  %v6540_v30 = vmul.f32 0.03125, %v6492_v7  ;;  %v6917_v15 = vmul.f32 %v9501_v53, %v13912_v61 }
 0xd0b   : > { %v9505_v22 = vpop.eup %9504  ;;  %v6918_v48 = vmul.f32 %v9503_v18, %v13916_v19  ;;  %9518 = vrcp.f32 %v6825_v39  ;;  %v7665_v46 = vmul.f32 -1.442695, %v13970_v12  ;;  %v6668_v5 = vmul.f32 %v13846_v45, %v6632_v25 }
 0xd0c   : > { %v9507_v29 = vpop.eup %9506  ;;  %9520 = vrsqrt.f32 %v6571_v17  ;;  %v6572_v52 = vadd.f32 1e-05, %v6540_v30  ;;  %v6919_v55 = vmul.f32 %v9505_v22, %v13923_v24  ;;  %v13980_v59 = vadd.f32 %v13851_v20, %v6667_v40 }
 0xd0d   : > { %v9509_v4 = vpop.eup %9508  ;;  %v6945_v60 = vpack.c.bf16 %v6918_v48, %v6917_v15  ;;  %v6920_v61 = vmul.f32 %v9507_v29, %v13926_v1  ;;  %9522 = vpow2.f32 %v7664_v63  ;;  %v13984_v19 = vadd.f32 %v13851_v20, %v6668_v5 }
 0xd0e   : > { %v9511_v57 = vpop.eup %9510  ;;  %9524 = vrsqrt.f32 %v6572_v52  ;;  %v6826_v34 = vadd.f32 1.0, %v9509_v4  ;;  %v7666_v24 = vmul.f32 -1.442695, %v13980_v59 }
 0xd0f   : > { %v9513_v43 = vpop.eup %9512  ;;  %8299 = vmatprep.mubr.msk.bf16.mxu0 %vm2081_vm0, %v6945_v60  ;;  %v6946_v8 = vpack.c.bf16 %v6920_v61, %v6919_v55  ;;  %v6827_v32 = vadd.f32 1.0, %v9511_v57  ;;  %9526 = vpow2.f32 %v7665_v46  ;;  %v7667_v27 = vmul.f32 -1.442695, %v13984_v19 }
 0xd10   : > { %9528 = vrcp.f32 %v6826_v34  ;;  %v6828_v21 = vadd.f32 1.0, %v9513_v43 }
 0xd11   : > { %8300 = vmatmul.mubr.msk.bf16.gmra.mrb[152].mxu0 %vm2081_vm0, %v6946_v8  ;;  %9530 = vrcp.f32 %v6827_v32 }
 0xd12   : > { %v9515_v1 = vpop.eup %9514  ;;  %9532 = vrcp.f32 %v6828_v21 }
 0xd13   : > { %v6633_v41 = vmul.f32 %v9515_v1, %v13770_v33  ;;  %v6495_v3 = vpop.xlane.xlu0 %6494  ;;  %9534 = vpow2.f32 %v7666_v24 }
 0xd14   : > { %v9517_v44 = vpop.eup %9516  ;;  %v6541_v49 = vmul.f32 0.03125, %v6495_v3  ;;  %9536 = vpow2.f32 %v7667_v27 }
 0xd15   : > { %v9519_v14 = vpop.eup %9518  ;;  %v6634_v31 = vmul.f32 %v9517_v44, %v13773_v51  ;;  %v6669_v47 = vmul.f32 %v13846_v45, %v6633_v41 }
 0xd16   : > { %v9521_v50 = vpop.eup %9520  ;;  %v6573_v11 = vadd.f32 1e-05, %v6541_v49  ;;  %v6498_v13 = vpop.xlane.xlu1 %6497  ;;  %v6921_v7 = vmul.f32 %v9519_v14, %v13939_v54 }
 0xd17   : > { %v9523_v35 = vpop.eup %9522  ;;  %v6635_v10 = vmul.f32 %v9521_v50, %v13778_v0  ;;  %v6542_v42 = vmul.f32 0.03125, %v6498_v13  ;;  %v6670_v39 = vmul.f32 %v13846_v45, %v6634_v31  ;;  %v13996_v33 = vadd.f32 %v13851_v20, %v6669_v47 }
 0xd18   : > { %v9525_v53 = vpop.eup %9524  ;;  %9538 = vrsqrt.f32 %v6573_v11  ;;  %v6501_v25 = vpop.xlane.xlu0 %6500  ;;  %v6829_v51 = vadd.f32 1.0, %v9523_v35 }
 0xd19   : > { %v9527_v63 = vpop.eup %9526  ;;  %v6636_v40 = vmul.f32 %v9525_v53, %v13784_v26  ;;  %v6574_v18 = vadd.f32 1e-05, %v6542_v42  ;;  %v6543_v17 = vmul.f32 0.03125, %v6501_v25  ;;  %v14001_v30 = vadd.f32 %v13851_v20, %v6670_v39 }
 0xd1a   : > { %v9529_v0 = vpop.eup %9528  ;;  %v6504_v15 = vpop.xlane.xlu1 %6503  ;;  %v6830_v22 = vadd.f32 1.0, %v9527_v63  ;;  %9540 = vrcp.f32 %v6829_v51  ;;  %v7668_v48 = vmul.f32 -1.442695, %v13996_v33  ;;  %v6671_v46 = vmul.f32 %v13846_v45, %v6635_v10 }
 0xd1b   : > { %v9531_v5 = vpop.eup %9530  ;;  %9542 = vrsqrt.f32 %v6574_v18  ;;  %v6575_v54 = vadd.f32 1e-05, %v6543_v17  ;;  %v6544_v29 = vmul.f32 0.03125, %v6504_v15  ;;  %v6922_v52 = vmul.f32 %v9529_v0, %v13945_v36 }
 0xd1c   : > { %v9533_v26 = vpop.eup %9532  ;;  %v6923_v55 = vmul.f32 %v9531_v5, %v13952_v37  ;;  %9544 = vrcp.f32 %v6830_v22  ;;  %v7669_v4 = vmul.f32 -1.442695, %v14001_v30  ;;  %v6672_v60 = vmul.f32 %v13846_v45, %v6636_v40 }
 0xd1d   : > { %v9535_v61 = vpop.eup %9534  ;;  %9546 = vrsqrt.f32 %v6575_v54  ;;  %v6576_v57 = vadd.f32 1e-05, %v6544_v29  ;;  %v6947_v34 = vpack.c.bf16 %v6922_v52, %v6921_v7  ;;  %v6924_v43 = vmul.f32 %v9533_v26, %v13956_v58 }
 0xd1e   : > { %v9537_v8 = vpop.eup %9536  ;;  %v6831_v32 = vadd.f32 1.0, %v9535_v61  ;;  %9548 = vpow2.f32 %v7668_v48  ;;  %v14011_v24 = vadd.f32 %v13851_v20, %v6671_v46  ;;  %v14014_v36 = vadd.f32 %v13851_v20, %v6672_v60 }
 0xd1f   : > { %9550 = vrsqrt.f32 %v6576_v57  ;;  %8303 = vmatprep.mubr.msk.bf16.mxu0 %vm2081_vm0, %v6947_v34  ;;  %v6948_v37 = vpack.c.bf16 %v6924_v43, %v6923_v55  ;;  %v6832_v21 = vadd.f32 1.0, %v9537_v8 }
 0xd20   : > { %9552 = vrcp.f32 %v6831_v32  ;;  %v7670_v27 = vmul.f32 -1.442695, %v14011_v24  ;;  %v7671_v1 = vmul.f32 -1.442695, %v14014_v36 }
 0xd21   : > { %8304 = vmatmul.mubr.msk.bf16.gmra.mrb[156].mxu0 %vm2081_vm0, %v6948_v37  ;;  %9554 = vrcp.f32 %v6832_v21 }
 0xd22   : > { %v9539_v58 = vpop.eup %9538  ;;  %v6507_v41 = vpop.xlane.xlu0 %6506  ;;  %9556 = vpow2.f32 %v7669_v4 }
 0xd23   : > { %v6637_v3 = vmul.f32 %v9539_v58, %v13794_v28  ;;  %v6545_v44 = vmul.f32 0.03125, %v6507_v41  ;;  %9558 = vpow2.f32 %v7670_v27 }
 0xd24   : > { %v9541_v49 = vpop.eup %9540  ;;  %v6510_v14 = vpop.xlane.xlu1 %6509  ;;  %9560 = vpow2.f32 %v7671_v1 }
 0xd25   : > { %v9543_v31 = vpop.eup %9542  ;;  %v6577_v47 = vadd.f32 1e-05, %v6545_v44  ;;  %v6546_v50 = vmul.f32 0.03125, %v6510_v14  ;;  %v6673_v11 = vmul.f32 %v13846_v45, %v6637_v3  ;;  %v6925_v42 = vmul.f32 %v9541_v49, %v13966_v9 }
 0xd26   : > { %v9545_v13 = vpop.eup %9544  ;;  %v6638_v35 = vmul.f32 %v9543_v31, %v13799_v23  ;;  %v6513_v10 = vpop.xlane.xlu0 %6512 }
 0xd27   : > { %v9547_v39 = vpop.eup %9546  ;;  %9562 = vrsqrt.f32 %v6577_v47  ;;  %v6578_v53 = vadd.f32 1e-05, %v6546_v50  ;;  %v6547_v28 = vmul.f32 0.03125, %v6513_v10  ;;  %v6926_v25 = vmul.f32 %v9545_v13, %v13970_v12 }
 0xd28   : > { %v9549_v7 = vpop.eup %9548  ;;  %v6639_v51 = vmul.f32 %v9547_v39, %v13803_v38  ;;  %v6516_v63 = vpop.xlane.xlu1 %6515  ;;  %v6674_v40 = vmul.f32 %v13846_v45, %v6638_v35  ;;  %v14028_v18 = vadd.f32 %v13851_v20, %v6673_v11 }
 0xd29   : > { %v9551_v17 = vpop.eup %9550  ;;  %9564 = vrsqrt.f32 %v6578_v53  ;;  %v6579_v23 = vadd.f32 1e-05, %v6547_v28  ;;  %v6548_v0 = vmul.f32 0.03125, %v6516_v63  ;;  %v6949_v9 = vpack.c.bf16 %v6926_v25, %v6925_v42 }
 0xd2a   : > { %v9553_v15 = vpop.eup %9552  ;;  %v6640_v22 = vmul.f32 %v9551_v17, %v13808_v56  ;;  %v6833_v48 = vadd.f32 1.0, %v9549_v7  ;;  %v14032_v12 = vadd.f32 %v13851_v20, %v6674_v40  ;;  %v7672_v38 = vmul.f32 -1.442695, %v14028_v18 }
 0xd2b   : > { %v9555_v46 = vpop.eup %9554  ;;  %9566 = vrsqrt.f32 %v6579_v23  ;;  %v6580_v5 = vadd.f32 1e-05, %v6548_v0  ;;  %8307 = vmatprep.mubr.msk.bf16.mxu0 %vm2081_vm0, %v6949_v9  ;;  %v6675_v54 = vmul.f32 %v13846_v45, %v6639_v51  ;;  %v6927_v52 = vmul.f32 %v9553_v15, %v13980_v59 }
 0xd2c   : > { %v9557_v29 = vpop.eup %9556  ;;  %v6928_v26 = vmul.f32 %v9555_v46, %v13984_v19  ;;  %9568 = vrcp.f32 %v6833_v48  ;;  %v6676_v56 = vmul.f32 %v13846_v45, %v6640_v22  ;;  %v7673_v60 = vmul.f32 -1.442695, %v14032_v12 }
 0xd2d   : > { %v9559_v55 = vpop.eup %9558  ;;  %9570 = vrsqrt.f32 %v6580_v5  ;;  %v6834_v4 = vadd.f32 1.0, %v9557_v29  ;;  %v14042_v61 = vadd.f32 %v13851_v20, %v6675_v54 }
 0xd2e   : > { %v9561_v57 = vpop.eup %9560  ;;  %v6950_v34 = vpack.c.bf16 %v6928_v26, %v6927_v52  ;;  %v6835_v43 = vadd.f32 1.0, %v9559_v55  ;;  %9572 = vpow2.f32 %v7672_v38  ;;  %v14045_v8 = vadd.f32 %v13851_v20, %v6676_v56 }
 0xd2f   : > { %9574 = vrcp.f32 %v6834_v4  ;;  %v6836_v59 = vadd.f32 1.0, %v9561_v57  ;;  %v7674_v19 = vmul.f32 -1.442695, %v14042_v61 }
 0xd30   : > { %8308 = vmatmul.mubr.msk.bf16.gmra.mrb[160].mxu0 %vm2081_vm0, %v6950_v34  ;;  %9576 = vrcp.f32 %v6835_v43  ;;  %v7675_v32 = vmul.f32 -1.442695, %v14045_v8 }
 0xd31   : > { %v9563_v37 = vpop.eup %9562  ;;  %9578 = vrcp.f32 %v6836_v59 }
 0xd32   : > { %v6641_v21 = vmul.f32 %v9563_v37, %v13818_v6  ;;  %9580 = vpow2.f32 %v7673_v60 }
 0xd33   : > { %v9565_v27 = vpop.eup %9564  ;;  %9582 = vpow2.f32 %v7674_v19 }
 0xd34   : > { %v6642_v1 = vmul.f32 %v9565_v27, %v13821_v2  ;;  %9584 = vpow2.f32 %v7675_v32  ;;  %v6677_v58 = vmul.f32 %v13846_v45, %v6641_v21  ;;  %v14086_v27 = vld [vmem:[%s14214_s8 + $0x10] ss:$0 sm:$0xff] }
 0xd35   : > { %v9567_v41 = vpop.eup %9566 }
 0xd36   : > { %v9569_v3 = vpop.eup %9568  ;;  %v6643_v44 = vmul.f32 %v9567_v41, %v13826_v16  ;;  %v6678_v49 = vmul.f32 %v13846_v45, %v6642_v1  ;;  %v14056_v14 = vadd.f32 %v13851_v20, %v6677_v58 }
 0xd37   : > { %v9571_v31 = vpop.eup %9570  ;;  %v6929_v35 = vmul.f32 %v9569_v3, %v13996_v33 }
 0xd38   : > { %v9573_v47 = vpop.eup %9572  ;;  %v6644_v6 = vmul.f32 %v9571_v31, %v13832_v62  ;;  %v6714_v50 = vadd.f32 %v13851_v20, %v6678_v49  ;;  %v7676_v2 = vmul.f32 -1.442695, %v14056_v14  ;;  %v6679_v11 = vmul.f32 %v13846_v45, %v6643_v44 }
 0xd39   : > { %v9575_v13 = vpop.eup %9574  ;;  %v6837_v10 = vadd.f32 1.0, %v9573_v47 }
 0xd3a   : > { %v9577_v16 = vpop.eup %9576  ;;  %v6930_v42 = vmul.f32 %v9575_v13, %v14001_v30  ;;  %9586 = vpow2.f32 %v7676_v2  ;;  %v7677_v39 = vmul.f32 -1.442695, %v6714_v50  ;;  %v6680_v53 = vmul.f32 %v13846_v45, %v6644_v6 }
 0xd3b   : > { %v9579_v28 = vpop.eup %9578  ;;  %v6931_v62 = vmul.f32 %v9577_v16, %v14011_v24  ;;  %v6715_v25 = vadd.f32 %v13851_v20, %v6679_v11 }
 0xd3c   : > { %v9581_v7 = vpop.eup %9580  ;;  %v6951_v51 = vpack.c.bf16 %v6930_v42, %v6929_v35  ;;  %v6932_v63 = vmul.f32 %v9579_v28, %v14014_v36  ;;  %9588 = vpow2.f32 %v7677_v39  ;;  %v6716_v33 = vadd.f32 %v13851_v20, %v6680_v53 }
 0xd3d   : > { %v9583_v40 = vpop.eup %9582  ;;  %v6838_v17 = vadd.f32 1.0, %v9581_v7  ;;  %9590 = vrcp.f32 %v6837_v10  ;;  %v7678_v0 = vmul.f32 -1.442695, %v6715_v25 }
 0xd3e   : > { %v9585_v30 = vpop.eup %9584  ;;  %8311 = vmatprep.mubr.msk.bf16.mxu0 %vm2081_vm0, %v6951_v51  ;;  %v6952_v23 = vpack.c.bf16 %v6932_v63, %v6931_v62  ;;  %v6839_v45 = vadd.f32 1.0, %v9583_v40  ;;  %v7679_v9 = vmul.f32 -1.442695, %v6716_v33 }
 0xd3f   : > { %9592 = vrcp.f32 %v6838_v17  ;;  %v6840_v24 = vadd.f32 1.0, %v9585_v30 }
 0xd40   : > { %8312 = vmatmul.mubr.msk.bf16.gmra.mrb[164].mxu0 %vm2081_vm0, %v6952_v23  ;;  %9594 = vrcp.f32 %v6839_v45 }
 0xd41   : > { %9596 = vrcp.f32 %v6840_v24 }
 0xd42   : > { %9598 = vpow2.f32 %v7678_v0 }
 0xd43   : > { %9600 = vpow2.f32 %v7679_v9 }
 0xd44   : > { %v9587_v36 = vpop.eup %9586 }
 0xd45   : > { %v6841_v20 = vadd.f32 1.0, %v9587_v36 }
 0xd46   : > { %v9589_v15 = vpop.eup %9588 }
 0xd47   : > { %v9591_v22 = vpop.eup %9590  ;;  %v6842_v48 = vadd.f32 1.0, %v9589_v15  ;;  %9602 = vrcp.f32 %v6841_v20 }
 0xd48   : > { %v6933_v5 = vmul.f32 %v9591_v22, %v14028_v18 }
 0xd49   : > { %v9593_v38 = vpop.eup %9592  ;;  %9604 = vrcp.f32 %v6842_v48 }
 0xd4a   : > { %v9595_v46 = vpop.eup %9594  ;;  %v6934_v54 = vmul.f32 %v9593_v38, %v14032_v12 }
 0xd4b   : > { %v9597_v29 = vpop.eup %9596  ;;  %v6935_v56 = vmul.f32 %v9595_v46, %v14042_v61 }
 0xd4c   : > { %v9599_v52 = vpop.eup %9598  ;;  %v6953_v26 = vpack.c.bf16 %v6934_v54, %v6933_v5  ;;  %v6936_v55 = vmul.f32 %v9597_v29, %v14045_v8 }
 0xd4d   : > { %v9601_v4 = vpop.eup %9600  ;;  %v6843_v60 = vadd.f32 1.0, %v9599_v52 }
 0xd4e   : > { %8315 = vmatprep.mubr.msk.bf16.mxu0 %vm2081_vm0, %v6953_v26  ;;  %v6954_v57 = vpack.c.bf16 %v6936_v55, %v6935_v56  ;;  %v6844_v34 = vadd.f32 1.0, %v9601_v4 }
 0xd4f   : > { %9606 = vrcp.f32 %v6843_v60 }
 0xd50   : > { %8316 = vmatmul.mubr.msk.bf16.gmra.mrb[168].mxu0 %vm2081_vm0, %v6954_v57  ;;  %9608 = vrcp.f32 %v6844_v34 }
 0xd51   : > { %v9603_v18 = vpop.eup %9602 }
 0xd52   : > { %v6937_v43 = vmul.f32 %v9603_v18, %v14056_v14 }
 0xd53   : > { %v9605_v12 = vpop.eup %9604 }
 0xd54   : > { %v6938_v59 = vmul.f32 %v9605_v12, %v6714_v50 }
 0xd56   : > { %v6955_v61 = vpack.c.bf16 %v6938_v59, %v6937_v43 }
 0xd58   : > { %8319 = vmatprep.mubr.msk.bf16.mxu0 %vm2081_vm0, %v6955_v61 }
 0xd59   : > { %v9607_v8 = vpop.eup %9606 }
 0xd5a   : > { %v9609_v19 = vpop.eup %9608  ;;  %v6939_v32 = vmul.f32 %v9607_v8, %v6715_v25 }
 0xd5b   : > { %v6940_v37 = vmul.f32 %v9609_v19, %v6716_v33 }
 0xd5d   : > { %v6956_v21 = vpack.c.bf16 %v6940_v37, %v6939_v32 }
 0xd5f   : > { %8320 = vmatmul.mubr.msk.bf16.gmra.mrb[172].mxu0 %vm2081_vm0, %v6956_v21 }
 0xdbb   : > { %v8293_v1 = vpop.f32.mrb[144].mxu0 }
 0xdbc   : > { %v7068_v58 = vadd.f32 %v8293_v1, %v14086_v27  ;;  %v7059_v41 = vpop.f32.mrb[145].mxu0 }
 0xdbd   : > { %v7060_v3 = vadd.f32 %v14086_v27, %v7059_v41  ;;  %v8294_v44 = vpop.f32.mrb[146].mxu0 }
 0xdbe   : > { %7188 = vst [vmem:[%s14090_s14 + $0x10] sm:$0xff] %v7068_v58  ;;  %v7071_v49 = vadd.f32 %v8294_v44, %v14086_v27  ;;  %v7062_v14 = vpop.f32.mrb[147].mxu0 }
 0xdbf   : > { %7186 = vst [vmem:[%s14090_s14] sm:$0xff] %v7060_v3  ;;  %v7063_v31 = vadd.f32 %v14086_v27, %v7062_v14 }
 0xdc0   : > { %7189 = vst [vmem:[%s14090_s14 + $0x18] sm:$0xff] %v7071_v49 }
 0xdc1   : > { %7187 = vst [vmem:[%s14090_s14 + $0x8] sm:$0xff] %v7063_v31 }
 0xdd1   : > { %v8297_v47 = vpop.f32.mrb[148].mxu0 }
 0xdd2   : > { %v7084_v6 = vadd.f32 %v8297_v47, %v14086_v27  ;;  %v7075_v50 = vpop.f32.mrb[149].mxu0 }
 0xdd3   : > { %v7076_v2 = vadd.f32 %v14086_v27, %v7075_v50  ;;  %v8298_v11 = vpop.f32.mrb[150].mxu0 }
 0xdd4   : > { %7192 = vst [vmem:[%s14090_s14 + $0x30] sm:$0xff] %v7084_v6  ;;  %v7087_v13 = vadd.f32 %v8298_v11, %v14086_v27  ;;  %v7078_v35 = vpop.f32.mrb[151].mxu0 }
 0xdd5   : > { %7190 = vst [vmem:[%s14090_s14 + $0x20] sm:$0xff] %v7076_v2  ;;  %v7079_v10 = vadd.f32 %v14086_v27, %v7078_v35 }
 0xdd6   : > { %7193 = vst [vmem:[%s14090_s14 + $0x38] sm:$0xff] %v7087_v13 }
 0xdd7   : > { %7191 = vst [vmem:[%s14090_s14 + $0x28] sm:$0xff] %v7079_v10 }
 0xde4   : > { %v8301_v16 = vpop.f32.mrb[152].mxu0 }
 0xde5   : > { %v7100_v42 = vadd.f32 %v8301_v16, %v14086_v27  ;;  %v7091_v39 = vpop.f32.mrb[153].mxu0 }
 0xde6   : > { %v7092_v53 = vadd.f32 %v14086_v27, %v7091_v39  ;;  %v8302_v28 = vpop.f32.mrb[154].mxu0 }
 0xde7   : > { %7196 = vst [vmem:[%s14090_s14 + $0x50] sm:$0xff] %v7100_v42  ;;  %v7103_v62 = vadd.f32 %v8302_v28, %v14086_v27  ;;  %v7094_v25 = vpop.f32.mrb[155].mxu0 }
 0xde8   : > { %7194 = vst [vmem:[%s14090_s14 + $0x40] sm:$0xff] %v7092_v53  ;;  %v7095_v7 = vadd.f32 %v14086_v27, %v7094_v25 }
 0xde9   : > { %7197 = vst [vmem:[%s14090_s14 + $0x58] sm:$0xff] %v7103_v62 }
 0xdea   : > { %7195 = vst [vmem:[%s14090_s14 + $0x48] sm:$0xff] %v7095_v7 }
 0xdf4   : > { %v8305_v51 = vpop.f32.mrb[156].mxu0 }
 0xdf5   : > { %v7116_v63 = vadd.f32 %v8305_v51, %v14086_v27  ;;  %v7107_v33 = vpop.f32.mrb[157].mxu0 }
 0xdf6   : > { %v7108_v40 = vadd.f32 %v14086_v27, %v7107_v33  ;;  %v8306_v17 = vpop.f32.mrb[158].mxu0 }
 0xdf7   : > { %7200 = vst [vmem:[%s14090_s14 + $0x70] sm:$0xff] %v7116_v63  ;;  %v7119_v30 = vadd.f32 %v8306_v17, %v14086_v27  ;;  %v7110_v23 = vpop.f32.mrb[159].mxu0 }
 0xdf8   : > { %7198 = vst [vmem:[%s14090_s14 + $0x60] sm:$0xff] %v7108_v40  ;;  %v7111_v45 = vadd.f32 %v14086_v27, %v7110_v23 }
 0xdf9   : > { %7201 = vst [vmem:[%s14090_s14 + $0x78] sm:$0xff] %v7119_v30 }
 0xdfa   : > { %7199 = vst [vmem:[%s14090_s14 + $0x68] sm:$0xff] %v7111_v45 }
 0xe03   : > { %v8309_v0 = vpop.f32.mrb[160].mxu0 }
 0xe04   : > { %v7132_v24 = vadd.f32 %v8309_v0, %v14086_v27  ;;  %v7123_v9 = vpop.f32.mrb[161].mxu0 }
 0xe05   : > { %v7124_v36 = vadd.f32 %v14086_v27, %v7123_v9  ;;  %v8310_v20 = vpop.f32.mrb[162].mxu0 }
 0xe06   : > { %7204 = vst [vmem:[%s14090_s14 + $0x90] sm:$0xff] %v7132_v24  ;;  %v7135_v15 = vadd.f32 %v8310_v20, %v14086_v27  ;;  %v7126_v22 = vpop.f32.mrb[163].mxu0 }
 0xe07   : > { %7202 = vst [vmem:[%s14090_s14 + $0x80] sm:$0xff] %v7124_v36  ;;  %v7127_v48 = vadd.f32 %v14086_v27, %v7126_v22 }
 0xe08   : > { %7205 = vst [vmem:[%s14090_s14 + $0x98] sm:$0xff] %v7135_v15 }
 0xe09   : > { %7203 = vst [vmem:[%s14090_s14 + $0x88] sm:$0xff] %v7127_v48 }
 0xe13   : > { %v8313_v38 = vpop.f32.mrb[164].mxu0 }
 0xe14   : > { %v7148_v46 = vadd.f32 %v8313_v38, %v14086_v27  ;;  %v7139_v5 = vpop.f32.mrb[165].mxu0 }
 0xe15   : > { %v7140_v54 = vadd.f32 %v14086_v27, %v7139_v5  ;;  %v8314_v29 = vpop.f32.mrb[166].mxu0 }
 0xe16   : > { %7208 = vst [vmem:[%s14090_s14 + $0xb0] sm:$0xff] %v7148_v46  ;;  %v7151_v52 = vadd.f32 %v8314_v29, %v14086_v27  ;;  %v7142_v26 = vpop.f32.mrb[167].mxu0 }
 0xe17   : > { %7206 = vst [vmem:[%s14090_s14 + $0xa0] sm:$0xff] %v7140_v54  ;;  %v7143_v56 = vadd.f32 %v14086_v27, %v7142_v26 }
 0xe18   : > { %7209 = vst [vmem:[%s14090_s14 + $0xb8] sm:$0xff] %v7151_v52 }
 0xe19   : > { %7207 = vst [vmem:[%s14090_s14 + $0xa8] sm:$0xff] %v7143_v56 }
 0xe23   : > { %v8317_v55 = vpop.f32.mrb[168].mxu0 }
 0xe24   : > { %v7164_v4 = vadd.f32 %v8317_v55, %v14086_v27  ;;  %v7155_v60 = vpop.f32.mrb[169].mxu0 }
 0xe25   : > { %v7156_v57 = vadd.f32 %v14086_v27, %v7155_v60  ;;  %v8318_v34 = vpop.f32.mrb[170].mxu0 }
 0xe26   : > { %7212 = vst [vmem:[%s14090_s14 + $0xd0] sm:$0xff] %v7164_v4  ;;  %v7167_v18 = vadd.f32 %v8318_v34, %v14086_v27  ;;  %v7158_v12 = vpop.f32.mrb[171].mxu0 }
 0xe27   : > { %7210 = vst [vmem:[%s14090_s14 + $0xc0] sm:$0xff] %v7156_v57  ;;  %v7159_v43 = vadd.f32 %v14086_v27, %v7158_v12 }
 0xe28   : > { %7213 = vst [vmem:[%s14090_s14 + $0xd8] sm:$0xff] %v7167_v18 }
 0xe29   : > { %7211 = vst [vmem:[%s14090_s14 + $0xc8] sm:$0xff] %v7159_v43 }
 0xe32   : > { %v8321_v59 = vpop.f32.mrb[172].mxu0 }
 0xe33   : > { %v7180_v61 = vadd.f32 %v8321_v59, %v14086_v27  ;;  %v7171_v8 = vpop.f32.mrb[173].mxu0 }
 0xe34   : > { %v7172_v19 = vadd.f32 %v14086_v27, %v7171_v8  ;;  %v8322_v32 = vpop.f32.mrb[174].mxu0 }
 0xe35   : > { %7216 = vst [vmem:[%s14090_s14 + $0xf0] sm:$0xff] %v7180_v61  ;;  %v7183_v37 = vadd.f32 %v8322_v32, %v14086_v27  ;;  %v7174_v21 = vpop.f32.mrb[175].mxu0 }
 0xe36   : > { %7214 = vst [vmem:[%s14090_s14 + $0xe0] sm:$0xff] %v7172_v19  ;;  %v7175_v1 = vadd.f32 %v14086_v27, %v7174_v21 }
 0xe37   : > { %7217 = vst [vmem:[%s14090_s14 + $0xf8] sm:$0xff] %v7183_v37 }
 0xe38   : > { %7215 = vst [vmem:[%s14090_s14 + $0xe8] sm:$0xff] %v7175_v1 }
 0xe39   : > { %9627 = shalt.err (!%p9624_p3)
}
 0xe3a   : > { %s9628_s25 = scalar_lea.hbm %s14155_s29, 4096  ;;  %s9632_s16 = scalar_lea.hbm %s14215_s9, 8192 }
 0xe3b   : > { %p9629_p4 = scmp.ne.s32.totalorder %s14155_s29, %s9628_s25  ;;  %p9633_p9 = scmp.lt.u32.totalorder %s14155_s29, %s14215_s9 }
 0xe3c   : > { %p9634_p10 = scmp.lt.u32.totalorder %s9632_s16, %s9628_s25  ;;  %p9636_p12 = scmp.lt.u32.totalorder %s9628_s25, %s14155_s29 }
 0xe3d   : > { %p9630_p7 = pnand %p9629_p4, %p9769_p5 }
 0xe3e   : > { %p9635_p11 = por %p9634_p10, %p9633_p9 }
 0xe3f   : > { %p9631_p8 = pneg %p9630_p7 }
 0xe40   : > { %p9637_p13 = por %p9636_p12, %p9635_p11 }
 0xe42   : > { %p9638_p0 = pnand %p9637_p13, %p9631_p8 }
 0xe44   : > { %9641 = shalt.err (!%p9638_p0)
}
 0xe45   : > { %s9679_s23 = smov 128   ;;  %s9680_s24 = smov 8  }
 0xe46   : > { %8339 = dma.vmem_to_hbm [thread:$0]  (%p9769_p5), %s14157_s17, 4096, %s14155_s29, %s14165_s13, %s9679_s23, %s9679_s23, %s9680_s24  }
 0xe47 PF: > { %p8345_p1 = scmp.ge.s32.totalorder %s9676_s12, 2  ;;  %s7247_s26 = sand.u32 1, %s9664_s30  }
 0xe48   : > { %s7248_s27 = scalar_lea.sflag [#allocation3], %s7247_s26 }
 0xe49   : > { %p8342_p2 = pnand %p8345_p1, %p9773_p6 }
 0xe4b   : > { %9659 = dma.done.wait (!%p8342_p2), %s7248_s27, 4096  }
 0xe4c   : > { %9661 = vsyncadd (!%p8342_p2), %s7248_s27, 4294963200  ;;  %p19_p3 = scmp.ge.s32.totalorder %s9756_s15, 4   ;;  %s14360_s30 = smov %s9668_s10 }
 0xe4d   : > { %s14361_s10 = smov %s9672_s11  ;;  %s14362_s11 = smov %s9767_s18 }
 0xe4e   : > { %s14363_s12 = smov %s9756_s15  ;;  %21 = sbr.rel (!%p19_p3) target bundleno = 3 (0x3), region = 91 }
 0xe55   :  { %7253 = vsyncpa [#allocation3], 1 }
 0xe56   :  { %7255 = vsyncpa [#allocation3 + $0x1], 1 }

</bundles_post_ra>
